<compile_context>
chip_gen: v7x
topology: tpu7x:2x2x1
jax: 0.10.0
libtpu: 0.0.40
codegen_flags: <defaults>
</compile_context>

<pallas_src>
import functools

import jax
import jax.numpy as jnp
from jax import lax
from jax.experimental import pallas as pl
from jax.experimental.pallas import tpu as pltpu


# ---------------------------------------------------------------------------
# helpers
# ---------------------------------------------------------------------------
def _round_up(x, m):
    return (x + m - 1) // m * m


def _choose_tile(m_rows, max_tm=1024):
    tm = min(max_tm, _round_up(m_rows, 32))
    m_pad = _round_up(m_rows, tm)
    return tm, m_pad, m_pad // tm


def _row_chunk(tm, coutp):
    """Rows per accumulator chunk: keep each f32 acc chunk <= ~128 KiB (~32 vregs)."""
    tc = max(64, min(256, (32768 // max(coutp, 1)) // 8 * 8))
    return min(tm, tc)


def _frame_mask(h, w, wp, m_pad):
    """1.0 at interior positions of the (h+2, wp) padded frame, 0.0 elsewhere."""
    hp = h + 2
    m = jnp.zeros((hp, wp), jnp.float32).at[1:h + 1, 1:w + 1].set(1.0)
    m = m.reshape(hp * wp, 1)
    return jnp.pad(m, ((0, m_pad - hp * wp), (0, 0)))


def _prep_conv3_weight(w_hwio, scale, cin_pad, cout_pad):
    """Fold BN scale into a 3x3 HWIO weight, pad channels, layout (9, Cin_p, Cout_p) bf16."""
    kh, kw, cin, cout = w_hwio.shape
    w = w_hwio * scale.reshape(1, 1, 1, cout)
    w = jnp.pad(w, ((0, 0), (0, 0), (0, cin_pad - cin), (0, cout_pad - cout)))
    return w.reshape(kh * kw, cin_pad, cout_pad).astype(jnp.bfloat16)


def _prep_bias(b, cout_pad):
    return jnp.pad(b, (0, cout_pad - b.shape[0])).reshape(1, cout_pad).astype(jnp.float32)


def _compiler_params(block_bytes):
    try:
        cap = int(pltpu.get_tpu_info().vmem_capacity_bytes)
    except Exception:                      # attribute / API not available -> assume 128 MiB
        cap = 128 * 2 ** 20
    est = 2 * int(sum(block_bytes)) + 8 * 2 ** 20            # double-buffers + headroom
    limit = int(min(cap * 3 // 4, max(32 * 2 ** 20, est)))   # leave headroom on v7x (64 MiB)
    return pltpu.CompilerParams(dimension_semantics=("parallel", "arbitrary"),
                                vmem_limit_bytes=limit)


# ---------------------------------------------------------------------------
# Pallas kernels
# ---------------------------------------------------------------------------
def _tap_offsets(lead, wp):
    # output frame position p reads input buffer rows  lead + p + (dy-1)*wp + (dx-1)
    return [lead + (dy - 1) * wp + (dx - 1) for dy in range(3) for dx in range(3)]


def _conv3x3_chunk(x_ref, w_ref, base, c0, tc, offs, m_tiles, coutp):
    """f32 accumulation of the 9 shifted matmuls for one row chunk (register-resident)."""
    acc = jnp.zeros((tc, coutp), jnp.float32)
    for k, o in enumerate(offs):
        st = base + c0 + o
        if m_tiles > 1 and o % 8 == 0:          # sublane-aligned tap start
            st = pl.multiple_of(st, 8)
        acc += jnp.dot(x_ref[pl.ds(st, tc), :], w_ref[k],
                       preferred_element_type=jnp.float32)
    return acc


def _conv1_kernel(x_ref, w_ref, b_ref, mask_ref, *rest,
                  tm, lead, wp, m_tiles, row_chunk, with_sc):
    """y1 = relu(conv3x3(x)*s1 + b1) * mask   [+ sc = (conv1x1(x)*ssc + bsc) * mask]."""
    if with_sc:
        wsc_ref, bsc_ref, y_ref, sc_ref = rest
    else:
        (y_ref,) = rest
    offs = _tap_offsets(lead, wp)
    coutp = w_ref.shape[-1]
    base = 0 if m_tiles == 1 else pl.program_id(1) * tm
    for c0 in range(0, tm, row_chunk):
        tc = min(row_chunk, tm - c0)
        acc = _conv3x3_chunk(x_ref, w_ref, base, c0, tc, offs, m_tiles, coutp)
        mask = mask_ref[c0:c0 + tc, :]
        y = jnp.maximum(acc + b_ref[...], 0.0) * mask
        y_ref[c0:c0 + tc, :] = y.astype(y_ref.dtype)
        if with_sc:
            st = base + c0 + lead                        # centre tap (dy=1, dx=1)
            if m_tiles > 1:
                st = pl.multiple_of(st, 8)
            sc = jnp.dot(x_ref[pl.ds(st, tc), :], wsc_ref[...],
                         preferred_element_type=jnp.float32)
            sc_ref[c0:c0 + tc, :] = ((sc + bsc_ref[...]) * mask).astype(sc_ref.dtype)


def _conv2_kernel(y_ref, w_ref, b_ref, sc_ref, o_ref, *,
                  tm, lead, wp, m_tiles, row_chunk):
    """out = relu(conv3x3(y1)*s2 + b2 + shortcut)."""
    offs = _tap_offsets(lead, wp)
    coutp = w_ref.shape[-1]
    base = 0 if m_tiles == 1 else pl.program_id(1) * tm
    for c0 in range(0, tm, row_chunk):
        tc = min(row_chunk, tm - c0)
        acc = _conv3x3_chunk(y_ref, w_ref, base, c0, tc, offs, m_tiles, coutp)
        out = acc + b_ref[...] + sc_ref[c0:c0 + tc, :].astype(jnp.float32)
        o_ref[c0:c0 + tc, :] = jnp.maximum(out, 0.0).astype(o_ref.dtype)


# ---------------------------------------------------------------------------
# BasicBlock forward (Pallas)
# ---------------------------------------------------------------------------
def basic_block_forward(x_nchw, params, stride):
    x = jnp.transpose(x_nchw, (0, 2, 3, 1))                           # NCHW -> NHWC
    n, h, w, cin = x.shape
    cout = params["w1_hwio"].shape[-1]
    coutp = _round_up(cout, 128)                                      # lane-dense channels
    conv_sc = "wsc_hwio" in params
    if stride != 1 and not conv_sc:
        raise ValueError("stride > 1 requires a projection (conv1x1) shortcut")

    # ---- stride-1 frame geometry for conv-1 over x -------------------------------
    wp1 = _round_up(w + 2, 8)                # padded frame width (sublane aligned)
    hp1 = h + 2
    m1 = hp1 * wp1
    tm1, m1p, gm1 = _choose_tile(m1)
    lead1 = 2 * wp1                          # zero lead-in so all tap offsets >= 0

    # single fused pad: lead rows + 1-px border + width pad + tail slack, then flatten
    rows1 = -(-(lead1 + m1p + wp1 + 8) // wp1)
    x_ext = jnp.pad(x, ((0, 0), (3, rows1 - 3 - h), (1, wp1 - 1 - w), (0, 0)))
    x_ext = x_ext.astype(jnp.bfloat16).reshape(n, rows1 * wp1, cin)
    lx1 = rows1 * wp1
    mask1 = _frame_mask(h, w, wp1, m1p)

    w1 = _prep_conv3_weight(params["w1_hwio"], params["s1"], cin, coutp)
    b1 = _prep_bias(params["b1"], coutp)

    # ---- output (conv-2) frame geometry -------------------------------------------
    ho = (h - 1) // stride + 1
    wo = (w - 1) // stride + 1
    hp2 = ho + 2
    wp2 = _round_up(wo + 2, 8)
    m2 = hp2 * wp2

    if stride == 1:                          # call-1 writes directly in call-2's layout
        tm2, m2p, gm2 = tm1, m1p, gm1
        n_lead = -(-(wp1 + 1) // tm1)        # lead blocks (block-aligned zero lead-in)
        lead2 = n_lead * tm1
        lx2 = lead2 + m1p + wp1 + 8
        y_shape = jax.ShapeDtypeStruct((n, lx2, coutp), jnp.bfloat16)
        y_spec = pl.BlockSpec((None, tm1, coutp), lambda i, j: (i, j + n_lead, 0))
    else:
        tm2, m2p, gm2 = _choose_tile(m2)
        y_shape = jax.ShapeDtypeStruct((n, m1p, coutp), jnp.bfloat16)
        y_spec = pl.BlockSpec((None, tm1, coutp), lambda i, j: (i, j, 0))

    # ------------- call 1: conv3x3+BN+ReLU (+ 1x1 shortcut+BN) from one read of x --
    in_specs = [
        pl.BlockSpec((None, lx1, cin), lambda i, j: (i, 0, 0)),   # resident frame / image
        pl.BlockSpec((9, cin, coutp), lambda i, j: (0, 0, 0)),
        pl.BlockSpec((1, coutp), lambda i, j: (0, 0)),
        pl.BlockSpec((tm1, 1), lambda i, j: (j, 0)),
    ]
    args = [x_ext, w1, b1, mask1]
    block_bytes = [lx1 * cin * 2, 9 * cin * coutp * 2, coutp * 4, tm1 * 4,
                   tm1 * coutp * 2]

    if conv_sc:
        wsc = params["wsc_hwio"][0, 0] * params["ssc"].reshape(1, cout)
        wsc = jnp.pad(wsc, ((0, 0), (0, coutp - cout))).astype(jnp.bfloat16)
        bsc = _prep_bias(params["bsc"], coutp)
        in_specs += [pl.BlockSpec((cin, coutp), lambda i, j: (0, 0)),
                     pl.BlockSpec((1, coutp), lambda i, j: (0, 0))]
        args += [wsc, bsc]
        block_bytes += [cin * coutp * 2, coutp * 4, tm1 * coutp * 2]
        out_shape = (y_shape, jax.ShapeDtypeStruct((n, m1p, coutp), jnp.bfloat16))
        out_specs = (y_spec, pl.BlockSpec((None, tm1, coutp), lambda i, j: (i, j, 0)))
    else:
        out_shape = y_shape
        out_specs = y_spec

    flops1 = 2 * n * m1p * coutp * (9 * cin + (cin if conv_sc else 0))
    bytes1 = (x_ext.size * 2 + w1.size * 2 + b1.size * 4 + mask1.size * 4
              + n * m1p * coutp * 2 * (2 if conv_sc else 1))
    res1 = pl.pallas_call(
        functools.partial(_conv1_kernel, tm=tm1, lead=lead1, wp=wp1, m_tiles=gm1,
                          row_chunk=_row_chunk(tm1, coutp), with_sc=conv_sc),
        out_shape=out_shape,
        grid=(n, gm1),
        in_specs=in_specs,
        out_specs=out_specs,
        compiler_params=_compiler_params(block_bytes),
        cost_estimate=pl.CostEstimate(flops=int(flops1), transcendentals=0,
                                      bytes_accessed=int(bytes1)),
    )(*args)
    y1f, scf = res1 if conv_sc else (res1, None)

    # ------------- stride handling / shortcut layout for call 2 --------------------
    if stride == 1:
        y1e = y1f                                # already in call-2's extended layout
        if conv_sc:
            sc2 = scf                            # already tile-aligned (n, m2p, coutp)
        else:
            # identity shortcut: x itself in the zero-bordered frame, channel-padded
            # TODO(synk): feed x_ext with a block-aligned lead to avoid this pad pass.
            sc2 = jnp.pad(x_ext[:, lead1:lead1 + m1, :],
                          ((0, 0), (0, m1p - m1), (0, coutp - cin)))
    else:
        # strided conv == stride-1 conv + subsample (host-side; see TODO at top)
        def _sub(frame_flat):
            fr = frame_flat[:, :m1, :].reshape(n, hp1, wp1, coutp)
            return fr[:, 1:2 + stride * (ho - 1):stride,
                      1:2 + stride * (wo - 1):stride, :]
        y1s, scs = _sub(y1f), _sub(scf)
        lead2 = 2 * wp2
        rows2 = -(-(lead2 + m2p + wp2 + 8) // wp2)
        y1e = jnp.pad(y1s, ((0, 0), (3, rows2 - 3 - ho), (1, wp2 - 1 - wo), (0, 0)))
        y1e = y1e.reshape(n, rows2 * wp2, coutp)
        sc2 = jnp.pad(scs, ((0, 0), (1, 1), (1, wp2 - 1 - wo), (0, 0)))
        sc2 = jnp.pad(sc2.reshape(n, m2, coutp), ((0, 0), (0, m2p - m2), (0, 0)))
    lx2 = y1e.shape[1]

    # ------------- call 2: conv3x3+BN + shortcut add + final ReLU ------------------
    w2 = _prep_conv3_weight(params["w2_hwio"], params["s2"], coutp, coutp)
    b2 = _prep_bias(params["b2"], coutp)

    flops2 = 2 * n * m2p * coutp * 9 * coutp
    bytes2 = y1e.size * 2 + w2.size * 2 + b2.size * 4 + sc2.size * 2 + n * m2p * coutp * 2
    out_f = pl.pallas_call(
        functools.partial(_conv2_kernel, tm=tm2, lead=lead2, wp=wp2, m_tiles=gm2,
                          row_chunk=_row_chunk(tm2, coutp)),
        out_shape=jax.ShapeDtypeStruct((n, m2p, coutp), jnp.bfloat16),
        grid=(n, gm2),
        in_specs=[pl.BlockSpec((None, lx2, coutp), lambda i, j: (i, 0, 0)),
                  pl.BlockSpec((9, coutp, coutp), lambda i, j: (0, 0, 0)),
                  pl.BlockSpec((1, coutp), lambda i, j: (0, 0)),
                  pl.BlockSpec((None, tm2, coutp), lambda i, j: (i, j, 0))],
        out_specs=pl.BlockSpec((None, tm2, coutp), lambda i, j: (i, j, 0)),
        compiler_params=_compiler_params(
            [lx2 * coutp * 2, 9 * coutp * coutp * 2, coutp * 4,
             tm2 * coutp * 2, tm2 * coutp * 2]),
        cost_estimate=pl.CostEstimate(flops=int(flops2), transcendentals=0,
                                      bytes_accessed=int(bytes2)),
    )(y1e, w2, b2, sc2)

    out = out_f[:, :m2, :].reshape(n, hp2, wp2, coutp)[:, 1:ho + 1, 1:wo + 1, :cout]
    return jnp.transpose(out.astype(jnp.float32), (0, 3, 1, 2))       # NHWC -> NCHW


# ---------------------------------------------------------------------------
# parameter init (inference-mode BN folded), pure-JAX reference
# ---------------------------------------------------------------------------
def fold_bn(gamma, beta, mean, var, eps=1e-5):
    scale = gamma * lax.rsqrt(var + eps)
    return scale, beta - mean * scale


def init_params(key, in_ch, out_ch, stride):
    kc1, kb1, kc2, kb2, kcs, kbs = jax.random.split(key, 6)

    def conv_w(k, cout, cin, kh, kw):
        w = 0.1 * jax.random.normal(k, (cout, cin, kh, kw), jnp.float32)   # OIHW (PyTorch)
        return jnp.transpose(w, (2, 3, 1, 0))                               # -> HWIO

    def bn(k, c):
        k1, k2, k3, k4 = jax.random.split(k, 4)
        gamma = jax.random.uniform(k1, (c,), jnp.float32, 0.5, 1.5)
        beta = 0.1 * jax.random.normal(k2, (c,), jnp.float32)
        mean = 0.1 * jax.random.normal(k3, (c,), jnp.float32)
        var = jax.random.uniform(k4, (c,), jnp.float32, 0.5, 1.5)
        return fold_bn(gamma, beta, mean, var)

    params = {"w1_hwio": conv_w(kc1, out_ch, in_ch, 3, 3)}
    params["s1"], params["b1"] = bn(kb1, out_ch)
    params["w2_hwio"] = conv_w(kc2, out_ch, out_ch, 3, 3)
    params["s2"], params["b2"] = bn(kb2, out_ch)
    if stride != 1 or in_ch != out_ch:
        params["wsc_hwio"] = conv_w(kcs, out_ch, in_ch, 1, 1)
        params["ssc"], params["bsc"] = bn(kbs, out_ch)
    return params


def ref_forward(x_nchw, params, stride):
    x = jnp.transpose(x_nchw, (0, 2, 3, 1))
    dn = ("NHWC", "HWIO", "NHWC")
    hi = lax.Precision.HIGHEST
    cin = x.shape[-1]
    cout = params["w1_hwio"].shape[-1]

    y = lax.conv_general_dilated(x, params["w1_hwio"], (stride, stride),
                                 [(1, 1), (1, 1)], dimension_numbers=dn, precision=hi)
    y = jnp.maximum(y * params["s1"] + params["b1"], 0.0)
    y = lax.conv_general_dilated(y, params["w2_hwio"], (1, 1),
                                 [(1, 1), (1, 1)], dimension_numbers=dn, precision=hi)
    y = y * params["s2"] + params["b2"]

    if stride != 1 or cin != cout:
        sc = lax.conv_general_dilated(x, params["wsc_hwio"], (stride, stride),
                                      [(0, 0), (0, 0)], dimension_numbers=dn, precision=hi)
        sc = sc * params["ssc"] + params["bsc"]
    else:
        sc = x

    out = jnp.maximum(y + sc, 0.0)
    return jnp.transpose(out, (0, 3, 1, 2))


if __name__ == "__main__":
    in_ch, out_ch, stride = 4, 8, 1        # in != out -> projection (conv1x1) shortcut
    key = jax.random.PRNGKey(0)
    kx, kp = jax.random.split(key)

    x = jax.random.normal(kx, (2, in_ch, 16, 16), jnp.float32)     # NCHW, as in PyTorch
    params = init_params(kp, in_ch, out_ch, stride)

    fwd = jax.jit(basic_block_forward, static_argnames="stride")
    out = jax.block_until_ready(fwd(x, params, stride=stride))
    ref = jax.block_until_ready(ref_forward(x, params, stride))

    assert out.shape == (2, out_ch, 16, 16), out.shape
    err = float(jnp.max(jnp.abs(out - ref)))
    # bf16 MXU operands + bf16 intermediates/output -> relaxed tolerance vs f32 reference
    assert jnp.allclose(out, ref, rtol=5e-2, atol=5e-2), f"max abs err {err}"
    print("KERNEL_OK")
</pallas_src>

<mosaic_0001>
module attributes {stable_mosaic.version = 11 : i64} {
  func.func @_conv1_kernel(%arg0: i32, %arg1: i32, %arg2: memref<1x528x4xbf16, #tpu.memory_space<vmem>>, %arg3: memref<9x4x128xbf16, #tpu.memory_space<vmem>>, %arg4: memref<1x128xf32, #tpu.memory_space<vmem>>, %arg5: memref<448x1xf32, #tpu.memory_space<vmem>>, %arg6: memref<4x128xbf16, #tpu.memory_space<vmem>>, %arg7: memref<1x128xf32, #tpu.memory_space<vmem>>, %arg8: memref<1x448x128xbf16, #tpu.memory_space<vmem>>, %arg9: memref<1x448x128xbf16, #tpu.memory_space<vmem>>) attributes {dimension_semantics = [#tpu.dimension_semantics<parallel>, #tpu.dimension_semantics<arbitrary>], iteration_bounds = array<i64: 2, 1>, scalar_prefetch = 0 : i64, scratch_operands = 0 : i64, tpu.core_type = #tpu.core_type<tc>, window_params = [{transform_indices = @transform_0, window_bounds = array<i64: 1, 528, 4>}, {pipeline_mode = #tpu.pipeline_mode<synchronous>, transform_indices = @transform_1, window_bounds = array<i64: 9, 4, 128>}, {pipeline_mode = #tpu.pipeline_mode<synchronous>, transform_indices = @transform_2, window_bounds = array<i64: 1, 128>}, {transform_indices = @transform_3, window_bounds = array<i64: 448, 1>}, {pipeline_mode = #tpu.pipeline_mode<synchronous>, transform_indices = @transform_4, window_bounds = array<i64: 4, 128>}, {pipeline_mode = #tpu.pipeline_mode<synchronous>, transform_indices = @transform_5, window_bounds = array<i64: 1, 128>}, {transform_indices = @transform_6, window_bounds = array<i64: 1, 448, 128>}, {transform_indices = @transform_7, window_bounds = array<i64: 1, 448, 128>}]} {
    %cst = arith.constant 0.000000e+00 : f32
    %0 = vector.broadcast %cst : f32 to vector<256x128xf32>
    %c0 = arith.constant 0 : index
    %c23 = arith.constant 23 : index
    %c0_0 = arith.constant 0 : index
    %1 = vector.load %arg2[%c0, %c23, %c0_0] : memref<1x528x4xbf16, #tpu.memory_space<vmem>>, vector<1x256x4xbf16>
    %2 = vector.shape_cast %1 : vector<1x256x4xbf16> to vector<256x4xbf16>
    %c0_1 = arith.constant 0 : index
    %c0_2 = arith.constant 0 : index
    %c0_3 = arith.constant 0 : index
    %3 = vector.load %arg3[%c0_1, %c0_2, %c0_3] : memref<9x4x128xbf16, #tpu.memory_space<vmem>>, vector<1x4x128xbf16>
    %4 = vector.shape_cast %3 : vector<1x4x128xbf16> to vector<4x128xbf16>
    %cst_4 = arith.constant dense<0.000000e+00> : vector<256x128xf32>
    %5 = tpu.matmul %2, %4, %cst_4 {dimension_numbers = #tpu.dot_dimension_numbers<[1], [0], [0], [1], [0, 0, 1, 1], [], []>} : vector<256x4xbf16>, vector<4x128xbf16>, vector<256x128xf32> -> vector<256x128xf32>
    %6 = arith.addf %0, %5 : vector<256x128xf32>
    %c0_5 = arith.constant 0 : index
    %c24 = arith.constant 24 : index
    %c0_6 = arith.constant 0 : index
    %7 = vector.load %arg2[%c0_5, %c24, %c0_6] : memref<1x528x4xbf16, #tpu.memory_space<vmem>>, vector<1x256x4xbf16>
    %8 = vector.shape_cast %7 : vector<1x256x4xbf16> to vector<256x4xbf16>
    %c1 = arith.constant 1 : index
    %c0_7 = arith.constant 0 : index
    %c0_8 = arith.constant 0 : index
    %9 = vector.load %arg3[%c1, %c0_7, %c0_8] : memref<9x4x128xbf16, #tpu.memory_space<vmem>>, vector<1x4x128xbf16>
    %10 = vector.shape_cast %9 : vector<1x4x128xbf16> to vector<4x128xbf16>
    %cst_9 = arith.constant dense<0.000000e+00> : vector<256x128xf32>
    %11 = tpu.matmul %8, %10, %cst_9 {dimension_numbers = #tpu.dot_dimension_numbers<[1], [0], [0], [1], [0, 0, 1, 1], [], []>} : vector<256x4xbf16>, vector<4x128xbf16>, vector<256x128xf32> -> vector<256x128xf32>
    %12 = arith.addf %6, %11 : vector<256x128xf32>
    %c0_10 = arith.constant 0 : index
    %c25 = arith.constant 25 : index
    %c0_11 = arith.constant 0 : index
    %13 = vector.load %arg2[%c0_10, %c25, %c0_11] : memref<1x528x4xbf16, #tpu.memory_space<vmem>>, vector<1x256x4xbf16>
    %14 = vector.shape_cast %13 : vector<1x256x4xbf16> to vector<256x4xbf16>
    %c2 = arith.constant 2 : index
    %c0_12 = arith.constant 0 : index
    %c0_13 = arith.constant 0 : index
    %15 = vector.load %arg3[%c2, %c0_12, %c0_13] : memref<9x4x128xbf16, #tpu.memory_space<vmem>>, vector<1x4x128xbf16>
    %16 = vector.shape_cast %15 : vector<1x4x128xbf16> to vector<4x128xbf16>
    %cst_14 = arith.constant dense<0.000000e+00> : vector<256x128xf32>
    %17 = tpu.matmul %14, %16, %cst_14 {dimension_numbers = #tpu.dot_dimension_numbers<[1], [0], [0], [1], [0, 0, 1, 1], [], []>} : vector<256x4xbf16>, vector<4x128xbf16>, vector<256x128xf32> -> vector<256x128xf32>
    %18 = arith.addf %12, %17 : vector<256x128xf32>
    %c0_15 = arith.constant 0 : index
    %c47 = arith.constant 47 : index
    %c0_16 = arith.constant 0 : index
    %19 = vector.load %arg2[%c0_15, %c47, %c0_16] : memref<1x528x4xbf16, #tpu.memory_space<vmem>>, vector<1x256x4xbf16>
    %20 = vector.shape_cast %19 : vector<1x256x4xbf16> to vector<256x4xbf16>
    %c3 = arith.constant 3 : index
    %c0_17 = arith.constant 0 : index
    %c0_18 = arith.constant 0 : index
    %21 = vector.load %arg3[%c3, %c0_17, %c0_18] : memref<9x4x128xbf16, #tpu.memory_space<vmem>>, vector<1x4x128xbf16>
    %22 = vector.shape_cast %21 : vector<1x4x128xbf16> to vector<4x128xbf16>
    %cst_19 = arith.constant dense<0.000000e+00> : vector<256x128xf32>
    %23 = tpu.matmul %20, %22, %cst_19 {dimension_numbers = #tpu.dot_dimension_numbers<[1], [0], [0], [1], [0, 0, 1, 1], [], []>} : vector<256x4xbf16>, vector<4x128xbf16>, vector<256x128xf32> -> vector<256x128xf32>
    %24 = arith.addf %18, %23 : vector<256x128xf32>
    %c0_20 = arith.constant 0 : index
    %c48 = arith.constant 48 : index
    %c0_21 = arith.constant 0 : index
    %25 = vector.load %arg2[%c0_20, %c48, %c0_21] : memref<1x528x4xbf16, #tpu.memory_space<vmem>>, vector<1x256x4xbf16>
    %26 = vector.shape_cast %25 : vector<1x256x4xbf16> to vector<256x4xbf16>
    %c4 = arith.constant 4 : index
    %c0_22 = arith.constant 0 : index
    %c0_23 = arith.constant 0 : index
    %27 = vector.load %arg3[%c4, %c0_22, %c0_23] : memref<9x4x128xbf16, #tpu.memory_space<vmem>>, vector<1x4x128xbf16>
    %28 = vector.shape_cast %27 : vector<1x4x128xbf16> to vector<4x128xbf16>
    %cst_24 = arith.constant dense<0.000000e+00> : vector<256x128xf32>
    %29 = tpu.matmul %26, %28, %cst_24 {dimension_numbers = #tpu.dot_dimension_numbers<[1], [0], [0], [1], [0, 0, 1, 1], [], []>} : vector<256x4xbf16>, vector<4x128xbf16>, vector<256x128xf32> -> vector<256x128xf32>
    %30 = arith.addf %24, %29 : vector<256x128xf32>
    %c0_25 = arith.constant 0 : index
    %c49 = arith.constant 49 : index
    %c0_26 = arith.constant 0 : index
    %31 = vector.load %arg2[%c0_25, %c49, %c0_26] : memref<1x528x4xbf16, #tpu.memory_space<vmem>>, vector<1x256x4xbf16>
    %32 = vector.shape_cast %31 : vector<1x256x4xbf16> to vector<256x4xbf16>
    %c5 = arith.constant 5 : index
    %c0_27 = arith.constant 0 : index
    %c0_28 = arith.constant 0 : index
    %33 = vector.load %arg3[%c5, %c0_27, %c0_28] : memref<9x4x128xbf16, #tpu.memory_space<vmem>>, vector<1x4x128xbf16>
    %34 = vector.shape_cast %33 : vector<1x4x128xbf16> to vector<4x128xbf16>
    %cst_29 = arith.constant dense<0.000000e+00> : vector<256x128xf32>
    %35 = tpu.matmul %32, %34, %cst_29 {dimension_numbers = #tpu.dot_dimension_numbers<[1], [0], [0], [1], [0, 0, 1, 1], [], []>} : vector<256x4xbf16>, vector<4x128xbf16>, vector<256x128xf32> -> vector<256x128xf32>
    %36 = arith.addf %30, %35 : vector<256x128xf32>
    %c0_30 = arith.constant 0 : index
    %c71 = arith.constant 71 : index
    %c0_31 = arith.constant 0 : index
    %37 = vector.load %arg2[%c0_30, %c71, %c0_31] : memref<1x528x4xbf16, #tpu.memory_space<vmem>>, vector<1x256x4xbf16>
    %38 = vector.shape_cast %37 : vector<1x256x4xbf16> to vector<256x4xbf16>
    %c6 = arith.constant 6 : index
    %c0_32 = arith.constant 0 : index
    %c0_33 = arith.constant 0 : index
    %39 = vector.load %arg3[%c6, %c0_32, %c0_33] : memref<9x4x128xbf16, #tpu.memory_space<vmem>>, vector<1x4x128xbf16>
    %40 = vector.shape_cast %39 : vector<1x4x128xbf16> to vector<4x128xbf16>
    %cst_34 = arith.constant dense<0.000000e+00> : vector<256x128xf32>
    %41 = tpu.matmul %38, %40, %cst_34 {dimension_numbers = #tpu.dot_dimension_numbers<[1], [0], [0], [1], [0, 0, 1, 1], [], []>} : vector<256x4xbf16>, vector<4x128xbf16>, vector<256x128xf32> -> vector<256x128xf32>
    %42 = arith.addf %36, %41 : vector<256x128xf32>
    %c0_35 = arith.constant 0 : index
    %c72 = arith.constant 72 : index
    %c0_36 = arith.constant 0 : index
    %43 = vector.load %arg2[%c0_35, %c72, %c0_36] : memref<1x528x4xbf16, #tpu.memory_space<vmem>>, vector<1x256x4xbf16>
    %44 = vector.shape_cast %43 : vector<1x256x4xbf16> to vector<256x4xbf16>
    %c7 = arith.constant 7 : index
    %c0_37 = arith.constant 0 : index
    %c0_38 = arith.constant 0 : index
    %45 = vector.load %arg3[%c7, %c0_37, %c0_38] : memref<9x4x128xbf16, #tpu.memory_space<vmem>>, vector<1x4x128xbf16>
    %46 = vector.shape_cast %45 : vector<1x4x128xbf16> to vector<4x128xbf16>
    %cst_39 = arith.constant dense<0.000000e+00> : vector<256x128xf32>
    %47 = tpu.matmul %44, %46, %cst_39 {dimension_numbers = #tpu.dot_dimension_numbers<[1], [0], [0], [1], [0, 0, 1, 1], [], []>} : vector<256x4xbf16>, vector<4x128xbf16>, vector<256x128xf32> -> vector<256x128xf32>
    %48 = arith.addf %42, %47 : vector<256x128xf32>
    %c0_40 = arith.constant 0 : index
    %c73 = arith.constant 73 : index
    %c0_41 = arith.constant 0 : index
    %49 = vector.load %arg2[%c0_40, %c73, %c0_41] : memref<1x528x4xbf16, #tpu.memory_space<vmem>>, vector<1x256x4xbf16>
    %50 = vector.shape_cast %49 : vector<1x256x4xbf16> to vector<256x4xbf16>
    %c8 = arith.constant 8 : index
    %c0_42 = arith.constant 0 : index
    %c0_43 = arith.constant 0 : index
    %51 = vector.load %arg3[%c8, %c0_42, %c0_43] : memref<9x4x128xbf16, #tpu.memory_space<vmem>>, vector<1x4x128xbf16>
    %52 = vector.shape_cast %51 : vector<1x4x128xbf16> to vector<4x128xbf16>
    %cst_44 = arith.constant dense<0.000000e+00> : vector<256x128xf32>
    %53 = tpu.matmul %50, %52, %cst_44 {dimension_numbers = #tpu.dot_dimension_numbers<[1], [0], [0], [1], [0, 0, 1, 1], [], []>} : vector<256x4xbf16>, vector<4x128xbf16>, vector<256x128xf32> -> vector<256x128xf32>
    %54 = arith.addf %48, %53 : vector<256x128xf32>
    %c0_45 = arith.constant 0 : index
    %c0_46 = arith.constant 0 : index
    %55 = vector.load %arg5[%c0_45, %c0_46] : memref<448x1xf32, #tpu.memory_space<vmem>>, vector<256x1xf32>
    %c0_47 = arith.constant 0 : index
    %c0_48 = arith.constant 0 : index
    %56 = vector.load %arg4[%c0_47, %c0_48] : memref<1x128xf32, #tpu.memory_space<vmem>>, vector<1x128xf32>
    %57 = vector.broadcast %56 : vector<1x128xf32> to vector<256x128xf32>
    %58 = arith.addf %54, %57 : vector<256x128xf32>
    %cst_49 = arith.constant 0.000000e+00 : f32
    %59 = vector.broadcast %cst_49 : f32 to vector<256x128xf32>
    %60 = arith.maximumf %58, %59 : vector<256x128xf32>
    %61 = vector.broadcast %55 : vector<256x1xf32> to vector<256x128xf32>
    %62 = arith.mulf %60, %61 : vector<256x128xf32>
    %63 = arith.truncf %62 : vector<256x128xf32> to vector<256x128xbf16>
    %c0_50 = arith.constant 0 : index
    %c0_51 = arith.constant 0 : index
    %c0_52 = arith.constant 0 : index
    %64 = vector.load %arg8[%c0_50, %c0_51, %c0_52] : memref<1x448x128xbf16, #tpu.memory_space<vmem>>, vector<1x256x128xbf16>
    %65 = vector.shape_cast %64 : vector<1x256x128xbf16> to vector<256x128xbf16>
    %66 = vector.shape_cast %63 : vector<256x128xbf16> to vector<1x256x128xbf16>
    tpu.vector_store %arg8[%c0_50, %c0_51, %c0_52], %66 {strides = array<i32>} : memref<1x448x128xbf16, #tpu.memory_space<vmem>>, vector<1x256x128xbf16>,
    %c0_53 = arith.constant 0 : index
    %c48_54 = arith.constant 48 : index
    %c0_55 = arith.constant 0 : index
    %67 = vector.load %arg2[%c0_53, %c48_54, %c0_55] : memref<1x528x4xbf16, #tpu.memory_space<vmem>>, vector<1x256x4xbf16>
    %68 = vector.shape_cast %67 : vector<1x256x4xbf16> to vector<256x4xbf16>
    %c0_56 = arith.constant 0 : index
    %c0_57 = arith.constant 0 : index
    %69 = vector.load %arg6[%c0_56, %c0_57] : memref<4x128xbf16, #tpu.memory_space<vmem>>, vector<4x128xbf16>
    %cst_58 = arith.constant dense<0.000000e+00> : vector<256x128xf32>
    %70 = tpu.matmul %68, %69, %cst_58 {dimension_numbers = #tpu.dot_dimension_numbers<[1], [0], [0], [1], [0, 0, 1, 1], [], []>} : vector<256x4xbf16>, vector<4x128xbf16>, vector<256x128xf32> -> vector<256x128xf32>
    %c0_59 = arith.constant 0 : index
    %c0_60 = arith.constant 0 : index
    %71 = vector.load %arg7[%c0_59, %c0_60] : memref<1x128xf32, #tpu.memory_space<vmem>>, vector<1x128xf32>
    %72 = vector.broadcast %71 : vector<1x128xf32> to vector<256x128xf32>
    %73 = arith.addf %70, %72 : vector<256x128xf32>
    %74 = vector.broadcast %55 : vector<256x1xf32> to vector<256x128xf32>
    %75 = arith.mulf %73, %74 : vector<256x128xf32>
    %76 = arith.truncf %75 : vector<256x128xf32> to vector<256x128xbf16>
    %c0_61 = arith.constant 0 : index
    %c0_62 = arith.constant 0 : index
    %c0_63 = arith.constant 0 : index
    %77 = vector.load %arg9[%c0_61, %c0_62, %c0_63] : memref<1x448x128xbf16, #tpu.memory_space<vmem>>, vector<1x256x128xbf16>
    %78 = vector.shape_cast %77 : vector<1x256x128xbf16> to vector<256x128xbf16>
    %79 = vector.shape_cast %76 : vector<256x128xbf16> to vector<1x256x128xbf16>
    tpu.vector_store %arg9[%c0_61, %c0_62, %c0_63], %79 {strides = array<i32>} : memref<1x448x128xbf16, #tpu.memory_space<vmem>>, vector<1x256x128xbf16>,
    %cst_64 = arith.constant 0.000000e+00 : f32
    %80 = vector.broadcast %cst_64 : f32 to vector<192x128xf32>
    %c0_65 = arith.constant 0 : index
    %c279 = arith.constant 279 : index
    %c0_66 = arith.constant 0 : index
    %81 = vector.load %arg2[%c0_65, %c279, %c0_66] : memref<1x528x4xbf16, #tpu.memory_space<vmem>>, vector<1x192x4xbf16>
    %82 = vector.shape_cast %81 : vector<1x192x4xbf16> to vector<192x4xbf16>
    %c0_67 = arith.constant 0 : index
    %c0_68 = arith.constant 0 : index
    %c0_69 = arith.constant 0 : index
    %83 = vector.load %arg3[%c0_67, %c0_68, %c0_69] : memref<9x4x128xbf16, #tpu.memory_space<vmem>>, vector<1x4x128xbf16>
    %84 = vector.shape_cast %83 : vector<1x4x128xbf16> to vector<4x128xbf16>
    %cst_70 = arith.constant dense<0.000000e+00> : vector<192x128xf32>
    %85 = tpu.matmul %82, %84, %cst_70 {dimension_numbers = #tpu.dot_dimension_numbers<[1], [0], [0], [1], [0, 0, 1, 1], [], []>} : vector<192x4xbf16>, vector<4x128xbf16>, vector<192x128xf32> -> vector<192x128xf32>
    %86 = arith.addf %80, %85 : vector<192x128xf32>
    %c0_71 = arith.constant 0 : index
    %c280 = arith.constant 280 : index
    %c0_72 = arith.constant 0 : index
    %87 = vector.load %arg2[%c0_71, %c280, %c0_72] : memref<1x528x4xbf16, #tpu.memory_space<vmem>>, vector<1x192x4xbf16>
    %88 = vector.shape_cast %87 : vector<1x192x4xbf16> to vector<192x4xbf16>
    %c1_73 = arith.constant 1 : index
    %c0_74 = arith.constant 0 : index
    %c0_75 = arith.constant 0 : index
    %89 = vector.load %arg3[%c1_73, %c0_74, %c0_75] : memref<9x4x128xbf16, #tpu.memory_space<vmem>>, vector<1x4x128xbf16>
    %90 = vector.shape_cast %89 : vector<1x4x128xbf16> to vector<4x128xbf16>
    %cst_76 = arith.constant dense<0.000000e+00> : vector<192x128xf32>
    %91 = tpu.matmul %88, %90, %cst_76 {dimension_numbers = #tpu.dot_dimension_numbers<[1], [0], [0], [1], [0, 0, 1, 1], [], []>} : vector<192x4xbf16>, vector<4x128xbf16>, vector<192x128xf32> -> vector<192x128xf32>
    %92 = arith.addf %86, %91 : vector<192x128xf32>
    %c0_77 = arith.constant 0 : index
    %c281 = arith.constant 281 : index
    %c0_78 = arith.constant 0 : index
    %93 = vector.load %arg2[%c0_77, %c281, %c0_78] : memref<1x528x4xbf16, #tpu.memory_space<vmem>>, vector<1x192x4xbf16>
    %94 = vector.shape_cast %93 : vector<1x192x4xbf16> to vector<192x4xbf16>
    %c2_79 = arith.constant 2 : index
    %c0_80 = arith.constant 0 : index
    %c0_81 = arith.constant 0 : index
    %95 = vector.load %arg3[%c2_79, %c0_80, %c0_81] : memref<9x4x128xbf16, #tpu.memory_space<vmem>>, vector<1x4x128xbf16>
    %96 = vector.shape_cast %95 : vector<1x4x128xbf16> to vector<4x128xbf16>
    %cst_82 = arith.constant dense<0.000000e+00> : vector<192x128xf32>
    %97 = tpu.matmul %94, %96, %cst_82 {dimension_numbers = #tpu.dot_dimension_numbers<[1], [0], [0], [1], [0, 0, 1, 1], [], []>} : vector<192x4xbf16>, vector<4x128xbf16>, vector<192x128xf32> -> vector<192x128xf32>
    %98 = arith.addf %92, %97 : vector<192x128xf32>
    %c0_83 = arith.constant 0 : index
    %c303 = arith.constant 303 : index
    %c0_84 = arith.constant 0 : index
    %99 = vector.load %arg2[%c0_83, %c303, %c0_84] : memref<1x528x4xbf16, #tpu.memory_space<vmem>>, vector<1x192x4xbf16>
    %100 = vector.shape_cast %99 : vector<1x192x4xbf16> to vector<192x4xbf16>
    %c3_85 = arith.constant 3 : index
    %c0_86 = arith.constant 0 : index
    %c0_87 = arith.constant 0 : index
    %101 = vector.load %arg3[%c3_85, %c0_86, %c0_87] : memref<9x4x128xbf16, #tpu.memory_space<vmem>>, vector<1x4x128xbf16>
    %102 = vector.shape_cast %101 : vector<1x4x128xbf16> to vector<4x128xbf16>
    %cst_88 = arith.constant dense<0.000000e+00> : vector<192x128xf32>
    %103 = tpu.matmul %100, %102, %cst_88 {dimension_numbers = #tpu.dot_dimension_numbers<[1], [0], [0], [1], [0, 0, 1, 1], [], []>} : vector<192x4xbf16>, vector<4x128xbf16>, vector<192x128xf32> -> vector<192x128xf32>
    %104 = arith.addf %98, %103 : vector<192x128xf32>
    %c0_89 = arith.constant 0 : index
    %c304 = arith.constant 304 : index
    %c0_90 = arith.constant 0 : index
    %105 = vector.load %arg2[%c0_89, %c304, %c0_90] : memref<1x528x4xbf16, #tpu.memory_space<vmem>>, vector<1x192x4xbf16>
    %106 = vector.shape_cast %105 : vector<1x192x4xbf16> to vector<192x4xbf16>
    %c4_91 = arith.constant 4 : index
    %c0_92 = arith.constant 0 : index
    %c0_93 = arith.constant 0 : index
    %107 = vector.load %arg3[%c4_91, %c0_92, %c0_93] : memref<9x4x128xbf16, #tpu.memory_space<vmem>>, vector<1x4x128xbf16>
    %108 = vector.shape_cast %107 : vector<1x4x128xbf16> to vector<4x128xbf16>
    %cst_94 = arith.constant dense<0.000000e+00> : vector<192x128xf32>
    %109 = tpu.matmul %106, %108, %cst_94 {dimension_numbers = #tpu.dot_dimension_numbers<[1], [0], [0], [1], [0, 0, 1, 1], [], []>} : vector<192x4xbf16>, vector<4x128xbf16>, vector<192x128xf32> -> vector<192x128xf32>
    %110 = arith.addf %104, %109 : vector<192x128xf32>
    %c0_95 = arith.constant 0 : index
    %c305 = arith.constant 305 : index
    %c0_96 = arith.constant 0 : index
    %111 = vector.load %arg2[%c0_95, %c305, %c0_96] : memref<1x528x4xbf16, #tpu.memory_space<vmem>>, vector<1x192x4xbf16>
    %112 = vector.shape_cast %111 : vector<1x192x4xbf16> to vector<192x4xbf16>
    %c5_97 = arith.constant 5 : index
    %c0_98 = arith.constant 0 : index
    %c0_99 = arith.constant 0 : index
    %113 = vector.load %arg3[%c5_97, %c0_98, %c0_99] : memref<9x4x128xbf16, #tpu.memory_space<vmem>>, vector<1x4x128xbf16>
    %114 = vector.shape_cast %113 : vector<1x4x128xbf16> to vector<4x128xbf16>
    %cst_100 = arith.constant dense<0.000000e+00> : vector<192x128xf32>
    %115 = tpu.matmul %112, %114, %cst_100 {dimension_numbers = #tpu.dot_dimension_numbers<[1], [0], [0], [1], [0, 0, 1, 1], [], []>} : vector<192x4xbf16>, vector<4x128xbf16>, vector<192x128xf32> -> vector<192x128xf32>
    %116 = arith.addf %110, %115 : vector<192x128xf32>
    %c0_101 = arith.constant 0 : index
    %c327 = arith.constant 327 : index
    %c0_102 = arith.constant 0 : index
    %117 = vector.load %arg2[%c0_101, %c327, %c0_102] : memref<1x528x4xbf16, #tpu.memory_space<vmem>>, vector<1x192x4xbf16>
    %118 = vector.shape_cast %117 : vector<1x192x4xbf16> to vector<192x4xbf16>
    %c6_103 = arith.constant 6 : index
    %c0_104 = arith.constant 0 : index
    %c0_105 = arith.constant 0 : index
    %119 = vector.load %arg3[%c6_103, %c0_104, %c0_105] : memref<9x4x128xbf16, #tpu.memory_space<vmem>>, vector<1x4x128xbf16>
    %120 = vector.shape_cast %119 : vector<1x4x128xbf16> to vector<4x128xbf16>
    %cst_106 = arith.constant dense<0.000000e+00> : vector<192x128xf32>
    %121 = tpu.matmul %118, %120, %cst_106 {dimension_numbers = #tpu.dot_dimension_numbers<[1], [0], [0], [1], [0, 0, 1, 1], [], []>} : vector<192x4xbf16>, vector<4x128xbf16>, vector<192x128xf32> -> vector<192x128xf32>
    %122 = arith.addf %116, %121 : vector<192x128xf32>
    %c0_107 = arith.constant 0 : index
    %c328 = arith.constant 328 : index
    %c0_108 = arith.constant 0 : index
    %123 = vector.load %arg2[%c0_107, %c328, %c0_108] : memref<1x528x4xbf16, #tpu.memory_space<vmem>>, vector<1x192x4xbf16>
    %124 = vector.shape_cast %123 : vector<1x192x4xbf16> to vector<192x4xbf16>
    %c7_109 = arith.constant 7 : index
    %c0_110 = arith.constant 0 : index
    %c0_111 = arith.constant 0 : index
    %125 = vector.load %arg3[%c7_109, %c0_110, %c0_111] : memref<9x4x128xbf16, #tpu.memory_space<vmem>>, vector<1x4x128xbf16>
    %126 = vector.shape_cast %125 : vector<1x4x128xbf16> to vector<4x128xbf16>
    %cst_112 = arith.constant dense<0.000000e+00> : vector<192x128xf32>
    %127 = tpu.matmul %124, %126, %cst_112 {dimension_numbers = #tpu.dot_dimension_numbers<[1], [0], [0], [1], [0, 0, 1, 1], [], []>} : vector<192x4xbf16>, vector<4x128xbf16>, vector<192x128xf32> -> vector<192x128xf32>
    %128 = arith.addf %122, %127 : vector<192x128xf32>
    %c0_113 = arith.constant 0 : index
    %c329 = arith.constant 329 : index
    %c0_114 = arith.constant 0 : index
    %129 = vector.load %arg2[%c0_113, %c329, %c0_114] : memref<1x528x4xbf16, #tpu.memory_space<vmem>>, vector<1x192x4xbf16>
    %130 = vector.shape_cast %129 : vector<1x192x4xbf16> to vector<192x4xbf16>
    %c8_115 = arith.constant 8 : index
    %c0_116 = arith.constant 0 : index
    %c0_117 = arith.constant 0 : index
    %131 = vector.load %arg3[%c8_115, %c0_116, %c0_117] : memref<9x4x128xbf16, #tpu.memory_space<vmem>>, vector<1x4x128xbf16>
    %132 = vector.shape_cast %131 : vector<1x4x128xbf16> to vector<4x128xbf16>
    %cst_118 = arith.constant dense<0.000000e+00> : vector<192x128xf32>
    %133 = tpu.matmul %130, %132, %cst_118 {dimension_numbers = #tpu.dot_dimension_numbers<[1], [0], [0], [1], [0, 0, 1, 1], [], []>} : vector<192x4xbf16>, vector<4x128xbf16>, vector<192x128xf32> -> vector<192x128xf32>
    %134 = arith.addf %128, %133 : vector<192x128xf32>
    %c256 = arith.constant 256 : index
    %c0_119 = arith.constant 0 : index
    %135 = vector.load %arg5[%c256, %c0_119] : memref<448x1xf32, #tpu.memory_space<vmem>>, vector<192x1xf32>
    %c0_120 = arith.constant 0 : index
    %c0_121 = arith.constant 0 : index
    %136 = vector.load %arg4[%c0_120, %c0_121] : memref<1x128xf32, #tpu.memory_space<vmem>>, vector<1x128xf32>
    %137 = vector.broadcast %136 : vector<1x128xf32> to vector<192x128xf32>
    %138 = arith.addf %134, %137 : vector<192x128xf32>
    %cst_122 = arith.constant 0.000000e+00 : f32
    %139 = vector.broadcast %cst_122 : f32 to vector<192x128xf32>
    %140 = arith.maximumf %138, %139 : vector<192x128xf32>
    %141 = vector.broadcast %135 : vector<192x1xf32> to vector<192x128xf32>
    %142 = arith.mulf %140, %141 : vector<192x128xf32>
    %143 = arith.truncf %142 : vector<192x128xf32> to vector<192x128xbf16>
    %c0_123 = arith.constant 0 : index
    %c256_124 = arith.constant 256 : index
    %c0_125 = arith.constant 0 : index
    %144 = vector.load %arg8[%c0_123, %c256_124, %c0_125] : memref<1x448x128xbf16, #tpu.memory_space<vmem>>, vector<1x192x128xbf16>
    %145 = vector.shape_cast %144 : vector<1x192x128xbf16> to vector<192x128xbf16>
    %146 = vector.shape_cast %143 : vector<192x128xbf16> to vector<1x192x128xbf16>
    tpu.vector_store %arg8[%c0_123, %c256_124, %c0_125], %146 {strides = array<i32>} : memref<1x448x128xbf16, #tpu.memory_space<vmem>>, vector<1x192x128xbf16>,
    %c0_126 = arith.constant 0 : index
    %c304_127 = arith.constant 304 : index
    %c0_128 = arith.constant 0 : index
    %147 = vector.load %arg2[%c0_126, %c304_127, %c0_128] : memref<1x528x4xbf16, #tpu.memory_space<vmem>>, vector<1x192x4xbf16>
    %148 = vector.shape_cast %147 : vector<1x192x4xbf16> to vector<192x4xbf16>
    %c0_129 = arith.constant 0 : index
    %c0_130 = arith.constant 0 : index
    %149 = vector.load %arg6[%c0_129, %c0_130] : memref<4x128xbf16, #tpu.memory_space<vmem>>, vector<4x128xbf16>
    %cst_131 = arith.constant dense<0.000000e+00> : vector<192x128xf32>
    %150 = tpu.matmul %148, %149, %cst_131 {dimension_numbers = #tpu.dot_dimension_numbers<[1], [0], [0], [1], [0, 0, 1, 1], [], []>} : vector<192x4xbf16>, vector<4x128xbf16>, vector<192x128xf32> -> vector<192x128xf32>
    %c0_132 = arith.constant 0 : index
    %c0_133 = arith.constant 0 : index
    %151 = vector.load %arg7[%c0_132, %c0_133] : memref<1x128xf32, #tpu.memory_space<vmem>>, vector<1x128xf32>
    %152 = vector.broadcast %151 : vector<1x128xf32> to vector<192x128xf32>
    %153 = arith.addf %150, %152 : vector<192x128xf32>
    %154 = vector.broadcast %135 : vector<192x1xf32> to vector<192x128xf32>
    %155 = arith.mulf %153, %154 : vector<192x128xf32>
    %156 = arith.truncf %155 : vector<192x128xf32> to vector<192x128xbf16>
    %c0_134 = arith.constant 0 : index
    %c256_135 = arith.constant 256 : index
    %c0_136 = arith.constant 0 : index
    %157 = vector.load %arg9[%c0_134, %c256_135, %c0_136] : memref<1x448x128xbf16, #tpu.memory_space<vmem>>, vector<1x192x128xbf16>
    %158 = vector.shape_cast %157 : vector<1x192x128xbf16> to vector<192x128xbf16>
    %159 = vector.shape_cast %156 : vector<192x128xbf16> to vector<1x192x128xbf16>
    tpu.vector_store %arg9[%c0_134, %c256_135, %c0_136], %159 {strides = array<i32>} : memref<1x448x128xbf16, #tpu.memory_space<vmem>>, vector<1x192x128xbf16>,
    return
  }
  func.func @transform_0(%arg0: i32, %arg1: i32) -> (i32, i32, i32) {
    %c0_i32 = arith.constant 0 : i32
    %c0_i32_0 = arith.constant 0 : i32
    %c0_i32_1 = arith.constant 0 : i32
    return %arg0, %c0_i32, %c0_i32_0 : i32, i32, i32
  }
  func.func @transform_1(%arg0: i32, %arg1: i32) -> (i32, i32, i32) {
    %c0_i32 = arith.constant 0 : i32
    %c0_i32_0 = arith.constant 0 : i32
    %c0_i32_1 = arith.constant 0 : i32
    %c0_i32_2 = arith.constant 0 : i32
    return %c0_i32, %c0_i32_0, %c0_i32_1 : i32, i32, i32
  }
  func.func @transform_2(%arg0: i32, %arg1: i32) -> (i32, i32) {
    %c0_i32 = arith.constant 0 : i32
    %c0_i32_0 = arith.constant 0 : i32
    %c0_i32_1 = arith.constant 0 : i32
    return %c0_i32, %c0_i32_0 : i32, i32
  }
  func.func @transform_3(%arg0: i32, %arg1: i32) -> (i32, i32) {
    %c0_i32 = arith.constant 0 : i32
    %c0_i32_0 = arith.constant 0 : i32
    return %arg1, %c0_i32 : i32, i32
  }
  func.func @transform_4(%arg0: i32, %arg1: i32) -> (i32, i32) {
    %c0_i32 = arith.constant 0 : i32
    %c0_i32_0 = arith.constant 0 : i32
    %c0_i32_1 = arith.constant 0 : i32
    return %c0_i32, %c0_i32_0 : i32, i32
  }
  func.func @transform_5(%arg0: i32, %arg1: i32) -> (i32, i32) {
    %c0_i32 = arith.constant 0 : i32
    %c0_i32_0 = arith.constant 0 : i32
    %c0_i32_1 = arith.constant 0 : i32
    return %c0_i32, %c0_i32_0 : i32, i32
  }
  func.func @transform_6(%arg0: i32, %arg1: i32) -> (i32, i32, i32) {
    %c1_i32 = arith.constant 1 : i32
    %0 = arith.addi %arg1, %c1_i32 : i32
    %c0_i32 = arith.constant 0 : i32
    %c0_i32_0 = arith.constant 0 : i32
    return %arg0, %0, %c0_i32 : i32, i32, i32
  }
  func.func @transform_7(%arg0: i32, %arg1: i32) -> (i32, i32, i32) {
    %c0_i32 = arith.constant 0 : i32
    %c0_i32_0 = arith.constant 0 : i32
    return %arg0, %arg1, %c0_i32 : i32, i32, i32
  }
}

module attributes {stable_mosaic.version = 11 : i64} {
  func.func @_conv2_kernel(%arg0: i32, %arg1: i32, %arg2: memref<1x928x128xbf16, #tpu.memory_space<vmem>>, %arg3: memref<9x128x128xbf16, #tpu.memory_space<vmem>>, %arg4: memref<1x128xf32, #tpu.memory_space<vmem>>, %arg5: memref<1x448x128xbf16, #tpu.memory_space<vmem>>, %arg6: memref<1x448x128xbf16, #tpu.memory_space<vmem>>) attributes {dimension_semantics = [#tpu.dimension_semantics<parallel>, #tpu.dimension_semantics<arbitrary>], iteration_bounds = array<i64: 2, 1>, scalar_prefetch = 0 : i64, scratch_operands = 0 : i64, tpu.core_type = #tpu.core_type<tc>, window_params = [{transform_indices = @transform_0, window_bounds = array<i64: 1, 928, 128>}, {pipeline_mode = #tpu.pipeline_mode<synchronous>, transform_indices = @transform_1, window_bounds = array<i64: 9, 128, 128>}, {pipeline_mode = #tpu.pipeline_mode<synchronous>, transform_indices = @transform_2, window_bounds = array<i64: 1, 128>}, {transform_indices = @transform_3, window_bounds = array<i64: 1, 448, 128>}, {transform_indices = @transform_4, window_bounds = array<i64: 1, 448, 128>}]} {
    %cst = arith.constant 0.000000e+00 : f32
    %0 = vector.broadcast %cst : f32 to vector<256x128xf32>
    %c0 = arith.constant 0 : index
    %c423 = arith.constant 423 : index
    %c0_0 = arith.constant 0 : index
    %1 = vector.load %arg2[%c0, %c423, %c0_0] : memref<1x928x128xbf16, #tpu.memory_space<vmem>>, vector<1x256x128xbf16>
    %2 = vector.shape_cast %1 : vector<1x256x128xbf16> to vector<256x128xbf16>
    %c0_1 = arith.constant 0 : index
    %c0_2 = arith.constant 0 : index
    %c0_3 = arith.constant 0 : index
    %3 = vector.load %arg3[%c0_1, %c0_2, %c0_3] : memref<9x128x128xbf16, #tpu.memory_space<vmem>>, vector<1x128x128xbf16>
    %4 = vector.shape_cast %3 : vector<1x128x128xbf16> to vector<128x128xbf16>
    %cst_4 = arith.constant dense<0.000000e+00> : vector<256x128xf32>
    %5 = tpu.matmul %2, %4, %cst_4 {dimension_numbers = #tpu.dot_dimension_numbers<[1], [0], [0], [1], [0, 0, 1, 1], [], []>} : vector<256x128xbf16>, vector<128x128xbf16>, vector<256x128xf32> -> vector<256x128xf32>
    %6 = arith.addf %0, %5 : vector<256x128xf32>
    %c0_5 = arith.constant 0 : index
    %c424 = arith.constant 424 : index
    %c0_6 = arith.constant 0 : index
    %7 = vector.load %arg2[%c0_5, %c424, %c0_6] : memref<1x928x128xbf16, #tpu.memory_space<vmem>>, vector<1x256x128xbf16>
    %8 = vector.shape_cast %7 : vector<1x256x128xbf16> to vector<256x128xbf16>
    %c1 = arith.constant 1 : index
    %c0_7 = arith.constant 0 : index
    %c0_8 = arith.constant 0 : index
    %9 = vector.load %arg3[%c1, %c0_7, %c0_8] : memref<9x128x128xbf16, #tpu.memory_space<vmem>>, vector<1x128x128xbf16>
    %10 = vector.shape_cast %9 : vector<1x128x128xbf16> to vector<128x128xbf16>
    %cst_9 = arith.constant dense<0.000000e+00> : vector<256x128xf32>
    %11 = tpu.matmul %8, %10, %cst_9 {dimension_numbers = #tpu.dot_dimension_numbers<[1], [0], [0], [1], [0, 0, 1, 1], [], []>} : vector<256x128xbf16>, vector<128x128xbf16>, vector<256x128xf32> -> vector<256x128xf32>
    %12 = arith.addf %6, %11 : vector<256x128xf32>
    %c0_10 = arith.constant 0 : index
    %c425 = arith.constant 425 : index
    %c0_11 = arith.constant 0 : index
    %13 = vector.load %arg2[%c0_10, %c425, %c0_11] : memref<1x928x128xbf16, #tpu.memory_space<vmem>>, vector<1x256x128xbf16>
    %14 = vector.shape_cast %13 : vector<1x256x128xbf16> to vector<256x128xbf16>
    %c2 = arith.constant 2 : index
    %c0_12 = arith.constant 0 : index
    %c0_13 = arith.constant 0 : index
    %15 = vector.load %arg3[%c2, %c0_12, %c0_13] : memref<9x128x128xbf16, #tpu.memory_space<vmem>>, vector<1x128x128xbf16>
    %16 = vector.shape_cast %15 : vector<1x128x128xbf16> to vector<128x128xbf16>
    %cst_14 = arith.constant dense<0.000000e+00> : vector<256x128xf32>
    %17 = tpu.matmul %14, %16, %cst_14 {dimension_numbers = #tpu.dot_dimension_numbers<[1], [0], [0], [1], [0, 0, 1, 1], [], []>} : vector<256x128xbf16>, vector<128x128xbf16>, vector<256x128xf32> -> vector<256x128xf32>
    %18 = arith.addf %12, %17 : vector<256x128xf32>
    %c0_15 = arith.constant 0 : index
    %c447 = arith.constant 447 : index
    %c0_16 = arith.constant 0 : index
    %19 = vector.load %arg2[%c0_15, %c447, %c0_16] : memref<1x928x128xbf16, #tpu.memory_space<vmem>>, vector<1x256x128xbf16>
    %20 = vector.shape_cast %19 : vector<1x256x128xbf16> to vector<256x128xbf16>
    %c3 = arith.constant 3 : index
    %c0_17 = arith.constant 0 : index
    %c0_18 = arith.constant 0 : index
    %21 = vector.load %arg3[%c3, %c0_17, %c0_18] : memref<9x128x128xbf16, #tpu.memory_space<vmem>>, vector<1x128x128xbf16>
    %22 = vector.shape_cast %21 : vector<1x128x128xbf16> to vector<128x128xbf16>
    %cst_19 = arith.constant dense<0.000000e+00> : vector<256x128xf32>
    %23 = tpu.matmul %20, %22, %cst_19 {dimension_numbers = #tpu.dot_dimension_numbers<[1], [0], [0], [1], [0, 0, 1, 1], [], []>} : vector<256x128xbf16>, vector<128x128xbf16>, vector<256x128xf32> -> vector<256x128xf32>
    %24 = arith.addf %18, %23 : vector<256x128xf32>
    %c0_20 = arith.constant 0 : index
    %c448 = arith.constant 448 : index
    %c0_21 = arith.constant 0 : index
    %25 = vector.load %arg2[%c0_20, %c448, %c0_21] : memref<1x928x128xbf16, #tpu.memory_space<vmem>>, vector<1x256x128xbf16>
    %26 = vector.shape_cast %25 : vector<1x256x128xbf16> to vector<256x128xbf16>
    %c4 = arith.constant 4 : index
    %c0_22 = arith.constant 0 : index
    %c0_23 = arith.constant 0 : index
    %27 = vector.load %arg3[%c4, %c0_22, %c0_23] : memref<9x128x128xbf16, #tpu.memory_space<vmem>>, vector<1x128x128xbf16>
    %28 = vector.shape_cast %27 : vector<1x128x128xbf16> to vector<128x128xbf16>
    %cst_24 = arith.constant dense<0.000000e+00> : vector<256x128xf32>
    %29 = tpu.matmul %26, %28, %cst_24 {dimension_numbers = #tpu.dot_dimension_numbers<[1], [0], [0], [1], [0, 0, 1, 1], [], []>} : vector<256x128xbf16>, vector<128x128xbf16>, vector<256x128xf32> -> vector<256x128xf32>
    %30 = arith.addf %24, %29 : vector<256x128xf32>
    %c0_25 = arith.constant 0 : index
    %c449 = arith.constant 449 : index
    %c0_26 = arith.constant 0 : index
    %31 = vector.load %arg2[%c0_25, %c449, %c0_26] : memref<1x928x128xbf16, #tpu.memory_space<vmem>>, vector<1x256x128xbf16>
    %32 = vector.shape_cast %31 : vector<1x256x128xbf16> to vector<256x128xbf16>
    %c5 = arith.constant 5 : index
    %c0_27 = arith.constant 0 : index
    %c0_28 = arith.constant 0 : index
    %33 = vector.load %arg3[%c5, %c0_27, %c0_28] : memref<9x128x128xbf16, #tpu.memory_space<vmem>>, vector<1x128x128xbf16>
    %34 = vector.shape_cast %33 : vector<1x128x128xbf16> to vector<128x128xbf16>
    %cst_29 = arith.constant dense<0.000000e+00> : vector<256x128xf32>
    %35 = tpu.matmul %32, %34, %cst_29 {dimension_numbers = #tpu.dot_dimension_numbers<[1], [0], [0], [1], [0, 0, 1, 1], [], []>} : vector<256x128xbf16>, vector<128x128xbf16>, vector<256x128xf32> -> vector<256x128xf32>
    %36 = arith.addf %30, %35 : vector<256x128xf32>
    %c0_30 = arith.constant 0 : index
    %c471 = arith.constant 471 : index
    %c0_31 = arith.constant 0 : index
    %37 = vector.load %arg2[%c0_30, %c471, %c0_31] : memref<1x928x128xbf16, #tpu.memory_space<vmem>>, vector<1x256x128xbf16>
    %38 = vector.shape_cast %37 : vector<1x256x128xbf16> to vector<256x128xbf16>
    %c6 = arith.constant 6 : index
    %c0_32 = arith.constant 0 : index
    %c0_33 = arith.constant 0 : index
    %39 = vector.load %arg3[%c6, %c0_32, %c0_33] : memref<9x128x128xbf16, #tpu.memory_space<vmem>>, vector<1x128x128xbf16>
    %40 = vector.shape_cast %39 : vector<1x128x128xbf16> to vector<128x128xbf16>
    %cst_34 = arith.constant dense<0.000000e+00> : vector<256x128xf32>
    %41 = tpu.matmul %38, %40, %cst_34 {dimension_numbers = #tpu.dot_dimension_numbers<[1], [0], [0], [1], [0, 0, 1, 1], [], []>} : vector<256x128xbf16>, vector<128x128xbf16>, vector<256x128xf32> -> vector<256x128xf32>
    %42 = arith.addf %36, %41 : vector<256x128xf32>
    %c0_35 = arith.constant 0 : index
    %c472 = arith.constant 472 : index
    %c0_36 = arith.constant 0 : index
    %43 = vector.load %arg2[%c0_35, %c472, %c0_36] : memref<1x928x128xbf16, #tpu.memory_space<vmem>>, vector<1x256x128xbf16>
    %44 = vector.shape_cast %43 : vector<1x256x128xbf16> to vector<256x128xbf16>
    %c7 = arith.constant 7 : index
    %c0_37 = arith.constant 0 : index
    %c0_38 = arith.constant 0 : index
    %45 = vector.load %arg3[%c7, %c0_37, %c0_38] : memref<9x128x128xbf16, #tpu.memory_space<vmem>>, vector<1x128x128xbf16>
    %46 = vector.shape_cast %45 : vector<1x128x128xbf16> to vector<128x128xbf16>
    %cst_39 = arith.constant dense<0.000000e+00> : vector<256x128xf32>
    %47 = tpu.matmul %44, %46, %cst_39 {dimension_numbers = #tpu.dot_dimension_numbers<[1], [0], [0], [1], [0, 0, 1, 1], [], []>} : vector<256x128xbf16>, vector<128x128xbf16>, vector<256x128xf32> -> vector<256x128xf32>
    %48 = arith.addf %42, %47 : vector<256x128xf32>
    %c0_40 = arith.constant 0 : index
    %c473 = arith.constant 473 : index
    %c0_41 = arith.constant 0 : index
    %49 = vector.load %arg2[%c0_40, %c473, %c0_41] : memref<1x928x128xbf16, #tpu.memory_space<vmem>>, vector<1x256x128xbf16>
    %50 = vector.shape_cast %49 : vector<1x256x128xbf16> to vector<256x128xbf16>
    %c8 = arith.constant 8 : index
    %c0_42 = arith.constant 0 : index
    %c0_43 = arith.constant 0 : index
    %51 = vector.load %arg3[%c8, %c0_42, %c0_43] : memref<9x128x128xbf16, #tpu.memory_space<vmem>>, vector<1x128x128xbf16>
    %52 = vector.shape_cast %51 : vector<1x128x128xbf16> to vector<128x128xbf16>
    %cst_44 = arith.constant dense<0.000000e+00> : vector<256x128xf32>
    %53 = tpu.matmul %50, %52, %cst_44 {dimension_numbers = #tpu.dot_dimension_numbers<[1], [0], [0], [1], [0, 0, 1, 1], [], []>} : vector<256x128xbf16>, vector<128x128xbf16>, vector<256x128xf32> -> vector<256x128xf32>
    %54 = arith.addf %48, %53 : vector<256x128xf32>
    %c0_45 = arith.constant 0 : index
    %c0_46 = arith.constant 0 : index
    %55 = vector.load %arg4[%c0_45, %c0_46] : memref<1x128xf32, #tpu.memory_space<vmem>>, vector<1x128xf32>
    %56 = vector.broadcast %55 : vector<1x128xf32> to vector<256x128xf32>
    %57 = arith.addf %54, %56 : vector<256x128xf32>
    %c0_47 = arith.constant 0 : index
    %c0_48 = arith.constant 0 : index
    %c0_49 = arith.constant 0 : index
    %58 = vector.load %arg5[%c0_47, %c0_48, %c0_49] : memref<1x448x128xbf16, #tpu.memory_space<vmem>>, vector<1x256x128xbf16>
    %59 = vector.shape_cast %58 : vector<1x256x128xbf16> to vector<256x128xbf16>
    %60 = arith.extf %59 : vector<256x128xbf16> to vector<256x128xf32>
    %61 = arith.addf %57, %60 : vector<256x128xf32>
    %cst_50 = arith.constant 0.000000e+00 : f32
    %62 = vector.broadcast %cst_50 : f32 to vector<256x128xf32>
    %63 = arith.maximumf %61, %62 : vector<256x128xf32>
    %64 = arith.truncf %63 : vector<256x128xf32> to vector<256x128xbf16>
    %c0_51 = arith.constant 0 : index
    %c0_52 = arith.constant 0 : index
    %c0_53 = arith.constant 0 : index
    %65 = vector.load %arg6[%c0_51, %c0_52, %c0_53] : memref<1x448x128xbf16, #tpu.memory_space<vmem>>, vector<1x256x128xbf16>
    %66 = vector.shape_cast %65 : vector<1x256x128xbf16> to vector<256x128xbf16>
    %67 = vector.shape_cast %64 : vector<256x128xbf16> to vector<1x256x128xbf16>
    tpu.vector_store %arg6[%c0_51, %c0_52, %c0_53], %67 {strides = array<i32>} : memref<1x448x128xbf16, #tpu.memory_space<vmem>>, vector<1x256x128xbf16>,
    %cst_54 = arith.constant 0.000000e+00 : f32
    %68 = vector.broadcast %cst_54 : f32 to vector<192x128xf32>
    %c0_55 = arith.constant 0 : index
    %c679 = arith.constant 679 : index
    %c0_56 = arith.constant 0 : index
    %69 = vector.load %arg2[%c0_55, %c679, %c0_56] : memref<1x928x128xbf16, #tpu.memory_space<vmem>>, vector<1x192x128xbf16>
    %70 = vector.shape_cast %69 : vector<1x192x128xbf16> to vector<192x128xbf16>
    %c0_57 = arith.constant 0 : index
    %c0_58 = arith.constant 0 : index
    %c0_59 = arith.constant 0 : index
    %71 = vector.load %arg3[%c0_57, %c0_58, %c0_59] : memref<9x128x128xbf16, #tpu.memory_space<vmem>>, vector<1x128x128xbf16>
    %72 = vector.shape_cast %71 : vector<1x128x128xbf16> to vector<128x128xbf16>
    %cst_60 = arith.constant dense<0.000000e+00> : vector<192x128xf32>
    %73 = tpu.matmul %70, %72, %cst_60 {dimension_numbers = #tpu.dot_dimension_numbers<[1], [0], [0], [1], [0, 0, 1, 1], [], []>} : vector<192x128xbf16>, vector<128x128xbf16>, vector<192x128xf32> -> vector<192x128xf32>
    %74 = arith.addf %68, %73 : vector<192x128xf32>
    %c0_61 = arith.constant 0 : index
    %c680 = arith.constant 680 : index
    %c0_62 = arith.constant 0 : index
    %75 = vector.load %arg2[%c0_61, %c680, %c0_62] : memref<1x928x128xbf16, #tpu.memory_space<vmem>>, vector<1x192x128xbf16>
    %76 = vector.shape_cast %75 : vector<1x192x128xbf16> to vector<192x128xbf16>
    %c1_63 = arith.constant 1 : index
    %c0_64 = arith.constant 0 : index
    %c0_65 = arith.constant 0 : index
    %77 = vector.load %arg3[%c1_63, %c0_64, %c0_65] : memref<9x128x128xbf16, #tpu.memory_space<vmem>>, vector<1x128x128xbf16>
    %78 = vector.shape_cast %77 : vector<1x128x128xbf16> to vector<128x128xbf16>
    %cst_66 = arith.constant dense<0.000000e+00> : vector<192x128xf32>
    %79 = tpu.matmul %76, %78, %cst_66 {dimension_numbers = #tpu.dot_dimension_numbers<[1], [0], [0], [1], [0, 0, 1, 1], [], []>} : vector<192x128xbf16>, vector<128x128xbf16>, vector<192x128xf32> -> vector<192x128xf32>
    %80 = arith.addf %74, %79 : vector<192x128xf32>
    %c0_67 = arith.constant 0 : index
    %c681 = arith.constant 681 : index
    %c0_68 = arith.constant 0 : index
    %81 = vector.load %arg2[%c0_67, %c681, %c0_68] : memref<1x928x128xbf16, #tpu.memory_space<vmem>>, vector<1x192x128xbf16>
    %82 = vector.shape_cast %81 : vector<1x192x128xbf16> to vector<192x128xbf16>
    %c2_69 = arith.constant 2 : index
    %c0_70 = arith.constant 0 : index
    %c0_71 = arith.constant 0 : index
    %83 = vector.load %arg3[%c2_69, %c0_70, %c0_71] : memref<9x128x128xbf16, #tpu.memory_space<vmem>>, vector<1x128x128xbf16>
    %84 = vector.shape_cast %83 : vector<1x128x128xbf16> to vector<128x128xbf16>
    %cst_72 = arith.constant dense<0.000000e+00> : vector<192x128xf32>
    %85 = tpu.matmul %82, %84, %cst_72 {dimension_numbers = #tpu.dot_dimension_numbers<[1], [0], [0], [1], [0, 0, 1, 1], [], []>} : vector<192x128xbf16>, vector<128x128xbf16>, vector<192x128xf32> -> vector<192x128xf32>
    %86 = arith.addf %80, %85 : vector<192x128xf32>
    %c0_73 = arith.constant 0 : index
    %c703 = arith.constant 703 : index
    %c0_74 = arith.constant 0 : index
    %87 = vector.load %arg2[%c0_73, %c703, %c0_74] : memref<1x928x128xbf16, #tpu.memory_space<vmem>>, vector<1x192x128xbf16>
    %88 = vector.shape_cast %87 : vector<1x192x128xbf16> to vector<192x128xbf16>
    %c3_75 = arith.constant 3 : index
    %c0_76 = arith.constant 0 : index
    %c0_77 = arith.constant 0 : index
    %89 = vector.load %arg3[%c3_75, %c0_76, %c0_77] : memref<9x128x128xbf16, #tpu.memory_space<vmem>>, vector<1x128x128xbf16>
    %90 = vector.shape_cast %89 : vector<1x128x128xbf16> to vector<128x128xbf16>
    %cst_78 = arith.constant dense<0.000000e+00> : vector<192x128xf32>
    %91 = tpu.matmul %88, %90, %cst_78 {dimension_numbers = #tpu.dot_dimension_numbers<[1], [0], [0], [1], [0, 0, 1, 1], [], []>} : vector<192x128xbf16>, vector<128x128xbf16>, vector<192x128xf32> -> vector<192x128xf32>
    %92 = arith.addf %86, %91 : vector<192x128xf32>
    %c0_79 = arith.constant 0 : index
    %c704 = arith.constant 704 : index
    %c0_80 = arith.constant 0 : index
    %93 = vector.load %arg2[%c0_79, %c704, %c0_80] : memref<1x928x128xbf16, #tpu.memory_space<vmem>>, vector<1x192x128xbf16>
    %94 = vector.shape_cast %93 : vector<1x192x128xbf16> to vector<192x128xbf16>
    %c4_81 = arith.constant 4 : index
    %c0_82 = arith.constant 0 : index
    %c0_83 = arith.constant 0 : index
    %95 = vector.load %arg3[%c4_81, %c0_82, %c0_83] : memref<9x128x128xbf16, #tpu.memory_space<vmem>>, vector<1x128x128xbf16>
    %96 = vector.shape_cast %95 : vector<1x128x128xbf16> to vector<128x128xbf16>
    %cst_84 = arith.constant dense<0.000000e+00> : vector<192x128xf32>
    %97 = tpu.matmul %94, %96, %cst_84 {dimension_numbers = #tpu.dot_dimension_numbers<[1], [0], [0], [1], [0, 0, 1, 1], [], []>} : vector<192x128xbf16>, vector<128x128xbf16>, vector<192x128xf32> -> vector<192x128xf32>
    %98 = arith.addf %92, %97 : vector<192x128xf32>
    %c0_85 = arith.constant 0 : index
    %c705 = arith.constant 705 : index
    %c0_86 = arith.constant 0 : index
    %99 = vector.load %arg2[%c0_85, %c705, %c0_86] : memref<1x928x128xbf16, #tpu.memory_space<vmem>>, vector<1x192x128xbf16>
    %100 = vector.shape_cast %99 : vector<1x192x128xbf16> to vector<192x128xbf16>
    %c5_87 = arith.constant 5 : index
    %c0_88 = arith.constant 0 : index
    %c0_89 = arith.constant 0 : index
    %101 = vector.load %arg3[%c5_87, %c0_88, %c0_89] : memref<9x128x128xbf16, #tpu.memory_space<vmem>>, vector<1x128x128xbf16>
    %102 = vector.shape_cast %101 : vector<1x128x128xbf16> to vector<128x128xbf16>
    %cst_90 = arith.constant dense<0.000000e+00> : vector<192x128xf32>
    %103 = tpu.matmul %100, %102, %cst_90 {dimension_numbers = #tpu.dot_dimension_numbers<[1], [0], [0], [1], [0, 0, 1, 1], [], []>} : vector<192x128xbf16>, vector<128x128xbf16>, vector<192x128xf32> -> vector<192x128xf32>
    %104 = arith.addf %98, %103 : vector<192x128xf32>
    %c0_91 = arith.constant 0 : index
    %c727 = arith.constant 727 : index
    %c0_92 = arith.constant 0 : index
    %105 = vector.load %arg2[%c0_91, %c727, %c0_92] : memref<1x928x128xbf16, #tpu.memory_space<vmem>>, vector<1x192x128xbf16>
    %106 = vector.shape_cast %105 : vector<1x192x128xbf16> to vector<192x128xbf16>
    %c6_93 = arith.constant 6 : index
    %c0_94 = arith.constant 0 : index
    %c0_95 = arith.constant 0 : index
    %107 = vector.load %arg3[%c6_93, %c0_94, %c0_95] : memref<9x128x128xbf16, #tpu.memory_space<vmem>>, vector<1x128x128xbf16>
    %108 = vector.shape_cast %107 : vector<1x128x128xbf16> to vector<128x128xbf16>
    %cst_96 = arith.constant dense<0.000000e+00> : vector<192x128xf32>
    %109 = tpu.matmul %106, %108, %cst_96 {dimension_numbers = #tpu.dot_dimension_numbers<[1], [0], [0], [1], [0, 0, 1, 1], [], []>} : vector<192x128xbf16>, vector<128x128xbf16>, vector<192x128xf32> -> vector<192x128xf32>
    %110 = arith.addf %104, %109 : vector<192x128xf32>
    %c0_97 = arith.constant 0 : index
    %c728 = arith.constant 728 : index
    %c0_98 = arith.constant 0 : index
    %111 = vector.load %arg2[%c0_97, %c728, %c0_98] : memref<1x928x128xbf16, #tpu.memory_space<vmem>>, vector<1x192x128xbf16>
    %112 = vector.shape_cast %111 : vector<1x192x128xbf16> to vector<192x128xbf16>
    %c7_99 = arith.constant 7 : index
    %c0_100 = arith.constant 0 : index
    %c0_101 = arith.constant 0 : index
    %113 = vector.load %arg3[%c7_99, %c0_100, %c0_101] : memref<9x128x128xbf16, #tpu.memory_space<vmem>>, vector<1x128x128xbf16>
    %114 = vector.shape_cast %113 : vector<1x128x128xbf16> to vector<128x128xbf16>
    %cst_102 = arith.constant dense<0.000000e+00> : vector<192x128xf32>
    %115 = tpu.matmul %112, %114, %cst_102 {dimension_numbers = #tpu.dot_dimension_numbers<[1], [0], [0], [1], [0, 0, 1, 1], [], []>} : vector<192x128xbf16>, vector<128x128xbf16>, vector<192x128xf32> -> vector<192x128xf32>
    %116 = arith.addf %110, %115 : vector<192x128xf32>
    %c0_103 = arith.constant 0 : index
    %c729 = arith.constant 729 : index
    %c0_104 = arith.constant 0 : index
    %117 = vector.load %arg2[%c0_103, %c729, %c0_104] : memref<1x928x128xbf16, #tpu.memory_space<vmem>>, vector<1x192x128xbf16>
    %118 = vector.shape_cast %117 : vector<1x192x128xbf16> to vector<192x128xbf16>
    %c8_105 = arith.constant 8 : index
    %c0_106 = arith.constant 0 : index
    %c0_107 = arith.constant 0 : index
    %119 = vector.load %arg3[%c8_105, %c0_106, %c0_107] : memref<9x128x128xbf16, #tpu.memory_space<vmem>>, vector<1x128x128xbf16>
    %120 = vector.shape_cast %119 : vector<1x128x128xbf16> to vector<128x128xbf16>
    %cst_108 = arith.constant dense<0.000000e+00> : vector<192x128xf32>
    %121 = tpu.matmul %118, %120, %cst_108 {dimension_numbers = #tpu.dot_dimension_numbers<[1], [0], [0], [1], [0, 0, 1, 1], [], []>} : vector<192x128xbf16>, vector<128x128xbf16>, vector<192x128xf32> -> vector<192x128xf32>
    %122 = arith.addf %116, %121 : vector<192x128xf32>
    %c0_109 = arith.constant 0 : index
    %c0_110 = arith.constant 0 : index
    %123 = vector.load %arg4[%c0_109, %c0_110] : memref<1x128xf32, #tpu.memory_space<vmem>>, vector<1x128xf32>
    %124 = vector.broadcast %123 : vector<1x128xf32> to vector<192x128xf32>
    %125 = arith.addf %122, %124 : vector<192x128xf32>
    %c0_111 = arith.constant 0 : index
    %c256 = arith.constant 256 : index
    %c0_112 = arith.constant 0 : index
    %126 = vector.load %arg5[%c0_111, %c256, %c0_112] : memref<1x448x128xbf16, #tpu.memory_space<vmem>>, vector<1x192x128xbf16>
    %127 = vector.shape_cast %126 : vector<1x192x128xbf16> to vector<192x128xbf16>
    %128 = arith.extf %127 : vector<192x128xbf16> to vector<192x128xf32>
    %129 = arith.addf %125, %128 : vector<192x128xf32>
    %cst_113 = arith.constant 0.000000e+00 : f32
    %130 = vector.broadcast %cst_113 : f32 to vector<192x128xf32>
    %131 = arith.maximumf %129, %130 : vector<192x128xf32>
    %132 = arith.truncf %131 : vector<192x128xf32> to vector<192x128xbf16>
    %c0_114 = arith.constant 0 : index
    %c256_115 = arith.constant 256 : index
    %c0_116 = arith.constant 0 : index
    %133 = vector.load %arg6[%c0_114, %c256_115, %c0_116] : memref<1x448x128xbf16, #tpu.memory_space<vmem>>, vector<1x192x128xbf16>
    %134 = vector.shape_cast %133 : vector<1x192x128xbf16> to vector<192x128xbf16>
    %135 = vector.shape_cast %132 : vector<192x128xbf16> to vector<1x192x128xbf16>
    tpu.vector_store %arg6[%c0_114, %c256_115, %c0_116], %135 {strides = array<i32>} : memref<1x448x128xbf16, #tpu.memory_space<vmem>>, vector<1x192x128xbf16>,
    return
  }
  func.func @transform_0(%arg0: i32, %arg1: i32) -> (i32, i32, i32) {
    %c0_i32 = arith.constant 0 : i32
    %c0_i32_0 = arith.constant 0 : i32
    %c0_i32_1 = arith.constant 0 : i32
    return %arg0, %c0_i32, %c0_i32_0 : i32, i32, i32
  }
  func.func @transform_1(%arg0: i32, %arg1: i32) -> (i32, i32, i32) {
    %c0_i32 = arith.constant 0 : i32
    %c0_i32_0 = arith.constant 0 : i32
    %c0_i32_1 = arith.constant 0 : i32
    %c0_i32_2 = arith.constant 0 : i32
    return %c0_i32, %c0_i32_0, %c0_i32_1 : i32, i32, i32
  }
  func.func @transform_2(%arg0: i32, %arg1: i32) -> (i32, i32) {
    %c0_i32 = arith.constant 0 : i32
    %c0_i32_0 = arith.constant 0 : i32
    %c0_i32_1 = arith.constant 0 : i32
    return %c0_i32, %c0_i32_0 : i32, i32
  }
  func.func @transform_3(%arg0: i32, %arg1: i32) -> (i32, i32, i32) {
    %c0_i32 = arith.constant 0 : i32
    %c0_i32_0 = arith.constant 0 : i32
    return %arg0, %arg1, %c0_i32 : i32, i32, i32
  }
  func.func @transform_4(%arg0: i32, %arg1: i32) -> (i32, i32, i32) {
    %c0_i32 = arith.constant 0 : i32
    %c0_i32_0 = arith.constant 0 : i32
    return %arg0, %arg1, %c0_i32 : i32, i32, i32
  }
}

</mosaic_0001>

<bundles_post_ra>
// kernel: basic_block_forward.2
= control target key start
LH: loop header
LB: loop body
LE: loop exit
PB: predicated region body
PF: predicated region fallthrough
CT: control target
= control target key end

     0   :  { %s12255_s24 = smov 0   ;;  %s12257_s25 = smov 0   ;;  %s15043_s0 = inlined_call_operand.vmem [shape: bf16[2,528,4], index: 0, kind: input, shape index: {}]   ;;  %s15044_s1 = inlined_call_operand.vmem [shape: bf16[9,4,128], index: 1, kind: input, shape index: {}]   ;;  %s15045_s2 = inlined_call_operand.vmem [shape: f32[1,128], index: 2, kind: input, shape index: {}]   ;;  %s15046_s3 = inlined_call_operand.vmem [shape: f32[448,1], index: 3, kind: input, shape index: {}]   ;;  %s15047_s4 = inlined_call_operand.vmem [shape: bf16[4,128], index: 4, kind: input, shape index: {}]   ;;  %s15048_s5 = inlined_call_operand.vmem [shape: f32[1,128], index: 5, kind: input, shape index: {}]   ;;  %s15049_s6 = inlined_call_operand.vmem [shape: bf16[2,928,128], index: 6, kind: output, shape index: {0}]   ;;  %s15050_s7 = inlined_call_operand.vmem [shape: bf16[2,448,128], index: 7, kind: output, shape index: {1}]  }
   0x1   :  { %s12259_s26 = smov 0   ;;  %s12261_s27 = smov 0  }
   0x2   :  { %s12263_s28 = smov 0  }
   0x3 LB: > { %s9240_s29 = sadd.s32 4294967295, %s12204_s28   ;;  %s30_s30 = sadd.s32 1, %s12200_s27  ;;  %s12204_s28 = sphi %s12263_s28, %s18_s28   ;;  %s12200_s27 = sphi %s12261_s27, %s15356_s27   ;;  %s12196_s26 = sphi %s12259_s26, %s15355_s26   ;;  %s12192_s25 = sphi %s12257_s25, %s15354_s25   ;;  %s12188_s24 = sphi %s12255_s24, %s15353_s24  }
   0x4   : > { %p32_p0 = scmp.ge.s32.totalorder %s30_s30, 2  ;;  %s177_s8 = sadd.s32 1, %s12192_s25 }
   0x5   : > { %p187_p1 = scmp.ne.s32.totalorder %s12192_s25, %s12188_s24  ;;  %p188_p2 = scmp.eq.s32.totalorder %s9240_s29, 1 }
   0x6   : > { %s15358_s30 = smov (%p32_p0, %s30_s30), 0  ;;  %p9245_p4 = scmp.ge.s32.totalorder %s12204_s28, 1 }
   0x7   : > { %p12287_p3 = por %p188_p2, %p187_p1  ;;  %s172_s10 = ssub.s32 %s12200_s27, %s15358_s30 }
   0x8   : > { %p269_p5 = scmp.lt.s32.totalorder %s12204_s28, 3  ;;  %p175_p6 = scmp.eq.s32.totalorder %s172_s10, 0 }
   0xa   : > { %p270_p7 = pnand %p9245_p4, %p269_p5 }
   0xb   : > { %s12296_s11 = scalar_select %p175_p6, %s12192_s25, %s177_s8  }
   0xc   : > { %273 = sbr.rel (%p270_p7) target bundleno = 854 (0x356), region = 44 }
  0x13   : > { %v9248_v0 = vld [vmem:[%s15044_s1 + $0x2] sm:$0x3]  ;;  %vm507_vm0 = vcmask 1041408   ;;  %p314_p8 = scmp.lt.s32.totalorder %s12196_s26, 1  ;;  %v375_v2 = vld [vmem:[%s15044_s1] sm:$0x3] }
  0x14   : > { %11759 = vmatprep.subr.msk.bf16.mxu0 %vm507_vm0, %v9248_v0  ;;  %11760 = vmatprep.subr.msk.bf16.mxu1 %vm507_vm0, %v9248_v0  ;;  %v509_v1 = vsel %vm507_vm0, %v9248_v0, 0  ;;  %v4578_v3 = vld [vmem:[%s15047_s4] sm:$0x3]  ;;  %v4093_v4 = vld [vmem:[%s15046_s3 + $0x10] sm:$0xff]  ;;  %v12214_v6 = vmov 0   ;;  %v4094_v7 = vld [vmem:[%s15046_s3 + $0x18] sm:$0xff] }
  0x15   : > { %10710 = vmatpush3.bf16.msra.mxu0 %v509_v1  ;;  %11310 = vmatpush3.bf16.msra.mxu1 %v509_v1  ;;  %s12312_s18 = scalar_select %p314_p8, %s12196_s26, 1  ;;  %v4091_v5 = vld [vmem:[%s15046_s3] sm:$0xff]  ;;  %v4092_v8 = vld [vmem:[%s15046_s3 + $0x8] sm:$0xff]  ;;  %vm458_vm1 = vcmask 31744   ;;  %v893_v15 = vsel %vm507_vm0, %v375_v2, 0  ;;  %v4715_v27 = vsel %vm507_vm0, %v4578_v3, 0 }
  0x16   : > { %11761 = vmatprep.subr.msk.bf16.mxu0 %vm507_vm0, %v375_v2  ;;  %11769 = vmatprep.subr.msk.bf16.mxu1 %vm507_vm0, %v4578_v3  ;;  %v12354_v16 = vld [vmem:[%s15044_s1 + $0x4] sm:$0x3]  ;;  %v4096_v19 = vld [vmem:[%s15046_s3 + $0x28] sm:$0xff]  ;;  %v9648_v28 = vld [vmem:[%s15044_s1 + $0x2] sm:$0x3]  ;;  %s9952_s22 = smul.u32 (%p12287_p3), 464, %s12196_s26 }
  0x17   : > { %s11781_s23 = smul.u32 264, %s12312_s18  ;;  %11857 = vset.pattern.permute.xlu1 %v12214_v6  ;;  %11856 = vset.pattern.permute.xlu0 %v12214_v6  ;;  %v4095_v22 = vld [vmem:[%s15046_s3 + $0x20] sm:$0xff]  ;;  %v4098_v29 = vld [vmem:[%s15046_s3 + $0x38] sm:$0xff]  ;;  %v4097_v30 = vld [vmem:[%s15046_s3 + $0x30] sm:$0xff]  ;;  %vm691_vm2 = vsmask.f32 4352 }
  0x18   : > { %4206 = vperm.xlu1 %11857, %v4093_v4   ;;  %4196 = vperm.xlu0 %11856, %v4091_v5   ;;  %v4100_v44 = vld [vmem:[%s15046_s3 + $0x48] sm:$0xff]  ;;  %v5194_v6 = vsel %vm507_vm0, %v9648_v28, 0  ;;  %vm1174_vm3 = vsmask.f32 7424  ;;  %s11782_s16 = smul.u32 224, %s12312_s18  ;;  %s300_s18 = sand.u32 1, %s12188_s24  }
  0x19   : > { %s12326_s10 = scalar_lea.vmem %s15043_s0, %s11781_s23  ;;  %s11780_s17 = smul.u32 224, %s300_s18 }
  0x1a   : > { %v12335_v9 = vld [vmem:[%s12326_s10 + $0xc] sm:$0xf]  ;;  %v12338_v10 = vld [vmem:[%s12326_s10 + $0x10] sm:$0xf]  ;;  %v12341_v11 = vld [vmem:[%s12326_s10 + $0x14] sm:$0xf]  ;;  %s13567_s19 = scalar_lea.vmem %s15050_s7, %s11782_s16  ;;  %s14894_s8 = scalar_lea.vmem (%p12287_p3), %s15049_s6, %s9952_s22 }
  0x1b   : > { %v12344_v12 = vld [vmem:[%s12326_s10 + $0x18] sm:$0xf]  ;;  %v9249_v13 = vcombine.low %v12335_v9, %v12338_v10  ;;  %v367_v17 = vld [vmem:[%s12326_s10 + $0x6c] sm:$0xf]  ;;  %v368_v18 = vld [vmem:[%s12326_s10 + $0x70] sm:$0xf] }
  0x1c   : > { %v9250_v14 = vcombine.low %v12341_v11, %v12344_v12  ;;  %4211 = vperm.xlu1 %11857, %v4094_v7   ;;  %4201 = vperm.xlu0 %11856, %v4092_v8   ;;  %v12363_v20 = vld [vmem:[%s12326_s10 + $0x68] sm:$0xf]  ;;  %v369_v21 = vld [vmem:[%s12326_s10 + $0x74] sm:$0xf]  ;;  %v370_v23 = vld [vmem:[%s12326_s10 + $0x78] sm:$0xf]  ;;  %v9261_v24 = vcombine.low %v367_v17, %v368_v18 }
  0x1d   : > { %10711 = vmatprep.mubr.msk.bf16.mxu0 %vm458_vm1, %v9249_v13  ;;  %v9293_v25 = vcombine.low %v12363_v20, %v367_v17  ;;  %v371_v26 = vld [vmem:[%s12326_s10 + $0x7c] sm:$0xf]  ;;  %v9262_v32 = vcombine.low %v369_v21, %v370_v23  ;;  %v9294_v33 = vcombine.low %v368_v18, %v369_v21  ;;  %v12392_v35 = vld [vmem:[%s12326_s10 + $0x20] sm:$0xf]  ;;  %v12396_v39 = vld [vmem:[%s12326_s10 + $0x24] sm:$0xf] }
  0x1e   : > { %10712 = vmatmul.mubr.msk.bf16.vlgmr.msra.gmra.mrb[0].mxu0 %vm458_vm1, %v9250_v14  ;;  %v12386_v31 = vld [vmem:[%s12326_s10 + $0x1c] sm:$0xf]  ;;  %10735 = vmatprep.mubr.msk.bf16.mxu1 %vm458_vm1, %v9261_v24  ;;  %v12389_v34 = vcombine.low %v370_v23, %v371_v26  ;;  %v372_v36 = vld [vmem:[%s12326_s10 + $0x80] sm:$0xf]  ;;  %v12399_v40 = vld [vmem:[%s12326_s10 + $0x28] sm:$0xf] }
  0x1f   : > { %10744 = vmatpush3.bf16.msra.mxu0 %v893_v15  ;;  %v800_v37 = vshrl.u32 %v9293_v25, 16  ;;  %v803_v38 = vshll.u32 %v9293_v25, 16  ;;  %v809_v41 = vshrl.u32 %v9294_v33, 16  ;;  %v812_v42 = vshll.u32 %v9294_v33, 16  ;;  %10736 = vmatmul.mubr.msk.bf16.vlgmr.msra.gmra.mrb[0].mxu1 %vm458_vm1, %v9262_v32  ;;  %v373_v43 = vld [vmem:[%s12326_s10 + $0x84] sm:$0xf] }
  0x20   : > { %11762 = vmatprep.subr.msk.bf16.mxu0 %vm507_vm0, %v12354_v16  ;;  %4221 = vperm.xlu1 %11857, %v4096_v19   ;;  %v9251_v47 = vcombine.low %v12386_v31, %v12392_v35  ;;  %v9263_v48 = vcombine.low %v371_v26, %v372_v36  ;;  %v12409_v49 = vld [vmem:[%s12326_s10 + $0x88] sm:$0xf]  ;;  %v12412_v50 = vld [vmem:[%s12326_s10 + $0x2c] sm:$0xf]  ;;  %v9252_v53 = vcombine.low %v12396_v39, %v12399_v40  ;;  %v12417_v54 = vld [vmem:[%s12326_s10 + $0x30] sm:$0xf] }
  0x21   : > { %4216 = vperm.xlu0 %11856, %v4095_v22   ;;  %v802_v45 = vrot.slane %v800_v37, 3  ;;  %v805_v46 = vrot.slane %v803_v38, 4  ;;  %11016 = vmatpush3.bf16.msra.mxu1 %v4715_v27  ;;  %v811_v51 = vrot.slane %v809_v41, 3  ;;  %v814_v52 = vrot.slane %v812_v42, 4  ;;  %v11879_v56 = vld [vmem:[%s12326_s10 + $0x18] sm:$0xff]   ;;  %v11882_v5 = vld [vmem:[%s12326_s10 + $0x20] sm:$0xff]  }
  0x22   : > { %11770 = vmatprep.subr.msk.bf16.mxu1 %vm507_vm0, %v9648_v28  ;;  %10715 = vmatprep.mubr.msk.bf16.mxu0 %vm458_vm1, %v9251_v47  ;;  %v12422_v55 = vcombine.low %v372_v36, %v373_v43  ;;  %v9264_v57 = vcombine.low %v373_v43, %v12409_v49  ;;  %v9253_v58 = vcombine.low %v12412_v50, %v12417_v54  ;;  %v12430_v59 = vld [vmem:[%s12326_s10 + $0x34] sm:$0xf]  ;;  %v12433_v60 = vld [vmem:[%s12326_s10 + $0x38] sm:$0xf]  ;;  %v12437_v61 = vld [vmem:[%s12326_s10 + $0x3c] sm:$0xf] }
  0x23   : > { %10739 = vmatprep.mubr.msk.bf16.mxu1 %vm458_vm1, %v9263_v48  ;;  %v12440_v62 = vld [vmem:[%s12326_s10 + $0x40] sm:$0xf]  ;;  %v12442_v63 = vor.u32 %v805_v46, %v802_v45  ;;  %v12444_v0 = vor.u32 %v814_v52, %v811_v51  ;;  %v9254_v1 = vcombine.low %v12430_v59, %v12433_v60  ;;  %v342_v4 = vld [vmem:[%s12326_s10 + $0x8] sm:$0x8]  ;;  %v12462_v8 = vld [vmem:[%s12326_s10 + $0x44] sm:$0xf]  ;;  %v9282_v19 = vcombine.low %v12338_v10, %v12341_v11 }
  0x24   : > { %4231 = vperm.xlu1 %11857, %v4098_v29   ;;  %v9255_v3 = vcombine.low %v12437_v61, %v12440_v62  ;;  %v11885_v7 = vld [vmem:[%s12326_s10 + $0x28] sm:$0xff]   ;;  %v12473_v15 = vld [vmem:[%s12326_s10 + $0x50] sm:$0xf]  ;;  %v9281_v17 = vcombine.low %v342_v4, %v12335_v9  ;;  %v12479_v18 = vld [vmem:[%s15044_s1] sm:$0x3]  ;;  %v9284_v33 = vcombine.low %v12392_v35, %v12396_v39  ;;  %v821_v35 = vshll.u32 %v12389_v34, 16 }
  0x25   : > { %4226 = vperm.xlu0 %11856, %v4097_v30   ;;  %v12452_v2 = vsel %vm691_vm2, %v12442_v63, %v12444_v0  ;;  %v12466_v13 = vld [vmem:[%s12326_s10 + $0x48] sm:$0xf]  ;;  %v12470_v14 = vld [vmem:[%s12326_s10 + $0x4c] sm:$0xf]  ;;  %v701_v10 = vshrl.u32 %v9282_v19, 16  ;;  %v704_v11 = vshll.u32 %v9282_v19, 16  ;;  %v9283_v30 = vcombine.low %v12344_v12, %v12386_v31 }
  0x26   : > { %10716 = vmatmul.mubr.msk.bf16.gmra.mrb[4].mxu0 %vm458_vm1, %v9252_v53  ;;  %v9256_v21 = vcombine.low %v12462_v8, %v12466_v13  ;;  %v9257_v9 = vcombine.low %v12470_v14, %v12473_v15  ;;  %v693_v22 = vshrl.u32 %v9281_v17, 16  ;;  %v696_v23 = vshll.u32 %v9281_v17, 16  ;;  %v11888_v24 = vld [vmem:[%s12326_s10 + $0x30] sm:$0xff]   ;;  %v11891_v25 = vld [vmem:[%s12326_s10 + $0x38] sm:$0xff]   ;;  %v12502_v28 = vld [vmem:[%s12326_s10 + $0x60] sm:$0xf] }
  0x27   : > { %10719 = vmatprep.mubr.msk.bf16.mxu0 %vm458_vm1, %v9253_v58  ;;  %10740 = vmatmul.mubr.msk.bf16.gmra.mrb[4].mxu1 %vm458_vm1, %v9264_v57  ;;  %v12496_v26 = vld [vmem:[%s12326_s10 + $0x54] sm:$0xf]  ;;  %v12499_v27 = vld [vmem:[%s12326_s10 + $0x58] sm:$0xf]  ;;  %v12505_v29 = vld [vmem:[%s12326_s10 + $0x5c] sm:$0xf] }
  0x28   : > { %4241 = vperm.xlu1 %11857, %v4100_v44   ;;  %11017 = vmatprep.mubr.msk.bf16.mxu1 %vm458_vm1, %v11879_v56  ;;  %v695_v32 = vrot.slane %v693_v22, 3  ;;  %v9258_v36 = vcombine.low %v12496_v26, %v12499_v27  ;;  %v698_v37 = vrot.slane %v696_v23, 4  ;;  %v703_v38 = vrot.slane %v701_v10, 3  ;;  %v12519_v44 = vld [vmem:[%s12326_s10 + $0x64] sm:$0xf]  ;;  %v11897_v46 = vld [vmem:[%s12326_s10 + $0x48] sm:$0xff]  }
  0x29   : > { %v706_v41 = vrot.slane %v704_v11, 4  ;;  %v9259_v42 = vcombine.low %v12505_v29, %v12502_v28  ;;  %v710_v12 = vshrl.u32 %v9283_v30, 16  ;;  %v818_v31 = vshrl.u32 %v12389_v34, 16  ;;  %v11894_v39 = vld [vmem:[%s12326_s10 + $0x40] sm:$0xff]   ;;  %v11898_v19 = vld [vmem:[%s12326_s10 + $0x50] sm:$0xff]   ;;  %v11899_v23 = vld [vmem:[%s12326_s10 + $0x58] sm:$0xff]  }
  0x2a   : > { %v713_v43 = vshll.u32 %v9283_v30, 16  ;;  %v719_v45 = vshrl.u32 %v9284_v33, 16  ;;  %v699_v47 = vor.u32 %v698_v37, %v695_v32  ;;  %v722_v51 = vshll.u32 %v9284_v33, 16  ;;  %v4099_v34 = vld [vmem:[%s15046_s3 + $0x40] sm:$0xff]  ;;  %s14659_s24 = scalar_lea.vmem [#allocation2], %s11780_s17   ;;  %s9128_s12 = scalar_lea.vmem (%p12287_p3), %s14894_s8, 224  }
  0x2b   : > { %v707_v48 = vor.u32 %v706_v41, %v703_v38  ;;  %v712_v52 = vrot.slane %v710_v12, 3  ;;  %v9260_v53 = vcombine.low %v12519_v44, %v12363_v20  ;;  %v9297_v56 = vcombine.low %v12409_v49, %v12409_v49  ;;  %4236 = vperm.xlu0 %11856, %v4099_v34   ;;  %v4105_v34 = vld [vmem:[%s15046_s3 + $0x70] sm:$0xff]  ;;  %s15351_s13 = smov (%p12287_p3), %s9128_s12  ;;  %s14901_s14 = smov (%p12287_p3), 0  }
  0x2c   : > { %v820_v57 = vrot.slane %v818_v31, 3  ;;  %v715_v58 = vrot.slane %v713_v43, 4  ;;  %v823_v4 = vrot.slane %v821_v35, 4  ;;  %v9286_v20 = vcombine.low %v12417_v54, %v12430_v59 }
  0x2d   : > { %v708_v49 = vsel %vm691_vm2, %v699_v47, %v707_v48  ;;  %v830_v17 = vshll.u32 %v12422_v55, 16 }
  0x2e   : > { %10720 = vmatmul.mubr.msk.bf16.gmra.mrb[8].mxu0 %vm458_vm1, %v9254_v1  ;;  %v9285_v1 = vcombine.low %v12399_v40, %v12412_v50  ;;  %v836_v40 = vshrl.u32 %v9297_v56, 16  ;;  %v839_v50 = vshll.u32 %v9297_v56, 16  ;;  %v716_v22 = vor.u32 %v715_v58, %v712_v52 }
  0x2f   : > { %10723 = vmatprep.mubr.msk.bf16.mxu0 %vm458_vm1, %v9255_v3  ;;  %11018 = vmatmul.mubr.msk.bf16.vlgmr.msra.gmra.mrb[8].mxu1 %vm458_vm1, %v11882_v5  ;;  %v721_v3 = vrot.slane %v719_v45, 3  ;;  %v724_v5 = vrot.slane %v722_v51, 4  ;;  %v740_v30 = vshll.u32 %v9286_v20, 16  ;;  %v11900_v45 = vld [vmem:[%s12326_s10 + $0x60] sm:$0xff]   ;;  %v9289_v58 = vcombine.low %v12466_v13, %v12470_v14  ;;  %v4108_v13 = vld [vmem:[%s15046_s3 + $0x88] sm:$0xff]  ;;  %v11903_v14 = vld [vmem:[%s12326_s10 + $0x78] sm:$0xff]  }
  0x30   : > { %11050 = vmatpush3.bf16.msra.mxu1 %v5194_v6  ;;  %11021 = vmatprep.mubr.msk.bf16.mxu1 %vm458_vm1, %v11885_v7  ;;  %v824_v6 = vor.u32 %v823_v4, %v820_v57  ;;  %v827_v7 = vshrl.u32 %v12422_v55, 16  ;;  %v731_v10 = vshll.u32 %v9285_v1, 16  ;;  %v838_v11 = vrot.slane %v836_v40, 3  ;;  %v4106_v57 = vld [vmem:[%s15046_s3 + $0x78] sm:$0xff] }
  0x31   : > { %11771 = vmatprep.subr.msk.bf16.mxu1 %vm507_vm0, %v12479_v18  ;;  %v725_v55 = vor.u32 %v724_v5, %v721_v3  ;;  %v717_v38 = vsel %vm691_vm2, %v707_v48, %v716_v22  ;;  %v742_v35 = vrot.slane %v740_v30, 4  ;;  %v767_v40 = vshll.u32 %v9289_v58, 16 }
  0x32   : > { %v12546_v54 = vsel %vm691_vm2, %v12444_v0, %v824_v6  ;;  %v829_v59 = vrot.slane %v827_v7, 3  ;;  %v1356_v0 = vsel %vm507_vm0, %v12354_v16, 0  ;;  %v4101_v16 = vld [vmem:[%s15046_s3 + $0x50] sm:$0xff] }
  0x33   : > { %v726_v31 = vsel %vm691_vm2, %v716_v22, %v725_v55  ;;  %4246 = vperm.xlu0 %11856, %v4101_v16   ;;  %v11902_v7 = vld [vmem:[%s12326_s10 + $0x70] sm:$0xff]   ;;  %v9291_v22 = vcombine.low %v12499_v27, %v12505_v29  ;;  %v4112_v27 = vld [vmem:[%s15046_s3 + $0xa8] sm:$0xff]  ;;  %v11904_v29 = vld [vmem:[%s12326_s10 + $0x80] sm:$0xff]  }
  0x36   : > { %10724 = vmatmul.mubr.msk.bf16.gmra.mrb[12].mxu0 %vm458_vm1, %v9256_v21  ;;  %v728_v21 = vshrl.u32 %v9285_v1, 16 }
  0x37   : > { %10727 = vmatprep.mubr.msk.bf16.mxu0 %vm458_vm1, %v9257_v9  ;;  %11022 = vmatmul.mubr.msk.bf16.gmra.mrb[12].mxu1 %vm458_vm1, %v11888_v24  ;;  %v832_v9 = vrot.slane %v830_v17, 4  ;;  %v841_v24 = vrot.slane %v839_v50, 4  ;;  %v4107_v17 = vld [vmem:[%s15046_s3 + $0x80] sm:$0xff] }
  0x38   : > { %11025 = vmatprep.mubr.msk.bf16.mxu1 %vm458_vm1, %v11891_v25  ;;  %v737_v25 = vshrl.u32 %v9286_v20, 16  ;;  %v730_v41 = vrot.slane %v728_v21, 3  ;;  %v9290_v20 = vcombine.low %v12473_v15, %v12496_v26  ;;  %v764_v26 = vshrl.u32 %v9289_v58, 16  ;;  %v5074_v58 = vld [vmem:[%s12326_s10 + $0x98] sm:$0xf] }
  0x39   : > { %v833_v32 = vor.u32 %v832_v9, %v829_v59  ;;  %v842_v33 = vor.u32 %v841_v24, %v838_v11  ;;  %v4110_v59 = vld [vmem:[%s15046_s3 + $0x98] sm:$0xff]  ;;  %v4109_v9 = vld [vmem:[%s15046_s3 + $0x90] sm:$0xff]  ;;  %v769_v11 = vrot.slane %v767_v40, 4  ;;  %v9292_v24 = vcombine.low %v12502_v28, %v12519_v44  ;;  %v11905_v28 = vld [vmem:[%s12326_s10 + $0x88] sm:$0xff]  }
  0x3a   : > { %v739_v43 = vrot.slane %v737_v25, 3  ;;  %v776_v21 = vshll.u32 %v9290_v20, 16 }
  0x3b   : > { %v12556_v37 = vsel %vm691_vm2, %v824_v6, %v833_v32  ;;  %v12561_v12 = vsel %vm691_vm2, %v833_v32, %v842_v33  ;;  %v4111_v32 = vld [vmem:[%s15046_s3 + $0xa0] sm:$0xff]  ;;  %v782_v33 = vshrl.u32 %v9291_v22, 16 }
  0x3c   : > { %v743_v52 = vor.u32 %v742_v35, %v739_v43  ;;  %v778_v30 = vrot.slane %v776_v21, 4  ;;  %v12648_v35 = vld [vmem:[%s12326_s10 + $0x8c] sm:$0xf]  ;;  %v5078_v21 = vld [vmem:[%s12326_s10 + $0xa8] sm:$0xf] }
  0x3e   : > { %10728 = vmatmul.mubr.msk.bf16.gmra.mrb[16].mxu0 %vm458_vm1, %v9258_v36  ;;  %v9287_v36 = vcombine.low %v12433_v60, %v12437_v61  ;;  %v4102_v60 = vld [vmem:[%s15046_s3 + $0x58] sm:$0xff]  ;;  %v9288_v61 = vcombine.low %v12440_v62, %v12462_v8  ;;  %v4103_v62 = vld [vmem:[%s15046_s3 + $0x60] sm:$0xff]  ;;  %v11901_v8 = vld [vmem:[%s12326_s10 + $0x68] sm:$0xff]  }
  0x3f   : > { %10731 = vmatprep.mubr.msk.bf16.mxu0 %vm458_vm1, %v9259_v42  ;;  %11026 = vmatmul.mubr.msk.bf16.gmra.mrb[16].mxu1 %vm458_vm1, %v11894_v39  ;;  %v733_v42 = vrot.slane %v731_v10, 4  ;;  %v12575_v39 = vld [vmem:[%s15044_s1 + $0x6] sm:$0x3]  ;;  %v766_v10 = vrot.slane %v764_v26, 3 }
  0x40   : > { %11029 = vmatprep.mubr.msk.bf16.mxu1 %vm458_vm1, %v11897_v46  ;;  %4251 = vperm.xlu1 %11857, %v4102_v60   ;;  %v4104_v46 = vld [vmem:[%s15046_s3 + $0x68] sm:$0xff]  ;;  %v746_v48 = vshrl.u32 %v9287_v36, 16  ;;  %v749_v51 = vshll.u32 %v9287_v36, 16  ;;  %v758_v56 = vshll.u32 %v9288_v61, 16  ;;  %v785_v36 = vshll.u32 %v9291_v22, 16  ;;  %v4113_v60 = vld [vmem:[%s15046_s3 + $0xb0] sm:$0xff] }
  0x41   : > { %v734_v47 = vor.u32 %v733_v42, %v730_v41  ;;  %4256 = vperm.xlu0 %11856, %v4103_v62   ;;  %v770_v44 = vor.u32 %v769_v11, %v766_v10  ;;  %v4114_v42 = vld [vmem:[%s15046_s3 + $0xb8] sm:$0xff]  ;;  %v12706_v26 = vld [vmem:[%s12326_s10 + $0x24] sm:$0xf]  ;;  %v11923_v22 = vld [vmem:[%s12326_s10 + $0xc] sm:$0xff]  }
  0x42   : > { %v748_v3 = vrot.slane %v746_v48, 3  ;;  %v751_v4 = vrot.slane %v749_v51, 4  ;;  %v760_v6 = vrot.slane %v758_v56, 4  ;;  %v4115_v48 = vld [vmem:[%s15046_s3 + $0xc0] sm:$0xff]  ;;  %v4118_v56 = vld [vmem:[%s15046_s3 + $0xd8] sm:$0xff]  ;;  %v1178_v11 = vshll.u32 %v11923_v22, 16 }
  0x43   : > { %v735_v1 = vsel %vm691_vm2, %v725_v55, %v734_v47  ;;  %v11924_v10 = vld [vmem:[%s12326_s10 + $0x14] sm:$0xff]  }
  0x44   : > { %4261 = vperm.xlu1 %11857, %v4104_v46   ;;  %v752_v15 = vor.u32 %v751_v4, %v748_v3  ;;  %v5075_v4 = vld [vmem:[%s12326_s10 + $0x9c] sm:$0xf] }
  0x45   : > { %4266 = vperm.xlu0 %11856, %v4105_v34   ;;  %v12672_v34 = vld [vmem:[%s12326_s10 + $0x94] sm:$0xf] }
  0x46   : > { %10732 = vmatmul.mubr.msk.bf16.gmra.mrb[20].mxu0 %vm458_vm1, %v9260_v53  ;;  %v755_v53 = vshrl.u32 %v9288_v61, 16  ;;  %v784_v61 = vrot.slane %v782_v33, 3 }
  0x47   : > { %10745 = vmatprep.mubr.msk.bf16.mxu0 %vm458_vm1, %v708_v49  ;;  %11030 = vmatmul.mubr.msk.bf16.gmra.mrb[20].mxu1 %vm458_vm1, %v11898_v19  ;;  %v744_v49 = vsel %vm691_vm2, %v734_v47, %v743_v52  ;;  %v773_v19 = vshrl.u32 %v9290_v20, 16  ;;  %v11906_v47 = vld [vmem:[%s12326_s10 + $0x90] sm:$0xff]   ;;  %v12680_v20 = vld [vmem:[%s12326_s10 + $0xa0] sm:$0xf] }
  0x48   : > { %11033 = vmatprep.mubr.msk.bf16.mxu1 %vm458_vm1, %v11899_v23  ;;  %v757_v5 = vrot.slane %v755_v53, 3  ;;  %4271 = vperm.xlu1 %11857, %v4106_v57   ;;  %v753_v23 = vsel %vm691_vm2, %v743_v52, %v752_v15  ;;  %v4117_v57 = vld [vmem:[%s15046_s3 + $0xd0] sm:$0xff] }
  0x49   : > { %4276 = vperm.xlu0 %11856, %v4107_v17   ;;  %v775_v25 = vrot.slane %v773_v19, 3  ;;  %v4122_v17 = vld [vmem:[%s15046_s3 + $0xf8] sm:$0xff]  ;;  %v5077_v19 = vld [vmem:[%s12326_s10 + $0xa4] sm:$0xf] }
  0x4a   : > { %v761_v50 = vor.u32 %v760_v6, %v757_v5  ;;  %v9650_v5 = vcombine.low %v12672_v34, %v5074_v58  ;;  %v4119_v6 = vld [vmem:[%s15046_s3 + $0xe0] sm:$0xff] }
  0x4b   : > { %v779_v41 = vor.u32 %v778_v30, %v775_v25  ;;  %v9675_v25 = vcombine.low %v5074_v58, %v5075_v4  ;;  %v5083_v30 = vld [vmem:[%s12326_s10 + $0xbc] sm:$0xf] }
  0x4c   : > { %4281 = vperm.xlu1 %11857, %v4108_v13   ;;  %v762_v55 = vsel %vm691_vm2, %v752_v15, %v761_v50  ;;  %v771_v16 = vsel %vm691_vm2, %v761_v50, %v770_v44  ;;  %v5493_v13 = vsel %vm507_vm0, %v12479_v18, 0  ;;  %v12703_v15 = vld [vmem:[%s12326_s10 + $0x20] sm:$0xf]  ;;  %v4121_v18 = vld [vmem:[%s15046_s3 + $0xf0] sm:$0xff] }
  0x4d   : > { %4286 = vperm.xlu0 %11856, %v4109_v9   ;;  %v780_v43 = vsel %vm691_vm2, %v770_v44, %v779_v41  ;;  %v5080_v9 = vld [vmem:[%s12326_s10 + $0xb0] sm:$0xf]  ;;  %v5070_v44 = vld [vmem:[%s12326_s10 + $0x88] sm:$0x8] }
  0x4e   : > { %10746 = vmatmul.mubr.msk.bf16.vlgmr.msra.gmra.mrb[0].mxu0 %vm458_vm1, %v717_v38  ;;  %v794_v38 = vshll.u32 %v9292_v24, 16 }
  0x4f   : > { %10778 = vmatpush3.bf16.msra.mxu0 %v1356_v0  ;;  %10749 = vmatprep.mubr.msk.bf16.mxu0 %vm458_vm1, %v726_v31  ;;  %v791_v0 = vshrl.u32 %v9292_v24, 16  ;;  %v787_v31 = vrot.slane %v785_v36, 4  ;;  %v5081_v24 = vld [vmem:[%s12326_s10 + $0xb4] sm:$0xf]  ;;  %v5358_v36 = vshrl.u32 %v9675_v25, 16 }
  0x50   : > { %11763 = vmatprep.subr.msk.bf16.mxu0 %vm507_vm0, %v12575_v39  ;;  %11034 = vmatmul.mubr.msk.bf16.gmra.mrb[24].mxu1 %vm458_vm1, %v11900_v45  ;;  %v12651_v45 = vld [vmem:[%s12326_s10 + $0x90] sm:$0xf]  ;;  %v796_v62 = vrot.slane %v794_v38, 4 }
  0x51   : > { %11037 = vmatprep.mubr.msk.bf16.mxu1 %vm458_vm1, %v11901_v8  ;;  %4291 = vperm.xlu1 %11857, %v4110_v59   ;;  %v793_v46 = vrot.slane %v791_v0, 3  ;;  %v4116_v8 = vld [vmem:[%s15046_s3 + $0xc8] sm:$0xff]  ;;  %v9649_v51 = vcombine.low %v12648_v35, %v12651_v45  ;;  %v788_v52 = vor.u32 %v787_v31, %v784_v61  ;;  %v5361_v0 = vshll.u32 %v9675_v25, 16  ;;  %v12796_v25 = vld [vmem:[%s12326_s10 + $0xe4] sm:$0xf] }
  0x52   : > { %4296 = vperm.xlu0 %11856, %v4111_v32   ;;  %v5079_v59 = vld [vmem:[%s12326_s10 + $0xac] sm:$0xf]  ;;  %v1180_v32 = vrot.slane %v1178_v11, 1  ;;  %v1187_v31 = vshrl.u32 %v11924_v10, 16 }
  0x53   : > { %v797_v53 = vor.u32 %v796_v62, %v793_v46  ;;  %v11933_v46 = vld [vmem:[%s12326_s10 + $0x2c] sm:$0xff]   ;;  %v9673_v62 = vcombine.low %v5070_v44, %v12648_v35 }
  0x55   : > { %4301 = vperm.xlu1 %11857, %v4112_v27   ;;  %v798_v3 = vsel %vm691_vm2, %v788_v52, %v797_v53  ;;  %v807_v50 = vsel %vm691_vm2, %v797_v53, %v12442_v63  ;;  %v9653_v63 = vcombine.low %v5079_v59, %v5080_v9  ;;  %v5084_v27 = vld [vmem:[%s12326_s10 + $0xc0] sm:$0xf]  ;;  %v12765_v53 = vld [vmem:[%s12326_s10 + $0x34] sm:$0xff]  }
  0x56   : > { %10750 = vmatmul.mubr.msk.bf16.gmra.mrb[4].mxu0 %vm458_vm1, %v735_v1  ;;  %4306 = vperm.xlu0 %11856, %v4113_v60   ;;  %v789_v1 = vsel %vm691_vm2, %v779_v41, %v788_v52  ;;  %v9655_v38 = vcombine.low %v5083_v30, %v5084_v27  ;;  %v5085_v41 = vld [vmem:[%s12326_s10 + $0xc4] sm:$0xf]  ;;  %v5086_v60 = vld [vmem:[%s12326_s10 + $0xc8] sm:$0xf]  ;;  %v12759_v52 = vrot.slane %v5361_v0, 4  ;;  %v1219_v0 = vshrl.u32 %v12765_v53, 16 }
  0x57   : > { %10753 = vmatprep.mubr.msk.bf16.mxu0 %vm458_vm1, %v744_v49  ;;  %v4120_v49 = vld [vmem:[%s15046_s3 + $0xe8] sm:$0xff] }
  0x58   : > { %11038 = vmatmul.mubr.msk.bf16.gmra.mrb[28].mxu1 %vm458_vm1, %v11902_v7  ;;  %v9651_v7 = vcombine.low %v5075_v4, %v12680_v20  ;;  %v12771_v4 = vld [vmem:[%s12326_s10 + $0xd4] sm:$0xf] }
  0x59   : > { %11041 = vmatprep.mubr.msk.bf16.mxu1 %vm458_vm1, %v11903_v14  ;;  %4311 = vperm.xlu1 %11857, %v4114_v42   ;;  %v12697_v14 = vld [vmem:[%s15044_s1 + $0x4] sm:$0x3] }
  0x5a   : > { %4316 = vperm.xlu0 %11856, %v4115_v48   ;;  %v11930_v42 = vld [vmem:[%s12326_s10 + $0x24] sm:$0xff]   ;;  %v5088_v48 = vld [vmem:[%s12326_s10 + $0xd0] sm:$0xf] }
  0x5b   : > { %v1199_v35 = vshll.u32 %v11930_v42, 16 }
  0x5d   : > { %4321 = vperm.xlu1 %11857, %v4116_v8   ;;  %v12752_v8 = vcombine.low %v12680_v20, %v5077_v19  ;;  %v1207_v20 = vshll.u32 %v11933_v46, 16 }
  0x5e   : > { %10754 = vmatmul.mubr.msk.bf16.gmra.mrb[8].mxu0 %vm458_vm1, %v753_v23  ;;  %4326 = vperm.xlu0 %11856, %v4117_v57   ;;  %v9652_v23 = vcombine.low %v5077_v19, %v5078_v21  ;;  %v1215_v19 = vshll.u32 %v12765_v53, 16  ;;  %v12831_v53 = vld [vmem:[%s12326_s10 + $0x54] sm:$0xff]  }
  0x5f   : > { %10757 = vmatprep.mubr.msk.bf16.mxu0 %vm458_vm1, %v762_v55  ;;  %v5082_v55 = vld [vmem:[%s12326_s10 + $0xb8] sm:$0xf] }
  0x60   : > { %11042 = vmatmul.mubr.msk.bf16.gmra.mrb[32].mxu1 %vm458_vm1, %v11904_v29  ;;  %v1176_v29 = vshrl.u32 %v11923_v22, 16  ;;  %v9654_v33 = vcombine.low %v5081_v24, %v5082_v55  ;;  %v5091_v22 = vld [vmem:[%s12326_s10 + $0xdc] sm:$0xf] }
  0x61   : > { %11045 = vmatprep.mubr.msk.bf16.mxu1 %vm458_vm1, %v11905_v28  ;;  %4331 = vperm.xlu1 %11857, %v4118_v56   ;;  %v1183_v28 = vshll.u32 %v11924_v10, 16  ;;  %v9656_v56 = vcombine.low %v5085_v41, %v5086_v60 }
  0x62   : > { %4336 = vperm.xlu0 %11856, %v4119_v6   ;;  %v5344_v6 = vshll.u32 %v9673_v62, 16 }
  0x63   : > { %v1185_v61 = vrot.slane %v1183_v28, 1 }
  0x65   : > { %4341 = vperm.xlu1 %11857, %v4120_v49   ;;  %v1189_v58 = vor.u32 %v1187_v31, %v1185_v61  ;;  %v12776_v49 = vld [vmem:[%s12326_s10 + $0xd8] sm:$0xf] }
  0x66   : > { %10758 = vmatmul.mubr.msk.bf16.gmra.mrb[12].mxu0 %vm458_vm1, %v771_v16  ;;  %4346 = vperm.xlu0 %11856, %v4121_v18   ;;  %v1181_v16 = vor.u32 %v1180_v32, %v1176_v29  ;;  %v1203_v18 = vshrl.u32 %v11930_v42, 16  ;;  %v9658_v11 = vcombine.low %v12771_v4, %v12776_v49  ;;  %v5346_v29 = vrot.slane %v5344_v6, 4 }
  0x67   : > { %10761 = vmatprep.mubr.msk.bf16.mxu0 %vm458_vm1, %v780_v43 }
  0x68   : > { %11046 = vmatmul.mubr.msk.bf16.gmra.mrb[36].mxu1 %vm458_vm1, %v11906_v47  ;;  %v5087_v47 = vld [vmem:[%s12326_s10 + $0xcc] sm:$0xf]  ;;  %v1186_v57 = vsel %vm1174_vm3, %v1181_v16, %v1185_v61 }
  0x69   : > { %11051 = vmatprep.mubr.msk.bf16.mxu1 %vm458_vm1, %v9649_v51  ;;  %4351 = vperm.xlu1 %11857, %v4122_v17   ;;  %v12757_v51 = vrot.slane %v5358_v36, 3  ;;  %v1201_v17 = vrot.slane %v1199_v35, 1  ;;  %v1217_v36 = vrot.slane %v1215_v19, 1 }
  0x6b   : > { %v1205_v44 = vor.u32 %v1203_v18, %v1201_v17 }
  0x6e   : > { %10762 = vmatmul.mubr.msk.bf16.gmra.mrb[16].mxu0 %vm458_vm1, %v789_v1  ;;  %v9657_v1 = vcombine.low %v5087_v47, %v5088_v48 }
  0x6f   : > { %10765 = vmatprep.mubr.msk.bf16.mxu0 %vm458_vm1, %v798_v3 }
  0x70   : > { %11052 = vmatmul.mubr.msk.bf16.vlgmr.msra.gmra.mrb[40].mxu1 %vm458_vm1, %v9650_v5  ;;  %v5341_v5 = vshrl.u32 %v9673_v62, 16  ;;  %v12824_v62 = vld [vmem:[%s15044_s1 + $0x8] sm:$0x3] }
  0x71   : > { %11076 = vmatpush3.bf16.msra.mxu1 %v5493_v13  ;;  %11055 = vmatprep.mubr.msk.bf16.mxu1 %vm458_vm1, %v9651_v7 }
  0x72   : > { %11772 = vmatprep.subr.msk.bf16.mxu1 %vm507_vm0, %v12697_v14 }
  0x76   : > { %10766 = vmatmul.mubr.msk.bf16.gmra.mrb[20].mxu0 %vm458_vm1, %v807_v50  ;;  %v1211_v50 = vshrl.u32 %v11933_v46, 16  ;;  %v5370_v46 = vshll.u32 %v12752_v8, 16 }
  0x77   : > { %10769 = vmatprep.mubr.msk.bf16.mxu0 %vm458_vm1, %v12452_v2  ;;  %v11927_v2 = vld [vmem:[%s12326_s10 + $0x1c] sm:$0xff]  }
  0x78   : > { %11056 = vmatmul.mubr.msk.bf16.gmra.mrb[44].mxu1 %vm458_vm1, %v9652_v23  ;;  %v1191_v43 = vshll.u32 %v11927_v2, 16  ;;  %v5092_v23 = vld [vmem:[%s12326_s10 + $0xe0] sm:$0xf] }
  0x79   : > { %11059 = vmatprep.mubr.msk.bf16.mxu1 %vm458_vm1, %v9653_v63  ;;  %v11938_v63 = vld [vmem:[%s12326_s10 + $0x3c] sm:$0xff]   ;;  %v9659_v42 = vcombine.low %v5091_v22, %v5092_v23  ;;  %v12817_v31 = vcombine.low %v5092_v23, %v12796_v25 }
  0x7a   : > { %v1193_v3 = vrot.slane %v1191_v43, 1  ;;  %v1223_v16 = vshll.u32 %v11938_v63, 16  ;;  %v5367_v43 = vshrl.u32 %v12752_v8, 16 }
  0x7c   : > { %v1194_v10 = vsel %vm1174_vm3, %v1189_v58, %v1193_v3  ;;  %v1225_v58 = vrot.slane %v1223_v16, 1 }
  0x7e   : > { %10770 = vmatmul.mubr.msk.bf16.gmra.mrb[24].mxu0 %vm458_vm1, %v12546_v54  ;;  %v12745_v54 = vsel %vm507_vm0, %v12575_v39, 0  ;;  %v12761_v39 = vcombine.low %v5078_v21, %v5079_v59  ;;  %v12780_v21 = vcombine.low %v5082_v55, %v5083_v30  ;;  %v12784_v59 = vcombine.low %v5086_v60, %v5087_v47  ;;  %v12799_v30 = vld [vmem:[%s12326_s10 + $0xe8] sm:$0xf] }
  0x7f   : > { %10773 = vmatprep.mubr.msk.bf16.mxu0 %vm458_vm1, %v12556_v37  ;;  %v9674_v37 = vcombine.low %v12651_v45, %v12672_v34  ;;  %v12767_v45 = vcombine.low %v5080_v9, %v5081_v24  ;;  %v1195_v34 = vshrl.u32 %v11927_v2, 16  ;;  %v12793_v24 = vcombine.low %v5088_v48, %v12771_v4  ;;  %v12803_v2 = vld [vmem:[%s12326_s10 + $0x44] sm:$0xff]   ;;  %v12848_v4 = vld [vmem:[%s12326_s10 + $0x5c] sm:$0xff]  }
  0x80   : > { %11060 = vmatmul.mubr.msk.bf16.gmra.mrb[48].mxu1 %vm458_vm1, %v9654_v33  ;;  %v1209_v55 = vrot.slane %v1207_v20, 1  ;;  %v12812_v60 = vcombine.low %v12776_v49, %v5091_v22  ;;  %v9660_v61 = vcombine.low %v12796_v25, %v12799_v30  ;;  %v1227_v48 = vshrl.u32 %v11938_v63, 16  ;;  %v12851_v20 = vld [vmem:[%s12326_s10 + $0x64] sm:$0xff]  }
  0x81   : > { %11063 = vmatprep.mubr.msk.bf16.mxu1 %vm458_vm1, %v9655_v38  ;;  %v5349_v7 = vshrl.u32 %v9674_v37, 16  ;;  %v5352_v13 = vshll.u32 %v9674_v37, 16  ;;  %v1197_v9 = vor.u32 %v1195_v34, %v1193_v3  ;;  %v12808_v38 = vld [vmem:[%s12326_s10 + $0x4c] sm:$0xff]   ;;  %v1231_v35 = vshll.u32 %v12803_v2, 16 }
  0x82   : > { %v1213_v33 = vor.u32 %v1211_v50, %v1209_v55  ;;  %v1210_v8 = vsel %vm1174_vm3, %v1205_v44, %v1209_v55  ;;  %v1239_v34 = vshll.u32 %v12808_v38, 16  ;;  %v12844_v3 = vsel %vm507_vm0, %v12697_v14, 0 }
  0x83   : > { %v5351_v32 = vrot.slane %v5349_v7, 3  ;;  %v5354_v28 = vrot.slane %v5352_v13, 4  ;;  %v5369_v49 = vrot.slane %v5367_v43, 3  ;;  %v5376_v6 = vshrl.u32 %v12761_v39, 16 }
  0x84   : > { %v1233_v7 = vrot.slane %v1231_v35, 1  ;;  %v1247_v13 = vshll.u32 %v12831_v53, 16  ;;  %v1241_v18 = vrot.slane %v1239_v34, 1  ;;  %v1243_v50 = vshrl.u32 %v12808_v38, 16 }
  0x85   : > { %v12827_v47 = vor.u32 %v5354_v28, %v5351_v32  ;;  %v5385_v19 = vshrl.u32 %v12767_v45, 16  ;;  %v5394_v22 = vshrl.u32 %v12780_v21, 16  ;;  %v5397_v23 = vshll.u32 %v12780_v21, 16 }
  0x86   : > { %10774 = vmatmul.mubr.msk.bf16.gmra.mrb[28].mxu0 %vm458_vm1, %v12561_v12  ;;  %v12782_v12 = vcombine.low %v5084_v27, %v5085_v41  ;;  %v5343_v27 = vrot.slane %v5341_v5, 3  ;;  %v1202_v41 = vsel %vm1174_vm3, %v1197_v9, %v1201_v17  ;;  %v5372_v5 = vrot.slane %v5370_v46, 4  ;;  %v12862_v17 = vld [vmem:[%s12326_s10 + $0x6c] sm:$0xff]  }
  0x87   : > { %10779 = vmatprep.mubr.msk.bf16.mxu0 %vm458_vm1, %v1186_v57  ;;  %v1221_v57 = vor.u32 %v1219_v0, %v1217_v36  ;;  %v1255_v9 = vshll.u32 %v12848_v4, 16  ;;  %v1263_v63 = vshll.u32 %v12851_v20, 16  ;;  %v1271_v32 = vshll.u32 %v12862_v17, 16 }
  0x88   : > { %11064 = vmatmul.mubr.msk.bf16.gmra.mrb[52].mxu1 %vm458_vm1, %v9656_v56  ;;  %v5347_v37 = vor.u32 %v5346_v29, %v5343_v27  ;;  %v1218_v56 = vsel %vm1174_vm3, %v1213_v33, %v1217_v36  ;;  %v5403_v27 = vshrl.u32 %v12782_v12, 16  ;;  %v1249_v29 = vrot.slane %v1247_v13, 1  ;;  %v12883_v36 = vld [vmem:[%s12326_s10 + $0x74] sm:$0xff]  }
  0x89   : > { %11067 = vmatprep.mubr.msk.bf16.mxu1 %vm458_vm1, %v9657_v1  ;;  %v12840_v1 = vor.u32 %v12759_v52, %v12757_v51  ;;  %v5379_v51 = vshll.u32 %v12761_v39, 16  ;;  %v1229_v52 = vor.u32 %v1227_v48, %v1225_v58  ;;  %v5388_v39 = vshll.u32 %v12767_v45, 16  ;;  %v12901_v48 = vld [vmem:[%s12326_s10 + $0x84] sm:$0xff]  }
  0x8a   : > { %v5356_v14 = vsel %vm691_vm2, %v5347_v37, %v12827_v47  ;;  %v5406_v45 = vshll.u32 %v12782_v12, 16  ;;  %v5412_v28 = vshrl.u32 %v12784_v59, 16  ;;  %v5387_v21 = vrot.slane %v5385_v19, 3 }
  0x8b   : > { %v5381_v55 = vrot.slane %v5379_v51, 4  ;;  %v1251_v44 = vshrl.u32 %v12831_v53, 16  ;;  %v1259_v33 = vshrl.u32 %v12848_v4, 16  ;;  %v12885_v0 = vrot.slane %v1255_v9, 1  ;;  %v13042_v4 = vld [vmem:[%s12326_s10 + $0x38] sm:$0xf] }
  0x8c   : > { %v12887_v38 = vrot.slane %v5394_v22, 3  ;;  %v12889_v12 = vrot.slane %v5397_v23, 4  ;;  %v12896_v43 = vrot.slane %v5403_v27, 3  ;;  %v1267_v46 = vshrl.u32 %v12851_v20, 16  ;;  %15135 = vst [vmem:[#allocation5_spill] sm:$0xff] %v13042_v4 }
  0x8d   : > { %v5415_v37 = vshll.u32 %v12784_v59, 16  ;;  %v12907_v35 = vrot.slane %v5406_v45, 4  ;;  %v12909_v53 = vrot.slane %v1271_v32, 1  ;;  %v12916_v34 = vcombine.low %v12799_v30, %v12799_v30  ;;  %v12966_v32 = vld [vmem:[%s12326_s10 + $0x28] sm:$0xf] }
  0x8e   : > { %10780 = vmatmul.mubr.msk.bf16.vlgmr.msra.gmra.mrb[0].mxu0 %vm458_vm1, %v1194_v10  ;;  %v12872_v10 = vor.u32 %v5372_v5, %v5369_v49  ;;  %v1226_v59 = vsel %vm1174_vm3, %v1221_v57, %v1225_v58  ;;  %v1279_v25 = vshll.u32 %v12883_v36, 16  ;;  %v12924_v49 = vld [vmem:[%s12326_s10 + $0x18] sm:$0xf]  ;;  %v5365_v5 = vsel %vm691_vm2, %v12827_v47, %v12840_v1 }
  0x8f   : > { %10812 = vmatpush3.bf16.msra.mxu0 %v12745_v54  ;;  %10783 = vmatprep.mubr.msk.bf16.mxu0 %vm458_vm1, %v1202_v41  ;;  %v1235_v54 = vshrl.u32 %v12803_v2, 16  ;;  %v5390_v2 = vrot.slane %v5388_v39, 4  ;;  %v12891_v41 = vrot.slane %v1263_v63, 1  ;;  %v5424_v30 = vshll.u32 %v12793_v24, 16  ;;  %v12940_v39 = vld [vmem:[%s12326_s10 + $0x1c] sm:$0xf] }
  0x90   : > { %11764 = vmatprep.subr.msk.bf16.mxu0 %vm507_vm0, %v12824_v62  ;;  %11068 = vmatmul.mubr.msk.bf16.gmra.mrb[56].mxu1 %vm458_vm1, %v9658_v11  ;;  %v5378_v11 = vrot.slane %v5376_v6, 3  ;;  %v1234_v6 = vsel %vm1174_vm3, %v1229_v52, %v1233_v7  ;;  %v5374_v57 = vsel %vm691_vm2, %v12840_v1, %v12872_v10  ;;  %v1245_v58 = vor.u32 %v1243_v50, %v1241_v18  ;;  %v13150_v20 = vld [vmem:[%s12326_s10 + $0x58] sm:$0xf] }
  0x91   : > { %11071 = vmatprep.mubr.msk.bf16.mxu1 %vm458_vm1, %v9659_v42  ;;  %v12894_v42 = vld [vmem:[%s12326_s10 + $0x7c] sm:$0xff]   ;;  %v1237_v16 = vor.u32 %v1235_v54, %v1233_v7  ;;  %v1551_v54 = vld [vmem:[%s12326_s10 + $0x14] sm:$0x8]  ;;  %v12936_v13 = vrot.slane %v5415_v37, 4  ;;  %v5430_v52 = vshrl.u32 %v12812_v60, 16  ;;  %v5433_v7 = vshll.u32 %v12812_v60, 16 }
  0x92   : > { %v1287_v51 = vshll.u32 %v12894_v42, 16  ;;  %v12947_v1 = vrot.slane %v1279_v25, 1  ;;  %v1295_v9 = vshll.u32 %v12901_v48, 16  ;;  %v5439_v22 = vshrl.u32 %v12817_v31, 16 }
  0x93   : > { %v1242_v47 = vsel %vm1174_vm3, %v1237_v16, %v1241_v18  ;;  %v12953_v23 = vrot.slane %v5424_v30, 4  ;;  %v5442_v18 = vshll.u32 %v12817_v31, 16  ;;  %v1250_v60 = vsel %vm1174_vm3, %v1245_v58, %v1249_v29  ;;  %v12973_v16 = vld [vmem:[%s15044_s1 + $0x6] sm:$0x3] }
  0x94   : > { %v12955_v63 = vrot.slane %v1287_v51, 1  ;;  %v12963_v27 = vor.u32 %v5390_v2, %v5387_v21  ;;  %v1253_v45 = vor.u32 %v1251_v44, %v1249_v29  ;;  %v12976_v31 = vrot.slane %v5430_v52, 3  ;;  %v13104_v21 = vld [vmem:[%s12326_s10 + $0x4c] sm:$0xf] }
  0x95   : > { %v12978_v37 = vrot.slane %v5433_v7, 4  ;;  %v12983_v29 = vrot.slane %v1295_v9, 1  ;;  %v12985_v44 = vrot.slane %v5439_v22, 3  ;;  %v5451_v25 = vshll.u32 %v12916_v34, 16  ;;  %v13013_v9 = vld [vmem:[%s12326_s10 + $0x2c] sm:$0xf] }
  0x96   : > { %10784 = vmatmul.mubr.msk.bf16.gmra.mrb[4].mxu0 %vm458_vm1, %v1210_v8  ;;  %v12911_v8 = vrot.slane %v5412_v28, 3  ;;  %v9350_v28 = vcombine.low %v12940_v39, %v12703_v15  ;;  %v1258_v58 = vsel %vm1174_vm3, %v1253_v45, %v12885_v0  ;;  %v9351_v7 = vcombine.low %v12706_v26, %v12966_v32  ;;  %v13016_v22 = vld [vmem:[%s12326_s10 + $0x30] sm:$0xf] }
  0x97   : > { %10787 = vmatprep.mubr.msk.bf16.mxu0 %vm458_vm1, %v1218_v56  ;;  %v1275_v56 = vshrl.u32 %v12862_v17, 16  ;;  %15133 = vst [vmem:[#allocation3_spill] sm:$0xff] %v13016_v22  ;;  %v13026_v45 = vrot.slane %v5451_v25, 4 }
  0x98   : > { %11072 = vmatmul.mubr.msk.bf16.gmra.mrb[60].mxu1 %vm458_vm1, %v9660_v61  ;;  %v5421_v61 = vshrl.u32 %v12793_v24, 16  ;;  %v5382_v24 = vor.u32 %v5381_v55, %v5378_v11  ;;  %v9349_v11 = vcombine.low %v1551_v54, %v12924_v49  ;;  %v12960_v55 = vld [vmem:[%s12326_s10 + $0x8c] sm:$0xff]   ;;  %v12992_v54 = vrot.slane %v5442_v18, 4 }
  0x99   : > { %11077 = vmatprep.mubr.msk.bf16.mxu1 %vm458_vm1, %v5356_v14  ;;  %v11948_v14 = vld [vmem:[%s12326_s10 + $0x8c] ss:$0 sps:$4 sm:$0x11]   ;;  %v1678_v51 = vshrl.u32 %v9350_v28, 16  ;;  %v1261_v18 = vor.u32 %v1259_v33, %v12885_v0  ;;  %v1687_v25 = vshrl.u32 %v9351_v7, 16 }
  0x9a   : > { %v12949_v50 = vrot.slane %v5421_v61, 3  ;;  %v1303_v2 = vshll.u32 %v11948_v14, 16  ;;  %v12990_v61 = vld [vmem:[%s12326_s10 + $0x94] sm:$0xff]   ;;  %v5383_v30 = vsel %vm691_vm2, %v12872_v10, %v5382_v24  ;;  %v1681_v14 = vshll.u32 %v9350_v28, 16 }
  0x9b   : > { %v5716_v10 = vshll.u32 %v12960_v55, 16  ;;  %v5400_v28 = vor.u32 %v12889_v12, %v12887_v38  ;;  %v13044_v33 = vrot.slane %v1678_v51, 3  ;;  %v5721_v38 = vshll.u32 %v12990_v61, 16  ;;  %v13051_v12 = vld [vmem:[%s12326_s10 + $0x3c] sm:$0xf] }
  0x9c   : > { %v13007_v52 = vrot.slane %v1303_v2, 1  ;;  %v13032_v2 = vor.u32 %v12907_v35, %v12896_v43  ;;  %v13046_v0 = vrot.slane %v1681_v14, 4  ;;  %v13064_v14 = vld [vmem:[%s12326_s10 + $0xa4] sm:$0xff]  }
  0x9d   : > { %v13054_v43 = vrot.slane %v5716_v10, 1  ;;  %v13086_v10 = vld [vmem:[%s12326_s10 + $0x44] sm:$0xf] }
  0x9e   : > { %10788 = vmatmul.mubr.msk.bf16.gmra.mrb[8].mxu0 %vm458_vm1, %v1226_v59  ;;  %v5448_v59 = vshrl.u32 %v12916_v34, 16  ;;  %v1266_v34 = vsel %vm1174_vm3, %v1261_v18, %v12891_v41  ;;  %v5401_v18 = vsel %vm691_vm2, %v12963_v27, %v5400_v28 }
  0x9f   : > { %10791 = vmatprep.mubr.msk.bf16.mxu0 %vm458_vm1, %v1234_v6  ;;  %v1670_v6 = vshrl.u32 %v9349_v11, 16 }
  0xa0   : > { %11078 = vmatmul.mubr.msk.bf16.vlgmr.msra.gmra.mrb[40].mxu1 %vm458_vm1, %v5365_v5  ;;  %v13101_v5 = vld [vmem:[%s12326_s10 + $0x48] sm:$0xf] }
  0xa1   : > { %11102 = vmatpush3.bf16.msra.mxu1 %v12844_v3  ;;  %11081 = vmatprep.mubr.msk.bf16.mxu1 %vm458_vm1, %v5374_v57  ;;  %v1673_v3 = vshll.u32 %v9349_v11, 16  ;;  %v13000_v57 = vld [vmem:[%s12326_s10 + $0x9c] sm:$0xff]   ;;  %v13024_v11 = vrot.slane %v5448_v59, 3  ;;  %v13034_v40 = vrot.slane %v1670_v6, 3  ;;  %v13076_v6 = vsel %vm507_vm0, %v12824_v62, 0 }
  0xa2   : > { %11773 = vmatprep.subr.msk.bf16.mxu1 %vm507_vm0, %v12973_v16  ;;  %v5729_v51 = vshll.u32 %v13000_v57, 16  ;;  %v13083_v59 = vld [vmem:[%s12326_s10 + $0x40] sm:$0xf]  ;;  %v13095_v62 = vsel %vm507_vm0, %v12973_v16, 0  ;;  %v13115_v16 = vld [vmem:[%s12326_s10 + $0x50] sm:$0xf] }
  0xa6   : > { %10792 = vmatmul.mubr.msk.bf16.gmra.mrb[12].mxu0 %vm458_vm1, %v1242_v47  ;;  %v5392_v47 = vsel %vm691_vm2, %v5382_v24, %v12963_v27  ;;  %v13039_v24 = vld [vmem:[%s12326_s10 + $0x34] sm:$0xf]  ;;  %v1269_v27 = vor.u32 %v1267_v46, %v12891_v41  ;;  %v13153_v46 = vld [vmem:[%s12326_s10 + $0x5c] sm:$0xf] }
  0xa7   : > { %10795 = vmatprep.mubr.msk.bf16.mxu0 %vm458_vm1, %v1250_v60  ;;  %v13036_v60 = vrot.slane %v1673_v3, 4  ;;  %15134 = vst [vmem:[#allocation4_spill] sm:$0xff] %v13039_v24  ;;  %v1690_v3 = vshll.u32 %v9351_v7, 16  ;;  %v13072_v7 = vrot.slane %v5721_v38, 1  ;;  %v13080_v35 = vcombine.low %v13039_v24, %v13042_v4 }
  0xa8   : > { %11082 = vmatmul.mubr.msk.bf16.gmra.mrb[44].mxu1 %vm458_vm1, %v5383_v30  ;;  %v9352_v30 = vcombine.low %v13013_v9, %v13016_v22  ;;  %v13091_v38 = vrot.slane %v1687_v25, 3  ;;  %v1277_v4 = vor.u32 %v1275_v56, %v12909_v53  ;;  %v13120_v24 = vrot.slane %v5729_v51, 1  ;;  %v13123_v22 = vld [vmem:[%s12326_s10 + $0xb4] sm:$0xff]  }
  0xa9   : > { %11085 = vmatprep.mubr.msk.bf16.mxu1 %vm458_vm1, %v5392_v47  ;;  %v13098_v47 = vld [vmem:[%s12326_s10 + $0xac] sm:$0xff]   ;;  %v13112_v25 = vrot.slane %v1690_v3, 4  ;;  %v13137_v56 = vcombine.low %v13051_v12, %v13083_v59  ;;  %v1274_v51 = vsel %vm1174_vm3, %v1269_v27, %v12909_v53 }
  0xaa   : > { %v1696_v19 = vshrl.u32 %v9352_v30, 16  ;;  %v1282_v3 = vsel %vm1174_vm3, %v1277_v4, %v12947_v1  ;;  %v13185_v4 = vld [vmem:[%s12326_s10 + $0x70] sm:$0xf] }
  0xab   : > { %15137 = vst [vmem:[#allocation6_spill] sm:$0xff] %v13185_v4 }
  0xac   : > { %v13146_v17 = vrot.slane %v1696_v19, 3  ;;  %v13167_v19 = vld [vmem:[%s12326_s10 + $0x68] sm:$0xf] }
  0xae   : > { %10796 = vmatmul.mubr.msk.bf16.gmra.mrb[16].mxu0 %vm458_vm1, %v1258_v58  ;;  %v5410_v58 = vsel %vm691_vm2, %v5400_v28, %v13032_v2  ;;  %v13126_v28 = vld [vmem:[%s12326_s10 + $0x54] sm:$0xf] }
  0xaf   : > { %10799 = vmatprep.mubr.msk.bf16.mxu0 %vm458_vm1, %v1266_v34  ;;  %v1699_v34 = vshll.u32 %v9352_v30, 16  ;;  %v5418_v30 = vor.u32 %v12936_v13, %v12911_v8  ;;  %v13161_v8 = vld [vmem:[%s12326_s10 + $0x60] sm:$0xf]  ;;  %v13164_v13 = vld [vmem:[%s12326_s10 + $0x64] sm:$0xf] }
  0xb0   : > { %11086 = vmatmul.mubr.msk.bf16.gmra.mrb[48].mxu1 %vm458_vm1, %v5401_v18  ;;  %v13194_v18 = vld [vmem:[%s12326_s10 + $0x74] sm:$0xf] }
  0xb1   : > { %11089 = vmatprep.mubr.msk.bf16.mxu1 %vm458_vm1, %v5410_v58  ;;  %v5427_v58 = vor.u32 %v12953_v23, %v12949_v50  ;;  %v1701_v53 = vrot.slane %v1699_v34, 4  ;;  %v5419_v23 = vsel %vm691_vm2, %v13032_v2, %v5418_v30  ;;  %v15136_v34 = vshrl.u32 %v12883_v36, 16  ;;  %15139 = vst [vmem:[#allocation7_spill] sm:$0xff] %v13194_v18  ;;  %v13211_v36 = vld [vmem:[%s12326_s10 + $0x78] sm:$0xf] }
  0xb2   : > { %v15138_v2 = vshrl.u32 %v12894_v42, 16  ;;  %15140 = vst [vmem:[#allocation8_spill] sm:$0xff] %v13211_v36  ;;  %v13214_v50 = vld [vmem:[%s12326_s10 + $0x7c] sm:$0xf] }
  0xb3   : > { %v1285_v27 = vor.u32 %v15136_v34, %v12947_v1  ;;  %v5428_v41 = vsel %vm691_vm2, %v5418_v30, %v5427_v58  ;;  %v5436_v30 = vor.u32 %v12978_v37, %v12976_v31  ;;  %15141 = vst [vmem:[#allocation9_spill] sm:$0xff] %v13214_v50  ;;  %v13217_v1 = vld [vmem:[%s12326_s10 + $0x80] sm:$0xf]  ;;  %v15144_v31 = vshrl.u32 %v12901_v48, 16 }
  0xb4   : > { %15142 = vst [vmem:[#allocation10_spill] sm:$0xff] %v13217_v1 }
  0xb5   : > { %v1290_v34 = vsel %vm1174_vm3, %v1285_v27, %v12955_v63  ;;  %v1301_v37 = vor.u32 %v15144_v31, %v12983_v29  ;;  %v1684_v27 = vor.u32 %v13046_v0, %v13044_v33  ;;  %v13248_v33 = vld [vmem:[%s12326_s10 + $0x88] sm:$0xf]  ;;  %v13251_v0 = vld [vmem:[%s12326_s10 + $0x8c] sm:$0xf] }
  0xb6   : > { %10800 = vmatmul.mubr.msk.bf16.gmra.mrb[20].mxu0 %vm458_vm1, %v1274_v51  ;;  %v13182_v51 = vld [vmem:[%s12326_s10 + $0x6c] sm:$0xf]  ;;  %15146 = vst [vmem:[#allocation12_spill] sm:$0xff] %v13248_v33  ;;  %15147 = vst [vmem:[#allocation13_spill] sm:$0xff] %v13251_v0 }
  0xb7   : > { %10803 = vmatprep.mubr.msk.bf16.mxu0 %vm458_vm1, %v1282_v3  ;;  %v1293_v3 = vor.u32 %v15138_v2, %v12955_v63  ;;  %v5445_v2 = vor.u32 %v12992_v54, %v12985_v44  ;;  %v5437_v63 = vsel %vm691_vm2, %v5427_v58, %v5436_v30  ;;  %v1306_v48 = vsel %vm1174_vm3, %v1301_v37, %v13007_v52 }
  0xb8   : > { %11090 = vmatmul.mubr.msk.bf16.gmra.mrb[52].mxu1 %vm458_vm1, %v5419_v23  ;;  %v13220_v23 = vld [vmem:[%s12326_s10 + $0x84] sm:$0xf]  ;;  %v1693_v52 = vor.u32 %v13112_v25, %v13091_v38  ;;  %v9355_v38 = vcombine.low %v13086_v10, %v13101_v5  ;;  %v13275_v25 = vld [vmem:[%s12326_s10 + $0xbc] sm:$0xff]  }
  0xb9   : > { %11093 = vmatprep.mubr.msk.bf16.mxu1 %vm458_vm1, %v5428_v41  ;;  %v1298_v42 = vsel %vm1174_vm3, %v1293_v3, %v12983_v29  ;;  %15143 = vst [vmem:[#allocation11_spill] sm:$0xff] %v13220_v23  ;;  %v5446_v54 = vsel %vm691_vm2, %v5436_v30, %v5445_v2  ;;  %v1676_v41 = vor.u32 %v13036_v60, %v13034_v40  ;;  %v15145_v40 = vshrl.u32 %v12960_v55, 16  ;;  %v13257_v30 = vld [vmem:[%s12326_s10 + $0x94] sm:$0xf] }
  0xba   : > { %v5454_v29 = vor.u32 %v13026_v45, %v13024_v11  ;;  %15149 = vst [vmem:[#allocation15_spill] sm:$0xff] %v13257_v30  ;;  %v1694_v37 = vsel %vm691_vm2, %v1684_v27, %v1693_v52 }
  0xbb   : > { %v1685_v3 = vsel %vm691_vm2, %v1676_v41, %v1684_v27  ;;  %v5719_v60 = vor.u32 %v13054_v43, %v15145_v40 }
  0xbc   : > { %v5455_v11 = vsel %vm691_vm2, %v5445_v2, %v5454_v29  ;;  %v15150_v2 = vshrl.u32 %v12990_v61, 16  ;;  %v5749_v61 = vshrl.u32 %v13098_v47, 16 }
  0xbd   : > { %v5724_v43 = vsel %vm1174_vm3, %v5719_v60, %v13072_v7 }
  0xbe   : > { %10804 = vmatmul.mubr.msk.bf16.gmra.mrb[24].mxu0 %vm458_vm1, %v1290_v34  ;;  %v13254_v34 = vld [vmem:[%s12326_s10 + $0x90] sm:$0xf]  ;;  %v5727_v31 = vor.u32 %v15150_v2, %v13072_v7  ;;  %v15155_v7 = vshrl.u32 %v13137_v56, 16 }
  0xbf   : > { %10807 = vmatprep.mubr.msk.bf16.mxu0 %vm458_vm1, %v1298_v42  ;;  %15148 = vst [vmem:[#allocation14_spill] sm:$0xff] %v13254_v34  ;;  %v1702_v42 = vor.u32 %v1701_v53, %v13146_v17  ;;  %v15153_v53 = vshll.u32 %v13080_v35, 16 }
  0xc0   : > { %11094 = vmatmul.mubr.msk.bf16.gmra.mrb[56].mxu1 %vm458_vm1, %v5437_v63  ;;  %v5733_v63 = vshrl.u32 %v13000_v57, 16  ;;  %v15152_v57 = vshrl.u32 %v13080_v35, 16  ;;  %v1716_v27 = vrot.slane %v15155_v7, 3  ;;  %v9356_v35 = vcombine.low %v13104_v21, %v13115_v16 }
  0xc1   : > { %11097 = vmatprep.mubr.msk.bf16.mxu1 %vm458_vm1, %v5446_v54  ;;  %v15151_v54 = vshll.u32 %v13064_v14, 16  ;;  %v1710_v29 = vrot.slane %v15153_v53, 4  ;;  %v1726_v53 = vshll.u32 %v9355_v38, 16  ;;  %v5761_v7 = vshll.u32 %v13275_v25, 16 }
  0xc2   : > { %v1707_v17 = vrot.slane %v15152_v57, 3  ;;  %v5735_v57 = vor.u32 %v5733_v63, %v13120_v24  ;;  %v1732_v63 = vshrl.u32 %v9356_v35, 16 }
  0xc3   : > { %v5739_v41 = vrot.slane %v15151_v54, 1  ;;  %v1703_v54 = vsel %vm691_vm2, %v1693_v52, %v1702_v42  ;;  %v5732_v52 = vsel %vm1174_vm3, %v5727_v31, %v13120_v24 }
  0xc6   : > { %10808 = vmatmul.mubr.msk.bf16.gmra.mrb[28].mxu0 %vm458_vm1, %v1306_v48  ;;  %v5741_v48 = vshrl.u32 %v13064_v14, 16  ;;  %v15156_v14 = vshll.u32 %v13137_v56, 16  ;;  %v1711_v56 = vor.u32 %v1710_v29, %v1707_v17  ;;  %v1728_v17 = vrot.slane %v1726_v53, 4 }
  0xc7   : > { %10813 = vmatprep.mubr.msk.bf16.mxu0 %vm458_vm1, %v1685_v3  ;;  %v15154_v3 = vshll.u32 %v13098_v47, 16  ;;  %v1723_v47 = vshrl.u32 %v9355_v38, 16  ;;  %v1735_v38 = vshll.u32 %v9356_v35, 16  ;;  %v1734_v29 = vrot.slane %v1732_v63, 3  ;;  %v11967_v63 = vld [vmem:[%s12326_s10 + $0xcc] sm:$0xff]  }
  0xc8   : > { %11098 = vmatmul.mubr.msk.bf16.gmra.mrb[60].mxu1 %vm458_vm1, %v5455_v11  ;;  %v1719_v60 = vrot.slane %v15156_v14, 4  ;;  %v15157_v11 = vshll.u32 %v13123_v22, 16  ;;  %v13316_v14 = vld [vmem:[%s12326_s10 + $0xc4] sm:$0xff]   ;;  %v1712_v24 = vsel %vm691_vm2, %v1702_v42, %v1711_v56  ;;  %v9358_v42 = vcombine.low %v13153_v46, %v13161_v8 }
  0xc9   : > { %v5747_v40 = vrot.slane %v15154_v3, 1  ;;  %11103 = vmatprep.mubr.msk.bf16.mxu1 %vm458_vm1, %v5724_v43  ;;  %v13306_v43 = vld [vmem:[%s15044_s1 + $0xa] sm:$0x3]  ;;  %v5757_v3 = vshrl.u32 %v13123_v22, 16  ;;  %v13324_v22 = vld [vmem:[%s15044_s1 + $0x8] sm:$0x3] }
  0xca   : > { %v5755_v2 = vrot.slane %v15157_v11, 1  ;;  %v5740_v11 = vsel %vm1174_vm3, %v5735_v57, %v5739_v41  ;;  %v1720_v45 = vor.u32 %v1719_v60, %v1716_v27  ;;  %v1725_v31 = vrot.slane %v1723_v47, 3 }
  0xcb   : > { %v1737_v27 = vrot.slane %v1735_v38, 4  ;;  %v9357_v60 = vcombine.low %v13126_v28, %v13150_v20 }
  0xcc   : > { %v1721_v35 = vsel %vm691_vm2, %v1711_v56, %v1720_v45  ;;  %v1750_v56 = vshrl.u32 %v9358_v42, 16  ;;  %v5759_v38 = vor.u32 %v5757_v3, %v5755_v2 }
  0xcd   : > { %v1741_v57 = vshrl.u32 %v9357_v60, 16  ;;  %v1744_v47 = vshll.u32 %v9357_v60, 16  ;;  %v1738_v53 = vor.u32 %v1737_v27, %v1734_v29 }
  0xce   : > { %10814 = vmatmul.mubr.msk.bf16.vlgmr.msra.gmra.mrb[0].mxu0 %vm458_vm1, %v1694_v37  ;;  %v5765_v37 = vshrl.u32 %v13275_v25, 16  ;;  %v5763_v25 = vrot.slane %v5761_v7, 1  ;;  %v9359_v7 = vcombine.low %v13164_v13, %v13167_v19  ;;  %v1752_v27 = vrot.slane %v1750_v56, 3 }
  0xcf   : > { %10846 = vmatpush3.bf16.msra.mxu0 %v13076_v6  ;;  %10817 = vmatprep.mubr.msk.bf16.mxu0 %vm458_vm1, %v1703_v54  ;;  %v5743_v6 = vor.u32 %v5741_v48, %v5739_v41  ;;  %v5751_v54 = vor.u32 %v5749_v61, %v5747_v40  ;;  %v1729_v48 = vor.u32 %v1728_v17, %v1725_v31  ;;  %v1746_v31 = vrot.slane %v1744_v47, 4  ;;  %v11969_v17 = vld [vmem:[%s12326_s10 + $0xd4] sm:$0xff]  }
  0xd0   : > { %11765 = vmatprep.subr.msk.bf16.mxu0 %vm507_vm0, %v13306_v43  ;;  %11104 = vmatmul.mubr.msk.bf16.vlgmr.msra.gmra.mrb[40].mxu1 %vm458_vm1, %v5732_v52  ;;  %v1753_v52 = vshll.u32 %v9358_v42, 16  ;;  %v5777_v42 = vshll.u32 %v11967_v63, 16  ;;  %v1762_v3 = vshll.u32 %v9359_v7, 16 }
  0xd1   : > { %11128 = vmatpush3.bf16.msra.mxu1 %v13095_v62  ;;  %11107 = vmatprep.mubr.msk.bf16.mxu1 %vm458_vm1, %v5740_v11  ;;  %v5769_v62 = vshll.u32 %v13316_v14, 16  ;;  %v5748_v41 = vsel %vm1174_vm3, %v5743_v6, %v5747_v40  ;;  %v5756_v61 = vsel %vm1174_vm3, %v5751_v54, %v5755_v2  ;;  %v5767_v11 = vor.u32 %v5765_v37, %v5763_v25 }
  0xd2   : > { %11774 = vmatprep.subr.msk.bf16.mxu1 %vm507_vm0, %v13324_v22  ;;  %v1730_v40 = vsel %vm691_vm2, %v1720_v45, %v1729_v48  ;;  %v1743_v6 = vrot.slane %v1741_v57, 3  ;;  %v1739_v29 = vsel %vm691_vm2, %v1729_v48, %v1738_v53  ;;  %v1755_v60 = vrot.slane %v1753_v52, 4 }
  0xd3   : > { %v5773_v54 = vshrl.u32 %v13316_v14, 16  ;;  %v1759_v2 = vshrl.u32 %v9359_v7, 16  ;;  %v5764_v45 = vsel %vm1174_vm3, %v5759_v38, %v5763_v25  ;;  %v1764_v52 = vrot.slane %v1762_v3, 4  ;;  %v11971_v7 = vld [vmem:[%s12326_s10 + $0xdc] sm:$0xff]   ;;  %v13377_v3 = vld [vmem:[%s12326_s10 + $0xe4] sm:$0xff]  }
  0xd4   : > { %v1747_v37 = vor.u32 %v1746_v31, %v1743_v6  ;;  %v1756_v57 = vor.u32 %v1755_v60, %v1752_v27  ;;  %v9361_v25 = vcombine.low %v13194_v18, %v13211_v36  ;;  %v6005_v6 = vld [vmem:[%s12326_s10 + $0x94] sm:$0x8]  ;;  %v13368_v31 = vld [vmem:[%s12326_s10 + $0x98] sm:$0xf]  ;;  %v13373_v27 = vpop.permute.xlu0 %4196  ;;  %v13401_v36 = vld [vmem:[%s12326_s10 + $0xa8] sm:$0xf] }
  0xd5   : > { %v1761_v56 = vrot.slane %v1759_v2, 3  ;;  %15158 = vst [vmem:[#allocation16_spill] sm:$0xff] %v13373_v27  ;;  %15161 = vst [vmem:[#allocation19_spill] sm:$0xff] %v13401_v36 }
  0xd6   : > { %10818 = vmatmul.mubr.msk.bf16.gmra.mrb[4].mxu0 %vm458_vm1, %v1712_v24  ;;  %v5771_v24 = vrot.slane %v5769_v62, 1  ;;  %v5781_v62 = vshrl.u32 %v11967_v63, 16  ;;  %v9362_v63 = vcombine.low %v13214_v50, %v13217_v1  ;;  %v1748_v38 = vsel %vm691_vm2, %v1738_v53, %v1747_v37 }
  0xd7   : > { %10821 = vmatprep.mubr.msk.bf16.mxu0 %vm458_vm1, %v1721_v35  ;;  %v9360_v35 = vcombine.low %v13182_v51, %v13185_v4  ;;  %v1757_v60 = vsel %vm691_vm2, %v1747_v37, %v1756_v57  ;;  %v5789_v53 = vshrl.u32 %v11969_v17, 16  ;;  %v1780_v55 = vshll.u32 %v9361_v25, 16 }
  0xd8   : > { %11108 = vmatmul.mubr.msk.bf16.gmra.mrb[44].mxu1 %vm458_vm1, %v5748_v41  ;;  %v5785_v41 = vshll.u32 %v11969_v17, 16  ;;  %v5772_v48 = vsel %vm1174_vm3, %v5767_v11, %v5771_v24  ;;  %v5775_v11 = vor.u32 %v5773_v54, %v5771_v24  ;;  %v5793_v24 = vshll.u32 %v11971_v7, 16 }
  0xd9   : > { %11111 = vmatprep.mubr.msk.bf16.mxu1 %vm458_vm1, %v5756_v61  ;;  %v1768_v14 = vshrl.u32 %v9360_v35, 16  ;;  %v1771_v47 = vshll.u32 %v9360_v35, 16  ;;  %v5779_v61 = vrot.slane %v5777_v42, 1  ;;  %v1777_v54 = vshrl.u32 %v9361_v25, 16 }
  0xda   : > { %v5787_v35 = vrot.slane %v5785_v41, 1  ;;  %v1786_v58 = vshrl.u32 %v9362_v63, 16  ;;  %v9725_v37 = vcombine.low %v6005_v6, %v13368_v31  ;;  %v11975_v25 = vld [vmem:[%s12326_s10 + $0xec] ss:$0 sps:$4 sm:$0x11]   ;;  %v5795_v6 = vrot.slane %v5793_v24, 1 }
  0xdb   : > { %v1770_v42 = vrot.slane %v1768_v14, 3  ;;  %v1773_v2 = vrot.slane %v1771_v47, 4  ;;  %v5780_v41 = vsel %vm1174_vm3, %v5775_v11, %v5779_v61  ;;  %v1789_v14 = vshll.u32 %v9362_v63, 16  ;;  %v13397_v11 = vpop.permute.xlu0 %4201 }
  0xdc   : > { %v5791_v1 = vor.u32 %v5789_v53, %v5787_v35  ;;  %v1779_v50 = vrot.slane %v1777_v54, 3  ;;  %15160 = vst [vmem:[#allocation18_spill] sm:$0xff] %v13397_v11  ;;  %v1782_v63 = vrot.slane %v1780_v55, 4  ;;  %v9364_v54 = vcombine.low %v13251_v0, %v13254_v34 }
  0xde   : > { %10822 = vmatmul.mubr.msk.bf16.gmra.mrb[8].mxu0 %vm458_vm1, %v1730_v40  ;;  %v5783_v40 = vor.u32 %v5781_v62, %v5779_v61  ;;  %v13382_v62 = vpop.permute.xlu1 %4206  ;;  %v13395_v61 = vld [vmem:[%s12326_s10 + $0xa4] sm:$0xf]  ;;  %v1804_v18 = vshrl.u32 %v9364_v54, 16  ;;  %v1807_v4 = vshll.u32 %v9364_v54, 16  ;;  %v13443_v54 = vld [vmem:[%s12326_s10 + $0xbc] sm:$0xf] }
  0xdf   : > { %10825 = vmatprep.mubr.msk.bf16.mxu0 %vm458_vm1, %v1739_v29  ;;  %v13371_v29 = vld [vmem:[%s12326_s10 + $0x9c] sm:$0xf]  ;;  %15159 = vst [vmem:[#allocation17_spill] sm:$0xff] %v13382_v62 }
  0xe0   : > { %11112 = vmatmul.mubr.msk.bf16.gmra.mrb[48].mxu1 %vm458_vm1, %v5764_v45  ;;  %v13380_v45 = vld [vmem:[%s12326_s10 + $0xa0] sm:$0xf]  ;;  %v5788_v47 = vsel %vm1174_vm3, %v5783_v40, %v5787_v35  ;;  %v6095_v40 = vshrl.u32 %v9725_v37, 16  ;;  %v6098_v35 = vshll.u32 %v9725_v37, 16  ;;  %v13416_v37 = vld [vmem:[%s12326_s10 + $0xac] sm:$0xf] }
  0xe1   : > { %11115 = vmatprep.mubr.msk.bf16.mxu1 %vm458_vm1, %v5772_v48  ;;  %v1765_v48 = vor.u32 %v1764_v52, %v1761_v56  ;;  %v9726_v17 = vcombine.low %v13371_v29, %v13380_v45  ;;  %v1774_v56 = vor.u32 %v1773_v2, %v1770_v42  ;;  %v5797_v52 = vshrl.u32 %v11971_v7, 16 }
  0xe2   : > { %v9363_v7 = vcombine.low %v13220_v23, %v13248_v33  ;;  %v13406_v53 = vpop.permute.xlu1 %4211  ;;  %v5805_v33 = vshrl.u32 %v13377_v3, 16  ;;  %v5809_v23 = vshll.u32 %v11975_v25, 16  ;;  %v13423_v25 = vpop.permute.xlu0 %4216 }
  0xe3   : > { %v1766_v44 = vsel %vm691_vm2, %v1756_v57, %v1765_v48  ;;  %v1791_v57 = vrot.slane %v1789_v14, 4  ;;  %v6103_v42 = vshrl.u32 %v9726_v17, 16  ;;  %v6106_v2 = vshll.u32 %v9726_v17, 16  ;;  %15162 = vst [vmem:[#allocation20_spill] sm:$0xff] %v13406_v53  ;;  %v13419_v17 = vld [vmem:[%s12326_s10 + $0xb0] sm:$0xf] }
  0xe4   : > { %v1775_v24 = vsel %vm691_vm2, %v1765_v48, %v1774_v56  ;;  %v5799_v55 = vor.u32 %v5797_v52, %v5795_v6  ;;  %v9727_v14 = vcombine.low %v13395_v61, %v13401_v36  ;;  %15163 = vst [vmem:[#allocation21_spill] sm:$0xff] %v13419_v17  ;;  %v1783_v48 = vor.u32 %v1782_v63, %v1779_v50 }
  0xe5   : > { %v1795_v52 = vshrl.u32 %v9363_v7, 16  ;;  %15164 = vst [vmem:[#allocation22_spill] sm:$0xff] %v13423_v25  ;;  %v5811_v63 = vrot.slane %v5809_v23, 1 }
  0xe6   : > { %10826 = vmatmul.mubr.msk.bf16.gmra.mrb[12].mxu0 %vm458_vm1, %v1748_v38  ;;  %v5801_v38 = vshll.u32 %v13377_v3, 16  ;;  %v6108_v3 = vrot.slane %v6106_v2, 4  ;;  %v1784_v2 = vsel %vm691_vm2, %v1774_v56, %v1783_v48  ;;  %v13450_v56 = vpop.permute.xlu0 %4226 }
  0xe7   : > { %10829 = vmatprep.mubr.msk.bf16.mxu0 %vm458_vm1, %v1757_v60  ;;  %v1788_v60 = vrot.slane %v1786_v58, 3  ;;  %15169 = vst [vmem:[#allocation27_spill] sm:$0xff] %v13450_v56 }
  0xe8   : > { %11116 = vmatmul.mubr.msk.bf16.gmra.mrb[52].mxu1 %vm458_vm1, %v5780_v41  ;;  %v5803_v58 = vrot.slane %v5801_v38, 1  ;;  %v5796_v41 = vsel %vm1174_vm3, %v5791_v1, %v5795_v6  ;;  %v1798_v38 = vshll.u32 %v9363_v7, 16  ;;  %v6100_v1 = vrot.slane %v6098_v35, 4  ;;  %v13428_v7 = vpop.permute.xlu1 %4221 }
  0xe9   : > { %11119 = vmatprep.mubr.msk.bf16.mxu1 %vm458_vm1, %v5788_v47  ;;  %v6097_v47 = vrot.slane %v6095_v40, 3  ;;  %v1792_v34 = vor.u32 %v1791_v57, %v1788_v60  ;;  %v6105_v6 = vrot.slane %v6103_v42, 3  ;;  %v6112_v40 = vshrl.u32 %v9727_v14, 16  ;;  %15165 = vst [vmem:[#allocation23_spill] sm:$0xff] %v13428_v7 }
  0xea   : > { %v5804_v0 = vsel %vm1174_vm3, %v5799_v55, %v5803_v58  ;;  %v5807_v50 = vor.u32 %v5805_v33, %v5803_v58  ;;  %v1797_v60 = vrot.slane %v1795_v52, 3  ;;  %v1800_v57 = vrot.slane %v1798_v38, 4  ;;  %v13437_v55 = vld [vmem:[%s12326_s10 + $0xb4] sm:$0xf]  ;;  %v13440_v58 = vld [vmem:[%s12326_s10 + $0xb8] sm:$0xf] }
  0xeb   : > { %v6115_v35 = vshll.u32 %v9727_v14, 16  ;;  %v9365_v42 = vcombine.low %v13257_v30, %v13257_v30  ;;  %v1793_v33 = vsel %vm691_vm2, %v1783_v48, %v1792_v34  ;;  %v6109_v23 = vor.u32 %v6108_v3, %v6105_v6  ;;  %15166 = vst [vmem:[#allocation24_spill] sm:$0xff] %v13440_v58 }
  0xec   : > { %v1809_v52 = vrot.slane %v1807_v4, 4  ;;  %v9729_v4 = vcombine.low %v13437_v55, %v13440_v58 }
  0xed   : > { %v1813_v6 = vshrl.u32 %v9365_v42, 16  ;;  %v1816_v3 = vshll.u32 %v9365_v42, 16 }
  0xee   : > { %10830 = vmatmul.mubr.msk.bf16.gmra.mrb[16].mxu0 %vm458_vm1, %v1766_v44  ;;  %v9728_v44 = vcombine.low %v13416_v37, %v13419_v17  ;;  %v13446_v17 = vld [vmem:[%s12326_s10 + $0xc0] sm:$0xf] }
  0xef   : > { %10833 = vmatprep.mubr.msk.bf16.mxu0 %vm458_vm1, %v1775_v24  ;;  %v6101_v24 = vor.u32 %v6100_v1, %v6097_v47  ;;  %15167 = vst [vmem:[#allocation25_spill] sm:$0xff] %v13446_v17  ;;  %v1801_v47 = vor.u32 %v1800_v57, %v1797_v60  ;;  %v6117_v1 = vrot.slane %v6115_v35, 4 }
  0xf0   : > { %11120 = vmatmul.mubr.msk.bf16.gmra.mrb[56].mxu1 %vm458_vm1, %v5796_v41  ;;  %v1806_v41 = vrot.slane %v1804_v18, 3  ;;  %v6121_v14 = vshrl.u32 %v9728_v44, 16  ;;  %v6124_v38 = vshll.u32 %v9728_v44, 16  ;;  %v5812_v18 = vsel %vm1174_vm3, %v5807_v50, %v5811_v63 }
  0xf1   : > { %11123 = vmatprep.mubr.msk.bf16.mxu1 %vm458_vm1, %v5804_v0  ;;  %v6114_v0 = vrot.slane %v6112_v40, 3  ;;  %v9730_v44 = vcombine.low %v13443_v54, %v13446_v17  ;;  %v13463_v40 = vpop.permute.xlu1 %4231  ;;  %v6110_v60 = vsel %vm691_vm2, %v6101_v24, %v6109_v23  ;;  %v1802_v50 = vsel %vm691_vm2, %v1792_v34, %v1801_v47 }
  0xf2   : > { %v13448_v30 = vpop.f32.mrb[0].mxu1  ;;  %15172 = vst [vmem:[#allocation30_spill] sm:$0xff] %v13463_v40  ;;  %v1810_v57 = vor.u32 %v1809_v52, %v1806_v41  ;;  %v6123_v35 = vrot.slane %v6121_v14, 3  ;;  %v6126_v42 = vrot.slane %v6124_v38, 4  ;;  %v13475_v41 = vld [vmem:[%s12326_s10 + $0xc8] sm:$0xf]  ;;  %v13477_v52 = vpop.permute.xlu0 %4236 }
  0xf3   : > { %15168 = vst [vmem:[#allocation26_spill] sm:$0xff] %v13448_v30  ;;  %v13452_v48 = vpop.f32.mrb[1].mxu1  ;;  %v6118_v63 = vor.u32 %v6117_v1, %v6114_v0  ;;  %v6133_v30 = vshll.u32 %v9729_v4, 16  ;;  %v6139_v17 = vshrl.u32 %v9730_v44, 16  ;;  %v6142_v24 = vshll.u32 %v9730_v44, 16  ;;  %15174 = vst [vmem:[#allocation32_spill] sm:$0xff] %v13475_v41 }
  0xf4   : > { %15170 = vst [vmem:[#allocation28_spill] sm:$0xff] %v13452_v48  ;;  %v13455_v36 = vpop.f32.mrb[2].mxu1  ;;  %v13471_v48 = vld [vmem:[%s12326_s10 + $0xc4] sm:$0xf]  ;;  %15175 = vst [vmem:[#allocation33_spill] sm:$0xff] %v13477_v52  ;;  %v1811_v14 = vsel %vm691_vm2, %v1801_v47, %v1810_v57  ;;  %v6127_v34 = vor.u32 %v6126_v42, %v6123_v35 }
  0xf5   : > { %15171 = vst [vmem:[#allocation29_spill] sm:$0xff] %v13455_v36  ;;  %v1818_v36 = vrot.slane %v1816_v3, 4  ;;  %v13482_v0 = vpop.permute.xlu1 %4241  ;;  %v13485_v1 = vld [vmem:[%s12326_s10 + $0xcc] sm:$0xf]  ;;  %v9731_v44 = vcombine.low %v13471_v48, %v13475_v41  ;;  %v6135_v35 = vrot.slane %v6133_v30, 4  ;;  %v6141_v42 = vrot.slane %v6139_v17, 3 }
  0xf6   : > { %10834 = vmatmul.mubr.msk.bf16.gmra.mrb[20].mxu0 %vm458_vm1, %v1784_v2  ;;  %v13465_v2 = vpop.f32.mrb[3].mxu1  ;;  %15177 = vst [vmem:[#allocation35_spill] sm:$0xff] %v13482_v0  ;;  %15178 = vst [vmem:[#allocation36_spill] sm:$0xff] %v13485_v1  ;;  %v13511_v30 = vld [vmem:[%s15044_s1 + $0xa] sm:$0x3] }
  0xf7   : > { %10837 = vmatprep.mubr.msk.bf16.mxu0 %vm458_vm1, %v1793_v33  ;;  %15173 = vst [vmem:[#allocation31_spill] sm:$0xff] %v13465_v2  ;;  %v1815_v33 = vrot.slane %v1813_v6, 3  ;;  %v6130_v2 = vshrl.u32 %v9729_v4, 16  ;;  %v13488_v6 = vld [vmem:[%s12326_s10 + $0xd0] sm:$0xf]  ;;  %v6148_v17 = vshrl.u32 %v9731_v44, 16 }
  0xf8   : > { %11124 = vmatmul.mubr.msk.bf16.gmra.mrb[60].mxu1 %vm458_vm1, %v5812_v18  ;;  %15179 = vst [vmem:[#allocation37_spill] sm:$0xff] %v13488_v6  ;;  %v6119_v18 = vsel %vm691_vm2, %v6109_v23, %v6118_v63  ;;  %v9732_v23 = vcombine.low %v13485_v1, %v13488_v6  ;;  %v13530_v6 = vld [vmem:[%s12326_s10 + $0xdc] sm:$0xf]  ;;  %v13533_v41 = vld [vmem:[%s12326_s10 + $0xe0] sm:$0xf]  ;;  %v15188_v1 = vcombine.low %v12924_v49, %v12940_v39 }
  0xf9   : > { %11129 = vmatprep.mubr.msk.bf16.mxu1 %vm458_vm1, %v6110_v60  ;;  %v1819_v4 = vor.u32 %v1818_v36, %v1815_v33  ;;  %v6132_v60 = vrot.slane %v6130_v2, 3  ;;  %v6128_v36 = vsel %vm691_vm2, %v6118_v63, %v6127_v34  ;;  %v13506_v33 = vpop.permute.xlu0 %4246  ;;  %v6151_v2 = vshll.u32 %v9731_v44, 16  ;;  %15187 = vst [vmem:[#allocation45_spill] sm:$0xff] %v13533_v41 }
  0xfa   : > { %v13480_v38 = vpop.f32.mrb[4].mxu1  ;;  %15183 = vst [vmem:[#allocation41_spill] sm:$0xff] %v13506_v33  ;;  %v6160_v44 = vshll.u32 %v9732_v23, 16 }
  0xfb   : > { %15176 = vst [vmem:[#allocation34_spill] sm:$0xff] %v13480_v38  ;;  %v13490_v3 = vpop.f32.mrb[5].mxu1  ;;  %v6144_v38 = vrot.slane %v6142_v24, 4  ;;  %v1820_v63 = vsel %vm691_vm2, %v1810_v57, %v1819_v4  ;;  %v6136_v24 = vor.u32 %v6135_v35, %v6132_v60  ;;  %v6150_v4 = vrot.slane %v6148_v17, 3 }
  0xfc   : > { %15180 = vst [vmem:[#allocation38_spill] sm:$0xff] %v13490_v3  ;;  %v13496_v47 = vpop.f32.mrb[6].mxu1  ;;  %v13527_v3 = vpop.permute.xlu1 %4251  ;;  %v6153_v60 = vrot.slane %v6151_v2, 4  ;;  %v9734_v17 = vcombine.low %v13530_v6, %v13533_v41  ;;  %v13562_v41 = vld [vmem:[%s12326_s10 + $0xe4] sm:$0xf] }
  0xfd   : > { %15181 = vst [vmem:[#allocation39_spill] sm:$0xff] %v13496_v47  ;;  %v13499_v58 = vpop.f32.mrb[7].mxu1  ;;  %v13525_v47 = vld [vmem:[%s12326_s10 + $0xd8] sm:$0xf]  ;;  %15186 = vst [vmem:[#allocation44_spill] sm:$0xff] %v13527_v3 }
  0xfe   : > { %10838 = vmatmul.mubr.msk.bf16.gmra.mrb[24].mxu0 %vm458_vm1, %v1802_v50  ;;  %15182 = vst [vmem:[#allocation40_spill] sm:$0xff] %v13499_v58  ;;  %v6452_v50 = vsel %vm507_vm0, %v13324_v22, 0  ;;  %v13517_v22 = vld [vmem:[%s15048_s5] ss:$0 sm:$0xff]  ;;  %v13522_v58 = vld [vmem:[%s12326_s10 + $0xd4] sm:$0xf] }
  0xff   : > { %10841 = vmatprep.mubr.msk.bf16.mxu0 %vm458_vm1, %v1811_v14  ;;  %v6145_v14 = vor.u32 %v6144_v38, %v6141_v42  ;;  %15184 = vst [vmem:[#allocation42_spill] sm:$0xff] %v13522_v58  ;;  %15185 = vst [vmem:[#allocation43_spill] sm:$0xff] %v13525_v47  ;;  %v9733_v35 = vcombine.low %v13522_v58, %v13525_v47  ;;  %v6162_v58 = vrot.slane %v6160_v44, 4  ;;  %v6178_v44 = vshll.u32 %v9734_v17, 16 }
 0x100   : > { %11130 = vmatmul.mubr.msk.bf16.vlgmr.msra.gmra.mrb[40].mxu1 %vm458_vm1, %v6119_v18  ;;  %v6157_v18 = vshrl.u32 %v9732_v23, 16  ;;  %v6137_v23 = vsel %vm691_vm2, %v6127_v34, %v6136_v24 }
 0x101   : > { %11154 = vmatpush3.bf16.msra.mxu1 %v6452_v50  ;;  %11133 = vmatprep.mubr.msk.bf16.mxu1 %vm458_vm1, %v6128_v36 }
 0x102   : > { %11775 = vmatprep.subr.msk.bf16.mxu1 %vm507_vm0, %v13511_v30  ;;  %v11019_v50 = vpop.f32.mrb[8].mxu1  ;;  %v6159_v34 = vrot.slane %v6157_v18, 3  ;;  %v6175_v18 = vshrl.u32 %v9734_v17, 16 }
 0x103   : > { %v4760_v57 = vadd.f32 %v11019_v50, %v13517_v22  ;;  %v4751_v38 = vpop.f32.mrb[9].mxu1  ;;  %v6146_v50 = vsel %vm691_vm2, %v6136_v24, %v6145_v14 }
 0x104   : > { %v4752_v42 = vadd.f32 %v13517_v22, %v4751_v38  ;;  %v11020_v36 = vpop.f32.mrb[10].mxu1 }
 0x105   : > { %v4880_v2 = vmul.f32 %v4760_v57, %v13382_v62  ;;  %v4763_v38 = vadd.f32 %v11020_v36, %v13517_v22  ;;  %v4754_v47 = vpop.f32.mrb[11].mxu1  ;;  %v6154_v57 = vor.u32 %v6153_v60, %v6150_v4  ;;  %v6166_v62 = vshrl.u32 %v9733_v35, 16  ;;  %v13575_v4 = vld [vmem:[%s12326_s10 + $0x30] sm:$0xf] }
 0x106   : > { %10842 = vmatmul.mubr.msk.bf16.gmra.mrb[28].mxu0 %vm458_vm1, %v1820_v63  ;;  %v13549_v63 = vpop.permute.xlu0 %4256  ;;  %v4878_v49 = vmul.f32 %v4752_v42, %v13373_v27  ;;  %v4755_v39 = vadd.f32 %v13517_v22, %v4754_v47  ;;  %v6169_v36 = vshll.u32 %v9733_v35, 16  ;;  %v13572_v42 = vld [vmem:[%s12326_s10 + $0x2c] sm:$0xf]  ;;  %15192 = vst [vmem:[#allocation49_spill] sm:$0xff] %v13575_v4  ;;  %v2626_v35 = vsel %vm507_vm0, %v13306_v43, 0 }
 0x107   : > { %10847 = vmatprep.mubr.msk.bf16.mxu0 %vm458_vm1, %v15188_v1  ;;  %15189 = vst [vmem:[#allocation46_spill] sm:$0xff] %v13549_v63  ;;  %v13557_v1 = vpop.permute.xlu1 %4261  ;;  %v4881_v24 = vmul.f32 %v4763_v38, %v13406_v53  ;;  %15191 = vst [vmem:[#allocation48_spill] sm:$0xff] %v13572_v42  ;;  %v13580_v38 = vld [vmem:[%s12326_s10 + $0xe8] sm:$0xf]  ;;  %v13583_v27 = vld [vmem:[%s12326_s10 + $0xec] sm:$0xf] }
 0x108   : > { %15190 = vst [vmem:[#allocation47_spill] sm:$0xff] %v13557_v1  ;;  %11134 = vmatmul.mubr.msk.bf16.gmra.mrb[44].mxu1 %vm458_vm1, %v6137_v23  ;;  %v4879_v47 = vmul.f32 %v4755_v39, %v13397_v11  ;;  %v6163_v23 = vor.u32 %v6162_v58, %v6159_v34  ;;  %v13590_v53 = vld [vmem:[%s12326_s10 + $0xf0] sm:$0xf]  ;;  %v15195_v34 = vcombine.low %v12703_v15, %v12706_v26  ;;  %v6180_v42 = vrot.slane %v6178_v44, 4 }
 0x109   : > { %11137 = vmatprep.mubr.msk.bf16.mxu1 %vm458_vm1, %v6146_v50  ;;  %v10163_v60 = vpack.c.bf16 %v4881_v24, %v4880_v2  ;;  %15194 = vst [vmem:[#allocation51_spill] sm:$0xff] %v13590_v53  ;;  %v13595_v2 = vld [vmem:[%s15044_s1 + $0xc] sm:$0x3]  ;;  %v6168_v24 = vrot.slane %v6166_v62, 3  ;;  %v9735_v15 = vcombine.low %v13562_v41, %v13580_v38 }
 0x10a   : > { %v10158_v39 = vpack.c.bf16 %v4879_v47, %v4878_v49  ;;  %v11023_v11 = vpop.f32.mrb[12].mxu1  ;;  %v13587_v17 = vpop.permute.xlu0 %4266  ;;  %v6155_v49 = vsel %vm691_vm2, %v6145_v14, %v6154_v57  ;;  %v6171_v47 = vrot.slane %v6169_v36, 4 }
 0x10b   : > { %15193 = vst [vmem:[#allocation50_spill] sm:$0xff] %v13587_v17  ;;  %10370 = vst [vmem:[%s13567_s19 + $0x8] sm:$0xff] %v10163_v60   ;;  %v4776_v43 = vadd.f32 %v11023_v11, %v13517_v22  ;;  %v4767_v58 = vpop.f32.mrb[13].mxu1  ;;  %v15196_v60 = vcombine.low %v12966_v32, %v13013_v9  ;;  %v6177_v11 = vrot.slane %v6175_v18, 3  ;;  %v13612_v26 = vpop.permute.xlu1 %4271  ;;  %v9736_v32 = vcombine.low %v13583_v27, %v13590_v53 }
 0x10c   : > { %10159 = vst [vmem:[%s13567_s19] sm:$0xff] %v10158_v39   ;;  %v4768_v50 = vadd.f32 %v13517_v22, %v4767_v58  ;;  %v11024_v4 = vpop.f32.mrb[14].mxu1  ;;  %15197 = vst [vmem:[#allocation52_spill] sm:$0xff] %v13612_v26  ;;  %v6187_v58 = vshll.u32 %v9735_v15, 16 }
 0x10d   : > { %v4779_v62 = vadd.f32 %v11024_v4, %v13517_v22  ;;  %v4770_v14 = vpop.f32.mrb[15].mxu1  ;;  %v4884_v36 = vmul.f32 %v4776_v43, %v13450_v56  ;;  %v6172_v4 = vor.u32 %v6171_v47, %v6168_v24  ;;  %v6184_v43 = vshrl.u32 %v9735_v15, 16 }
 0x10e   : > { %10848 = vmatmul.mubr.msk.bf16.vlgmr.msra.gmra.mrb[0].mxu0 %vm458_vm1, %v15195_v34  ;;  %v4882_v9 = vmul.f32 %v4768_v50, %v13423_v25  ;;  %v4771_v18 = vadd.f32 %v13517_v22, %v4770_v14  ;;  %v13627_v34 = vpop.permute.xlu0 %4276  ;;  %v6193_v14 = vshrl.u32 %v9736_v32, 16  ;;  %v6196_v25 = vshll.u32 %v9736_v32, 16 }
 0x10f   : > { %10880 = vmatpush3.bf16.msra.mxu0 %v2626_v35  ;;  %10851 = vmatprep.mubr.msk.bf16.mxu0 %vm458_vm1, %v15196_v60  ;;  %v6164_v35 = vsel %vm691_vm2, %v6154_v57, %v6163_v23  ;;  %v4885_v44 = vmul.f32 %v4779_v62, %v13463_v40  ;;  %v6181_v57 = vor.u32 %v6180_v42, %v6177_v11  ;;  %v13630_v60 = vld [vmem:[%s12326_s10 + $0xf4] sm:$0xf]  ;;  %v13632_v53 = vpop.permute.xlu1 %4281  ;;  %v15200_v62 = vld [vmem:[#allocation3_spill] sm:$0xff]  ;;  %v15201_v42 = vld [vmem:[#allocation4_spill] sm:$0xff] }
 0x110   : > { %11766 = vmatprep.subr.msk.bf16.mxu0 %vm507_vm0, %v13595_v2  ;;  %11138 = vmatmul.mubr.msk.bf16.gmra.mrb[48].mxu1 %vm458_vm1, %v6155_v49  ;;  %v4883_v39 = vmul.f32 %v4771_v18, %v13428_v7  ;;  %15198 = vst [vmem:[#allocation53_spill] sm:$0xff] %v13627_v34  ;;  %15199 = vst [vmem:[#allocation54_spill] sm:$0xff] %v13632_v53  ;;  %v15202_v11 = vcombine.low %v15200_v62, %v15201_v42  ;;  %v6195_v42 = vrot.slane %v6193_v14, 3 }
 0x111   : > { %11141 = vmatprep.mubr.msk.bf16.mxu1 %vm458_vm1, %v6164_v35  ;;  %v10173_v50 = vpack.c.bf16 %v4885_v44, %v4884_v36  ;;  %v6173_v15 = vsel %vm691_vm2, %v6163_v23, %v6172_v4  ;;  %v9737_v36 = vcombine.low %v13630_v60, %v13630_v60  ;;  %v6186_v44 = vrot.slane %v6184_v43, 3 }
 0x112   : > { %v10168_v49 = vpack.c.bf16 %v4883_v39, %v4882_v9  ;;  %v11027_v56 = vpop.f32.mrb[16].mxu1  ;;  %v15203_v9 = vld [vmem:[#allocation5_spill] sm:$0xff]  ;;  %v6189_v39 = vrot.slane %v6187_v58, 4  ;;  %v13654_v7 = vpop.permute.xlu0 %4286 }
 0x113   : > { %10372 = vst [vmem:[%s13567_s19 + $0x18] sm:$0xff] %v10173_v50   ;;  %v4792_v24 = vadd.f32 %v11027_v56, %v13517_v22  ;;  %v4783_v47 = vpop.f32.mrb[17].mxu1  ;;  %v15204_v18 = vcombine.low %v15203_v9, %v13051_v12  ;;  %v6182_v56 = vsel %vm691_vm2, %v6172_v4, %v6181_v57  ;;  %15205 = vst [vmem:[#allocation3_spill] sm:$0xff] %v13654_v7  ;;  %v6202_v58 = vshrl.u32 %v9737_v36, 16 }
 0x114   : > { %10371 = vst [vmem:[%s13567_s19 + $0x10] sm:$0xff] %v10168_v49   ;;  %v4784_v35 = vadd.f32 %v13517_v22, %v4783_v47  ;;  %v11028_v32 = vpop.f32.mrb[18].mxu1  ;;  %v6190_v43 = vor.u32 %v6189_v39, %v6186_v44  ;;  %v6205_v14 = vshll.u32 %v9737_v36, 16  ;;  %v15208_v39 = vcombine.low %v13101_v5, %v13104_v21 }
 0x115   : > { %v4795_v50 = vadd.f32 %v11028_v32, %v13517_v22  ;;  %v4786_v62 = vpop.f32.mrb[19].mxu1  ;;  %v4888_v23 = vmul.f32 %v4792_v24, %v13506_v33 }
 0x116   : > { %10852 = vmatmul.mubr.msk.bf16.gmra.mrb[4].mxu0 %vm458_vm1, %v15202_v11  ;;  %v6198_v11 = vrot.slane %v6196_v25, 4  ;;  %v4886_v49 = vmul.f32 %v4784_v35, %v13477_v52  ;;  %v4787_v47 = vadd.f32 %v13517_v22, %v4786_v62  ;;  %v13660_v25 = vpop.permute.xlu1 %4291  ;;  %v6191_v36 = vsel %vm691_vm2, %v6181_v57, %v6190_v43 }
 0x117   : > { %10855 = vmatprep.mubr.msk.bf16.mxu0 %vm458_vm1, %v15204_v18  ;;  %v4889_v12 = vmul.f32 %v4795_v50, %v13527_v3  ;;  %15206 = vst [vmem:[#allocation4_spill] sm:$0xff] %v13660_v25  ;;  %v15207_v50 = vcombine.low %v13083_v59, %v13086_v10  ;;  %v6204_v62 = vrot.slane %v6202_v58, 3 }
 0x118   : > { %11142 = vmatmul.mubr.msk.bf16.gmra.mrb[52].mxu1 %vm458_vm1, %v6173_v15  ;;  %v4887_v4 = vmul.f32 %v4787_v47, %v13482_v0  ;;  %v6199_v35 = vor.u32 %v6198_v11, %v6195_v42  ;;  %v13675_v42 = vpop.permute.xlu0 %4296  ;;  %v15268_v0 = vld [vmem:[#allocation49_spill] sm:$0xff] }
 0x119   : > { %11145 = vmatprep.mubr.msk.bf16.mxu1 %vm458_vm1, %v6182_v56  ;;  %v10183_v24 = vpack.c.bf16 %v4889_v12, %v4888_v23  ;;  %v6207_v23 = vrot.slane %v6205_v14, 4  ;;  %15209 = vst [vmem:[#allocation5_spill] sm:$0xff] %v13675_v42 }
 0x11a   : > { %v10178_v32 = vpack.c.bf16 %v4887_v4, %v4886_v49  ;;  %v11031_v9 = vpop.f32.mrb[20].mxu1  ;;  %v6200_v49 = vsel %vm691_vm2, %v6190_v43, %v6199_v35  ;;  %v13682_v21 = vpop.permute.xlu1 %4301 }
 0x11b   : > { %10374 = vst [vmem:[%s13567_s19 + $0x28] sm:$0xff] %v10183_v24   ;;  %v4808_v18 = vadd.f32 %v11031_v9, %v13517_v22  ;;  %v4799_v15 = vpop.f32.mrb[21].mxu1  ;;  %15210 = vst [vmem:[#allocation55_spill] sm:$0xff] %v13682_v21  ;;  %v6208_v4 = vor.u32 %v6207_v23, %v6204_v62 }
 0x11c   : > { %10373 = vst [vmem:[%s13567_s19 + $0x20] sm:$0xff] %v10178_v32   ;;  %v4800_v56 = vadd.f32 %v13517_v22, %v4799_v15  ;;  %v11032_v44 = vpop.f32.mrb[22].mxu1  ;;  %v13688_v43 = vpop.permute.xlu0 %4306 }
 0x11d   : > { %v4811_v11 = vadd.f32 %v11032_v44, %v13517_v22  ;;  %v4802_v59 = vpop.f32.mrb[23].mxu1  ;;  %v4892_v10 = vmul.f32 %v4808_v18, %v13587_v17  ;;  %15211 = vst [vmem:[#allocation56_spill] sm:$0xff] %v13688_v43  ;;  %v15212_v18 = vcombine.low %v13115_v16, %v13126_v28  ;;  %v15213_v44 = vcombine.low %v13150_v20, %v13153_v46 }
 0x11e   : > { %10856 = vmatmul.mubr.msk.bf16.gmra.mrb[8].mxu0 %vm458_vm1, %v15207_v50  ;;  %v4890_v47 = vmul.f32 %v4800_v56, %v13549_v63  ;;  %v4803_v57 = vadd.f32 %v13517_v22, %v4802_v59  ;;  %v6209_v56 = vsel %vm691_vm2, %v6199_v35, %v6208_v4 }
 0x11f   : > { %10859 = vmatprep.mubr.msk.bf16.mxu0 %vm458_vm1, %v15208_v39  ;;  %v4893_v5 = vmul.f32 %v4811_v11, %v13612_v26  ;;  %v13705_v39 = vpop.permute.xlu1 %4311 }
 0x120   : > { %11146 = vmatmul.mubr.msk.bf16.gmra.mrb[56].mxu1 %vm458_vm1, %v6191_v36  ;;  %v4891_v12 = vmul.f32 %v4803_v57, %v13557_v1  ;;  %v9751_v36 = vcombine.low %v13368_v31, %v13371_v29  ;;  %15214 = vst [vmem:[#allocation57_spill] sm:$0xff] %v13705_v39  ;;  %v13715_v31 = vpop.permute.xlu0 %4316 }
 0x121   : > { %11149 = vmatprep.mubr.msk.bf16.mxu1 %vm458_vm1, %v6200_v49  ;;  %v10193_v58 = vpack.c.bf16 %v4893_v5, %v4892_v10  ;;  %15215 = vst [vmem:[#allocation58_spill] sm:$0xff] %v13715_v31  ;;  %v9752_v49 = vcombine.low %v13380_v45, %v13395_v61  ;;  %v15217_v5 = vcombine.low %v13161_v8, %v13164_v13  ;;  %v15219_v45 = vld [vmem:[#allocation19_spill] sm:$0xff]  ;;  %v6833_v13 = vsel %vm507_vm0, %v13511_v30, 0 }
 0x122   : > { %v10188_v14 = vpack.c.bf16 %v4891_v12, %v4890_v47  ;;  %v9753_v61 = vcombine.low %v15219_v45, %v13416_v37 }
 0x123   : > { %v11035_v24 = vpop.f32.mrb[24].mxu1  ;;  %10376 = vst [vmem:[%s13567_s19 + $0x38] sm:$0xff] %v10193_v58   ;;  %v13717_v10 = vpop.permute.xlu1 %4321  ;;  %v15218_v58 = vcombine.low %v13167_v19, %v13182_v51  ;;  %v13746_v51 = vld [vmem:[%s15044_s1 + $0xc] sm:$0x3] }
 0x124   : > { %v4824_v32 = vadd.f32 %v11035_v24, %v13517_v22  ;;  %v4815_v9 = vpop.f32.mrb[25].mxu1  ;;  %10375 = vst [vmem:[%s13567_s19 + $0x30] sm:$0xff] %v10188_v14   ;;  %15216 = vst [vmem:[#allocation59_spill] sm:$0xff] %v13717_v10  ;;  %v13741_v19 = vpop.permute.xlu0 %4326 }
 0x125   : > { %v4816_v15 = vadd.f32 %v13517_v22, %v4815_v9  ;;  %v11036_v50 = vpop.f32.mrb[26].mxu1  ;;  %15220 = vst [vmem:[#allocation19_spill] sm:$0xff] %v13741_v19 }
 0x126   : > { %10860 = vmatmul.mubr.msk.bf16.gmra.mrb[12].mxu0 %vm458_vm1, %v15212_v18  ;;  %v4827_v16 = vadd.f32 %v11036_v50, %v13517_v22  ;;  %v4818_v28 = vpop.f32.mrb[27].mxu1  ;;  %v4896_v62 = vmul.f32 %v4824_v32, %v13654_v7  ;;  %v12016_v50 = vld [vmem:[%s12326_s10 + $0x18] sm:$0xff]   ;;  %v14048_v7 = vld [vmem:[%s12326_s10 + $0xac] sm:$0xf] }
 0x127   : > { %10863 = vmatprep.mubr.msk.bf16.mxu0 %vm458_vm1, %v15213_v44  ;;  %v4894_v23 = vmul.f32 %v4816_v15, %v13627_v34  ;;  %v4819_v35 = vadd.f32 %v13517_v22, %v4818_v28  ;;  %v13752_v30 = vpop.permute.xlu1 %4331  ;;  %v15222_v28 = vld [vmem:[#allocation6_spill] sm:$0xff]  ;;  %v2448_v45 = vshll.u32 %v12016_v50, 16 }
 0x128   : > { %11150 = vmatmul.mubr.msk.bf16.gmra.mrb[60].mxu1 %vm458_vm1, %v6209_v56  ;;  %v4897_v20 = vmul.f32 %v4827_v16, %v13660_v25  ;;  %15221 = vst [vmem:[#allocation60_spill] sm:$0xff] %v13752_v30 }
 0x129   : > { %v4895_v46 = vmul.f32 %v4819_v35, %v13632_v53  ;;  %11155 = vmatprep.mubr.msk.bf16.mxu1 %vm458_vm1, %v9751_v36  ;;  %v15225_v35 = vld [vmem:[#allocation21_spill] sm:$0xff] }
 0x12a   : > { %v10203_v29 = vpack.c.bf16 %v4897_v20, %v4896_v62  ;;  %v15223_v62 = vld [vmem:[#allocation7_spill] sm:$0xff]  ;;  %v9754_v20 = vcombine.low %v15225_v35, %v13437_v55 }
 0x12b   : > { %v10198_v11 = vpack.c.bf16 %v4895_v46, %v4894_v23  ;;  %v11039_v59 = vpop.f32.mrb[28].mxu1  ;;  %v15224_v23 = vcombine.low %v15222_v28, %v15223_v62  ;;  %v12017_v55 = vld [vmem:[%s12326_s10 + $0x20] sm:$0xff]  }
 0x12c   : > { %10378 = vst [vmem:[%s13567_s19 + $0x48] sm:$0xff] %v10203_v29   ;;  %v4840_v47 = vadd.f32 %v11039_v59, %v13517_v22  ;;  %v4831_v57 = vpop.f32.mrb[29].mxu1  ;;  %v15227_v59 = vld [vmem:[#allocation8_spill] sm:$0xff]  ;;  %v15234_v28 = vld [vmem:[#allocation11_spill] sm:$0xff] }
 0x12d   : > { %10377 = vst [vmem:[%s13567_s19 + $0x40] sm:$0xff] %v10198_v11   ;;  %v4832_v12 = vadd.f32 %v13517_v22, %v4831_v57  ;;  %v11040_v4 = vpop.f32.mrb[30].mxu1  ;;  %v13767_v11 = vpop.permute.xlu0 %4336  ;;  %v15230_v57 = vld [vmem:[#allocation24_spill] sm:$0xff] }
 0x12e   : > { %10864 = vmatmul.mubr.msk.bf16.gmra.mrb[16].mxu0 %vm458_vm1, %v15217_v5  ;;  %v4843_v14 = vadd.f32 %v11040_v4, %v13517_v22  ;;  %v4834_v24 = vpop.f32.mrb[31].mxu1  ;;  %v4900_v8 = vmul.f32 %v4840_v47, %v13688_v43  ;;  %15226 = vst [vmem:[#allocation6_spill] sm:$0xff] %v13767_v11  ;;  %v9755_v5 = vcombine.low %v15230_v57, %v13443_v54  ;;  %v15241_v57 = vld [vmem:[#allocation36_spill] sm:$0xff]  ;;  %v14043_v43 = vld [vmem:[%s12326_s10 + $0x78] sm:$0xf] }
 0x12f   : > { %10867 = vmatprep.mubr.msk.bf16.mxu0 %vm458_vm1, %v15218_v58  ;;  %v4898_v32 = vmul.f32 %v4832_v12, %v13675_v42  ;;  %v4835_v9 = vadd.f32 %v13517_v22, %v4834_v24  ;;  %v13780_v24 = vpop.permute.xlu1 %4341  ;;  %v14037_v42 = vld [vmem:[%s12326_s10 + $0xa8] sm:$0xf] }
 0x130   : > { %11156 = vmatmul.mubr.msk.bf16.vlgmr.msra.gmra.mrb[40].mxu1 %vm458_vm1, %v9752_v49  ;;  %v4901_v37 = vmul.f32 %v4843_v14, %v13705_v39  ;;  %v15228_v49 = vld [vmem:[#allocation9_spill] sm:$0xff]  ;;  %15231 = vst [vmem:[#allocation7_spill] sm:$0xff] %v13780_v24 }
 0x131   : > { %v4899_v18 = vmul.f32 %v4835_v9, %v13682_v21  ;;  %11180 = vmatpush3.bf16.msra.mxu1 %v6833_v13  ;;  %11159 = vmatprep.mubr.msk.bf16.mxu1 %vm458_vm1, %v9753_v61  ;;  %v15229_v47 = vcombine.low %v15227_v59, %v15228_v49  ;;  %v2450_v9 = vrot.slane %v2448_v45, 1  ;;  %v15238_v59 = vld [vmem:[#allocation12_spill] sm:$0xff]  ;;  %v15239_v49 = vld [vmem:[#allocation13_spill] sm:$0xff] }
 0x132   : > { %v10213_v15 = vpack.c.bf16 %v4901_v37, %v4900_v8  ;;  %11776 = vmatprep.subr.msk.bf16.mxu1 %vm507_vm0, %v13746_v51  ;;  %v2453_v37 = vshll.u32 %v12017_v55, 16  ;;  %v14040_v39 = vld [vmem:[%s12326_s10 + $0x74] sm:$0xf] }
 0x133   : > { %v10208_v56 = vpack.c.bf16 %v4899_v18, %v4898_v32  ;;  %v11043_v44 = vpop.f32.mrb[32].mxu1  ;;  %v2446_v32 = vshrl.u32 %v12016_v50, 16  ;;  %v12019_v50 = vld [vmem:[%s12326_s10 + $0x28] sm:$0xff]  }
 0x134   : > { %10380 = vst [vmem:[%s13567_s19 + $0x58] sm:$0xff] %v10213_v15   ;;  %v4856_v36 = vadd.f32 %v11043_v44, %v13517_v22  ;;  %v4847_v16 = vpop.f32.mrb[33].mxu1 }
 0x135   : > { %10379 = vst [vmem:[%s13567_s19 + $0x50] sm:$0xff] %v10208_v56   ;;  %v4848_v46 = vadd.f32 %v13517_v22, %v4847_v16  ;;  %v11044_v29 = vpop.f32.mrb[34].mxu1  ;;  %v13786_v56 = vpop.permute.xlu0 %4346  ;;  %v15233_v16 = vld [vmem:[#allocation10_spill] sm:$0xff]  ;;  %v2451_v45 = vor.u32 %v2450_v9, %v2446_v32 }
 0x136   : > { %10868 = vmatmul.mubr.msk.bf16.gmra.mrb[20].mxu0 %vm458_vm1, %v15224_v23  ;;  %v4859_v12 = vadd.f32 %v11044_v29, %v13517_v22  ;;  %v4850_v4 = vpop.f32.mrb[35].mxu1  ;;  %v4904_v58 = vmul.f32 %v4856_v36, %v13741_v19  ;;  %15232 = vst [vmem:[#allocation21_spill] sm:$0xff] %v13786_v56  ;;  %v15235_v62 = vcombine.low %v15233_v16, %v15234_v28  ;;  %v15236_v23 = vld [vmem:[#allocation25_spill] sm:$0xff]  ;;  %v13799_v29 = vpop.permute.xlu1 %4351  ;;  %v15243_v16 = vld [vmem:[#allocation14_spill] sm:$0xff]  ;;  %v15244_v28 = vld [vmem:[#allocation15_spill] sm:$0xff] }
 0x137   : > { %10871 = vmatprep.mubr.msk.bf16.mxu0 %vm458_vm1, %v15229_v47  ;;  %v4902_v61 = vmul.f32 %v4848_v46, %v13715_v31  ;;  %v4851_v14 = vadd.f32 %v13517_v22, %v4850_v4  ;;  %v9756_v35 = vcombine.low %v15236_v23, %v13471_v48  ;;  %15237 = vst [vmem:[#allocation8_spill] sm:$0xff] %v13799_v29  ;;  %v15246_v23 = vld [vmem:[#allocation42_spill] sm:$0xff]  ;;  %v14010_v19 = vld [vmem:[%s12326_s10 + $0x28] sm:$0xf] }
 0x138   : > { %11160 = vmatmul.mubr.msk.bf16.gmra.mrb[44].mxu1 %vm458_vm1, %v9754_v20  ;;  %v4905_v8 = vmul.f32 %v4859_v12, %v13752_v30  ;;  %v15240_v47 = vcombine.low %v15238_v59, %v15239_v49 }
 0x139   : > { %v4903_v54 = vmul.f32 %v4851_v14, %v13717_v10  ;;  %11163 = vmatprep.mubr.msk.bf16.mxu1 %vm458_vm1, %v9755_v5  ;;  %v15242_v5 = vld [vmem:[#allocation32_spill] sm:$0xff]  ;;  %v12021_v14 = vld [vmem:[%s12326_s10 + $0x30] sm:$0xff]  }
 0x13a   : > { %v10223_v13 = vpack.c.bf16 %v4905_v8, %v4904_v58  ;;  %v9757_v12 = vcombine.low %v15242_v5, %v15241_v57  ;;  %v12025_v5 = vld [vmem:[%s12326_s10 + $0x40] sm:$0xff]  }
 0x13b   : > { %v10218_v18 = vpack.c.bf16 %v4903_v54, %v4902_v61  ;;  %v11047_v15 = vpop.f32.mrb[36].mxu1  ;;  %v2455_v61 = vrot.slane %v2453_v37, 1  ;;  %v2465_v37 = vshrl.u32 %v12019_v50, 16 }
 0x13c   : > { %10382 = vst [vmem:[%s13567_s19 + $0x68] sm:$0xff] %v10223_v13   ;;  %v4872_v44 = vadd.f32 %v11047_v15, %v13517_v22  ;;  %v4863_v36 = vpop.f32.mrb[37].mxu1 }
 0x13d   : > { %10381 = vst [vmem:[%s13567_s19 + $0x60] sm:$0xff] %v10218_v18   ;;  %v4864_v20 = vadd.f32 %v13517_v22, %v4863_v36  ;;  %v11048_v46 = vpop.f32.mrb[38].mxu1  ;;  %v2461_v18 = vshll.u32 %v12019_v50, 16  ;;  %v2456_v9 = vsel %vm1174_vm3, %v2451_v45, %v2455_v61  ;;  %v2469_v36 = vshll.u32 %v12021_v14, 16  ;;  %v15248_v50 = vld [vmem:[#allocation43_spill] sm:$0xff] }
 0x13e   : > { %10872 = vmatmul.mubr.msk.bf16.gmra.mrb[24].mxu0 %vm458_vm1, %v15235_v62  ;;  %v4875_v4 = vadd.f32 %v11048_v46, %v13517_v22  ;;  %v4866_v58 = vpop.f32.mrb[39].mxu1  ;;  %v4908_v48 = vmul.f32 %v4872_v44, %v13786_v56  ;;  %v2457_v44 = vshrl.u32 %v12017_v55, 16  ;;  %v15245_v62 = vcombine.low %v15243_v16, %v15244_v28  ;;  %v12023_v55 = vld [vmem:[%s12326_s10 + $0x38] sm:$0xff]  }
 0x13f   : > { %10875 = vmatprep.mubr.msk.bf16.mxu0 %vm458_vm1, %v15240_v47  ;;  %v4906_v8 = vmul.f32 %v4864_v20, %v13767_v11  ;;  %v4867_v54 = vadd.f32 %v13517_v22, %v4866_v58  ;;  %v2463_v46 = vrot.slane %v2461_v18, 1  ;;  %v9759_v49 = vcombine.low %v15248_v50, %v13530_v6  ;;  %v13841_v18 = vld [vmem:[%s15044_s1 + $0xe] sm:$0x3]  ;;  %v13990_v11 = vld [vmem:[%s12326_s10 + $0x70] sm:$0xf] }
 0x140   : > { %11164 = vmatmul.mubr.msk.bf16.gmra.mrb[48].mxu1 %vm458_vm1, %v9756_v35  ;;  %v4909_v13 = vmul.f32 %v4875_v4, %v13799_v29  ;;  %v15247_v35 = vld [vmem:[#allocation37_spill] sm:$0xff]  ;;  %v2459_v59 = vor.u32 %v2457_v44, %v2455_v61  ;;  %v2471_v57 = vrot.slane %v2469_v36, 1  ;;  %v2477_v4 = vshll.u32 %v12023_v55, 16  ;;  %v12027_v61 = vld [vmem:[%s12326_s10 + $0xa0] sm:$0xff]   ;;  %v13998_v29 = vld [vmem:[%s12326_s10 + $0xe8] sm:$0xff]  }
 0x141   : > { %v4907_v15 = vmul.f32 %v4867_v54, %v13780_v24  ;;  %11167 = vmatprep.mubr.msk.bf16.mxu1 %vm458_vm1, %v9757_v12  ;;  %v9758_v20 = vcombine.low %v15247_v35, %v15246_v23  ;;  %v2467_v47 = vor.u32 %v2465_v37, %v2463_v46  ;;  %v12026_v12 = vld [vmem:[%s12326_s10 + $0x98] sm:$0xff]   ;;  %v2473_v45 = vshrl.u32 %v12021_v14, 16  ;;  %v12028_v14 = vld [vmem:[%s12326_s10 + $0x48] sm:$0xff]   ;;  %v13984_v24 = vld [vmem:[%s12326_s10 + $0x24] sm:$0xf] }
 0x142   : > { %v10233_v32 = vpack.c.bf16 %v4909_v13, %v4908_v48  ;;  %v2464_v58 = vsel %vm1174_vm3, %v2459_v59, %v2463_v46  ;;  %v3140_v48 = vsel %vm507_vm0, %v13595_v2, 0  ;;  %v2481_v6 = vshrl.u32 %v12023_v55, 16  ;;  %v12031_v55 = vld [vmem:[%s12326_s10 + $0xb0] sm:$0xff]   ;;  %v13979_v59 = vld [vmem:[%s12326_s10 + $0x68] sm:$0xf] }
 0x143   : > { %v10228_v22 = vpack.c.bf16 %v4907_v15, %v4906_v8  ;;  %v2472_v8 = vsel %vm1174_vm3, %v2467_v47, %v2471_v57  ;;  %v2485_v54 = vshll.u32 %v12025_v5, 16  ;;  %v6699_v13 = vshll.u32 %v12026_v12, 16  ;;  %v15249_v15 = vld [vmem:[#allocation45_spill] sm:$0xff]  ;;  %15261 = vst [vmem:[#allocation15_spill] sm:$0xff] %v13979_v59 }
 0x144   : > { %10384 = vst [vmem:[%s13567_s19 + $0x78] sm:$0xff] %v10233_v32   ;;  %v9760_v44 = vcombine.low %v15249_v15, %v13562_v41  ;;  %v2479_v2 = vrot.slane %v2477_v4, 1  ;;  %v9761_v32 = vcombine.low %v13580_v38, %v13583_v27  ;;  %v6704_v37 = vshll.u32 %v12027_v61, 16  ;;  %v12029_v41 = vld [vmem:[%s12326_s10 + $0xa8] sm:$0xff]   ;;  %v13861_v27 = vld [vmem:[%s12326_s10 + $0x40] sm:$0xf] }
 0x145   : > { %10383 = vst [vmem:[%s13567_s19 + $0x70] sm:$0xff] %v10228_v22   ;;  %v2487_v22 = vrot.slane %v2485_v54, 1  ;;  %v6697_v16 = vshrl.u32 %v12026_v12, 16  ;;  %v6701_v28 = vrot.slane %v6699_v13, 1  ;;  %v2489_v23 = vshrl.u32 %v12025_v5, 16  ;;  %15251 = vst [vmem:[#allocation24_spill] sm:$0xff] %v13861_v27 }
 0x146   : > { %10876 = vmatmul.mubr.msk.bf16.gmra.mrb[28].mxu0 %vm458_vm1, %v15245_v62  ;;  %v2483_v36 = vor.u32 %v2481_v6, %v2479_v2  ;;  %v13851_v62 = vld [vmem:[%s12326_s10 + $0x50] sm:$0xff]   ;;  %v2493_v35 = vshll.u32 %v12028_v14, 16  ;;  %v6706_v46 = vrot.slane %v6704_v37, 1  ;;  %v2497_v47 = vshrl.u32 %v12028_v14, 16  ;;  %v15252_v12 = vld [vmem:[#allocation51_spill] sm:$0xff]  ;;  %v12033_v13 = vld [vmem:[%s12326_s10 + $0xb8] sm:$0xff]  }
 0x147   : > { %10881 = vmatprep.mubr.msk.bf16.mxu0 %vm458_vm1, %v2456_v9  ;;  %v2475_v9 = vor.u32 %v2473_v45, %v2471_v57  ;;  %v2501_v57 = vshll.u32 %v13851_v62, 16  ;;  %v6712_v5 = vshll.u32 %v12029_v41, 16  ;;  %v9762_v4 = vcombine.low %v15252_v12, %v13630_v60  ;;  %v13878_v14 = vld [vmem:[%s12326_s10 + $0x60] sm:$0xff]  }
 0x148   : > { %11168 = vmatmul.mubr.msk.bf16.gmra.mrb[52].mxu1 %vm458_vm1, %v9758_v20  ;;  %v13858_v20 = vld [vmem:[%s12326_s10 + $0x3c] sm:$0xf]  ;;  %v2488_v50 = vsel %vm1174_vm3, %v2483_v36, %v2487_v22  ;;  %v2495_v45 = vrot.slane %v2493_v35, 1  ;;  %v6716_v6 = vshrl.u32 %v12029_v41, 16  ;;  %v6720_v54 = vshll.u32 %v12031_v55, 16 }
 0x149   : > { %11171 = vmatprep.mubr.msk.bf16.mxu1 %vm458_vm1, %v9759_v49  ;;  %15250 = vst [vmem:[#allocation9_spill] sm:$0xff] %v13858_v20  ;;  %v2480_v38 = vsel %vm1174_vm3, %v2475_v9, %v2479_v2  ;;  %v6702_v49 = vor.u32 %v6701_v28, %v6697_v16  ;;  %v2503_v2 = vrot.slane %v2501_v57, 1  ;;  %v6714_v60 = vrot.slane %v6712_v5, 1  ;;  %v13885_v9 = vld [vmem:[%s12326_s10 + $0x48] sm:$0xf]  ;;  %v13890_v16 = vld [vmem:[%s12326_s10 + $0xc0] sm:$0xff]  }
 0x14a   : > { %15254 = vst [vmem:[#allocation11_spill] sm:$0xff] %v13885_v9  ;;  %v13893_v28 = vld [vmem:[%s12326_s10 + $0x4c] sm:$0xf]  ;;  %v13896_v41 = vld [vmem:[%s12326_s10 + $0x50] sm:$0xf]  ;;  %v6722_v35 = vrot.slane %v6720_v54, 1 }
 0x14b   : > { %v6707_v15 = vsel %vm1174_vm3, %v6702_v49, %v6706_v46  ;;  %15255 = vst [vmem:[#allocation25_spill] sm:$0xff] %v13893_v28  ;;  %v12036_v57 = vld [vmem:[%s12326_s10 + $0x68] sm:$0xff]   ;;  %v6724_v5 = vshrl.u32 %v12031_v55, 16 }
 0x14e   : > { %10882 = vmatmul.mubr.msk.bf16.vlgmr.msra.gmra.mrb[0].mxu0 %vm458_vm1, %v2464_v58  ;;  %v6708_v58 = vshrl.u32 %v12027_v61, 16  ;;  %v2505_v61 = vshrl.u32 %v13851_v62, 16  ;;  %v13952_v62 = vld [vmem:[%s12326_s10 + $0xd8] sm:$0xff]  }
 0x14f   : > { %10914 = vmatpush3.bf16.msra.mxu0 %v3140_v48  ;;  %10885 = vmatprep.mubr.msk.bf16.mxu0 %vm458_vm1, %v2472_v8  ;;  %v2491_v48 = vor.u32 %v2489_v23, %v2487_v22  ;;  %v12032_v8 = vld [vmem:[%s12326_s10 + $0x58] sm:$0xff]   ;;  %v6718_v23 = vor.u32 %v6716_v6, %v6714_v60 }
 0x150   : > { %11767 = vmatprep.subr.msk.bf16.mxu0 %vm507_vm0, %v13841_v18  ;;  %11172 = vmatmul.mubr.msk.bf16.gmra.mrb[56].mxu1 %vm458_vm1, %v9760_v44  ;;  %v2499_v44 = vor.u32 %v2497_v47, %v2495_v45  ;;  %v6710_v37 = vor.u32 %v6708_v58, %v6706_v46  ;;  %v2509_v22 = vshll.u32 %v12032_v8, 16  ;;  %v2513_v49 = vshrl.u32 %v12032_v8, 16  ;;  %v12040_v46 = vld [vmem:[%s12326_s10 + $0x78] sm:$0xff]  }
 0x151   : > { %11175 = vmatprep.mubr.msk.bf16.mxu1 %vm458_vm1, %v9761_v32  ;;  %v13882_v32 = vld [vmem:[%s12326_s10 + $0x44] sm:$0xf]  ;;  %v2496_v36 = vsel %vm1174_vm3, %v2491_v48, %v2495_v45  ;;  %v2517_v47 = vshll.u32 %v13878_v14, 16  ;;  %v6732_v58 = vshrl.u32 %v12033_v13, 16  ;;  %v6736_v48 = vshll.u32 %v13890_v16, 16  ;;  %v13910_v45 = vld [vmem:[%s12326_s10 + $0xc8] sm:$0xff]  }
 0x152   : > { %15253 = vst [vmem:[#allocation10_spill] sm:$0xff] %v13882_v32  ;;  %v6715_v12 = vsel %vm1174_vm3, %v6710_v37, %v6714_v60  ;;  %v7230_v8 = vsel %vm507_vm0, %v13746_v51, 0  ;;  %v6723_v55 = vsel %vm1174_vm3, %v6718_v23, %v6722_v35  ;;  %v2507_v6 = vor.u32 %v2505_v61, %v2503_v2  ;;  %v13918_v37 = vld [vmem:[%s12326_s10 + $0x70] sm:$0xff]   ;;  %v13923_v51 = vld [vmem:[%s15044_s1 + $0xe] sm:$0x3] }
 0x153   : > { %v2525_v60 = vshll.u32 %v12036_v57, 16  ;;  %v13929_v23 = vld [vmem:[%s12326_s10 + $0x58] sm:$0xf]  ;;  %v6744_v61 = vshll.u32 %v13910_v45, 16 }
 0x154   : > { %15257 = vst [vmem:[#allocation13_spill] sm:$0xff] %v13929_v23 }
 0x156   : > { %10886 = vmatmul.mubr.msk.bf16.gmra.mrb[4].mxu0 %vm458_vm1, %v2480_v38  ;;  %v6728_v38 = vshll.u32 %v12033_v13, 16  ;;  %v2521_v13 = vshrl.u32 %v13878_v14, 16  ;;  %v6738_v14 = vrot.slane %v6736_v48, 1  ;;  %v2533_v48 = vshll.u32 %v13918_v37, 16 }
 0x157   : > { %10889 = vmatprep.mubr.msk.bf16.mxu0 %vm458_vm1, %v2488_v50  ;;  %v2504_v50 = vsel %vm1174_vm3, %v2499_v44, %v2503_v2  ;;  %v2519_v44 = vrot.slane %v2517_v47, 1  ;;  %v2529_v47 = vshrl.u32 %v12036_v57, 16  ;;  %v6740_v57 = vshrl.u32 %v13890_v16, 16 }
 0x158   : > { %11176 = vmatmul.mubr.msk.bf16.gmra.mrb[60].mxu1 %vm458_vm1, %v9762_v4  ;;  %v2511_v4 = vrot.slane %v2509_v22, 1  ;;  %v6730_v54 = vrot.slane %v6728_v38, 1  ;;  %v13926_v22 = vld [vmem:[%s12326_s10 + $0x54] sm:$0xf]  ;;  %v13934_v38 = vld [vmem:[%s12326_s10 + $0x5c] sm:$0xf] }
 0x159   : > { %11181 = vmatprep.mubr.msk.bf16.mxu1 %vm458_vm1, %v6707_v15  ;;  %15256 = vst [vmem:[#allocation12_spill] sm:$0xff] %v13926_v22  ;;  %15258 = vst [vmem:[#allocation36_spill] sm:$0xff] %v13934_v38 }
 0x15a   : > { %v2515_v15 = vor.u32 %v2513_v49, %v2511_v4  ;;  %v6734_v2 = vor.u32 %v6732_v58, %v6730_v54  ;;  %v2512_v49 = vsel %vm1174_vm3, %v2507_v6, %v2511_v4  ;;  %v2523_v6 = vor.u32 %v2521_v13, %v2519_v44 }
 0x15b   : > { %v2541_v13 = vshll.u32 %v12040_v46, 16 }
 0x15c   : > { %v2520_v58 = vsel %vm1174_vm3, %v2515_v15, %v2519_v44  ;;  %v6746_v15 = vrot.slane %v6744_v61, 1  ;;  %v2535_v44 = vrot.slane %v2533_v48, 1  ;;  %v2545_v61 = vshrl.u32 %v12040_v46, 16  ;;  %v13987_v48 = vld [vmem:[%s12326_s10 + $0x6c] sm:$0xf] }
 0x15d   : > { %15262 = vst [vmem:[#allocation42_spill] sm:$0xff] %v13987_v48  ;;  %v2543_v10 = vrot.slane %v2541_v13, 1  ;;  %v6764_v13 = vshrl.u32 %v13952_v62, 16 }
 0x15e   : > { %10890 = vmatmul.mubr.msk.bf16.gmra.mrb[8].mxu0 %vm458_vm1, %v2496_v36  ;;  %v6726_v36 = vor.u32 %v6724_v5, %v6722_v35  ;;  %v13937_v35 = vld [vmem:[%s12326_s10 + $0x60] sm:$0xf]  ;;  %v13944_v5 = vld [vmem:[%s12326_s10 + $0xd0] sm:$0xff]  }
 0x15f   : > { %10893 = vmatprep.mubr.msk.bf16.mxu0 %vm458_vm1, %v2504_v50  ;;  %15259 = vst [vmem:[#allocation32_spill] sm:$0xff] %v13937_v35  ;;  %v6748_v50 = vshrl.u32 %v13910_v45, 16  ;;  %v6752_v16 = vshll.u32 %v13944_v5, 16  ;;  %v6742_v45 = vor.u32 %v6740_v57, %v6738_v14 }
 0x160   : > { %11182 = vmatmul.mubr.msk.bf16.vlgmr.msra.gmra.mrb[40].mxu1 %vm458_vm1, %v6715_v12  ;;  %v6731_v4 = vsel %vm1174_vm3, %v6726_v36, %v6730_v54  ;;  %v13965_v54 = vld [vmem:[%s12326_s10 + $0x80] sm:$0xff]  }
 0x161   : > { %11206 = vmatpush3.bf16.msra.mxu1 %v7230_v8  ;;  %11185 = vmatprep.mubr.msk.bf16.mxu1 %vm458_vm1, %v6723_v55  ;;  %v2527_v8 = vrot.slane %v2525_v60, 1  ;;  %v6739_v55 = vsel %vm1174_vm3, %v6734_v2, %v6738_v14  ;;  %v2537_v60 = vshrl.u32 %v13918_v37, 16  ;;  %v13968_v36 = vld [vmem:[%s12326_s10 + $0xe0] sm:$0xff]   ;;  %v6760_v2 = vshll.u32 %v13952_v62, 16  ;;  %v14022_v62 = vld [vmem:[%s12326_s10 + $0xf0] sm:$0xff]  }
 0x162   : > { %11777 = vmatprep.subr.msk.bf16.mxu1 %vm507_vm0, %v13923_v51  ;;  %v6750_v14 = vor.u32 %v6748_v50, %v6746_v15  ;;  %v2549_v57 = vshll.u32 %v13965_v54, 16  ;;  %v6754_v56 = vrot.slane %v6752_v16, 1  ;;  %v6747_v46 = vsel %vm1174_vm3, %v6742_v45, %v6746_v15 }
 0x163   : > { %v2531_v12 = vor.u32 %v2529_v47, %v2527_v8  ;;  %v2821_v47 = vld [vmem:[%s12326_s10 + $0x20] sm:$0x8]  ;;  %v2528_v37 = vsel %vm1174_vm3, %v2523_v6, %v2527_v8  ;;  %v2539_v31 = vor.u32 %v2537_v60, %v2535_v44  ;;  %v6756_v50 = vshrl.u32 %v13944_v5, 16  ;;  %v14032_v8 = vld [vmem:[%s12326_s10 + $0xa4] sm:$0xf] }
 0x164   : > { %v9450_v21 = vcombine.low %v2821_v47, %v13984_v24  ;;  %v2547_v16 = vor.u32 %v2545_v61, %v2543_v10  ;;  %v2553_v15 = vshrl.u32 %v13965_v54, 16  ;;  %v2551_v5 = vrot.slane %v2549_v57, 1  ;;  %v15263_v54 = vld [vmem:[#allocation48_spill] sm:$0xff] }
 0x165   : > { %v2536_v6 = vsel %vm1174_vm3, %v2531_v12, %v2535_v44  ;;  %v6762_v12 = vrot.slane %v6760_v2, 1  ;;  %v6772_v44 = vshrl.u32 %v13968_v36, 16  ;;  %v6776_v45 = vshll.u32 %v13998_v29, 16 }
 0x166   : > { %10894 = vmatmul.mubr.msk.bf16.gmra.mrb[12].mxu0 %vm458_vm1, %v2512_v49  ;;  %v13972_v49 = vld [vmem:[%s12326_s10 + $0x88] sm:$0xff]   ;;  %v6755_v47 = vsel %vm1174_vm3, %v6750_v14, %v6754_v56  ;;  %v9451_v57 = vcombine.low %v14010_v19, %v15263_v54  ;;  %v2552_v53 = vsel %vm1174_vm3, %v2547_v16, %v2551_v5  ;;  %v2555_v34 = vor.u32 %v2553_v15, %v2551_v5 }
 0x167   : > { %10897 = vmatprep.mubr.msk.bf16.mxu0 %vm458_vm1, %v2520_v58  ;;  %v13976_v58 = vld [vmem:[%s12326_s10 + $0x64] sm:$0xf]  ;;  %v2557_v30 = vshll.u32 %v13972_v49, 16  ;;  %v2561_v61 = vshrl.u32 %v13972_v49, 16  ;;  %v6758_v49 = vor.u32 %v6756_v50, %v6754_v56  ;;  %v6766_v14 = vor.u32 %v6764_v13, %v6762_v12 }
 0x168   : > { %15260 = vst [vmem:[#allocation14_spill] sm:$0xff] %v13976_v58  ;;  %11186 = vmatmul.mubr.msk.bf16.gmra.mrb[44].mxu1 %vm458_vm1, %v6731_v4  ;;  %v6768_v4 = vshll.u32 %v13968_v36, 16  ;;  %v2943_v56 = vshll.u32 %v9450_v21, 16  ;;  %v2948_v50 = vshrl.u32 %v9451_v57, 16  ;;  %v2951_v13 = vshll.u32 %v9451_v57, 16 }
 0x169   : > { %11189 = vmatprep.mubr.msk.bf16.mxu1 %vm458_vm1, %v6739_v55  ;;  %v14007_v55 = vld [vmem:[%s12326_s10 + $0x90] sm:$0xff]   ;;  %v2559_v2 = vrot.slane %v2557_v30, 1  ;;  %v2544_v30 = vsel %vm1174_vm3, %v2539_v31, %v2543_v10  ;;  %v14054_v31 = vld [vmem:[%s12326_s10 + $0x80] sm:$0xf]  ;;  %v6778_v16 = vrot.slane %v6776_v45, 1  ;;  %v6780_v15 = vshrl.u32 %v13998_v29, 16 }
 0x16a   : > { %v6770_v60 = vrot.slane %v6768_v4, 1  ;;  %v2565_v36 = vshll.u32 %v14007_v55, 16  ;;  %v2940_v4 = vshrl.u32 %v9450_v21, 16  ;;  %v6784_v5 = vshll.u32 %v14022_v62, 16 }
 0x16b   : > { %v2569_v21 = vshrl.u32 %v14007_v55, 16  ;;  %v12049_v10 = vld [vmem:[%s12326_s10 + $0xf8] ss:$0 sps:$4 sm:$0x11]   ;;  %v9803_v45 = vcombine.low %v14037_v42, %v14048_v7  ;;  %v14077_v55 = vld [vmem:[%s12326_s10 + $0xb0] sm:$0xf] }
 0x16c   : > { %v6774_v25 = vor.u32 %v6772_v44, %v6770_v60  ;;  %v2567_v1 = vrot.slane %v2565_v36, 1  ;;  %v6771_v29 = vsel %vm1174_vm3, %v6766_v14, %v6770_v60  ;;  %v2563_v36 = vor.u32 %v2561_v61, %v2559_v2  ;;  %v14090_v61 = vld [vmem:[%s12326_s10 + $0x88] sm:$0xf] }
 0x16d   : > { %v2942_v63 = vrot.slane %v2940_v4, 3  ;;  %v2945_v26 = vrot.slane %v2943_v56, 4  ;;  %v6782_v14 = vor.u32 %v6780_v15, %v6778_v16  ;;  %15267 = vst [vmem:[#allocation51_spill] sm:$0xff] %v14090_v61  ;;  %v7086_v52 = vshrl.u32 %v9803_v45, 16 }
 0x16e   : > { %10898 = vmatmul.mubr.msk.bf16.gmra.mrb[16].mxu0 %vm458_vm1, %v2528_v37  ;;  %v14025_v37 = vld [vmem:[%s12326_s10 + $0x98] ss:$0 sps:$4 sm:$0x11]   ;;  %v6779_v60 = vsel %vm1174_vm3, %v6774_v25, %v6778_v16  ;;  %v7089_v56 = vshll.u32 %v9803_v45, 16  ;;  %v6786_v16 = vrot.slane %v6784_v5, 1  ;;  %v6792_v15 = vshll.u32 %v12049_v10, 16 }
 0x16f   : > { %10901 = vmatprep.mubr.msk.bf16.mxu0 %vm458_vm1, %v2536_v6  ;;  %v6988_v6 = vld [vmem:[%s12326_s10 + $0xa0] sm:$0x8]  ;;  %v2573_v57 = vshll.u32 %v14025_v37, 16  ;;  %v14080_v37 = vld [vmem:[%s12326_s10 + $0xb4] sm:$0xf]  ;;  %v2568_v45 = vsel %vm1174_vm3, %v2563_v36, %v2567_v1  ;;  %v2571_v3 = vor.u32 %v2569_v21, %v2567_v1  ;;  %v6788_v33 = vshrl.u32 %v14022_v62, 16 }
 0x170   : > { %11190 = vmatmul.mubr.msk.bf16.gmra.mrb[48].mxu1 %vm458_vm1, %v6747_v46  ;;  %v14051_v46 = vld [vmem:[%s12326_s10 + $0x7c] sm:$0xf]  ;;  %v9802_v44 = vcombine.low %v6988_v6, %v14032_v8  ;;  %v2560_v6 = vsel %vm1174_vm3, %v2555_v34, %v2559_v2  ;;  %v14087_v2 = vld [vmem:[%s12326_s10 + $0x84] sm:$0xf]  ;;  %v2946_v25 = vor.u32 %v2945_v26, %v2942_v63  ;;  %v14115_v10 = vld [vmem:[%s12326_s10 + $0xb8] sm:$0xf]  ;;  %v6787_v63 = vsel %vm1174_vm3, %v6782_v14, %v6786_v16 }
 0x171   : > { %11193 = vmatprep.mubr.msk.bf16.mxu1 %vm458_vm1, %v6755_v47  ;;  %15264 = vst [vmem:[#allocation37_spill] sm:$0xff] %v14051_v46  ;;  %v6763_v47 = vsel %vm1174_vm3, %v6758_v49, %v6762_v12  ;;  %v2950_v12 = vrot.slane %v2948_v50, 3  ;;  %v2953_v49 = vrot.slane %v2951_v13, 4  ;;  %v14096_v50 = vld [vmem:[%s12326_s10 + $0x8c] sm:$0xf]  ;;  %v7088_v1 = vrot.slane %v7086_v52, 3 }
 0x172   : > { %v7078_v17 = vshrl.u32 %v9802_v44, 16  ;;  %v7081_v34 = vshll.u32 %v9802_v44, 16  ;;  %15269 = vst [vmem:[#allocation61_spill] sm:$0xff] %v14096_v50  ;;  %v14099_v13 = vld [vmem:[%s12326_s10 + $0x90] sm:$0xf]  ;;  %v7091_v21 = vrot.slane %v7089_v56, 4 }
 0x173   : > { %v14112_v54 = vor.u32 %v2953_v49, %v2950_v12  ;;  %v6794_v26 = vrot.slane %v6792_v15, 1  ;;  %v6790_v12 = vor.u32 %v6788_v33, %v6786_v16  ;;  %v14126_v52 = vld [vmem:[%s12326_s10 + $0xc0] sm:$0xf]  ;;  %v9454_v33 = vcombine.low %v13861_v27, %v13882_v32  ;;  %v14137_v16 = vld [vmem:[%s12326_s10 + $0x94] sm:$0xf] }
 0x174   : > { %v7080_v5 = vrot.slane %v7078_v17, 3  ;;  %v7083_v36 = vrot.slane %v7081_v34, 4  ;;  %15271 = vst [vmem:[#allocation63_spill] sm:$0xff] %v14126_v52  ;;  %v14129_v34 = vld [vmem:[%s12326_s10 + $0xc4] sm:$0xf]  ;;  %v9455_v32 = vcombine.low %v13885_v9, %v13893_v28 }
 0x175   : > { %15272 = vst [vmem:[#allocation64_spill] sm:$0xff] %v14129_v34  ;;  %v2955_v14 = vsel %vm691_vm2, %v2946_v25, %v14112_v54  ;;  %v14155_v27 = vld [vmem:[%s12326_s10 + $0xc8] sm:$0xf] }
 0x176   : > { %10902 = vmatmul.mubr.msk.bf16.gmra.mrb[20].mxu0 %vm458_vm1, %v2544_v30  ;;  %v14074_v30 = vld [vmem:[%s12326_s10 + $0x34] sm:$0xf]  ;;  %v7084_v15 = vor.u32 %v7083_v36, %v7080_v5 }
 0x177   : > { %10905 = vmatprep.mubr.msk.bf16.mxu0 %vm458_vm1, %v2552_v53  ;;  %15265 = vst [vmem:[#allocation43_spill] sm:$0xff] %v14074_v30  ;;  %v14083_v53 = vld [vmem:[%s12326_s10 + $0x38] sm:$0xf]  ;;  %v9452_v4 = vcombine.low %v15268_v0, %v14074_v30  ;;  %v2575_v0 = vrot.slane %v2573_v57, 1  ;;  %v14144_v30 = vld [vmem:[%s12326_s10 + $0x9c] sm:$0xf] }
 0x178   : > { %15266 = vst [vmem:[#allocation45_spill] sm:$0xff] %v14083_v53  ;;  %11194 = vmatmul.mubr.msk.bf16.gmra.mrb[52].mxu1 %vm458_vm1, %v6763_v47  ;;  %v9804_v47 = vcombine.low %v14077_v55, %v14080_v37  ;;  %v9453_v40 = vcombine.low %v14083_v53, %v13858_v20 }
 0x179   : > { %11197 = vmatprep.mubr.msk.bf16.mxu1 %vm458_vm1, %v6771_v29  ;;  %v14118_v29 = vld [vmem:[%s12326_s10 + $0xbc] sm:$0xf]  ;;  %v2957_v62 = vshrl.u32 %v9452_v4, 16  ;;  %v2960_v17 = vshll.u32 %v9452_v4, 16  ;;  %v2576_v56 = vsel %vm1174_vm3, %v2571_v3, %v2575_v0  ;;  %v14147_v0 = vld [vmem:[%s12326_s10 + $0xa0] sm:$0xf] }
 0x17a   : > { %15270 = vst [vmem:[#allocation62_spill] sm:$0xff] %v14118_v29  ;;  %v7095_v57 = vshrl.u32 %v9804_v47, 16  ;;  %v2966_v49 = vshrl.u32 %v9453_v40, 16  ;;  %v2969_v44 = vshll.u32 %v9453_v40, 16  ;;  %v7098_v4 = vshll.u32 %v9804_v47, 16 }
 0x17b   : > { %v14140_v40 = vld [vmem:[%s12326_s10 + $0x98] sm:$0xf]  ;;  %v2959_v20 = vrot.slane %v2957_v62, 3  ;;  %v2962_v25 = vrot.slane %v2960_v17, 4  ;;  %v2975_v3 = vshrl.u32 %v9454_v33, 16 }
 0x17c   : > { %v7097_v47 = vrot.slane %v7095_v57, 3  ;;  %v2968_v36 = vrot.slane %v2966_v49, 3  ;;  %v7100_v53 = vrot.slane %v7098_v4, 4  ;;  %v6795_v57 = vsel %vm1174_vm3, %v6790_v12, %v6794_v26 }
 0x17d   : > { %v2963_v5 = vor.u32 %v2962_v25, %v2959_v20  ;;  %v2984_v49 = vshrl.u32 %v9455_v32, 16  ;;  %v7972_v20 = vld [vmem:[%s15046_s3 + $0x108] sm:$0xff]  ;;  %v14186_v25 = vld [vmem:[%s12326_s10 + $0xd4] sm:$0xf] }
 0x17e   : > { %10906 = vmatmul.mubr.msk.bf16.gmra.mrb[24].mxu0 %vm458_vm1, %v2560_v6  ;;  %v9805_v6 = vcombine.low %v14115_v10, %v14118_v29  ;;  %v2978_v29 = vshll.u32 %v9454_v33, 16  ;;  %v7101_v9 = vor.u32 %v7100_v53, %v7097_v47  ;;  %8057 = vperm.xlu1 %11857, %v7972_v20   ;;  %v3402_v47 = vsel %vm507_vm0, %v13841_v18, 0 }
 0x17f   : > { %10909 = vmatprep.mubr.msk.bf16.mxu0 %vm458_vm1, %v2568_v45  ;;  %v7092_v45 = vor.u32 %v7091_v21, %v7088_v1  ;;  %v2971_v1 = vrot.slane %v2969_v44, 4  ;;  %v2987_v44 = vshll.u32 %v9455_v32, 16  ;;  %v7971_v32 = vld [vmem:[%s15046_s3 + $0x100] sm:$0xff]  ;;  %v2964_v53 = vsel %vm691_vm2, %v14112_v54, %v2963_v5  ;;  %v14194_v54 = vld [vmem:[%s12326_s10 + $0xd8] sm:$0xf] }
 0x180   : > { %11198 = vmatmul.mubr.msk.bf16.gmra.mrb[56].mxu1 %vm458_vm1, %v6779_v60  ;;  %v14158_v60 = vld [vmem:[%s12326_s10 + $0xcc] sm:$0xf]  ;;  %v7104_v21 = vshrl.u32 %v9805_v6, 16  ;;  %v7107_v62 = vshll.u32 %v9805_v6, 16  ;;  %8052 = vperm.xlu0 %11856, %v7971_v32   ;;  %v9458_v20 = vcombine.low %v13937_v35, %v13976_v58  ;;  %v14222_v32 = vld [vmem:[%s12326_s10 + $0xe0] sm:$0xf]  ;;  %v9459_v58 = vcombine.low %v13979_v59, %v13987_v48 }
 0x181   : > { %11201 = vmatprep.mubr.msk.bf16.mxu1 %vm458_vm1, %v6787_v63  ;;  %15273 = vst [vmem:[#allocation65_spill] sm:$0xff] %v14158_v60  ;;  %v9806_v63 = vcombine.low %v14126_v52, %v14129_v34  ;;  %v9807_v17 = vcombine.low %v14155_v27, %v14158_v60  ;;  %v7093_v6 = vsel %vm691_vm2, %v7084_v15, %v7092_v45  ;;  %v2977_v34 = vrot.slane %v2975_v3, 3  ;;  %v14183_v3 = vld [vmem:[%s12326_s10 + $0xd0] sm:$0xf]  ;;  %v14250_v35 = vld [vmem:[%s12326_s10 + $0xec] sm:$0xf] }
 0x182   : > { %v2972_v4 = vor.u32 %v2971_v1, %v2968_v36  ;;  %v7106_v28 = vrot.slane %v7104_v21, 3  ;;  %v7109_v33 = vrot.slane %v7107_v62, 4  ;;  %v9456_v15 = vcombine.low %v13896_v41, %v13926_v22  ;;  %v14197_v62 = vld [vmem:[%s12326_s10 + $0xdc] sm:$0xf] }
 0x183   : > { %v7113_v52 = vshrl.u32 %v9806_v63, 16  ;;  %v7116_v60 = vshll.u32 %v9806_v63, 16  ;;  %v7122_v26 = vshrl.u32 %v9807_v17, 16  ;;  %v7125_v12 = vshll.u32 %v9807_v17, 16 }
 0x184   : > { %v2973_v36 = vsel %vm691_vm2, %v2963_v5, %v2972_v4  ;;  %v7110_v1 = vor.u32 %v7109_v33, %v7106_v28  ;;  %v9457_v21 = vcombine.low %v13929_v23, %v13934_v38  ;;  %v7102_v63 = vsel %vm691_vm2, %v7092_v45, %v7101_v9 }
 0x185   : > { %v7118_v18 = vrot.slane %v7116_v60, 4  ;;  %v7124_v28 = vrot.slane %v7122_v26, 3  ;;  %v7127_v5 = vrot.slane %v7125_v12, 4  ;;  %v7435_v60 = vsel %vm507_vm0, %v13923_v51, 0 }
 0x186   : > { %10910 = vmatmul.mubr.msk.bf16.gmra.mrb[28].mxu0 %vm458_vm1, %v2576_v56  ;;  %v2980_v56 = vrot.slane %v2978_v29, 4  ;;  %v2986_v29 = vrot.slane %v2984_v49, 3  ;;  %v14203_v49 = vld [vmem:[%s15044_s1 + $0x10] sm:$0x3]  ;;  %v7111_v33 = vsel %vm691_vm2, %v7101_v9, %v7110_v1  ;;  %v3005_v26 = vshll.u32 %v9457_v21, 16 }
 0x187   : > { %10915 = vmatprep.mubr.msk.bf16.mxu0 %vm458_vm1, %v2955_v14  ;;  %v2989_v14 = vrot.slane %v2987_v44, 4  ;;  %v9808_v44 = vcombine.low %v14183_v3, %v14186_v25  ;;  %v14230_v51 = vor.u32 %v7127_v5, %v7124_v28  ;;  %v3020_v38 = vshrl.u32 %v9459_v58, 16 }
 0x188   : > { %11202 = vmatmul.mubr.msk.bf16.gmra.mrb[60].mxu1 %vm458_vm1, %v6795_v57  ;;  %v2981_v17 = vor.u32 %v2980_v56, %v2977_v34  ;;  %v7115_v57 = vrot.slane %v7113_v52, 3  ;;  %v2993_v52 = vshrl.u32 %v9456_v15, 16  ;;  %v2996_v34 = vshll.u32 %v9456_v15, 16  ;;  %v7974_v15 = vld [vmem:[%s15046_s3 + $0x118] sm:$0xff] }
 0x189   : > { %11207 = vmatprep.mubr.msk.bf16.mxu1 %vm458_vm1, %v7093_v6  ;;  %v14209_v45 = vor.u32 %v2989_v14, %v2986_v29  ;;  %v9809_v6 = vcombine.low %v14194_v54, %v14197_v62  ;;  %v3002_v56 = vshrl.u32 %v9457_v21, 16  ;;  %v7131_v29 = vshrl.u32 %v9808_v44, 16  ;;  %8067 = vperm.xlu1 %11857, %v7974_v15  }
 0x18a   : > { %v2982_v12 = vsel %vm691_vm2, %v2972_v4, %v2981_v17  ;;  %v7119_v9 = vor.u32 %v7118_v18, %v7115_v57  ;;  %v7134_v14 = vshll.u32 %v9808_v44, 16  ;;  %v14233_v4 = vld [vmem:[%s12326_s10 + $0xe4] sm:$0xf]  ;;  %v2995_v21 = vrot.slane %v2993_v52, 3  ;;  %v14245_v18 = vld [vmem:[%s12326_s10 + $0xe8] sm:$0xf] }
 0x18b   : > { %v7140_v57 = vshrl.u32 %v9809_v6, 16  ;;  %v3004_v28 = vrot.slane %v3002_v56, 3  ;;  %v3007_v5 = vrot.slane %v3005_v26, 4  ;;  %v7143_v44 = vshll.u32 %v9809_v6, 16  ;;  %v7976_v52 = vld [vmem:[%s15046_s3 + $0x128] sm:$0xff]  ;;  %v7975_v26 = vld [vmem:[%s15046_s3 + $0x120] sm:$0xff] }
 0x18c   : > { %v7133_v6 = vrot.slane %v7131_v29, 3  ;;  %v7136_v56 = vrot.slane %v7134_v14, 4  ;;  %v9811_v48 = vcombine.low %v14245_v18, %v14250_v35 }
 0x18d   : > { %v3008_v59 = vor.u32 %v3007_v5, %v3004_v28  ;;  %8077 = vperm.xlu1 %11857, %v7976_v52   ;;  %v14282_v5 = vld [vmem:[%s12326_s10 + $0xf0] sm:$0xf]  ;;  %v3022_v52 = vrot.slane %v3020_v38, 3 }
 0x18e   : > { %10916 = vmatmul.mubr.msk.bf16.vlgmr.msra.gmra.mrb[0].mxu0 %vm458_vm1, %v2964_v53  ;;  %v14227_v53 = vld [vmem:[%s15044_s1 + $0x10] sm:$0x3]  ;;  %v7161_v28 = vshll.u32 %v9811_v48, 16 }
 0x18f   : > { %10948 = vmatpush3.bf16.msra.mxu0 %v3402_v47  ;;  %10919 = vmatprep.mubr.msk.bf16.mxu0 %vm458_vm1, %v2973_v36  ;;  %v7973_v47 = vld [vmem:[%s15046_s3 + $0x110] sm:$0xff]  ;;  %v2991_v36 = vsel %vm691_vm2, %v2981_v17, %v14209_v45  ;;  %v9810_v17 = vcombine.low %v14222_v32, %v14233_v4 }
 0x190   : > { %11768 = vmatprep.subr.msk.bf16.mxu0 %vm507_vm0, %v14203_v49  ;;  %11208 = vmatmul.mubr.msk.bf16.vlgmr.msra.gmra.mrb[40].mxu1 %vm458_vm1, %v7102_v63  ;;  %v2998_v63 = vrot.slane %v2996_v34, 4  ;;  %v7120_v34 = vsel %vm691_vm2, %v7110_v1, %v7119_v9  ;;  %v3023_v1 = vshll.u32 %v9459_v58, 16  ;;  %v7977_v58 = vld [vmem:[%s15046_s3 + $0x130] sm:$0xff] }
 0x191   : > { %11232 = vmatpush3.bf16.msra.mxu1 %v7435_v60  ;;  %11211 = vmatprep.mubr.msk.bf16.mxu1 %vm458_vm1, %v7111_v33  ;;  %v3011_v60 = vshrl.u32 %v9458_v20, 16  ;;  %v3014_v33 = vshll.u32 %v9458_v20, 16  ;;  %v7129_v20 = vsel %vm691_vm2, %v7119_v9, %v14230_v51  ;;  %v7149_v23 = vshrl.u32 %v9810_v17, 16 }
 0x192   : > { %11778 = vmatprep.subr.msk.bf16.mxu1 %vm507_vm0, %v14227_v53  ;;  %8062 = vperm.xlu0 %11856, %v7973_v47   ;;  %v2999_v15 = vor.u32 %v2998_v63, %v2995_v21  ;;  %v7142_v47 = vrot.slane %v7140_v57, 3  ;;  %v7152_v22 = vshll.u32 %v9810_v17, 16  ;;  %v7137_v9 = vor.u32 %v7136_v56, %v7133_v6  ;;  %v7978_v21 = vld [vmem:[%s15046_s3 + $0x138] sm:$0xff] }
 0x193   : > { %v3013_v29 = vrot.slane %v3011_v60, 3  ;;  %v3016_v14 = vrot.slane %v3014_v33, 4  ;;  %v7158_v57 = vshrl.u32 %v9811_v48, 16  ;;  %v9461_v60 = vcombine.low %v14043_v43, %v14051_v46  ;;  %v14291_v6 = vld [vmem:[%s12326_s10 + $0xf8] sm:$0xf]  ;;  %8087 = vperm.xlu1 %11857, %v7978_v21   ;;  %v7980_v48 = vld [vmem:[%s15046_s3 + $0x148] sm:$0xff] }
 0x194   : > { %v3000_v63 = vsel %vm691_vm2, %v14209_v45, %v2999_v15  ;;  %v3009_v33 = vsel %vm691_vm2, %v2999_v15, %v3008_v59  ;;  %v7154_v45 = vrot.slane %v7152_v22, 4  ;;  %v7138_v15 = vsel %vm691_vm2, %v14230_v51, %v7137_v9  ;;  %v7979_v22 = vld [vmem:[%s15046_s3 + $0x140] sm:$0xff] }
 0x195   : > { %v3017_v56 = vor.u32 %v3016_v14, %v3013_v29  ;;  %v3038_v29 = vshrl.u32 %v9461_v60, 16  ;;  %v3041_v14 = vshll.u32 %v9461_v60, 16  ;;  %v7981_v60 = vld [vmem:[%s15046_s3 + $0x150] sm:$0xff] }
 0x196   : > { %10920 = vmatmul.mubr.msk.bf16.gmra.mrb[4].mxu0 %vm458_vm1, %v2982_v12  ;;  %v7145_v12 = vrot.slane %v7143_v44, 4  ;;  %8072 = vperm.xlu0 %11856, %v7975_v26   ;;  %v14285_v44 = vld [vmem:[%s12326_s10 + $0xf4] sm:$0xf]  ;;  %v7151_v26 = vrot.slane %v7149_v23, 3  ;;  %v7160_v23 = vrot.slane %v7158_v57, 3 }
 0x197   : > { %10923 = vmatprep.mubr.msk.bf16.mxu0 %vm458_vm1, %v2991_v36  ;;  %v9460_v36 = vcombine.low %v13990_v11, %v14040_v39  ;;  %8097 = vperm.xlu1 %11857, %v7980_v48  }
 0x198   : > { %11212 = vmatmul.mubr.msk.bf16.gmra.mrb[44].mxu1 %vm458_vm1, %v7120_v34  ;;  %v7146_v17 = vor.u32 %v7145_v12, %v7142_v47  ;;  %v3025_v34 = vrot.slane %v3023_v1, 4  ;;  %v9812_v12 = vcombine.low %v14282_v5, %v14285_v44  ;;  %v7163_v1 = vrot.slane %v7161_v28, 4 }
 0x199   : > { %11215 = vmatprep.mubr.msk.bf16.mxu1 %vm458_vm1, %v7129_v20  ;;  %v14294_v20 = vld [vmem:[%s12326_s10 + $0xfc] sm:$0xf]  ;;  %v3029_v38 = vshrl.u32 %v9460_v36, 16  ;;  %v3032_v47 = vshll.u32 %v9460_v36, 16  ;;  %v3018_v36 = vsel %vm691_vm2, %v3008_v59, %v3017_v56  ;;  %v3040_v59 = vrot.slane %v3038_v29, 3 }
 0x19a   : > { %8082 = vperm.xlu0 %11856, %v7977_v58   ;;  %v7147_v21 = vsel %vm691_vm2, %v7137_v9, %v7146_v17  ;;  %v3026_v58 = vor.u32 %v3025_v34, %v3022_v52  ;;  %v9813_v51 = vcombine.low %v14291_v6, %v14294_v20  ;;  %v7167_v57 = vshrl.u32 %v9812_v12, 16  ;;  %v7982_v9 = vld [vmem:[%s15046_s3 + $0x158] sm:$0xff] }
 0x19b   : > { %v3031_v46 = vrot.slane %v3029_v38, 3  ;;  %v7170_v28 = vshll.u32 %v9812_v12, 16  ;;  %v7164_v52 = vor.u32 %v7163_v1, %v7160_v23  ;;  %v3043_v34 = vrot.slane %v3041_v14, 4  ;;  %8107 = vperm.xlu1 %11857, %v7982_v9   ;;  %v7983_v14 = vld [vmem:[%s15046_s3 + $0x160] sm:$0xff] }
 0x19c   : > { %v3027_v48 = vsel %vm691_vm2, %v3017_v56, %v3026_v58  ;;  %v7179_v38 = vshll.u32 %v9813_v51, 16  ;;  %v7169_v1 = vrot.slane %v7167_v57, 3 }
 0x19d   : > { %v7172_v29 = vrot.slane %v7170_v28, 4 }
 0x19e   : > { %10924 = vmatmul.mubr.msk.bf16.gmra.mrb[8].mxu0 %vm458_vm1, %v3000_v63  ;;  %v7155_v63 = vor.u32 %v7154_v45, %v7151_v26  ;;  %8092 = vperm.xlu0 %11856, %v7979_v22   ;;  %v9462_v26 = vcombine.low %v14054_v31, %v14087_v2  ;;  %v14323_v45 = vld [vmem:[%s12326_s10 + $0x100] sm:$0xf]  ;;  %v7984_v22 = vld [vmem:[%s15046_s3 + $0x168] sm:$0xff] }
 0x19f   : > { %10927 = vmatprep.mubr.msk.bf16.mxu0 %vm458_vm1, %v3009_v33  ;;  %v3034_v33 = vrot.slane %v3032_v47, 4  ;;  %v9463_v47 = vcombine.low %v14090_v61, %v14096_v50  ;;  %v9814_v56 = vcombine.low %v14323_v45, %v14323_v45  ;;  %v7181_v50 = vrot.slane %v7179_v38, 4  ;;  %8117 = vperm.xlu1 %11857, %v7984_v22   ;;  %v7988_v22 = vld [vmem:[%s15046_s3 + $0x188] sm:$0xff] }
 0x1a0   : > { %11216 = vmatmul.mubr.msk.bf16.gmra.mrb[48].mxu1 %vm458_vm1, %v7138_v15  ;;  %v7176_v15 = vshrl.u32 %v9813_v51, 16  ;;  %v7156_v12 = vsel %vm691_vm2, %v7146_v17, %v7155_v63  ;;  %v7165_v17 = vsel %vm691_vm2, %v7155_v63, %v7164_v52  ;;  %v3047_v51 = vshrl.u32 %v9462_v26, 16  ;;  %v7986_v63 = vld [vmem:[%s15046_s3 + $0x178] sm:$0xff] }
 0x1a1   : > { %11219 = vmatprep.mubr.msk.bf16.mxu1 %vm458_vm1, %v7147_v21  ;;  %v3035_v23 = vor.u32 %v3034_v33, %v3031_v46  ;;  %v3044_v21 = vor.u32 %v3043_v34, %v3040_v59  ;;  %v3050_v9 = vshll.u32 %v9462_v26, 16  ;;  %v3059_v46 = vshll.u32 %v9463_v47, 16  ;;  %v7985_v59 = vld [vmem:[%s15046_s3 + $0x170] sm:$0xff] }
 0x1a2   : > { %8102 = vperm.xlu0 %11856, %v7981_v60   ;;  %v7178_v60 = vrot.slane %v7176_v15, 3  ;;  %v7173_v57 = vor.u32 %v7172_v29, %v7169_v1  ;;  %v7185_v28 = vshrl.u32 %v9814_v56, 16  ;;  %v7188_v61 = vshll.u32 %v9814_v56, 16  ;;  %v7987_v29 = vld [vmem:[%s15046_s3 + $0x180] sm:$0xff] }
 0x1a3   : > { %v3036_v33 = vsel %vm691_vm2, %v3026_v58, %v3035_v23  ;;  %v3045_v34 = vsel %vm691_vm2, %v3035_v23, %v3044_v21  ;;  %v3049_v26 = vrot.slane %v3047_v51, 3  ;;  %v9464_v58 = vcombine.low %v14099_v13, %v14137_v16  ;;  %8127 = vperm.xlu1 %11857, %v7986_v63  }
 0x1a4   : > { %v7182_v15 = vor.u32 %v7181_v50, %v7178_v60  ;;  %v7187_v23 = vrot.slane %v7185_v28, 3  ;;  %v7190_v1 = vrot.slane %v7188_v61, 4  ;;  %v7174_v50 = vsel %vm691_vm2, %v7164_v52, %v7173_v57  ;;  %v7989_v52 = vld [vmem:[%s15046_s3 + $0x190] sm:$0xff] }
 0x1a5   : > { %v9466_v63 = vcombine.low %v14147_v0, %v14147_v0 }
 0x1a6   : > { %10928 = vmatmul.mubr.msk.bf16.gmra.mrb[12].mxu0 %vm458_vm1, %v3018_v36  ;;  %v3056_v36 = vshrl.u32 %v9463_v47, 16  ;;  %8112 = vperm.xlu0 %11856, %v7983_v14   ;;  %v3061_v47 = vrot.slane %v3059_v46, 4  ;;  %v3065_v14 = vshrl.u32 %v9464_v58, 16  ;;  %v7183_v51 = vsel %vm691_vm2, %v7173_v57, %v7182_v15  ;;  %v7990_v46 = vld [vmem:[%s15046_s3 + $0x198] sm:$0xff] }
 0x1a7   : > { %10931 = vmatprep.mubr.msk.bf16.mxu0 %vm458_vm1, %v3027_v48  ;;  %v3052_v48 = vrot.slane %v3050_v9, 4  ;;  %8137 = vperm.xlu1 %11857, %v7988_v22   ;;  %v7191_v61 = vor.u32 %v7190_v1, %v7187_v23  ;;  %v3086_v22 = vshll.u32 %v9466_v63, 16 }
 0x1a8   : > { %11220 = vmatmul.mubr.msk.bf16.gmra.mrb[52].mxu1 %vm458_vm1, %v7156_v12  ;;  %v3058_v38 = vrot.slane %v3056_v36, 3  ;;  %v9465_v12 = vcombine.low %v14140_v40, %v14144_v30  ;;  %v3067_v57 = vrot.slane %v3065_v14, 3  ;;  %v9830_v14 = vcombine.low %v14080_v37, %v14115_v10  ;;  %v15274_v37 = vld [vmem:[#allocation63_spill] sm:$0xff]  ;;  %v15275_v10 = vld [vmem:[#allocation62_spill] sm:$0xff] }
 0x1a9   : > { %11223 = vmatprep.mubr.msk.bf16.mxu1 %vm458_vm1, %v7165_v17  ;;  %v3053_v56 = vor.u32 %v3052_v48, %v3049_v26  ;;  %v3068_v17 = vshll.u32 %v9464_v58, 16  ;;  %v7992_v48 = vld [vmem:[%s15046_s3 + $0x1a8] sm:$0xff]  ;;  %v7991_v58 = vld [vmem:[%s15046_s3 + $0x1a0] sm:$0xff] }
 0x1aa   : > { %8122 = vperm.xlu0 %11856, %v7985_v59   ;;  %v3062_v9 = vor.u32 %v3061_v47, %v3058_v38  ;;  %v3074_v60 = vshrl.u32 %v9465_v12, 16  ;;  %v3077_v36 = vshll.u32 %v9465_v12, 16  ;;  %v7192_v38 = vsel %vm691_vm2, %v7182_v15, %v7191_v61  ;;  %v15277_v61 = vld [vmem:[#allocation45_spill] sm:$0xff] }
 0x1ab   : > { %v3070_v28 = vrot.slane %v3068_v17, 4  ;;  %8147 = vperm.xlu1 %11857, %v7990_v46   ;;  %v3083_v12 = vshrl.u32 %v9466_v63, 16  ;;  %v3896_v46 = vsel %vm507_vm0, %v14203_v49, 0  ;;  %v9834_v63 = vcombine.low %v14186_v25, %v14194_v54  ;;  %v15284_v49 = vld [vmem:[#allocation24_spill] sm:$0xff] }
 0x1ac   : > { %v3063_v59 = vsel %vm691_vm2, %v3053_v56, %v3062_v9  ;;  %v3079_v26 = vrot.slane %v3077_v36, 4  ;;  %v9836_v25 = vcombine.low %v14233_v4, %v14245_v18  ;;  %v12101_v54 = vld [vmem:[%s12326_s10 + $0xa4] sm:$0xff]   ;;  %v9838_v4 = vcombine.low %v14285_v44, %v14291_v6 }
 0x1ad   : > { %v3071_v47 = vor.u32 %v3070_v28, %v3067_v57  ;;  %v3085_v1 = vrot.slane %v3083_v12, 3  ;;  %v15282_v28 = vld [vmem:[#allocation65_spill] sm:$0xff]  ;;  %v15291_v12 = vld [vmem:[#allocation12_spill] sm:$0xff]  ;;  %v7680_v18 = vshrl.u32 %v12101_v54, 16  ;;  %v9839_v44 = vcombine.low %v14294_v20, %v14323_v45 }
 0x1ae   : > { %10932 = vmatmul.mubr.msk.bf16.gmra.mrb[16].mxu0 %vm458_vm1, %v3036_v33  ;;  %8132 = vperm.xlu0 %11856, %v7987_v29   ;;  %v3054_v33 = vsel %vm691_vm2, %v3044_v21, %v3053_v56  ;;  %v9828_v21 = vcombine.low %v14032_v8, %v14037_v42  ;;  %v7994_v42 = vld [vmem:[%s15046_s3 + $0x1b8] sm:$0xff]  ;;  %v7993_v8 = vld [vmem:[%s15046_s3 + $0x1b0] sm:$0xff]  ;;  %v3088_v29 = vrot.slane %v3086_v22, 4  ;;  %v9829_v56 = vcombine.low %v14048_v7, %v14077_v55 }
 0x1af   : > { %10935 = vmatprep.mubr.msk.bf16.mxu0 %vm458_vm1, %v3045_v34  ;;  %v3076_v34 = vrot.slane %v3074_v60, 3  ;;  %8157 = vperm.xlu1 %11857, %v7992_v48   ;;  %v3072_v15 = vsel %vm691_vm2, %v3062_v9, %v3071_v47  ;;  %v14408_v9 = vld [vmem:[%s15047_s4] sm:$0x3]  ;;  %v9484_v55 = vcombine.low %v13984_v24, %v14010_v19  ;;  %v15276_v60 = vld [vmem:[#allocation64_spill] sm:$0xff]  ;;  %v15286_v48 = vld [vmem:[#allocation10_spill] sm:$0xff] }
 0x1b0   : > { %11224 = vmatmul.mubr.msk.bf16.gmra.mrb[56].mxu1 %vm458_vm1, %v7174_v50  ;;  %v3089_v17 = vor.u32 %v3088_v29, %v3085_v1  ;;  %v9832_v36 = vcombine.low %v15276_v60, %v14155_v27  ;;  %v15278_v19 = vld [vmem:[#allocation43_spill] sm:$0xff]  ;;  %v9833_v27 = vcombine.low %v15282_v28, %v14183_v3  ;;  %v15292_v22 = vld [vmem:[#allocation13_spill] sm:$0xff]  ;;  %v15295_v29 = vld [vmem:[#allocation32_spill] sm:$0xff] }
 0x1b1   : > { %11227 = vmatprep.mubr.msk.bf16.mxu1 %vm458_vm1, %v7183_v51  ;;  %v3080_v23 = vor.u32 %v3079_v26, %v3076_v34  ;;  %v7816_v51 = vsel %vm507_vm0, %v14227_v53, 0  ;;  %v9831_v53 = vcombine.low %v15275_v10, %v15274_v37  ;;  %v9486_v24 = vcombine.low %v15278_v19, %v15277_v61  ;;  %v15287_v3 = vld [vmem:[#allocation11_spill] sm:$0xff]  ;;  %v15300_v61 = vld [vmem:[#allocation42_spill] sm:$0xff] }
 0x1b2   : > { %8142 = vperm.xlu0 %11856, %v7989_v52   ;;  %v15279_v52 = vld [vmem:[#allocation48_spill] sm:$0xff]  ;;  %v9835_v26 = vcombine.low %v14197_v62, %v14222_v32  ;;  %v9837_v32 = vcombine.low %v14250_v35, %v14282_v5  ;;  %v12106_v35 = vld [vmem:[%s12326_s10 + $0xbc] sm:$0xff]   ;;  %v15301_v19 = vcombine.low %v15300_v61, %v13990_v11 }
 0x1b3   : > { %v3081_v50 = vsel %vm691_vm2, %v3071_v47, %v3080_v23  ;;  %8167 = vperm.xlu1 %11857, %v7994_v42   ;;  %v3090_v7 = vsel %vm691_vm2, %v3080_v23, %v3089_v17  ;;  %v15289_v47 = vld [vmem:[#allocation25_spill] sm:$0xff]  ;;  %v15293_v23 = vcombine.low %v15291_v12, %v15292_v22  ;;  %v15294_v5 = vld [vmem:[#allocation36_spill] sm:$0xff]  ;;  %v7703_v37 = vshll.u32 %v12106_v35, 16 }
 0x1b4   : > { %v15290_v62 = vcombine.low %v15289_v47, %v13896_v41  ;;  %v12104_v41 = vld [vmem:[%s12326_s10 + $0xb4] sm:$0xff]  }
 0x1b5   : > { %v7695_v6 = vshll.u32 %v12104_v41, 16  ;;  %v7705_v45 = vrot.slane %v7703_v37, 1 }
 0x1b6   : > { %10936 = vmatmul.mubr.msk.bf16.gmra.mrb[20].mxu0 %vm458_vm1, %v3054_v33  ;;  %8152 = vperm.xlu0 %11856, %v7991_v58   ;;  %v15280_v33 = vld [vmem:[#allocation49_spill] sm:$0xff] }
 0x1b7   : > { %10939 = vmatprep.mubr.msk.bf16.mxu0 %vm458_vm1, %v3063_v59  ;;  %v15281_v57 = vcombine.low %v15279_v52, %v15280_v33  ;;  %v15283_v59 = vld [vmem:[#allocation9_spill] sm:$0xff]  ;;  %v7697_v10 = vrot.slane %v7695_v6, 1  ;;  %v15302_v52 = vcombine.low %v14040_v39, %v14043_v43  ;;  %v7707_v33 = vshrl.u32 %v12106_v35, 16 }
 0x1b8   : > { %11228 = vmatmul.mubr.msk.bf16.gmra.mrb[60].mxu1 %vm458_vm1, %v7192_v38  ;;  %v15285_v34 = vcombine.low %v15283_v59, %v15284_v49  ;;  %v12102_v58 = vld [vmem:[%s12326_s10 + $0xac] sm:$0xff]   ;;  %v7682_v38 = vshll.u32 %v12101_v54, 16 }
 0x1b9   : > { %11233 = vmatprep.mubr.msk.bf16.mxu1 %vm458_vm1, %v9828_v21  ;;  %v15288_v21 = vcombine.low %v15286_v48, %v15287_v3  ;;  %v7709_v43 = vor.u32 %v7707_v33, %v7705_v45 }
 0x1ba   : > { %8162 = vperm.xlu0 %11856, %v7993_v8   ;;  %v7684_v42 = vrot.slane %v7682_v38, 1  ;;  %v7687_v8 = vshll.u32 %v12102_v58, 16 }
 0x1bc   : > { %v7689_v1 = vrot.slane %v7687_v8, 1 }
 0x1be   : > { %10940 = vmatmul.mubr.msk.bf16.gmra.mrb[24].mxu0 %vm458_vm1, %v3072_v15  ;;  %v7685_v15 = vor.u32 %v7684_v42, %v7680_v18 }
 0x1bf   : > { %10943 = vmatprep.mubr.msk.bf16.mxu0 %vm458_vm1, %v3081_v50  ;;  %v15296_v50 = vcombine.low %v15294_v5, %v15295_v29  ;;  %v12120_v5 = vld [vmem:[%s12326_s10 + $0x34] sm:$0xff]  }
 0x1c0   : > { %11234 = vmatmul.mubr.msk.bf16.vlgmr.msra.gmra.mrb[40].mxu1 %vm458_vm1, %v9829_v56  ;;  %v15297_v56 = vld [vmem:[#allocation14_spill] sm:$0xff]  ;;  %v3731_v37 = vshll.u32 %v12120_v5, 16 }
 0x1c1   : > { %11258 = vmatpush3.bf16.msra.mxu1 %v7816_v51  ;;  %11237 = vmatprep.mubr.msk.bf16.mxu1 %vm458_vm1, %v9830_v14  ;;  %v15298_v14 = vld [vmem:[#allocation15_spill] sm:$0xff]  ;;  %v7691_v51 = vshrl.u32 %v12102_v58, 16 }
 0x1c2   : > { %11779 = vmatprep.subr.msk.bf16.mxu1 %vm507_vm0, %v14408_v9  ;;  %v15299_v17 = vcombine.low %v15297_v56, %v15298_v14 }
 0x1c3   : > { %v7693_v60 = vor.u32 %v7691_v51, %v7689_v1 }
 0x1c6   : > { %10944 = vmatmul.mubr.msk.bf16.gmra.mrb[28].mxu0 %vm458_vm1, %v3090_v7  ;;  %v7690_v7 = vsel %vm1174_vm3, %v7685_v15, %v7689_v1  ;;  %v15307_v1 = vld [vmem:[#allocation61_spill] sm:$0xff] }
 0x1c7   : > { %10949 = vmatprep.mubr.msk.bf16.mxu0 %vm458_vm1, %v9484_v55  ;;  %v7699_v55 = vshrl.u32 %v12104_v41, 16  ;;  %v12119_v41 = vld [vmem:[%s12326_s10 + $0xec] sm:$0xff]   ;;  %v15308_v35 = vcombine.low %v15307_v1, %v14099_v13 }
 0x1c8   : > { %11238 = vmatmul.mubr.msk.bf16.gmra.mrb[44].mxu1 %vm458_vm1, %v9831_v53  ;;  %v12108_v53 = vld [vmem:[%s12326_s10 + $0xc4] sm:$0xff]   ;;  %v7751_v51 = vshll.u32 %v12119_v41, 16 }
 0x1c9   : > { %11241 = vmatprep.mubr.msk.bf16.mxu1 %vm458_vm1, %v9832_v36  ;;  %v7701_v20 = vor.u32 %v7699_v55, %v7697_v10  ;;  %v12110_v36 = vld [vmem:[%s12326_s10 + $0xcc] sm:$0xff]   ;;  %v12121_v55 = vld [vmem:[%s12326_s10 + $0xf4] sm:$0xff]  }
 0x1ca   : > { %v7719_v11 = vshll.u32 %v12110_v36, 16  ;;  %v7723_v58 = vshrl.u32 %v12110_v36, 16  ;;  %v12123_v36 = vld [vmem:[%s12326_s10 + $0xfc] sm:$0xff]   ;;  %v7759_v61 = vshll.u32 %v12121_v55, 16 }
 0x1cb   : > { %v7706_v28 = vsel %vm1174_vm3, %v7701_v20, %v7705_v45  ;;  %v3735_v20 = vshrl.u32 %v12120_v5, 16  ;;  %v12132_v5 = vld [vmem:[%s12326_s10 + $0x64] sm:$0xff]  }
 0x1cc   : > { %v7721_v49 = vrot.slane %v7719_v11, 1 }
 0x1ce   : > { %10950 = vmatmul.mubr.msk.bf16.vlgmr.msra.gmra.mrb[0].mxu0 %vm458_vm1, %v15281_v57  ;;  %v8443_v57 = vsel %vm507_vm0, %v14408_v9, 0  ;;  %v15303_v9 = vld [vmem:[#allocation37_spill] sm:$0xff] }
 0x1cf   : > { %10982 = vmatpush3.bf16.msra.mxu0 %v3896_v46  ;;  %10953 = vmatprep.mubr.msk.bf16.mxu0 %vm458_vm1, %v9486_v24  ;;  %v7711_v24 = vshll.u32 %v12108_v53, 16  ;;  %v7698_v46 = vsel %vm1174_vm3, %v7693_v60, %v7697_v10  ;;  %v15304_v3 = vcombine.low %v15303_v9, %v14054_v31  ;;  %v12116_v31 = vld [vmem:[%s12326_s10 + $0xe4] sm:$0xff]   ;;  %v7753_v60 = vrot.slane %v7751_v51, 1 }
 0x1d0   : > { %11242 = vmatmul.mubr.msk.bf16.gmra.mrb[48].mxu1 %vm458_vm1, %v9833_v27  ;;  %v7715_v27 = vshrl.u32 %v12108_v53, 16  ;;  %v7743_v15 = vshll.u32 %v12116_v31, 16  ;;  %v7747_v6 = vshrl.u32 %v12116_v31, 16 }
 0x1d1   : > { %11245 = vmatprep.mubr.msk.bf16.mxu1 %vm458_vm1, %v9834_v63  ;;  %v12112_v63 = vld [vmem:[%s12326_s10 + $0xd4] sm:$0xff]   ;;  %v7713_v59 = vrot.slane %v7711_v24, 1  ;;  %v3733_v24 = vrot.slane %v3731_v37, 1 }
 0x1d2   : > { %v7727_v48 = vshll.u32 %v12112_v63, 16  ;;  %v7731_v38 = vshrl.u32 %v12112_v63, 16  ;;  %v7745_v13 = vrot.slane %v7743_v15, 1 }
 0x1d3   : > { %v7717_v39 = vor.u32 %v7715_v27, %v7713_v59  ;;  %v3737_v11 = vor.u32 %v3735_v20, %v3733_v24 }
 0x1d4   : > { %v7729_v22 = vrot.slane %v7727_v48, 1  ;;  %v7749_v10 = vor.u32 %v7747_v6, %v7745_v13  ;;  %v12125_v48 = vld [vmem:[%s12326_s10 + $0x104] ss:$0 sps:$4 sm:$0x11]  }
 0x1d5   : > { %v7722_v47 = vsel %vm1174_vm3, %v7717_v39, %v7721_v49 }
 0x1d6   : > { %10954 = vmatmul.mubr.msk.bf16.gmra.mrb[4].mxu0 %vm458_vm1, %v15285_v34  ;;  %v12114_v34 = vld [vmem:[%s12326_s10 + $0xdc] sm:$0xff]   ;;  %v7754_v27 = vsel %vm1174_vm3, %v7749_v10, %v7753_v60  ;;  %v12136_v10 = vld [vmem:[%s12326_s10 + $0x74] sm:$0xff]  }
 0x1d7   : > { %10957 = vmatprep.mubr.msk.bf16.mxu0 %vm458_vm1, %v15288_v21  ;;  %v7714_v21 = vsel %vm1174_vm3, %v7709_v43, %v7713_v59  ;;  %v7767_v59 = vshll.u32 %v12123_v36, 16  ;;  %v12126_v43 = vld [vmem:[%s12326_s10 + $0x4c] sm:$0xff]  }
 0x1d8   : > { %11246 = vmatmul.mubr.msk.bf16.gmra.mrb[52].mxu1 %vm458_vm1, %v9835_v26  ;;  %v12117_v26 = vld [vmem:[%s12326_s10 + $0x24] sm:$0xff]  }
 0x1d9   : > { %11249 = vmatprep.mubr.msk.bf16.mxu1 %vm458_vm1, %v9836_v25  ;;  %v15305_v25 = vld [vmem:[#allocation51_spill] sm:$0xff]  ;;  %v3718_v12 = vshll.u32 %v12117_v26, 16  ;;  %v3716_v18 = vshrl.u32 %v12117_v26, 16 }
 0x1da   : > { %v15306_v54 = vcombine.low %v14087_v2, %v15305_v25  ;;  %v3755_v25 = vshll.u32 %v12126_v43, 16 }
 0x1db   : > { %v3720_v42 = vrot.slane %v3718_v12, 1 }
 0x1dc   : > { %v3757_v31 = vrot.slane %v3755_v25, 1  ;;  %v12139_v25 = vld [vmem:[%s12326_s10 + $0xc8] sm:$0xff]  }
 0x1dd   : > { %v3721_v14 = vor.u32 %v3720_v42, %v3716_v18 }
 0x1de   : > { %10958 = vmatmul.mubr.msk.bf16.gmra.mrb[8].mxu0 %vm458_vm1, %v15290_v62  ;;  %v7735_v62 = vshll.u32 %v12114_v34, 16 }
 0x1df   : > { %10961 = vmatprep.mubr.msk.bf16.mxu0 %vm458_vm1, %v15293_v23  ;;  %v7725_v23 = vor.u32 %v7723_v58, %v7721_v49  ;;  %v12128_v58 = vld [vmem:[%s12326_s10 + $0x54] sm:$0xff]  }
 0x1e0   : > { %11250 = vmatmul.mubr.msk.bf16.gmra.mrb[56].mxu1 %vm458_vm1, %v9837_v32  ;;  %v12118_v32 = vld [vmem:[%s12326_s10 + $0x2c] sm:$0xff]   ;;  %v7737_v2 = vrot.slane %v7735_v62, 1  ;;  %v7771_v62 = vshrl.u32 %v12123_v36, 16  ;;  %v3767_v15 = vshrl.u32 %v12128_v58, 16  ;;  %v12138_v36 = vld [vmem:[%s12326_s10 + $0x7c] sm:$0xff]  }
 0x1e1   : > { %11253 = vmatprep.mubr.msk.bf16.mxu1 %vm458_vm1, %v9838_v4  ;;  %v7733_v4 = vor.u32 %v7731_v38, %v7729_v22  ;;  %v3723_v8 = vshll.u32 %v12118_v32, 16  ;;  %v7730_v29 = vsel %vm1174_vm3, %v7725_v23, %v7729_v22  ;;  %v12130_v23 = vld [vmem:[%s12326_s10 + $0x5c] sm:$0xff]  }
 0x1e2   : > { %v3771_v1 = vshll.u32 %v12130_v23, 16 }
 0x1e3   : > { %v7738_v56 = vsel %vm1174_vm3, %v7733_v4, %v7737_v2  ;;  %v3763_v4 = vshll.u32 %v12128_v58, 16 }
 0x1e6   : > { %10962 = vmatmul.mubr.msk.bf16.gmra.mrb[12].mxu0 %vm458_vm1, %v15296_v50  ;;  %v15309_v50 = vcombine.low %v14137_v16, %v14140_v40  ;;  %v3727_v40 = vshrl.u32 %v12118_v32, 16  ;;  %v7775_v32 = vshll.u32 %v12125_v48, 16 }
 0x1e7   : > { %10965 = vmatprep.mubr.msk.bf16.mxu0 %vm458_vm1, %v15299_v17  ;;  %v3725_v17 = vrot.slane %v3723_v8, 1  ;;  %v3759_v8 = vshrl.u32 %v12126_v43, 16 }
 0x1e8   : > { %11254 = vmatmul.mubr.msk.bf16.gmra.mrb[60].mxu1 %vm458_vm1, %v9839_v44  ;;  %v7739_v44 = vshrl.u32 %v12114_v34, 16  ;;  %v7777_v42 = vrot.slane %v7775_v32, 1 }
 0x1e9   : > { %11259 = vmatprep.mubr.msk.bf16.mxu1 %vm458_vm1, %v7690_v7  ;;  %v12122_v7 = vld [vmem:[%s12326_s10 + $0x3c] sm:$0xff]   ;;  %v3726_v53 = vsel %vm1174_vm3, %v3721_v14, %v3725_v17  ;;  %v3729_v33 = vor.u32 %v3727_v40, %v3725_v17  ;;  %v12134_v14 = vld [vmem:[%s12326_s10 + $0x6c] sm:$0xff]   ;;  %v3779_v17 = vshll.u32 %v12132_v5, 16 }
 0x1ea   : > { %v7741_v16 = vor.u32 %v7739_v44, %v7737_v2  ;;  %v3739_v45 = vshll.u32 %v12122_v7, 16  ;;  %v3743_v26 = vshrl.u32 %v12122_v7, 16  ;;  %v3761_v44 = vor.u32 %v3759_v8, %v3757_v31  ;;  %v12148_v8 = vld [vmem:[%s12326_s10 + $0xa4] ss:$0 sps:$4 sm:$0x11]  }
 0x1eb   : > { %v3734_v39 = vsel %vm1174_vm3, %v3729_v33, %v3733_v24  ;;  %v3775_v7 = vshrl.u32 %v12130_v23, 16  ;;  %v3787_v37 = vshll.u32 %v12134_v14, 16  ;;  %v3781_v40 = vrot.slane %v3779_v17, 1  ;;  %v12149_v17 = vld [vmem:[%s12326_s10 + $0xf0] sm:$0xff]  }
 0x1ec   : > { %v3741_v63 = vrot.slane %v3739_v45, 1  ;;  %v3791_v24 = vshrl.u32 %v12134_v14, 16  ;;  %v3803_v33 = vshll.u32 %v12138_v36, 16 }
 0x1ed   : > { %v3789_v45 = vrot.slane %v3787_v37, 1 }
 0x1ee   : > { %10966 = vmatmul.mubr.msk.bf16.gmra.mrb[16].mxu0 %vm458_vm1, %v15301_v19  ;;  %v15310_v19 = vcombine.low %v14144_v30, %v14147_v0  ;;  %v7761_v30 = vrot.slane %v7759_v61, 1  ;;  %v3742_v9 = vsel %vm1174_vm3, %v3737_v11, %v3741_v63  ;;  %v3795_v61 = vshll.u32 %v12136_v10, 16  ;;  %v12135_v11 = vld [vmem:[%s12326_s10 + $0xb8] sm:$0xff]  }
 0x1ef   : > { %10969 = vmatprep.mubr.msk.bf16.mxu0 %vm458_vm1, %v15302_v52  ;;  %v7746_v52 = vsel %vm1174_vm3, %v7741_v16, %v7745_v13  ;;  %v12129_v16 = vld [vmem:[%s12326_s10 + $0xa0] sm:$0xff]   ;;  %v3805_v43 = vrot.slane %v3803_v33, 1 }
 0x1f0   : > { %11260 = vmatmul.mubr.msk.bf16.vlgmr.msra.gmra.mrb[40].mxu1 %vm458_vm1, %v7698_v46  ;;  %v12124_v46 = vld [vmem:[%s12326_s10 + $0x44] sm:$0xff]  }
 0x1f1   : > { %11284 = vmatpush3.bf16.msra.mxu1 %v8443_v57  ;;  %11263 = vmatprep.mubr.msk.bf16.mxu1 %vm458_vm1, %v7706_v28  ;;  %v7755_v57 = vshrl.u32 %v12119_v41, 16  ;;  %v7763_v28 = vshrl.u32 %v12121_v55, 16  ;;  %v3747_v0 = vshll.u32 %v12124_v46, 16  ;;  %v3783_v55 = vshrl.u32 %v12132_v5, 16 }
 0x1f2   : > { %v3843_v5 = vshll.u32 %v12148_v8, 16 }
 0x1f3   : > { %v7757_v49 = vor.u32 %v7755_v57, %v7753_v60  ;;  %v7765_v34 = vor.u32 %v7763_v28, %v7761_v30  ;;  %v3785_v20 = vor.u32 %v3783_v55, %v3781_v40  ;;  %v12133_v57 = vld [vmem:[%s12326_s10 + $0xb0] sm:$0xff]   ;;  %v3797_v28 = vrot.slane %v3795_v61, 1 }
 0x1f5   : > { %v7762_v38 = vsel %vm1174_vm3, %v7757_v49, %v7761_v30  ;;  %v12142_v30 = vld [vmem:[%s12326_s10 + $0x8c] sm:$0xff]   ;;  %v3807_v49 = vshrl.u32 %v12138_v36, 16 }
 0x1f6   : > { %10970 = vmatmul.mubr.msk.bf16.gmra.mrb[20].mxu0 %vm458_vm1, %v15304_v3  ;;  %v7769_v3 = vrot.slane %v7767_v59, 1  ;;  %v3819_v48 = vshll.u32 %v12142_v30, 16 }
 0x1f7   : > { %10973 = vmatprep.mubr.msk.bf16.mxu0 %vm458_vm1, %v15306_v54  ;;  %v3749_v54 = vrot.slane %v3747_v0, 1 }
 0x1f8   : > { %11264 = vmatmul.mubr.msk.bf16.gmra.mrb[44].mxu1 %vm458_vm1, %v7714_v21  ;;  %v3751_v21 = vshrl.u32 %v12124_v46, 16  ;;  %v7770_v12 = vsel %vm1174_vm3, %v7765_v34, %v7769_v3  ;;  %v7773_v18 = vor.u32 %v7771_v62, %v7769_v3  ;;  %v3790_v46 = vsel %vm1174_vm3, %v3785_v20, %v3789_v45 }
 0x1f9   : > { %11267 = vmatprep.mubr.msk.bf16.mxu1 %vm458_vm1, %v7722_v47  ;;  %v3745_v47 = vor.u32 %v3743_v26, %v3741_v63  ;;  %v3793_v63 = vor.u32 %v3791_v24, %v3789_v45 }
 0x1fa   : > { %v3753_v22 = vor.u32 %v3751_v21, %v3749_v54  ;;  %v12144_v21 = vld [vmem:[%s12326_s10 + $0x94] sm:$0xff]  }
 0x1fb   : > { %v3750_v2 = vsel %vm1174_vm3, %v3745_v47, %v3749_v54  ;;  %v3809_v54 = vor.u32 %v3807_v49, %v3805_v43  ;;  %v12146_v47 = vld [vmem:[%s12326_s10 + $0x9c] sm:$0xff]   ;;  %v3827_v62 = vshll.u32 %v12144_v21, 16 }
 0x1fc   : > { %v3758_v41 = vsel %vm1174_vm3, %v3753_v22, %v3757_v31  ;;  %v3831_v31 = vshrl.u32 %v12144_v21, 16  ;;  %v3835_v23 = vshll.u32 %v12146_v47, 16 }
 0x1fe   : > { %10974 = vmatmul.mubr.msk.bf16.gmra.mrb[24].mxu0 %vm458_vm1, %v15308_v35  ;;  %v3765_v35 = vrot.slane %v3763_v4, 1  ;;  %v12141_v4 = vld [vmem:[%s12326_s10 + $0xd0] sm:$0xff]  }
 0x1ff   : > { %10977 = vmatprep.mubr.msk.bf16.mxu0 %vm458_vm1, %v15309_v50  ;;  %v12127_v50 = vld [vmem:[%s12326_s10 + $0x98] sm:$0xff]  }
 0x200   : > { %11268 = vmatmul.mubr.msk.bf16.gmra.mrb[48].mxu1 %vm458_vm1, %v7730_v29  ;;  %v7778_v29 = vsel %vm1174_vm3, %v7773_v18, %v7777_v42  ;;  %v3769_v6 = vor.u32 %v3767_v15, %v3765_v35  ;;  %v3766_v51 = vsel %vm1174_vm3, %v3761_v44, %v3765_v35  ;;  %v12143_v18 = vld [vmem:[%s12326_s10 + $0xd8] sm:$0xff]   ;;  %v3837_v15 = vrot.slane %v3835_v23, 1  ;;  %v12147_v44 = vld [vmem:[%s12326_s10 + $0xe8] sm:$0xff]  }
 0x201   : > { %11271 = vmatprep.mubr.msk.bf16.mxu1 %vm458_vm1, %v7738_v56  ;;  %v3773_v56 = vrot.slane %v3771_v1, 1  ;;  %v3839_v35 = vshrl.u32 %v12146_v47, 16 }
 0x203   : > { %v3774_v13 = vsel %vm1174_vm3, %v3769_v6, %v3773_v56  ;;  %v3777_v60 = vor.u32 %v3775_v7, %v3773_v56  ;;  %v3841_v6 = vor.u32 %v3839_v35, %v3837_v15  ;;  %v3845_v56 = vrot.slane %v3843_v5, 1  ;;  %v14621_v7 = vpop.permute.xlu0 %8052 }
 0x205   : > { %v3846_v14 = vsel %vm1174_vm3, %v3841_v6, %v3845_v56 }
 0x206   : > { %10978 = vmatmul.mubr.msk.bf16.gmra.mrb[28].mxu0 %vm458_vm1, %v15310_v19  ;;  %v3782_v19 = vsel %vm1174_vm3, %v3777_v60, %v3781_v40 }
 0x207   : > { %10983 = vmatprep.mubr.msk.bf16.mxu0 %vm458_vm1, %v3726_v53  ;;  %v12131_v53 = vld [vmem:[%s12326_s10 + $0xa8] sm:$0xff]  }
 0x208   : > { %11272 = vmatmul.mubr.msk.bf16.gmra.mrb[52].mxu1 %vm458_vm1, %v7746_v52  ;;  %v3799_v52 = vshrl.u32 %v12136_v10, 16 }
 0x209   : > { %11275 = vmatprep.mubr.msk.bf16.mxu1 %vm458_vm1, %v7754_v27  ;;  %v12140_v27 = vld [vmem:[%s12326_s10 + $0x84] sm:$0xff]  }
 0x20a   : > { %v3801_v59 = vor.u32 %v3799_v52, %v3797_v28  ;;  %v3811_v0 = vshll.u32 %v12140_v27, 16  ;;  %v3815_v26 = vshrl.u32 %v12140_v27, 16 }
 0x20c   : > { %v3806_v34 = vsel %vm1174_vm3, %v3801_v59, %v3805_v43  ;;  %v3813_v3 = vrot.slane %v3811_v0, 1 }
 0x20e   : > { %10984 = vmatmul.mubr.msk.bf16.vlgmr.msra.gmra.mrb[0].mxu0 %vm458_vm1, %v3734_v39  ;;  %v3798_v39 = vsel %vm1174_vm3, %v3793_v63, %v3797_v28  ;;  %v3817_v58 = vor.u32 %v3815_v26, %v3813_v3  ;;  %v3814_v32 = vsel %vm1174_vm3, %v3809_v54, %v3813_v3 }
 0x20f   : > { %10987 = vmatprep.mubr.msk.bf16.mxu0 %vm458_vm1, %v3742_v9  ;;  %v12137_v9 = vld [vmem:[%s12326_s10 + $0xc0] sm:$0xff]  }
 0x210   : > { %11276 = vmatmul.mubr.msk.bf16.gmra.mrb[56].mxu1 %vm458_vm1, %v7762_v38  ;;  %v3821_v38 = vrot.slane %v3819_v48, 1 }
 0x211   : > { %11279 = vmatprep.mubr.msk.bf16.mxu1 %vm458_vm1, %v7770_v12  ;;  %v3823_v12 = vshrl.u32 %v12142_v30, 16  ;;  %v14625_v55 = vpop.permute.xlu0 %8062 }
 0x212   : > { %v3822_v22 = vsel %vm1174_vm3, %v3817_v58, %v3821_v38 }
 0x213   : > { %v3825_v42 = vor.u32 %v3823_v12, %v3821_v38 }
 0x216   : > { %10988 = vmatmul.mubr.msk.bf16.gmra.mrb[4].mxu0 %vm458_vm1, %v3750_v2  ;;  %v3829_v2 = vrot.slane %v3827_v62, 1 }
 0x217   : > { %10991 = vmatprep.mubr.msk.bf16.mxu0 %vm458_vm1, %v3758_v41 }
 0x218   : > { %11280 = vmatmul.mubr.msk.bf16.gmra.mrb[60].mxu1 %vm458_vm1, %v7778_v29  ;;  %v3833_v41 = vor.u32 %v3831_v31, %v3829_v2  ;;  %v3830_v1 = vsel %vm1174_vm3, %v3825_v42, %v3829_v2 }
 0x219   : > { %11285 = vmatprep.mubr.msk.bf16.mxu1 %vm458_vm1, %v12127_v50  ;;  %v12145_v50 = vld [vmem:[%s12326_s10 + $0xe0] sm:$0xff]  }
 0x21a   : > { %v3838_v29 = vsel %vm1174_vm3, %v3833_v41, %v3837_v15 }
 0x21e   : > { %10992 = vmatmul.mubr.msk.bf16.gmra.mrb[8].mxu0 %vm458_vm1, %v3766_v51  ;;  %v14619_v51 = vpop.permute.xlu1 %8057 }
 0x21f   : > { %10995 = vmatprep.mubr.msk.bf16.mxu0 %vm458_vm1, %v3774_v13 }
 0x220   : > { %11286 = vmatmul.mubr.msk.bf16.vlgmr.msra.gmra.mrb[64].mxu1 %vm458_vm1, %v12129_v16  ;;  %v14629_v16 = vpop.permute.xlu0 %8072 }
 0x221   : > { %11289 = vmatprep.mubr.msk.bf16.mxu1 %vm458_vm1, %v12131_v53  ;;  %v14638_v53 = vld [vmem:[%s15045_s2] ss:$0 sm:$0xff] }
 0x222   : > { %v14623_v13 = vpop.permute.xlu1 %8067 }
 0x224   : > { %v14633_v10 = vpop.permute.xlu0 %8082 }
 0x226   : > { %10996 = vmatmul.mubr.msk.bf16.gmra.mrb[12].mxu0 %vm458_vm1, %v3782_v19  ;;  %v14627_v37 = vpop.permute.xlu1 %8077 }
 0x227   : > { %10999 = vmatprep.mubr.msk.bf16.mxu0 %vm458_vm1, %v3790_v46 }
 0x228   : > { %11290 = vmatmul.mubr.msk.bf16.gmra.mrb[68].mxu1 %vm458_vm1, %v12133_v57  ;;  %v14646_v33 = vpop.permute.xlu0 %8092 }
 0x229   : > { %11293 = vmatprep.mubr.msk.bf16.mxu1 %vm458_vm1, %v12135_v11 }
 0x22a   : > { %v14631_v40 = vpop.permute.xlu1 %8087 }
 0x22c   : > { %v14656_v48 = vpop.permute.xlu0 %8102 }
 0x22e   : > { %11000 = vmatmul.mubr.msk.bf16.gmra.mrb[16].mxu0 %vm458_vm1, %v3798_v39  ;;  %v14643_v19 = vpop.permute.xlu1 %8097 }
 0x22f   : > { %11003 = vmatprep.mubr.msk.bf16.mxu0 %vm458_vm1, %v3806_v34 }
 0x230   : > { %11294 = vmatmul.mubr.msk.bf16.gmra.mrb[72].mxu1 %vm458_vm1, %v12137_v9  ;;  %v14669_v23 = vpop.permute.xlu0 %8112 }
 0x231   : > { %11297 = vmatprep.mubr.msk.bf16.mxu1 %vm458_vm1, %v12139_v25 }
 0x232   : > { %v14653_v39 = vpop.permute.xlu1 %8107 }
 0x236   : > { %11004 = vmatmul.mubr.msk.bf16.gmra.mrb[20].mxu0 %vm458_vm1, %v3814_v32  ;;  %v14665_v12 = vpop.permute.xlu1 %8117 }
 0x237   : > { %11007 = vmatprep.mubr.msk.bf16.mxu0 %vm458_vm1, %v3822_v22 }
 0x238   : > { %11298 = vmatmul.mubr.msk.bf16.gmra.mrb[76].mxu1 %vm458_vm1, %v12141_v4 }
 0x239   : > { %11301 = vmatprep.mubr.msk.bf16.mxu1 %vm458_vm1, %v12143_v18 }
 0x23a   : > { %v14679_v56 = vpop.permute.xlu1 %8127 }
 0x23e   : > { %11008 = vmatmul.mubr.msk.bf16.gmra.mrb[24].mxu0 %vm458_vm1, %v3830_v1 }
 0x23f   : > { %11011 = vmatprep.mubr.msk.bf16.mxu0 %vm458_vm1, %v3838_v29 }
 0x240   : > { %11302 = vmatmul.mubr.msk.bf16.gmra.mrb[80].mxu1 %vm458_vm1, %v12145_v50 }
 0x241   : > { %11305 = vmatprep.mubr.msk.bf16.mxu1 %vm458_vm1, %v12147_v44 }
 0x246   : > { %11012 = vmatmul.mubr.msk.bf16.gmra.mrb[28].mxu0 %vm458_vm1, %v3846_v14 }
 0x248   : > { %11306 = vmatmul.mubr.msk.bf16.gmra.mrb[84].mxu1 %vm458_vm1, %v12149_v17  ;;  %v14681_v17 = vpop.permute.xlu0 %8122 }
 0x2c3   : > { %v11261_v60 = vpop.f32.mrb[40].mxu1 }
 0x2c4   : > { %v8004_v20 = vadd.f32 %v11261_v60, %v14638_v53  ;;  %v7852_v45 = vpop.f32.mrb[41].mxu1 }
 0x2c5   : > { %v8002_v36 = vadd.f32 %v14638_v53, %v7852_v45  ;;  %v11262_v61 = vpop.f32.mrb[42].mxu1 }
 0x2c6   : > { %v8028_v24 = vmax.f32 %v8004_v20, 0.0  ;;  %v8005_v46 = vadd.f32 %v11262_v61, %v14638_v53  ;;  %v7855_v52 = vpop.f32.mrb[43].mxu1 }
 0x2c7   : > { %v8026_v57 = vmax.f32 %v8002_v36, 0.0  ;;  %v8003_v28 = vadd.f32 %v14638_v53, %v7855_v52 }
 0x2c8   : > { %v8029_v27 = vmax.f32 %v8005_v46, 0.0  ;;  %v8172_v63 = vmul.f32 %v14625_v55, %v8028_v24 }
 0x2c9   : > { %v8027_v11 = vmax.f32 %v8003_v28, 0.0  ;;  %v8170_v43 = vmul.f32 %v14621_v7, %v8026_v57 }
 0x2ca   : > { %v8173_v59 = vmul.f32 %v14623_v13, %v8029_v27 }
 0x2cb   : > { %v8171_v30 = vmul.f32 %v14619_v51, %v8027_v11  ;;  %v11265_v0 = vpop.f32.mrb[44].mxu1 }
 0x2cc   : > { %v10243_v49 = vpack.c.bf16 %v8173_v59, %v8172_v63  ;;  %v8008_v34 = vadd.f32 %v11265_v0, %v14638_v53  ;;  %v7868_v26 = vpop.f32.mrb[45].mxu1  ;;  %v14689_v63 = vpop.permute.xlu1 %8137 }
 0x2cd   : > { %v10238_v9 = vpack.c.bf16 %v8171_v30, %v8170_v43  ;;  %v8006_v3 = vadd.f32 %v14638_v53, %v7868_v26  ;;  %v11266_v21 = vpop.f32.mrb[46].mxu1  ;;  %v14693_v0 = vpop.permute.xlu0 %8132 }
 0x2ce   : > { %10386 = vst [vmem:[%s14659_s24 + $0x88] sm:$0xff] %v10243_v49   ;;  %v8032_v25 = vmax.f32 %v8008_v34, 0.0  ;;  %v8009_v54 = vadd.f32 %v11266_v21, %v14638_v53  ;;  %v7871_v58 = vpop.f32.mrb[47].mxu1 }
 0x2cf   : > { %10385 = vst [vmem:[%s14659_s24 + $0x80] sm:$0xff] %v10238_v9   ;;  %v8030_v38 = vmax.f32 %v8006_v3, 0.0  ;;  %v8007_v47 = vadd.f32 %v14638_v53, %v7871_v58 }
 0x2d0   : > { %v8033_v62 = vmax.f32 %v8009_v54, 0.0  ;;  %v8176_v22 = vmul.f32 %v14633_v10, %v8032_v25 }
 0x2d1   : > { %v8031_v32 = vmax.f32 %v8007_v47, 0.0  ;;  %v8174_v4 = vmul.f32 %v14629_v16, %v8030_v38 }
 0x2d2   : > { %v8177_v31 = vmul.f32 %v14631_v40, %v8033_v62 }
 0x2d3   : > { %v8175_v2 = vmul.f32 %v14627_v37, %v8031_v32  ;;  %v11269_v18 = vpop.f32.mrb[48].mxu1 }
 0x2d4   : > { %v10253_v42 = vpack.c.bf16 %v8177_v31, %v8176_v22  ;;  %v8012_v8 = vadd.f32 %v11269_v18, %v14638_v53  ;;  %v7884_v41 = vpop.f32.mrb[49].mxu1 }
 0x2d5   : > { %v10248_v15 = vpack.c.bf16 %v8175_v2, %v8174_v4  ;;  %v8010_v1 = vadd.f32 %v14638_v53, %v7884_v41  ;;  %v11270_v35 = vpop.f32.mrb[50].mxu1 }
 0x2d6   : > { %10388 = vst [vmem:[%s14659_s24 + $0x98] sm:$0xff] %v10253_v42   ;;  %v8036_v5 = vmax.f32 %v8012_v8, 0.0  ;;  %v8013_v29 = vadd.f32 %v11270_v35, %v14638_v53  ;;  %v7887_v50 = vpop.f32.mrb[51].mxu1  ;;  %v14705_v8 = vpop.permute.xlu1 %8147 }
 0x2d7   : > { %10387 = vst [vmem:[%s14659_s24 + $0x90] sm:$0xff] %v10248_v15   ;;  %v8034_v44 = vmax.f32 %v8010_v1, 0.0  ;;  %v8011_v6 = vadd.f32 %v14638_v53, %v7887_v50 }
 0x2d8   : > { %v8037_v14 = vmax.f32 %v8013_v29, 0.0  ;;  %v8180_v20 = vmul.f32 %v14656_v48, %v8036_v5  ;;  %v14708_v5 = vpop.permute.xlu0 %8142 }
 0x2d9   : > { %v8035_v60 = vmax.f32 %v8011_v6, 0.0  ;;  %v8178_v36 = vmul.f32 %v14646_v33, %v8034_v44 }
 0x2da   : > { %v8181_v45 = vmul.f32 %v14653_v39, %v8037_v14  ;;  %v15311_v14 = vld [vmem:[#allocation17_spill] sm:$0xff] }
 0x2db   : > { %v8179_v61 = vmul.f32 %v14643_v19, %v8035_v60  ;;  %v11273_v24 = vpop.f32.mrb[52].mxu1 }
 0x2dc   : > { %v10263_v46 = vpack.c.bf16 %v8181_v45, %v8180_v20  ;;  %v8016_v52 = vadd.f32 %v11273_v24, %v14638_v53  ;;  %v7900_v57 = vpop.f32.mrb[53].mxu1  ;;  %v15312_v45 = vld [vmem:[#allocation20_spill] sm:$0xff] }
 0x2dd   : > { %v10258_v28 = vpack.c.bf16 %v8179_v61, %v8178_v36  ;;  %v8014_v27 = vadd.f32 %v14638_v53, %v7900_v57  ;;  %v11274_v11 = vpop.f32.mrb[54].mxu1 }
 0x2de   : > { %10390 = vst [vmem:[%s14659_s24 + $0xa8] sm:$0xff] %v10263_v46   ;;  %v8040_v59 = vmax.f32 %v8016_v52, 0.0  ;;  %v8017_v43 = vadd.f32 %v11274_v11, %v14638_v53  ;;  %v7903_v30 = vpop.f32.mrb[55].mxu1  ;;  %v15313_v46 = vld [vmem:[#allocation16_spill] sm:$0xff] }
 0x2df   : > { %10389 = vst [vmem:[%s14659_s24 + $0xa0] sm:$0xff] %v10258_v28   ;;  %v8038_v49 = vmax.f32 %v8014_v27, 0.0  ;;  %v8015_v34 = vadd.f32 %v14638_v53, %v7903_v30  ;;  %v15314_v28 = vld [vmem:[#allocation18_spill] sm:$0xff] }
 0x2e0   : > { %v8041_v9 = vmax.f32 %v8017_v43, 0.0  ;;  %v8184_v38 = vmul.f32 %v14681_v17, %v8040_v59 }
 0x2e1   : > { %v10985_v26 = vpop.f32.mrb[0].mxu0  ;;  %v8039_v25 = vmax.f32 %v8015_v34, 0.0  ;;  %v8182_v31 = vmul.f32 %v14669_v23, %v8038_v49 }
 0x2e2   : > { %v4132_v3 = vadd.f32 %v10985_v26, %v14638_v53  ;;  %v3932_v21 = vpop.f32.mrb[1].mxu0  ;;  %v8185_v47 = vmul.f32 %v14679_v56, %v8041_v9 }
 0x2e3   : > { %v4130_v54 = vadd.f32 %v14638_v53, %v3932_v21  ;;  %v10986_v58 = vpop.f32.mrb[2].mxu0  ;;  %v8183_v4 = vmul.f32 %v14665_v12, %v8039_v25  ;;  %v11277_v2 = vpop.f32.mrb[56].mxu1 }
 0x2e4   : > { %v4164_v62 = vmax.f32 %v4132_v3, 0.0  ;;  %v4133_v32 = vadd.f32 %v10986_v58, %v14638_v53  ;;  %v3935_v22 = vpop.f32.mrb[3].mxu0  ;;  %v10273_v41 = vpack.c.bf16 %v8185_v47, %v8184_v38  ;;  %v8020_v15 = vadd.f32 %v11277_v2, %v14638_v53  ;;  %v7916_v1 = vpop.f32.mrb[57].mxu1 }
 0x2e5   : > { %v4162_v18 = vmax.f32 %v4130_v54, 0.0  ;;  %v4131_v42 = vadd.f32 %v14638_v53, %v3935_v22  ;;  %v10268_v29 = vpack.c.bf16 %v8183_v4, %v8182_v31  ;;  %v8018_v50 = vadd.f32 %v14638_v53, %v7916_v1  ;;  %v11278_v44 = vpop.f32.mrb[58].mxu1  ;;  %v14721_v25 = vpop.permute.xlu1 %8157 }
 0x2e6   : > { %v4165_v35 = vmax.f32 %v4133_v32, 0.0  ;;  %10392 = vst [vmem:[%s14659_s24 + $0xb8] sm:$0xff] %v10273_v41   ;;  %v4356_v60 = vmul.f32 %v15311_v14, %v4164_v62  ;;  %v8044_v20 = vmax.f32 %v8020_v15, 0.0  ;;  %v8021_v61 = vadd.f32 %v11278_v44, %v14638_v53  ;;  %v7919_v24 = vpop.f32.mrb[59].mxu1  ;;  %v14727_v32 = vpop.permute.xlu0 %8152 }
 0x2e7   : > { %v4163_v6 = vmax.f32 %v4131_v42, 0.0  ;;  %10391 = vst [vmem:[%s14659_s24 + $0xb0] sm:$0xff] %v10268_v29   ;;  %v4354_v52 = vmul.f32 %v15313_v46, %v4162_v18  ;;  %v8042_v57 = vmax.f32 %v8018_v50, 0.0  ;;  %v8019_v11 = vadd.f32 %v14638_v53, %v7919_v24  ;;  %v15317_v24 = vld [vmem:[#allocation22_spill] sm:$0xff] }
 0x2e8   : > { %v4357_v36 = vmul.f32 %v15312_v45, %v4165_v35  ;;  %v8045_v30 = vmax.f32 %v8021_v61, 0.0  ;;  %v8188_v54 = vmul.f32 %v14708_v5, %v8044_v20  ;;  %v15316_v20 = vld [vmem:[#allocation30_spill] sm:$0xff] }
 0x2e9   : > { %v4355_v27 = vmul.f32 %v15314_v28, %v4163_v6  ;;  %v10989_v59 = vpop.f32.mrb[4].mxu0  ;;  %v8043_v9 = vmax.f32 %v8019_v11, 0.0  ;;  %v8186_v22 = vmul.f32 %v14693_v0, %v8042_v57  ;;  %v15315_v6 = vld [vmem:[#allocation27_spill] sm:$0xff] }
 0x2ea   : > { %v10083_v43 = vpack.c.bf16 %v4357_v36, %v4356_v60  ;;  %v4136_v49 = vadd.f32 %v10989_v59, %v14638_v53  ;;  %v3948_v34 = vpop.f32.mrb[5].mxu0  ;;  %v8189_v58 = vmul.f32 %v14705_v8, %v8045_v30  ;;  %v15318_v57 = vld [vmem:[#allocation23_spill] sm:$0xff]  ;;  %v14743_v59 = vpop.permute.xlu1 %8167 }
 0x2eb   : > { %v10078_v26 = vpack.c.bf16 %v4355_v27, %v4354_v52  ;;  %v4134_v3 = vadd.f32 %v14638_v53, %v3948_v34  ;;  %v10990_v21 = vpop.f32.mrb[6].mxu0  ;;  %v8187_v31 = vmul.f32 %v14689_v63, %v8043_v9  ;;  %v11281_v4 = vpop.f32.mrb[60].mxu1 }
 0x2ec   : > { %10355 = vst [vmem:[%s14659_s24 + $0x8] sm:$0xff] %v10083_v43   ;;  %v4168_v38 = vmax.f32 %v4136_v49, 0.0  ;;  %v4137_v47 = vadd.f32 %v10990_v21, %v14638_v53  ;;  %v3951_v62 = vpop.f32.mrb[7].mxu0  ;;  %v10283_v42 = vpack.c.bf16 %v8189_v58, %v8188_v54  ;;  %v8024_v41 = vadd.f32 %v11281_v4, %v14638_v53  ;;  %v7932_v15 = vpop.f32.mrb[61].mxu1  ;;  %v14751_v21 = vld [vmem:[%s15048_s5] ss:$0 sm:$0xff] }
 0x2ed   : > { %10079 = vst [vmem:[%s14659_s24] sm:$0xff] %v10078_v26   ;;  %v4166_v2 = vmax.f32 %v4134_v3, 0.0  ;;  %v4135_v18 = vadd.f32 %v14638_v53, %v3951_v62  ;;  %v10278_v35 = vpack.c.bf16 %v8187_v31, %v8186_v22  ;;  %v8022_v29 = vadd.f32 %v14638_v53, %v7932_v15  ;;  %v11282_v50 = vpop.f32.mrb[62].mxu1  ;;  %v14746_v26 = vpop.permute.xlu0 %8162 }
 0x2ee   : > { %v4169_v1 = vmax.f32 %v4137_v47, 0.0  ;;  %10394 = vst [vmem:[%s14659_s24 + $0xc8] sm:$0xff] %v10283_v42   ;;  %v4360_v14 = vmul.f32 %v15315_v6, %v4168_v38  ;;  %v8048_v60 = vmax.f32 %v8024_v41, 0.0  ;;  %v8025_v36 = vadd.f32 %v11282_v50, %v14638_v53  ;;  %v7935_v61 = vpop.f32.mrb[63].mxu1 }
 0x2ef   : > { %v4167_v44 = vmax.f32 %v4135_v18, 0.0  ;;  %10393 = vst [vmem:[%s14659_s24 + $0xc0] sm:$0xff] %v10278_v35   ;;  %v4358_v46 = vmul.f32 %v15317_v24, %v4166_v2  ;;  %v8046_v52 = vmax.f32 %v8022_v29, 0.0  ;;  %v8023_v27 = vadd.f32 %v14638_v53, %v7935_v61 }
 0x2f0   : > { %v4361_v45 = vmul.f32 %v15316_v20, %v4169_v1  ;;  %v8049_v30 = vmax.f32 %v8025_v36, 0.0  ;;  %v8192_v38 = vmul.f32 %v14746_v26, %v8048_v60  ;;  %v15319_v60 = vld [vmem:[#allocation41_spill] sm:$0xff] }
 0x2f1   : > { %v4359_v28 = vmul.f32 %v15318_v57, %v4167_v44  ;;  %v10993_v11 = vpop.f32.mrb[8].mxu0  ;;  %v8047_v3 = vmax.f32 %v8023_v27, 0.0  ;;  %v8190_v4 = vmul.f32 %v14727_v32, %v8046_v52  ;;  %v15322_v57 = vld [vmem:[#allocation35_spill] sm:$0xff] }
 0x2f2   : > { %v10093_v43 = vpack.c.bf16 %v4361_v45, %v4360_v14  ;;  %v4140_v49 = vadd.f32 %v10993_v11, %v14638_v53  ;;  %v3964_v34 = vpop.f32.mrb[9].mxu0  ;;  %v8193_v47 = vmul.f32 %v14743_v59, %v8049_v30  ;;  %v15320_v45 = vld [vmem:[#allocation44_spill] sm:$0xff] }
 0x2f3   : > { %v10088_v9 = vpack.c.bf16 %v4359_v28, %v4358_v46  ;;  %v4138_v54 = vadd.f32 %v14638_v53, %v3964_v34  ;;  %v10994_v58 = vpop.f32.mrb[10].mxu0  ;;  %v8191_v2 = vmul.f32 %v14721_v25, %v8047_v3  ;;  %v11287_v18 = vpop.f32.mrb[64].mxu1  ;;  %v15321_v46 = vld [vmem:[#allocation33_spill] sm:$0xff] }
 0x2f4   : > { %10357 = vst [vmem:[%s14659_s24 + $0x18] sm:$0xff] %v10093_v43   ;;  %v4172_v62 = vmax.f32 %v4140_v49, 0.0  ;;  %v4141_v22 = vadd.f32 %v10994_v58, %v14638_v53  ;;  %v3967_v31 = vpop.f32.mrb[11].mxu0  ;;  %v10293_v15 = vpack.c.bf16 %v8193_v47, %v8192_v38  ;;  %v8488_v1 = vadd.f32 %v11287_v18, %v14751_v21  ;;  %v8479_v35 = vpop.f32.mrb[65].mxu1 }
 0x2f5   : > { %10356 = vst [vmem:[%s14659_s24 + $0x10] sm:$0xff] %v10088_v9   ;;  %v4170_v42 = vmax.f32 %v4138_v54, 0.0  ;;  %v4139_v41 = vadd.f32 %v14638_v53, %v3967_v31  ;;  %v10288_v50 = vpack.c.bf16 %v8191_v2, %v8190_v4  ;;  %v8480_v44 = vadd.f32 %v14751_v21, %v8479_v35  ;;  %v11288_v6 = vpop.f32.mrb[66].mxu1  ;;  %v15323_v35 = vld [vmem:[#allocation50_spill] sm:$0xff] }
 0x2f6   : > { %v4173_v29 = vmax.f32 %v4141_v22, 0.0  ;;  %10396 = vst [vmem:[%s14659_s24 + $0xd8] sm:$0xff] %v10293_v15   ;;  %v4364_v20 = vmul.f32 %v15319_v60, %v4172_v62  ;;  %v8491_v61 = vadd.f32 %v11288_v6, %v14751_v21  ;;  %v8482_v24 = vpop.f32.mrb[67].mxu1  ;;  %v8576_v43 = vmul.f32 %v8488_v1, %v14625_v55  ;;  %v15325_v60 = vld [vmem:[#allocation46_spill] sm:$0xff] }
 0x2f7   : > { %v4171_v14 = vmax.f32 %v4139_v41, 0.0  ;;  %10395 = vst [vmem:[%s14659_s24 + $0xd0] sm:$0xff] %v10288_v50   ;;  %v4362_v52 = vmul.f32 %v15321_v46, %v4170_v42  ;;  %v8483_v27 = vadd.f32 %v14751_v21, %v8482_v24  ;;  %v8574_v3 = vmul.f32 %v8480_v44, %v14621_v7  ;;  %v15324_v50 = vld [vmem:[#allocation52_spill] sm:$0xff] }
 0x2f8   : > { %v4365_v36 = vmul.f32 %v15320_v45, %v4173_v29  ;;  %v8577_v49 = vmul.f32 %v8491_v61, %v14623_v13  ;;  %v15326_v45 = vld [vmem:[#allocation47_spill] sm:$0xff] }
 0x2f9   : > { %v4363_v28 = vmul.f32 %v15322_v57, %v4171_v14  ;;  %v10997_v11 = vpop.f32.mrb[12].mxu0  ;;  %v8575_v58 = vmul.f32 %v8483_v27, %v14619_v51 }
 0x2fa   : > { %v10103_v30 = vpack.c.bf16 %v4365_v36, %v4364_v20  ;;  %v4144_v34 = vadd.f32 %v10997_v11, %v14638_v53  ;;  %v3980_v9 = vpop.f32.mrb[13].mxu0  ;;  %v10303_v62 = vpack.c.bf16 %v8577_v49, %v8576_v43 }
 0x2fb   : > { %v10098_v54 = vpack.c.bf16 %v4363_v28, %v4362_v52  ;;  %v4142_v38 = vadd.f32 %v14638_v53, %v3980_v9  ;;  %v10998_v47 = vpop.f32.mrb[14].mxu0  ;;  %v10298_v13 = vpack.c.bf16 %v8575_v58, %v8574_v3  ;;  %v11291_v4 = vpop.f32.mrb[68].mxu1 }
 0x2fc   : > { %10359 = vst [vmem:[%s14659_s24 + $0x28] sm:$0xff] %v10103_v30   ;;  %v4176_v22 = vmax.f32 %v4144_v34, 0.0  ;;  %v4145_v55 = vadd.f32 %v10998_v47, %v14638_v53  ;;  %v3983_v31 = vpop.f32.mrb[15].mxu0  ;;  %10398 = vst [vmem:[%s13567_s19 + $0x88] sm:$0xff] %v10303_v62   ;;  %v8504_v7 = vadd.f32 %v11291_v4, %v14751_v21  ;;  %v8495_v51 = vpop.f32.mrb[69].mxu1 }
 0x2fd   : > { %10358 = vst [vmem:[%s14659_s24 + $0x20] sm:$0xff] %v10098_v54   ;;  %v4174_v2 = vmax.f32 %v4142_v38, 0.0  ;;  %v4143_v18 = vadd.f32 %v14638_v53, %v3983_v31  ;;  %10397 = vst [vmem:[%s13567_s19 + $0x80] sm:$0xff] %v10298_v13   ;;  %v8496_v41 = vadd.f32 %v14751_v21, %v8495_v51  ;;  %v11292_v15 = vpop.f32.mrb[70].mxu1  ;;  %v15327_v13 = vld [vmem:[#allocation3_spill] sm:$0xff] }
 0x2fe   : > { %v4177_v42 = vmax.f32 %v4145_v55, 0.0  ;;  %v4368_v29 = vmul.f32 %v15323_v35, %v4176_v22  ;;  %v8507_v6 = vadd.f32 %v11292_v15, %v14751_v21  ;;  %v8498_v14 = vpop.f32.mrb[71].mxu1  ;;  %v8580_v46 = vmul.f32 %v8504_v7, %v14633_v10  ;;  %v15330_v15 = vld [vmem:[#allocation54_spill] sm:$0xff] }
 0x2ff   : > { %v4175_v1 = vmax.f32 %v4143_v18, 0.0  ;;  %v4366_v20 = vmul.f32 %v15325_v60, %v4174_v2  ;;  %v8499_v61 = vadd.f32 %v14751_v21, %v8498_v14  ;;  %v8578_v11 = vmul.f32 %v8496_v41, %v14629_v16  ;;  %v15328_v2 = vld [vmem:[#allocation4_spill] sm:$0xff] }
 0x300   : > { %v4369_v44 = vmul.f32 %v15324_v50, %v4177_v42  ;;  %v8581_v57 = vmul.f32 %v8507_v6, %v14631_v40  ;;  %v15329_v42 = vld [vmem:[#allocation53_spill] sm:$0xff] }
 0x301   : > { %v4367_v36 = vmul.f32 %v15326_v45, %v4175_v1  ;;  %v11001_v24 = vpop.f32.mrb[16].mxu0  ;;  %v8579_v30 = vmul.f32 %v8499_v61, %v14627_v37 }
 0x302   : > { %v10113_v52 = vpack.c.bf16 %v4369_v44, %v4368_v29  ;;  %v4148_v28 = vadd.f32 %v11001_v24, %v14638_v53  ;;  %v3996_v27 = vpop.f32.mrb[17].mxu0  ;;  %v10313_v9 = vpack.c.bf16 %v8581_v57, %v8580_v46 }
 0x303   : > { %v10108_v43 = vpack.c.bf16 %v4367_v36, %v4366_v20  ;;  %v4146_v49 = vadd.f32 %v14638_v53, %v3996_v27  ;;  %v11002_v34 = vpop.f32.mrb[18].mxu0  ;;  %v10308_v40 = vpack.c.bf16 %v8579_v30, %v8578_v11  ;;  %v11295_v58 = vpop.f32.mrb[72].mxu1 }
 0x304   : > { %10361 = vst [vmem:[%s14659_s24 + $0x38] sm:$0xff] %v10113_v52   ;;  %v4180_v3 = vmax.f32 %v4148_v28, 0.0  ;;  %v4149_v10 = vadd.f32 %v11002_v34, %v14638_v53  ;;  %v3999_v54 = vpop.f32.mrb[19].mxu0  ;;  %10400 = vst [vmem:[%s13567_s19 + $0x98] sm:$0xff] %v10313_v9   ;;  %v8520_v16 = vadd.f32 %v11295_v58, %v14751_v21  ;;  %v8511_v37 = vpop.f32.mrb[73].mxu1  ;;  %v15331_v9 = vld [vmem:[#allocation56_spill] sm:$0xff] }
 0x305   : > { %10360 = vst [vmem:[%s14659_s24 + $0x30] sm:$0xff] %v10108_v43   ;;  %v4178_v38 = vmax.f32 %v4146_v49, 0.0  ;;  %v4147_v47 = vadd.f32 %v14638_v53, %v3999_v54  ;;  %10399 = vst [vmem:[%s13567_s19 + $0x90] sm:$0xff] %v10308_v40   ;;  %v8512_v22 = vadd.f32 %v14751_v21, %v8511_v37  ;;  %v11296_v55 = vpop.f32.mrb[74].mxu1 }
 0x306   : > { %v4181_v62 = vmax.f32 %v4149_v10, 0.0  ;;  %v4372_v4 = vmul.f32 %v15327_v13, %v4180_v3  ;;  %v8523_v7 = vadd.f32 %v11296_v55, %v14751_v21  ;;  %v8514_v51 = vpop.f32.mrb[75].mxu1  ;;  %v8584_v50 = vmul.f32 %v8520_v16, %v14656_v48  ;;  %v15332_v10 = vld [vmem:[#allocation57_spill] sm:$0xff]  ;;  %v15334_v16 = vld [vmem:[#allocation55_spill] sm:$0xff] }
 0x307   : > { %v4179_v31 = vmax.f32 %v4147_v47, 0.0  ;;  %v4370_v41 = vmul.f32 %v15329_v42, %v4178_v38  ;;  %v8515_v35 = vadd.f32 %v14751_v21, %v8514_v51  ;;  %v8582_v20 = vmul.f32 %v8512_v22, %v14646_v33  ;;  %v15333_v38 = vld [vmem:[#allocation5_spill] sm:$0xff] }
 0x308   : > { %v4373_v18 = vmul.f32 %v15328_v2, %v4181_v62  ;;  %v8585_v6 = vmul.f32 %v8523_v7, %v14653_v39 }
 0x309   : > { %v4371_v1 = vmul.f32 %v15330_v15, %v4179_v31  ;;  %v11005_v29 = vpop.f32.mrb[20].mxu0  ;;  %v8583_v36 = vmul.f32 %v8515_v35, %v14643_v19 }
 0x30a   : > { %v10123_v44 = vpack.c.bf16 %v4373_v18, %v4372_v4  ;;  %v4152_v14 = vadd.f32 %v11005_v29, %v14638_v53  ;;  %v4012_v60 = vpop.f32.mrb[21].mxu0  ;;  %v10323_v46 = vpack.c.bf16 %v8585_v6, %v8584_v50  ;;  %v15335_v4 = vld [vmem:[#allocation26_spill] sm:$0xff]  ;;  %v15337_v29 = vld [vmem:[#allocation29_spill] sm:$0xff] }
 0x30b   : > { %v10118_v45 = vpack.c.bf16 %v4371_v1, %v4370_v41  ;;  %v4150_v61 = vadd.f32 %v14638_v53, %v4012_v60  ;;  %v11006_v24 = vpop.f32.mrb[22].mxu0  ;;  %v10318_v39 = vpack.c.bf16 %v8583_v36, %v8582_v20  ;;  %v11299_v28 = vpop.f32.mrb[76].mxu1  ;;  %v15336_v41 = vld [vmem:[#allocation28_spill] sm:$0xff] }
 0x30c   : > { %10363 = vst [vmem:[%s14659_s24 + $0x48] sm:$0xff] %v10123_v44   ;;  %v4184_v52 = vmax.f32 %v4152_v14, 0.0  ;;  %v4153_v48 = vadd.f32 %v11006_v24, %v14638_v53  ;;  %v4015_v57 = vpop.f32.mrb[23].mxu0  ;;  %10402 = vst [vmem:[%s13567_s19 + $0xa8] sm:$0xff] %v10323_v46   ;;  %v8536_v33 = vadd.f32 %v11299_v28, %v14751_v21  ;;  %v8527_v19 = vpop.f32.mrb[77].mxu1  ;;  %v15339_v28 = vld [vmem:[#allocation19_spill] sm:$0xff] }
 0x30d   : > { %10362 = vst [vmem:[%s14659_s24 + $0x40] sm:$0xff] %v10118_v45   ;;  %v4182_v27 = vmax.f32 %v4150_v61, 0.0  ;;  %v4151_v11 = vadd.f32 %v14638_v53, %v4015_v57  ;;  %10401 = vst [vmem:[%s13567_s19 + $0xa0] sm:$0xff] %v10318_v39   ;;  %v8528_v30 = vadd.f32 %v14751_v21, %v8527_v19  ;;  %v11300_v49 = vpop.f32.mrb[78].mxu1 }
 0x30e   : > { %v4185_v43 = vmax.f32 %v4153_v48, 0.0  ;;  %v4376_v3 = vmul.f32 %v15331_v9, %v4184_v52  ;;  %v8539_v40 = vadd.f32 %v11300_v49, %v14751_v21  ;;  %v8530_v58 = vpop.f32.mrb[79].mxu1  ;;  %v8588_v55 = vmul.f32 %v8536_v33, %v14681_v17 }
 0x30f   : > { %v4183_v34 = vmax.f32 %v4151_v11, 0.0  ;;  %v4374_v47 = vmul.f32 %v15333_v38, %v4182_v27  ;;  %v8531_v62 = vadd.f32 %v14751_v21, %v8530_v58  ;;  %v8586_v7 = vmul.f32 %v8528_v30, %v14669_v23  ;;  %v15338_v23 = vld [vmem:[#allocation31_spill] sm:$0xff]  ;;  %v15340_v30 = vld [vmem:[#allocation58_spill] sm:$0xff] }
 0x310   : > { %v4377_v54 = vmul.f32 %v15332_v10, %v4185_v43  ;;  %v8589_v13 = vmul.f32 %v8539_v40, %v14679_v56  ;;  %v15342_v10 = vld [vmem:[#allocation34_spill] sm:$0xff]  ;;  %v15343_v38 = vld [vmem:[#allocation59_spill] sm:$0xff] }
 0x311   : > { %v4375_v37 = vmul.f32 %v15334_v16, %v4183_v34  ;;  %v11009_v22 = vpop.f32.mrb[24].mxu0  ;;  %v8587_v42 = vmul.f32 %v8531_v62, %v14665_v12  ;;  %v15341_v34 = vld [vmem:[#allocation60_spill] sm:$0xff]  ;;  %v15344_v16 = vld [vmem:[#allocation38_spill] sm:$0xff] }
 0x312   : > { %v10133_v31 = vpack.c.bf16 %v4377_v54, %v4376_v3  ;;  %v11311_v2 = vadd.f32 %v11009_v22, %v15335_v4  ;;  %v4028_v18 = vpop.f32.mrb[25].mxu0  ;;  %v10333_v35 = vpack.c.bf16 %v8589_v13, %v8588_v55 }
 0x313   : > { %v10128_v51 = vpack.c.bf16 %v4375_v37, %v4374_v47  ;;  %v11312_v15 = vadd.f32 %v4028_v18, %v15336_v41  ;;  %v11010_v1 = vpop.f32.mrb[26].mxu0  ;;  %v10328_v44 = vpack.c.bf16 %v8587_v42, %v8586_v7  ;;  %v11303_v6 = vpop.f32.mrb[80].mxu1 }
 0x314   : > { %10365 = vst [vmem:[%s14659_s24 + $0x58] sm:$0xff] %v10133_v31   ;;  %v4156_v17 = vadd.f32 %v11311_v2, %v14638_v53  ;;  %v11313_v50 = vadd.f32 %v11010_v1, %v15337_v29  ;;  %v4031_v56 = vpop.f32.mrb[27].mxu0  ;;  %10404 = vst [vmem:[%s13567_s19 + $0xb8] sm:$0xff] %v10333_v35   ;;  %v8552_v20 = vadd.f32 %v11303_v6, %v14751_v21  ;;  %v8543_v45 = vpop.f32.mrb[81].mxu1  ;;  %v15345_v31 = vld [vmem:[#allocation39_spill] sm:$0xff] }
 0x315   : > { %10364 = vst [vmem:[%s14659_s24 + $0x50] sm:$0xff] %v10128_v51   ;;  %v4154_v14 = vadd.f32 %v11312_v15, %v14638_v53  ;;  %v11314_v60 = vadd.f32 %v4031_v56, %v15338_v23  ;;  %10403 = vst [vmem:[%s13567_s19 + $0xb0] sm:$0xff] %v10328_v44   ;;  %v8544_v24 = vadd.f32 %v14751_v21, %v8543_v45  ;;  %v11304_v46 = vpop.f32.mrb[82].mxu1  ;;  %v15346_v51 = vld [vmem:[#allocation40_spill] sm:$0xff] }
 0x316   : > { %v4188_v12 = vmax.f32 %v4156_v17, 0.0  ;;  %v4157_v36 = vadd.f32 %v11313_v50, %v14638_v53  ;;  %v8555_v57 = vadd.f32 %v11304_v46, %v14751_v21  ;;  %v8546_v39 = vpop.f32.mrb[83].mxu1  ;;  %v8592_v11 = vmul.f32 %v8552_v20, %v14708_v5  ;;  %v15348_v45 = vld [vmem:[#allocation8_spill] sm:$0xff] }
 0x317   : > { %v4186_v61 = vmax.f32 %v4154_v14, 0.0  ;;  %v4155_v52 = vadd.f32 %v11314_v60, %v14638_v53  ;;  %v8547_v19 = vadd.f32 %v14751_v21, %v8546_v39  ;;  %v8590_v58 = vmul.f32 %v8544_v24, %v14693_v0  ;;  %v15347_v60 = vld [vmem:[#allocation21_spill] sm:$0xff] }
 0x318   : > { %v4189_v48 = vmax.f32 %v4157_v36, 0.0  ;;  %v4380_v27 = vmul.f32 %v15339_v28, %v4188_v12  ;;  %v8593_v3 = vmul.f32 %v8555_v57, %v14705_v8 }
 0x319   : > { %v4187_v33 = vmax.f32 %v4155_v52, 0.0  ;;  %v11013_v43 = vpop.f32.mrb[28].mxu0  ;;  %v4378_v49 = vmul.f32 %v15340_v30, %v4186_v61  ;;  %v8591_v5 = vmul.f32 %v8547_v19, %v14689_v63  ;;  %v15350_v52 = vld [vmem:[#allocation7_spill] sm:$0xff] }
 0x31a   : > { %v4381_v9 = vmul.f32 %v15341_v34, %v4189_v48  ;;  %v11315_v54 = vadd.f32 %v11013_v43, %v15342_v10  ;;  %v4044_v40 = vpop.f32.mrb[29].mxu0  ;;  %v10343_v55 = vpack.c.bf16 %v8593_v3, %v8592_v11 }
 0x31b   : > { %v4379_v47 = vmul.f32 %v15343_v38, %v4187_v33  ;;  %v11316_v37 = vadd.f32 %v4044_v40, %v15344_v16  ;;  %v11014_v62 = vpop.f32.mrb[30].mxu0  ;;  %v10338_v18 = vpack.c.bf16 %v8591_v5, %v8590_v58  ;;  %v11307_v0 = vpop.f32.mrb[84].mxu1 }
 0x31c   : > { %v10143_v22 = vpack.c.bf16 %v4381_v9, %v4380_v27  ;;  %v4160_v8 = vadd.f32 %v11315_v54, %v14638_v53  ;;  %v11317_v13 = vadd.f32 %v11014_v62, %v15345_v31  ;;  %v4047_v4 = vpop.f32.mrb[31].mxu0  ;;  %10406 = vst [vmem:[%s13567_s19 + $0xc8] sm:$0xff] %v10343_v55   ;;  %v8568_v41 = vadd.f32 %v11307_v0, %v14751_v21  ;;  %v8559_v15 = vpop.f32.mrb[85].mxu1 }
 0x31d   : > { %v10138_v2 = vpack.c.bf16 %v4379_v47, %v4378_v49  ;;  %v4158_v7 = vadd.f32 %v11316_v37, %v14638_v53  ;;  %v11318_v42 = vadd.f32 %v4047_v4, %v15346_v51  ;;  %10405 = vst [vmem:[%s13567_s19 + $0xc0] sm:$0xff] %v10338_v18   ;;  %v8560_v17 = vadd.f32 %v14751_v21, %v8559_v15  ;;  %v11308_v29 = vpop.f32.mrb[86].mxu1 }
 0x31e   : > { %10367 = vst [vmem:[%s14659_s24 + $0x68] sm:$0xff] %v10143_v22   ;;  %v4192_v63 = vmax.f32 %v4160_v8, 0.0  ;;  %v4161_v1 = vadd.f32 %v11317_v13, %v14638_v53  ;;  %v8571_v44 = vadd.f32 %v11308_v29, %v14751_v21  ;;  %v8562_v6 = vpop.f32.mrb[87].mxu1  ;;  %v8596_v20 = vmul.f32 %v8568_v41, %v14746_v26 }
 0x31f   : > { %10366 = vst [vmem:[%s14659_s24 + $0x60] sm:$0xff] %v10138_v2   ;;  %v4190_v35 = vmax.f32 %v4158_v7, 0.0  ;;  %v4159_v50 = vadd.f32 %v11318_v42, %v14638_v53  ;;  %v8563_v23 = vadd.f32 %v14751_v21, %v8562_v6  ;;  %v15349_v53 = vld [vmem:[#allocation6_spill] sm:$0xff]  ;;  %v8594_v46 = vmul.f32 %v8560_v17, %v14727_v32 }
 0x320   : > { %v4193_v56 = vmax.f32 %v4161_v1, 0.0  ;;  %v4384_v12 = vmul.f32 %v15347_v60, %v4192_v63  ;;  %v8597_v61 = vmul.f32 %v8571_v44, %v14743_v59 }
 0x321   : > { %v4191_v14 = vmax.f32 %v4159_v50, 0.0  ;;  %v4382_v24 = vmul.f32 %v15349_v53, %v4190_v35  ;;  %v8595_v57 = vmul.f32 %v8563_v23, %v14721_v25  ;;  %8733 = sbr.rel (!%p12287_p3) target bundleno = 854 (0x356), region = 48 }
 0x322   : > { %v4385_v36 = vmul.f32 %v15348_v45, %v4193_v56  ;;  %v10353_v28 = vpack.c.bf16 %v8597_v61, %v8596_v20 }
 0x323   : > { %v4383_v48 = vmul.f32 %v15350_v52, %v4191_v14  ;;  %v10348_v27 = vpack.c.bf16 %v8595_v57, %v8594_v46 }
 0x324   : > { %v10153_v39 = vpack.c.bf16 %v4385_v36, %v4384_v12  ;;  %10408 = vst [vmem:[%s13567_s19 + $0xd8] sm:$0xff] %v10353_v28  }
 0x325   : > { %v10148_v21 = vpack.c.bf16 %v4383_v48, %v4382_v24  ;;  %10407 = vst [vmem:[%s13567_s19 + $0xd0] sm:$0xff] %v10348_v27  }
 0x326   : > { %10369 = vst [vmem:[%s14659_s24 + $0x78] sm:$0xff] %v10153_v39  }
 0x327   : > { %10368 = vst [vmem:[%s14659_s24 + $0x70] sm:$0xff] %v10148_v21  }
 0x328 LB: >> { %v8764_v25 = vld [vmem:[%s14659_s24] sm:$0xf]  ;;  %v8766_v32 = vld [vmem:[%s14659_s24 + $0x4] sm:$0xf]  ;;  %v8768_v59 = vld [vmem:[%s14659_s24 + $0x8] sm:$0xf]  ;;  %s12212_s14 = sphi %s14901_s14, %s8758_s14   ;;  %s12208_s13 = sphi %s15351_s13, %s15352_s13  }
 0x329   : >> { %8765 = vst [vmem:[%s12208_s13] sm:$0xf] %v8764_v25  ;;  %8767 = vst [vmem:[%s12208_s13 + $0x4] sm:$0xf] %v8766_v32  ;;  %v8770_v26 = vld [vmem:[%s14659_s24 + $0xc] sm:$0xf]  ;;  %s8758_s14 = sadd.s32 1, %s12212_s14  }
 0x32a   : >> { %8769 = vst [vmem:[%s12208_s13 + $0x8] sm:$0xf] %v8768_v59  ;;  %v8772_v11 = vld [vmem:[%s14659_s24 + $0x10] sm:$0xf]  ;;  %v8774_v33 = vld [vmem:[%s14659_s24 + $0x14] sm:$0xf] }
 0x32b   : >> { %8771 = vst [vmem:[%s12208_s13 + $0xc] sm:$0xf] %v8770_v26  ;;  %8773 = vst [vmem:[%s12208_s13 + $0x10] sm:$0xf] %v8772_v11  ;;  %v8776_v19 = vld [vmem:[%s14659_s24 + $0x18] sm:$0xf] }
 0x32c   : >> { %8775 = vst [vmem:[%s12208_s13 + $0x14] sm:$0xf] %v8774_v33  ;;  %v8778_v43 = vld [vmem:[%s14659_s24 + $0x1c] sm:$0xf]  ;;  %v8780_v30 = vld [vmem:[%s14659_s24 + $0x20] sm:$0xf] }
 0x32d   : >> { %8777 = vst [vmem:[%s12208_s13 + $0x18] sm:$0xf] %v8776_v19  ;;  %8779 = vst [vmem:[%s12208_s13 + $0x1c] sm:$0xf] %v8778_v43  ;;  %v8782_v49 = vld [vmem:[%s14659_s24 + $0x24] sm:$0xf] }
 0x32e   : >> { %8781 = vst [vmem:[%s12208_s13 + $0x20] sm:$0xf] %v8780_v30  ;;  %v8784_v34 = vld [vmem:[%s14659_s24 + $0x28] sm:$0xf]  ;;  %v8786_v9 = vld [vmem:[%s14659_s24 + $0x2c] sm:$0xf] }
 0x32f   : >> { %8783 = vst [vmem:[%s12208_s13 + $0x24] sm:$0xf] %v8782_v49  ;;  %8785 = vst [vmem:[%s12208_s13 + $0x28] sm:$0xf] %v8784_v34  ;;  %v8788_v3 = vld [vmem:[%s14659_s24 + $0x30] sm:$0xf] }
 0x330   : >> { %8787 = vst [vmem:[%s12208_s13 + $0x2c] sm:$0xf] %v8786_v9  ;;  %v8790_v10 = vld [vmem:[%s14659_s24 + $0x34] sm:$0xf]  ;;  %v8792_v54 = vld [vmem:[%s14659_s24 + $0x38] sm:$0xf] }
 0x331   : >> { %8789 = vst [vmem:[%s12208_s13 + $0x30] sm:$0xf] %v8788_v3  ;;  %8791 = vst [vmem:[%s12208_s13 + $0x34] sm:$0xf] %v8790_v10  ;;  %v8794_v40 = vld [vmem:[%s14659_s24 + $0x3c] sm:$0xf] }
 0x332   : >> { %8793 = vst [vmem:[%s12208_s13 + $0x38] sm:$0xf] %v8792_v54  ;;  %v8796_v58 = vld [vmem:[%s14659_s24 + $0x40] sm:$0xf]  ;;  %v8798_v38 = vld [vmem:[%s14659_s24 + $0x44] sm:$0xf] }
 0x333   : >> { %8795 = vst [vmem:[%s12208_s13 + $0x3c] sm:$0xf] %v8794_v40  ;;  %8797 = vst [vmem:[%s12208_s13 + $0x40] sm:$0xf] %v8796_v58  ;;  %v8800_v47 = vld [vmem:[%s14659_s24 + $0x48] sm:$0xf] }
 0x334   : >> { %8799 = vst [vmem:[%s12208_s13 + $0x44] sm:$0xf] %v8798_v38  ;;  %v8802_v5 = vld [vmem:[%s14659_s24 + $0x4c] sm:$0xf]  ;;  %v8804_v16 = vld [vmem:[%s14659_s24 + $0x50] sm:$0xf] }
 0x335   : >> { %8801 = vst [vmem:[%s12208_s13 + $0x48] sm:$0xf] %v8800_v47  ;;  %8803 = vst [vmem:[%s12208_s13 + $0x4c] sm:$0xf] %v8802_v5  ;;  %v8806_v37 = vld [vmem:[%s14659_s24 + $0x54] sm:$0xf] }
 0x336   : >> { %8805 = vst [vmem:[%s12208_s13 + $0x50] sm:$0xf] %v8804_v16  ;;  %v8808_v62 = vld [vmem:[%s14659_s24 + $0x58] sm:$0xf]  ;;  %v8810_v22 = vld [vmem:[%s14659_s24 + $0x5c] sm:$0xf] }
 0x337   : >> { %8807 = vst [vmem:[%s12208_s13 + $0x54] sm:$0xf] %v8806_v37  ;;  %8809 = vst [vmem:[%s12208_s13 + $0x58] sm:$0xf] %v8808_v62  ;;  %v8812_v55 = vld [vmem:[%s14659_s24 + $0x60] sm:$0xf] }
 0x338   : >> { %8811 = vst [vmem:[%s12208_s13 + $0x5c] sm:$0xf] %v8810_v22  ;;  %v8814_v8 = vld [vmem:[%s14659_s24 + $0x64] sm:$0xf]  ;;  %v8816_v31 = vld [vmem:[%s14659_s24 + $0x68] sm:$0xf] }
 0x339   : >> { %8813 = vst [vmem:[%s12208_s13 + $0x60] sm:$0xf] %v8812_v55  ;;  %8815 = vst [vmem:[%s12208_s13 + $0x64] sm:$0xf] %v8814_v8  ;;  %v8818_v13 = vld [vmem:[%s14659_s24 + $0x6c] sm:$0xf] }
 0x33a   : >> { %8817 = vst [vmem:[%s12208_s13 + $0x68] sm:$0xf] %v8816_v31  ;;  %v8820_v4 = vld [vmem:[%s14659_s24 + $0x70] sm:$0xf]  ;;  %v8822_v2 = vld [vmem:[%s14659_s24 + $0x74] sm:$0xf] }
 0x33b   : >> { %8819 = vst [vmem:[%s12208_s13 + $0x6c] sm:$0xf] %v8818_v13  ;;  %8821 = vst [vmem:[%s12208_s13 + $0x70] sm:$0xf] %v8820_v4  ;;  %v8824_v18 = vld [vmem:[%s14659_s24 + $0x78] sm:$0xf] }
 0x33c   : >> { %8823 = vst [vmem:[%s12208_s13 + $0x74] sm:$0xf] %v8822_v2  ;;  %v8826_v0 = vld [vmem:[%s14659_s24 + $0x7c] sm:$0xf]  ;;  %v8828_v7 = vld [vmem:[%s14659_s24 + $0x80] sm:$0xf] }
 0x33d   : >> { %8825 = vst [vmem:[%s12208_s13 + $0x78] sm:$0xf] %v8824_v18  ;;  %8827 = vst [vmem:[%s12208_s13 + $0x7c] sm:$0xf] %v8826_v0  ;;  %v8830_v51 = vld [vmem:[%s14659_s24 + $0x84] sm:$0xf] }
 0x33e   : >> { %8829 = vst [vmem:[%s12208_s13 + $0x80] sm:$0xf] %v8828_v7  ;;  %v8832_v42 = vld [vmem:[%s14659_s24 + $0x88] sm:$0xf]  ;;  %v8834_v63 = vld [vmem:[%s14659_s24 + $0x8c] sm:$0xf] }
 0x33f   : >> { %8831 = vst [vmem:[%s12208_s13 + $0x84] sm:$0xf] %v8830_v51  ;;  %8833 = vst [vmem:[%s12208_s13 + $0x88] sm:$0xf] %v8832_v42  ;;  %v8836_v41 = vld [vmem:[%s14659_s24 + $0x90] sm:$0xf] }
 0x340   : >> { %8835 = vst [vmem:[%s12208_s13 + $0x8c] sm:$0xf] %v8834_v63  ;;  %v8838_v15 = vld [vmem:[%s14659_s24 + $0x94] sm:$0xf]  ;;  %v8840_v1 = vld [vmem:[%s14659_s24 + $0x98] sm:$0xf] }
 0x341   : >> { %8837 = vst [vmem:[%s12208_s13 + $0x90] sm:$0xf] %v8836_v41  ;;  %8839 = vst [vmem:[%s12208_s13 + $0x94] sm:$0xf] %v8838_v15  ;;  %v8842_v35 = vld [vmem:[%s14659_s24 + $0x9c] sm:$0xf] }
 0x342   : >> { %8841 = vst [vmem:[%s12208_s13 + $0x98] sm:$0xf] %v8840_v1  ;;  %v8844_v17 = vld [vmem:[%s14659_s24 + $0xa0] sm:$0xf]  ;;  %v8846_v29 = vld [vmem:[%s14659_s24 + $0xa4] sm:$0xf] }
 0x343   : >> { %8843 = vst [vmem:[%s12208_s13 + $0x9c] sm:$0xf] %v8842_v35  ;;  %8845 = vst [vmem:[%s12208_s13 + $0xa0] sm:$0xf] %v8844_v17  ;;  %v8848_v50 = vld [vmem:[%s14659_s24 + $0xa8] sm:$0xf] }
 0x344   : >> { %8847 = vst [vmem:[%s12208_s13 + $0xa4] sm:$0xf] %v8846_v29  ;;  %v8850_v56 = vld [vmem:[%s14659_s24 + $0xac] sm:$0xf]  ;;  %v8852_v44 = vld [vmem:[%s14659_s24 + $0xb0] sm:$0xf] }
 0x345   : >> { %8849 = vst [vmem:[%s12208_s13 + $0xa8] sm:$0xf] %v8848_v50  ;;  %8851 = vst [vmem:[%s12208_s13 + $0xac] sm:$0xf] %v8850_v56  ;;  %v8854_v6 = vld [vmem:[%s14659_s24 + $0xb4] sm:$0xf] }
 0x346   : >> { %8853 = vst [vmem:[%s12208_s13 + $0xb0] sm:$0xf] %v8852_v44  ;;  %v8856_v14 = vld [vmem:[%s14659_s24 + $0xb8] sm:$0xf]  ;;  %v8858_v23 = vld [vmem:[%s14659_s24 + $0xbc] sm:$0xf] }
 0x347   : >> { %8855 = vst [vmem:[%s12208_s13 + $0xb4] sm:$0xf] %v8854_v6  ;;  %8857 = vst [vmem:[%s12208_s13 + $0xb8] sm:$0xf] %v8856_v14  ;;  %v8860_v60 = vld [vmem:[%s14659_s24 + $0xc0] sm:$0xf] }
 0x348   : >> { %8859 = vst [vmem:[%s12208_s13 + $0xbc] sm:$0xf] %v8858_v23  ;;  %v8862_v12 = vld [vmem:[%s14659_s24 + $0xc4] sm:$0xf]  ;;  %v8864_v20 = vld [vmem:[%s14659_s24 + $0xc8] sm:$0xf] }
 0x349   : >> { %8861 = vst [vmem:[%s12208_s13 + $0xc0] sm:$0xf] %v8860_v60  ;;  %8863 = vst [vmem:[%s12208_s13 + $0xc4] sm:$0xf] %v8862_v12  ;;  %v8866_v45 = vld [vmem:[%s14659_s24 + $0xcc] sm:$0xf] }
 0x34a   : >> { %8865 = vst [vmem:[%s12208_s13 + $0xc8] sm:$0xf] %v8864_v20  ;;  %v8868_v36 = vld [vmem:[%s14659_s24 + $0xd0] sm:$0xf]  ;;  %v8870_v61 = vld [vmem:[%s14659_s24 + $0xd4] sm:$0xf] }
 0x34b   : >> { %8867 = vst [vmem:[%s12208_s13 + $0xcc] sm:$0xf] %v8866_v45  ;;  %8869 = vst [vmem:[%s12208_s13 + $0xd0] sm:$0xf] %v8868_v36  ;;  %v8872_v53 = vld [vmem:[%s14659_s24 + $0xd8] sm:$0xf] }
 0x34c   : >> { %8871 = vst [vmem:[%s12208_s13 + $0xd4] sm:$0xf] %v8870_v61  ;;  %v8874_v24 = vld [vmem:[%s14659_s24 + $0xdc] sm:$0xf]  ;;  %8873 = vst [vmem:[%s12208_s13 + $0xd8] sm:$0xf] %v8872_v53 }
 0x34d   : >> { %8875 = vst [vmem:[%s12208_s13 + $0xdc] sm:$0xf] %v8874_v24  ;;  %p8757_p9 = scmp.ge.s32.totalorder %s8758_s14, 1  ;;  %s15352_s13 = smov %s9128_s12 }
 0x34f   : > { %8760 = sbr.rel (!%p8757_p9) target bundleno = 808 (0x328), region = 153 }
 0x356 PF: > { %s18_s28 = sadd.s32 1, %s12204_s28   ;;  %s15353_s24 = smov %s12192_s25 }
 0x357   : > { %p15_p10 = scmp.ge.s32.totalorder %s18_s28, 4   ;;  %s15354_s25 = smov %s12296_s11 }
 0x358   : > { %s15355_s26 = smov %s12200_s27  ;;  %s15356_s27 = smov %s15358_s30 }
 0x359   :  { %17 = sbr.rel (!%p15_p10) target bundleno = 3 (0x3), region = 175 }

// kernel: basic_block_forward.3
= control target key start
LH: loop header
LB: loop body
LE: loop exit
PB: predicated region body
PF: predicated region fallthrough
CT: control target
= control target key end

     0   :  { %s11368_s15 = smov 0   ;;  %s11370_s16 = smov 0   ;;  %s13900_s0 = inlined_call_operand.vmem [shape: bf16[2,928,128], index: 0, kind: input, shape index: {}]   ;;  %s13901_s1 = inlined_call_operand.vmem [shape: bf16[9,128,128], index: 1, kind: input, shape index: {}]   ;;  %s13902_s2 = inlined_call_operand.vmem [shape: f32[1,128], index: 2, kind: input, shape index: {}]   ;;  %s13903_s3 = inlined_call_operand.vmem [shape: bf16[2,448,128], index: 3, kind: input, shape index: {}]   ;;  %s13904_s4 = inlined_call_operand.vmem [shape: bf16[2,448,128], index: 4, kind: output, shape index: {}]  }
   0x1   :  { %s11372_s17 = smov 0  }
   0x2 LB: > { %s26_s18 = sadd.s32 1, %s11337_s16  ;;  %p8159_p0 = scmp.ge.s32.totalorder %s11341_s17, 1  ;;  %s11341_s17 = sphi %s11372_s17, %s14_s17   ;;  %s11337_s16 = sphi %s11370_s16, %s14128_s16   ;;  %s11333_s15 = sphi %s11368_s15, %s14127_s15  }
   0x3   : > { %p28_p1 = scmp.ge.s32.totalorder %s26_s18, 2  ;;  %p193_p2 = scmp.lt.s32.totalorder %s11341_s17, 3 }
   0x5   : > { %s14130_s18 = smov (%p28_p1, %s26_s18), 0  ;;  %p194_p3 = pnand %p8159_p0, %p193_p2 }
   0x7   : > { %197 = sbr.rel (%p194_p3) target bundleno = 780 (0x30c), region = 36 }
   0xe   : > { %v10911_v0 = vld [vmem:[%s13901_s1 + $0x40] sm:$0xff]   ;;  %p232_p4 = scmp.lt.s32.totalorder %s11333_s15, 1  ;;  %v10913_v2 = vld [vmem:[%s13901_s1 + $0x48] sm:$0xff]   ;;  %v10915_v4 = vld [vmem:[%s13901_s1 + $0x50] sm:$0xff]   ;;  %vm648_vm0 = vsmask.f32 4352 }
   0xf   : > { %v10912_v1 = vld [vmem:[%s13901_s1] sm:$0xff]   ;;  %9645 = vmatprep.subr.bf16.mxu1 %v10911_v0  ;;  %v10914_v3 = vld [vmem:[%s13901_s1 + $0x8] sm:$0xff]   ;;  %v10916_v5 = vld [vmem:[%s13901_s1 + $0x10] sm:$0xff]   ;;  %vm1159_vm1 = vsmask.f32 7424 }
  0x10   : > { %9693 = vmatprep.subr.bf16.mxu0 %v10912_v1  ;;  %9646 = vmatpush3.bf16.msra.mxu1 %v10911_v0  ;;  %s14132_s15 = smov (!%p232_p4, %s11333_s15), 1  ;;  %v10917_v6 = vld [vmem:[%s13901_s1 + $0x58] sm:$0xff]   ;;  %v10919_v8 = vld [vmem:[%s13901_s1 + $0x60] sm:$0xff]   ;;  %v10921_v10 = vld [vmem:[%s13901_s1 + $0x68] sm:$0xff]  }
  0x11   : > { %9694 = vmatpush3.bf16.msra.mxu0 %v10912_v1  ;;  %9647 = vmatprep.subr.bf16.mxu1 %v10913_v2  ;;  %v10918_v7 = vld [vmem:[%s13901_s1 + $0x18] sm:$0xff]   ;;  %s10885_s9 = smul.u32 464, %s14132_s15  ;;  %v10920_v9 = vld [vmem:[%s13901_s1 + $0x20] sm:$0xff]   ;;  %v10922_v14 = vld [vmem:[%s13901_s1 + $0x28] sm:$0xff]  }
  0x12   : > { %9695 = vmatprep.subr.bf16.mxu0 %v10914_v3  ;;  %v10923_v19 = vld [vmem:[%s13901_s1 + $0x70] sm:$0xff]   ;;  %v10925_v44 = vld [vmem:[%s13901_s1 + $0x78] sm:$0xff]   ;;  %v10932_v55 = vld [vmem:[%s13901_s1 + $0x80] sm:$0xff]   ;;  %s10886_s11 = smul.u32 224, %s14132_s15 }
  0x13   : > { %s11422_s20 = scalar_lea.vmem %s13900_s0, %s10885_s9  ;;  %v10924_v22 = vld [vmem:[%s13901_s1 + $0x30] sm:$0xff]   ;;  %v10926_v49 = vld [vmem:[%s13901_s1 + $0x38] sm:$0xff]   ;;  %v10943_v58 = vld [vmem:[%s13901_s1 + $0x40] sm:$0xff]  }
  0x14   : > { %9648 = vmatpush3.bf16.msra.mxu1 %v10913_v2  ;;  %v258_v11 = vld [vmem:[%s11422_s20 + $0xd0] sm:$0x8]  ;;  %v259_v12 = vld [vmem:[%s11422_s20 + $0xd4] sm:$0xf]  ;;  %v260_v13 = vld [vmem:[%s11422_s20 + $0xd8] sm:$0xf]  ;;  %s13675_s23 = scalar_lea.vmem %s13904_s4, %s10886_s11 }
  0x15   : > { %9696 = vmatpush3.bf16.msra.mxu0 %v10914_v3  ;;  %9649 = vmatprep.subr.bf16.mxu1 %v10915_v4  ;;  %v11434_v15 = vld [vmem:[%s11422_s20 + $0xdc] sm:$0xf]  ;;  %v8179_v16 = vcombine.low %v259_v12, %v260_v13  ;;  %v8203_v17 = vcombine.low %v258_v11, %v259_v12  ;;  %v11437_v18 = vld [vmem:[%s11422_s20 + $0xe0] sm:$0xf]  ;;  %v11444_v21 = vld [vmem:[%s11422_s20 + $0xe4] sm:$0xf] }
  0x16   : > { %9697 = vmatprep.subr.bf16.mxu0 %v10916_v5  ;;  %v8204_v20 = vcombine.low %v260_v13, %v11434_v15  ;;  %v8205_v25 = vcombine.low %v11437_v18, %v11444_v21  ;;  %v11452_v26 = vld [vmem:[%s11422_s20 + $0xe8] sm:$0xf]  ;;  %v11455_v29 = vld [vmem:[%s11422_s20 + $0xec] sm:$0xf]  ;;  %v11458_v30 = vld [vmem:[%s11422_s20 + $0xf0] sm:$0xf]  ;;  %v8180_v0 = vcombine.low %v11434_v15, %v11437_v18 }
  0x17   : > { %9661 = vmatprep.mubr.bf16.mxu1 %v8179_v16  ;;  %v650_v23 = vshrl.u32 %v8203_v17, 16  ;;  %v653_v24 = vshll.u32 %v8203_v17, 16  ;;  %v11461_v35 = vld [vmem:[%s11422_s20 + $0xf4] sm:$0xf]  ;;  %v8206_v38 = vcombine.low %v11452_v26, %v11455_v29  ;;  %v11466_v42 = vld [vmem:[%s11422_s20 + $0xf8] sm:$0xf]  ;;  %v8181_v3 = vcombine.low %v11444_v21, %v11452_v26 }
  0x18   : > { %9650 = vmatpush3.bf16.msra.mxu1 %v10915_v4  ;;  %v658_v27 = vshrl.u32 %v8204_v20, 16  ;;  %v661_v28 = vshll.u32 %v8204_v20, 16  ;;  %v667_v33 = vshrl.u32 %v8205_v25, 16  ;;  %v670_v34 = vshll.u32 %v8205_v25, 16  ;;  %v11469_v43 = vld [vmem:[%s11422_s20 + $0xfc] sm:$0xf] }
  0x19   : > { %9698 = vmatpush3.bf16.msra.mxu0 %v10916_v5  ;;  %9651 = vmatprep.subr.bf16.mxu1 %v10917_v6  ;;  %v652_v31 = vrot.slane %v650_v23, 3  ;;  %v655_v32 = vrot.slane %v653_v24, 4  ;;  %v676_v46 = vshrl.u32 %v8206_v38, 16  ;;  %v679_v47 = vshll.u32 %v8206_v38, 16  ;;  %v11489_v62 = vld [vmem:[%s11422_s20 + $0x100] sm:$0xf] }
  0x1a   : > { %9699 = vmatprep.subr.bf16.mxu0 %v10918_v7  ;;  %v660_v36 = vrot.slane %v658_v27, 3  ;;  %v663_v37 = vrot.slane %v661_v28, 4  ;;  %v669_v40 = vrot.slane %v667_v33, 3  ;;  %v672_v41 = vrot.slane %v670_v34, 4  ;;  %v11492_v63 = vld [vmem:[%s11422_s20 + $0x104] sm:$0xf] }
  0x1b   : > { %v656_v39 = vor.u32 %v655_v32, %v652_v31  ;;  %v8207_v48 = vcombine.low %v11458_v30, %v11461_v35  ;;  %v8208_v50 = vcombine.low %v11466_v42, %v11469_v43  ;;  %v678_v52 = vrot.slane %v676_v46, 3  ;;  %v11497_v1 = vld [vmem:[%s11422_s20 + $0x108] sm:$0xf]  ;;  %v11500_v2 = vld [vmem:[%s11422_s20 + $0x10c] sm:$0xf]  ;;  %v10955_v27 = vld [vmem:[%s13901_s1 + $0x50] sm:$0xff]  }
  0x1c   : > { %9652 = vmatpush3.bf16.msra.mxu1 %v10917_v6  ;;  %v664_v45 = vor.u32 %v663_v37, %v660_v36  ;;  %v681_v53 = vrot.slane %v679_v47, 4  ;;  %v673_v54 = vor.u32 %v672_v41, %v669_v40  ;;  %v8210_v12 = vcombine.low %v11497_v1, %v11500_v2  ;;  %v10949_v13 = vld [vmem:[%s13901_s1 + $0x48] sm:$0xff]   ;;  %v11520_v15 = vld [vmem:[%s11422_s20 + $0x114] sm:$0xf]  ;;  %v11526_v20 = vld [vmem:[%s11422_s20 + $0x11c] sm:$0xf] }
  0x1d   : > { %9700 = vmatpush3.bf16.msra.mxu0 %v10918_v7  ;;  %9653 = vmatprep.subr.bf16.mxu1 %v10919_v8  ;;  %v685_v56 = vshrl.u32 %v8207_v48, 16  ;;  %v688_v57 = vshll.u32 %v8207_v48, 16  ;;  %v694_v60 = vshrl.u32 %v8208_v50, 16  ;;  %v697_v61 = vshll.u32 %v8208_v50, 16  ;;  %v11551_v40 = vld [vmem:[%s11422_s20 + $0x124] sm:$0xf] }
  0x1e   : > { %9701 = vmatprep.subr.bf16.mxu0 %v10920_v9  ;;  %v665_v51 = vsel %vm648_vm0, %v656_v39, %v664_v45  ;;  %v682_v59 = vor.u32 %v681_v53, %v678_v52  ;;  %v674_v4 = vsel %vm648_vm0, %v664_v45, %v673_v54  ;;  %v8209_v7 = vcombine.low %v11489_v62, %v11492_v63  ;;  %v11548_v39 = vld [vmem:[%s11422_s20 + $0x120] sm:$0xf]  ;;  %v10961_v41 = vld [vmem:[%s13901_s1 + $0x58] sm:$0xff]   ;;  %v11560_v46 = vld [vmem:[%s11422_s20 + $0x128] sm:$0xf] }
  0x1f   : > { %9709 = vmatprep.mubr.bf16.mxu0 %v665_v51  ;;  %v687_v5 = vrot.slane %v685_v56, 3  ;;  %v690_v6 = vrot.slane %v688_v57, 4  ;;  %v699_v11 = vrot.slane %v697_v61, 4  ;;  %v712_v23 = vshrl.u32 %v8210_v12, 16  ;;  %v10954_v45 = vld [vmem:[%s13901_s1 + $0xa0] sm:$0xff]  }
  0x20   : > { %9654 = vmatpush3.bf16.msra.mxu1 %v10919_v8  ;;  %v683_v8 = vsel %vm648_vm0, %v673_v54, %v682_v59  ;;  %v703_v17 = vshrl.u32 %v8209_v7, 16  ;;  %v706_v18 = vshll.u32 %v8209_v7, 16  ;;  %v715_v24 = vshll.u32 %v8210_v12, 16  ;;  %v11563_v47 = vld [vmem:[%s11422_s20 + $0x12c] sm:$0xf]  ;;  %v10967_v51 = vld [vmem:[%s13901_s1 + $0x60] sm:$0xff]  }
  0x21   : > { %9702 = vmatpush3.bf16.msra.mxu0 %v10920_v9  ;;  %9655 = vmatprep.subr.bf16.mxu1 %v10921_v10  ;;  %v10937_v9 = vld [vmem:[%s13901_s1 + $0x88] sm:$0xff]   ;;  %v691_v16 = vor.u32 %v690_v6, %v687_v5  ;;  %v8182_v25 = vcombine.low %v11455_v29, %v11458_v30  ;;  %v8183_v28 = vcombine.low %v11461_v35, %v11466_v42  ;;  %v714_v34 = vrot.slane %v712_v23, 3  ;;  %v10948_v35 = vld [vmem:[%s13901_s1 + $0x98] sm:$0xff]   ;;  %v11582_v61 = vld [vmem:[%s11422_s20 + $0x134] sm:$0xf] }
  0x22   : > { %9703 = vmatprep.subr.bf16.mxu0 %v10922_v14  ;;  %v705_v29 = vrot.slane %v703_v17, 3  ;;  %v708_v30 = vrot.slane %v706_v18, 4  ;;  %v717_v36 = vrot.slane %v715_v24, 4  ;;  %v8184_v50 = vcombine.low %v11469_v43, %v11489_v62  ;;  %v10960_v62 = vld [vmem:[%s13901_s1 + $0xa8] sm:$0xff]   ;;  %v11591_v7 = vld [vmem:[%s11422_s20 + $0x138] sm:$0xf] }
  0x23   : > { %v692_v32 = vsel %vm648_vm0, %v682_v59, %v691_v16  ;;  %v8185_v52 = vcombine.low %v11492_v63, %v11497_v1  ;;  %v8214_v57 = vcombine.low %v11560_v46, %v11563_v47  ;;  %v10968_v63 = vld [vmem:[%s13901_s1 + $0x68] sm:$0xff]   ;;  %v10974_v12 = vld [vmem:[%s13901_s1 + $0x70] sm:$0xff]   ;;  %v10973_v23 = vld [vmem:[%s13901_s1 + $0xb8] sm:$0xff]  }
  0x24   : > { %9656 = vmatpush3.bf16.msra.mxu1 %v10921_v10  ;;  %v696_v10 = vrot.slane %v694_v60, 3  ;;  %v709_v48 = vor.u32 %v708_v30, %v705_v29  ;;  %v11579_v60 = vld [vmem:[%s11422_s20 + $0x130] sm:$0xf]  ;;  %v11619_v24 = vld [vmem:[%s11422_s20 + $0x140] sm:$0xf] }
  0x25   : > { %9704 = vmatpush3.bf16.msra.mxu0 %v10922_v14  ;;  %9657 = vmatprep.subr.bf16.mxu1 %v10923_v19  ;;  %v11517_v14 = vld [vmem:[%s11422_s20 + $0x110] sm:$0xf]  ;;  %v751_v6 = vshll.u32 %v8214_v57, 16  ;;  %v11630_v30 = vld [vmem:[%s13901_s1 + $0xc0] sm:$0xff]  }
  0x26   : > { %9705 = vmatprep.subr.bf16.mxu0 %v10924_v22  ;;  %v700_v21 = vor.u32 %v699_v11, %v696_v10  ;;  %v8211_v26 = vcombine.low %v11517_v14, %v11520_v15  ;;  %v8186_v10 = vcombine.low %v11500_v2, %v11517_v14  ;;  %v8215_v11 = vcombine.low %v11579_v60, %v11582_v61 }
  0x28   : > { %9658 = vmatpush3.bf16.msra.mxu1 %v10923_v19  ;;  %v11523_v19 = vld [vmem:[%s11422_s20 + $0x118] sm:$0xf]  ;;  %v701_v33 = vsel %vm648_vm0, %v691_v16, %v700_v21  ;;  %v721_v37 = vshrl.u32 %v8211_v26, 16  ;;  %v724_v38 = vshll.u32 %v8211_v26, 16  ;;  %v710_v56 = vsel %vm648_vm0, %v700_v21, %v709_v48 }
  0x29   : > { %9706 = vmatpush3.bf16.msra.mxu0 %v10924_v22  ;;  %9659 = vmatprep.subr.bf16.mxu1 %v10925_v44  ;;  %v10942_v22 = vld [vmem:[%s13901_s1 + $0x90] sm:$0xff]   ;;  %v8212_v31 = vcombine.low %v11523_v19, %v11526_v20  ;;  %v8187_v16 = vcombine.low %v11520_v15, %v11523_v19  ;;  %v757_v15 = vshrl.u32 %v8215_v11, 16  ;;  %v10975_v19 = vld [vmem:[%s13901_s1 + $0x78] sm:$0xff]   ;;  %v760_v26 = vshll.u32 %v8215_v11, 16 }
  0x2a   : > { %9707 = vmatprep.subr.bf16.mxu0 %v10926_v49  ;;  %v723_v53 = vrot.slane %v721_v37, 3  ;;  %v726_v54 = vrot.slane %v724_v38, 4 }
  0x2b   : > { %v730_v42 = vshrl.u32 %v8212_v31, 16  ;;  %v759_v37 = vrot.slane %v757_v15, 3  ;;  %v762_v38 = vrot.slane %v760_v26, 4 }
  0x2c   : > { %9660 = vmatpush3.bf16.msra.mxu1 %v10925_v44  ;;  %v733_v44 = vshll.u32 %v8212_v31, 16  ;;  %v11625_v31 = vld [vmem:[%s11422_s20 + $0x148] sm:$0xf] }
  0x2d   : > { %9708 = vmatpush3.bf16.msra.mxu0 %v10926_v49  ;;  %10077 = vmatprep.subr.bf16.mxu1 %v10943_v58  ;;  %v718_v49 = vor.u32 %v717_v36, %v714_v34  ;;  %v11635_v34 = vld [vmem:[%s11422_s20 + $0x14c] sm:$0xf]  ;;  %v8189_v36 = vcombine.low %v11551_v40, %v11560_v46 }
  0x2e   : > { %9741 = vmatprep.subr.bf16.mxu0 %v10932_v55  ;;  %v735_v59 = vrot.slane %v733_v44, 4 }
  0x2f   : > { %9662 = vmatmul.mubr.bf16.vlgmr.msra.gmra.mrb[0].mxu1 %v8180_v0  ;;  %v719_v43 = vsel %vm648_vm0, %v709_v48, %v718_v49  ;;  %v727_v0 = vor.u32 %v726_v54, %v723_v53  ;;  %v8190_v53 = vcombine.low %v11563_v47, %v11579_v60  ;;  %v8191_v54 = vcombine.low %v11582_v61, %v11591_v7 }
  0x30   : > { %9710 = vmatmul.mubr.bf16.vlgmr.msra.gmra.mrb[0].mxu0 %v674_v4  ;;  %9665 = vmatprep.mubr.bf16.mxu1 %v8181_v3  ;;  %v748_v4 = vshrl.u32 %v8214_v57, 16 }
  0x31   : > { %9742 = vmatpush3.bf16.msra.mxu0 %v10932_v55  ;;  %9713 = vmatprep.mubr.bf16.mxu0 %v683_v8  ;;  %v8213_v55 = vcombine.low %v11548_v39, %v11551_v40  ;;  %v11594_v8 = vld [vmem:[%s11422_s20 + $0x13c] sm:$0xf] }
  0x32   : > { %9743 = vmatprep.subr.bf16.mxu0 %v10937_v9  ;;  %10078 = vmatpush3.bf16.msra.mxu1 %v10943_v58  ;;  %v732_v58 = vrot.slane %v730_v42, 3  ;;  %v750_v21 = vrot.slane %v748_v4, 3  ;;  %v8216_v2 = vcombine.low %v11591_v7, %v11594_v8  ;;  %v8192_v4 = vcombine.low %v11594_v8, %v11619_v24  ;;  %v10982_v8 = vld [vmem:[%s11422_s20 + $0xe4] sm:$0xff]  }
  0x33   : > { %10079 = vmatprep.subr.bf16.mxu1 %v10949_v13  ;;  %v739_v1 = vshrl.u32 %v8213_v55, 16  ;;  %v742_v3 = vshll.u32 %v8213_v55, 16  ;;  %v1176_v15 = vshll.u32 %v10982_v8, 16 }
  0x34   : > { %v736_v5 = vor.u32 %v735_v59, %v732_v58  ;;  %v769_v29 = vshll.u32 %v8216_v2, 16 }
  0x35   : > { %9744 = vmatpush3.bf16.msra.mxu0 %v10937_v9  ;;  %v10966_v9 = vld [vmem:[%s13901_s1 + $0xb0] sm:$0xff]   ;;  %v741_v17 = vrot.slane %v739_v1, 3  ;;  %v744_v18 = vrot.slane %v742_v3, 4  ;;  %v10977_v1 = vld [vmem:[%s11422_s20 + $0xdc] sm:$0xff]  }
  0x36   : > { %9745 = vmatprep.subr.bf16.mxu0 %v10942_v22  ;;  %10080 = vmatpush3.bf16.msra.mxu1 %v10949_v13  ;;  %v728_v13 = vsel %vm648_vm0, %v718_v49, %v727_v0  ;;  %v737_v14 = vsel %vm648_vm0, %v727_v0, %v736_v5 }
  0x37   : > { %9666 = vmatmul.mubr.bf16.gmra.mrb[4].mxu1 %v8182_v25  ;;  %10081 = vmatprep.subr.bf16.mxu1 %v10955_v27  ;;  %v745_v25 = vor.u32 %v744_v18, %v741_v17  ;;  %v4586_v18 = vld [vmem:[%s11422_s20 + $0x158] sm:$0xf] }
  0x38   : > { %9714 = vmatmul.mubr.bf16.gmra.mrb[4].mxu0 %v692_v32  ;;  %9669 = vmatprep.mubr.bf16.mxu1 %v8183_v28  ;;  %v11622_v28 = vld [vmem:[%s11422_s20 + $0x144] sm:$0xf] }
  0x39   : > { %9717 = vmatprep.mubr.bf16.mxu0 %v701_v33  ;;  %9746 = vmatpush3.bf16.msra.mxu0 %v10942_v22  ;;  %v753_v22 = vrot.slane %v751_v6, 4  ;;  %v8188_v33 = vcombine.low %v11526_v20, %v11548_v39  ;;  %v8218_v20 = vcombine.low %v11625_v31, %v11635_v34  ;;  %v763_v39 = vor.u32 %v762_v38, %v759_v37 }
  0x3a   : > { %9747 = vmatprep.subr.bf16.mxu0 %v10948_v35  ;;  %10082 = vmatpush3.bf16.msra.mxu1 %v10955_v27  ;;  %v766_v27 = vshrl.u32 %v8216_v2, 16 }
  0x3b   : > { %10083 = vmatprep.subr.bf16.mxu1 %v10961_v41  ;;  %v754_v32 = vor.u32 %v753_v22, %v750_v21  ;;  %v784_v49 = vshrl.u32 %v8218_v20, 16  ;;  %v10984_v21 = vld [vmem:[%s11422_s20 + $0xec] sm:$0xff]  }
  0x3c   : > { %v768_v44 = vrot.slane %v766_v27, 3  ;;  %v1184_v26 = vshll.u32 %v10984_v21, 16 }
  0x3d   : > { %9748 = vmatpush3.bf16.msra.mxu0 %v10948_v35  ;;  %v746_v35 = vsel %vm648_vm0, %v736_v5, %v745_v25  ;;  %v755_v42 = vsel %vm648_vm0, %v745_v25, %v754_v32  ;;  %v764_v55 = vsel %vm648_vm0, %v754_v32, %v763_v39  ;;  %v786_v59 = vrot.slane %v784_v49, 3  ;;  %v4584_v25 = vld [vmem:[%s11422_s20 + $0x150] sm:$0x8]  ;;  %v4588_v32 = vld [vmem:[%s11422_s20 + $0x160] sm:$0xf] }
  0x3e   : > { %9749 = vmatprep.subr.bf16.mxu0 %v10954_v45  ;;  %10084 = vmatpush3.bf16.msra.mxu1 %v10961_v41  ;;  %v8217_v41 = vcombine.low %v11619_v24, %v11622_v28  ;;  %v8193_v5 = vcombine.low %v11622_v28, %v11625_v31  ;;  %v1172_v24 = vshrl.u32 %v10977_v1, 16  ;;  %v4587_v28 = vld [vmem:[%s11422_s20 + $0x15c] sm:$0xf]  ;;  %v1180_v31 = vshrl.u32 %v10982_v8, 16 }
  0x3f   : > { %9670 = vmatmul.mubr.bf16.gmra.mrb[8].mxu1 %v8184_v50  ;;  %10085 = vmatprep.subr.bf16.mxu1 %v10967_v51  ;;  %v787_v50 = vshll.u32 %v8218_v20, 16  ;;  %v1186_v38 = vrot.slane %v1184_v26, 1 }
  0x40   : > { %9718 = vmatmul.mubr.bf16.gmra.mrb[8].mxu0 %v710_v56  ;;  %9673 = vmatprep.mubr.bf16.mxu1 %v8185_v52  ;;  %v775_v40 = vshrl.u32 %v8217_v41, 16  ;;  %v778_v46 = vshll.u32 %v8217_v41, 16  ;;  %v11650_v52 = vld [vmem:[%s13901_s1] sm:$0xff]  }
  0x41   : > { %9721 = vmatprep.mubr.bf16.mxu0 %v719_v43  ;;  %9750 = vmatpush3.bf16.msra.mxu0 %v10954_v45  ;;  %v771_v45 = vrot.slane %v769_v29, 4 }
  0x42   : > { %9751 = vmatprep.subr.bf16.mxu0 %v10960_v62  ;;  %10086 = vmatpush3.bf16.msra.mxu1 %v10967_v51  ;;  %v290_v51 = vld [vmem:[%s11422_s20 + $0x150] sm:$0xf]  ;;  %v777_v56 = vrot.slane %v775_v40, 3  ;;  %v780_v57 = vrot.slane %v778_v46, 4 }
  0x43   : > { %10087 = vmatprep.subr.bf16.mxu1 %v10968_v63  ;;  %v772_v48 = vor.u32 %v771_v45, %v768_v44  ;;  %v8219_v43 = vcombine.low %v290_v51, %v290_v51  ;;  %v8194_v22 = vcombine.low %v11635_v34, %v290_v51  ;;  %v4589_v34 = vld [vmem:[%s11422_s20 + $0x164] sm:$0xf]  ;;  %v8563_v45 = vcombine.low %v4587_v28, %v4588_v32  ;;  %v10988_v51 = vld [vmem:[%s13901_s1 + $0xc8] sm:$0xff]  }
  0x44   : > { %v781_v47 = vor.u32 %v780_v57, %v777_v56  ;;  %v8584_v41 = vcombine.low %v4588_v32, %v4589_v34 }
  0x45   : > { %9752 = vmatpush3.bf16.msra.mxu0 %v10960_v62  ;;  %v773_v58 = vsel %vm648_vm0, %v763_v39, %v772_v48  ;;  %v789_v62 = vrot.slane %v787_v50, 4  ;;  %v793_v60 = vshrl.u32 %v8219_v43, 16  ;;  %v796_v61 = vshll.u32 %v8219_v43, 16 }
  0x46   : > { %9753 = vmatprep.subr.bf16.mxu0 %v10966_v9  ;;  %10088 = vmatpush3.bf16.msra.mxu1 %v10968_v63  ;;  %v10976_v63 = vld [vmem:[%s11422_s20 + $0xd4] sm:$0xff]   ;;  %v782_v6 = vsel %vm648_vm0, %v772_v48, %v781_v47  ;;  %v4923_v49 = vshrl.u32 %v8584_v41, 16  ;;  %v1188_v50 = vshrl.u32 %v10984_v21, 16  ;;  %v4926_v43 = vshll.u32 %v8584_v41, 16 }
  0x47   : > { %9674 = vmatmul.mubr.bf16.gmra.mrb[12].mxu1 %v8186_v10  ;;  %10089 = vmatprep.subr.bf16.mxu1 %v10974_v12  ;;  %v790_v0 = vor.u32 %v789_v62, %v786_v59  ;;  %v1163_v3 = vshll.u32 %v10976_v63, 16  ;;  %v795_v7 = vrot.slane %v793_v60, 3  ;;  %v1161_v10 = vshrl.u32 %v10976_v63, 16  ;;  %v4592_v62 = vld [vmem:[%s11422_s20 + $0x170] sm:$0xf]  ;;  %v10994_v63 = vld [vmem:[%s11422_s20 + $0x104] sm:$0xff]  }
  0x48   : > { %9722 = vmatmul.mubr.bf16.gmra.mrb[12].mxu0 %v728_v13  ;;  %9677 = vmatprep.mubr.bf16.mxu1 %v8187_v16  ;;  %v1168_v13 = vshll.u32 %v10977_v1, 16  ;;  %v4585_v16 = vld [vmem:[%s11422_s20 + $0x154] sm:$0xf]  ;;  %v1212_v21 = vshrl.u32 %v10994_v63, 16 }
  0x49   : > { %9725 = vmatprep.mubr.bf16.mxu0 %v737_v14  ;;  %9754 = vmatpush3.bf16.msra.mxu0 %v10966_v9  ;;  %v798_v9 = vrot.slane %v796_v61, 4  ;;  %v791_v11 = vsel %vm648_vm0, %v781_v47, %v790_v0  ;;  %v11677_v29 = vcombine.low %v4584_v25, %v4585_v16  ;;  %v1190_v47 = vor.u32 %v1188_v50, %v1186_v38  ;;  %v4593_v60 = vld [vmem:[%s11422_s20 + $0x174] sm:$0xf]  ;;  %v4594_v61 = vld [vmem:[%s11422_s20 + $0x178] sm:$0xf] }
  0x4a   : > { %9755 = vmatprep.subr.bf16.mxu0 %v10973_v23  ;;  %10090 = vmatpush3.bf16.msra.mxu1 %v10974_v12  ;;  %v1165_v12 = vrot.slane %v1163_v3, 1  ;;  %v1170_v14 = vrot.slane %v1168_v13, 1  ;;  %v1208_v13 = vshll.u32 %v10994_v63, 16  ;;  %v11787_v63 = vld [vmem:[%s11422_s20 + $0x134] sm:$0xff]  }
  0x4b   : > { %10091 = vmatprep.subr.bf16.mxu1 %v10975_v19  ;;  %v799_v17 = vor.u32 %v798_v9, %v795_v7  ;;  %v4906_v20 = vshrl.u32 %v11677_v29, 16  ;;  %v4909_v46 = vshll.u32 %v11677_v29, 16  ;;  %v11715_v9 = vcombine.low %v4592_v62, %v4593_v60 }
  0x4c   : > { %v1166_v2 = vor.u32 %v1165_v12, %v1161_v10  ;;  %v1174_v37 = vor.u32 %v1172_v24, %v1170_v14  ;;  %v11007_v10 = vld [vmem:[%s13901_s1 + $0x10] sm:$0xff]   ;;  %v11722_v12 = vrot.slane %v4926_v43, 4 }
  0x4d   : > { %9756 = vmatpush3.bf16.msra.mxu0 %v10973_v23  ;;  %v8562_v23 = vcombine.low %v4585_v16, %v4586_v18  ;;  %v4595_v16 = vld [vmem:[%s11422_s20 + $0x17c] sm:$0xf]  ;;  %v4941_v25 = vshrl.u32 %v11715_v9, 16  ;;  %v4944_v32 = vshll.u32 %v11715_v9, 16  ;;  %v4600_v43 = vld [vmem:[%s11422_s20 + $0x190] sm:$0xf] }
  0x4e   : > { %10092 = vmatpush3.bf16.msra.mxu1 %v10975_v19  ;;  %9789 = vmatprep.subr.bf16.mxu0 %v11630_v30  ;;  %v800_v19 = vsel %vm648_vm0, %v790_v0, %v799_v17  ;;  %v1171_v27 = vsel %vm1159_vm1, %v1166_v2, %v1170_v14  ;;  %v4597_v2 = vld [vmem:[%s11422_s20 + $0x184] sm:$0xf] }
  0x4f   : > { %9678 = vmatmul.mubr.bf16.gmra.mrb[16].mxu1 %v8188_v33  ;;  %10117 = vmatprep.subr.bf16.mxu1 %v11650_v52  ;;  %v1178_v33 = vrot.slane %v1176_v15, 1  ;;  %v11004_v15 = vld [vmem:[%s13901_s1 + $0xd8] sm:$0xff]  }
  0x50   : > { %9726 = vmatmul.mubr.bf16.gmra.mrb[16].mxu0 %v746_v35  ;;  %9681 = vmatprep.mubr.bf16.mxu1 %v8189_v36  ;;  %v4590_v36 = vld [vmem:[%s11422_s20 + $0x168] sm:$0xf]  ;;  %v10987_v35 = vld [vmem:[%s11422_s20 + $0xf4] sm:$0xff]  }
  0x51   : > { %9729 = vmatprep.mubr.bf16.mxu0 %v755_v42  ;;  %v11683_v42 = vld [vmem:[%s11422_s20 + $0xfc] sm:$0xff]   ;;  %v1182_v44 = vor.u32 %v1180_v31, %v1178_v33  ;;  %v8564_v39 = vcombine.low %v4589_v34, %v4590_v36  ;;  %v1192_v40 = vshll.u32 %v10987_v35, 16  ;;  %v1179_v48 = vsel %vm1159_vm1, %v1174_v37, %v1178_v33  ;;  %v11003_v31 = vld [vmem:[%s11422_s20 + $0x114] sm:$0xff]   ;;  %v4598_v34 = vld [vmem:[%s11422_s20 + $0x188] sm:$0xf] }
  0x52   : > { %v1196_v56 = vshrl.u32 %v10987_v35, 16  ;;  %v1200_v57 = vshll.u32 %v11683_v42, 16  ;;  %v1204_v17 = vshrl.u32 %v11683_v42, 16  ;;  %v11013_v42 = vld [vmem:[%s13901_s1 + $0xe0] sm:$0xff]   ;;  %v8568_v50 = vcombine.low %v4597_v2, %v4598_v34 }
  0x53   : > { %v1194_v59 = vrot.slane %v1192_v40, 1  ;;  %v11758_v40 = vld [vmem:[%s11422_s20 + $0x18c] sm:$0xf] }
  0x54   : > { %v1202_v3 = vrot.slane %v1200_v57, 1 }
  0x55   : > { %v1198_v1 = vor.u32 %v1196_v56, %v1194_v59  ;;  %v1195_v8 = vsel %vm1159_vm1, %v1190_v47, %v1194_v59  ;;  %v11772_v56 = vld [vmem:[%s11422_s20 + $0x12c] sm:$0xff]   ;;  %v11781_v59 = vld [vmem:[%s11422_s20 + $0x194] sm:$0xf] }
  0x56   : > { %v1206_v33 = vor.u32 %v1204_v17, %v1202_v3 }
  0x57   : > { %9682 = vmatmul.mubr.bf16.gmra.mrb[20].mxu1 %v8190_v53  ;;  %v11691_v53 = vcombine.low %v4586_v18, %v4587_v28  ;;  %v4596_v18 = vld [vmem:[%s11422_s20 + $0x180] sm:$0xf]  ;;  %v1203_v14 = vsel %vm1159_vm1, %v1198_v1, %v1202_v3  ;;  %v1210_v28 = vrot.slane %v1208_v13, 1  ;;  %v11797_v3 = vld [vmem:[%s11422_s20 + $0xe4] sm:$0xf] }
  0x58   : > { %9730 = vmatmul.mubr.bf16.gmra.mrb[20].mxu0 %v764_v55  ;;  %9685 = vmatprep.mubr.bf16.mxu1 %v8191_v54  ;;  %v1187_v54 = vsel %vm1159_vm1, %v1182_v44, %v1186_v38  ;;  %v4591_v55 = vld [vmem:[%s11422_s20 + $0x16c] sm:$0xf]  ;;  %v11739_v26 = vcombine.low %v4596_v18, %v4597_v2  ;;  %v8567_v44 = vcombine.low %v4595_v16, %v4596_v18  ;;  %v11794_v1 = vld [vmem:[%s11422_s20 + $0xe0] sm:$0xf]  ;;  %v11030_v2 = vld [vmem:[%s13901_s1 + $0xf0] sm:$0xff]  }
  0x59   : > { %9733 = vmatprep.mubr.bf16.mxu0 %v773_v58  ;;  %v10999_v58 = vld [vmem:[%s13901_s1 + $0x8] sm:$0xff]   ;;  %v4914_v0 = vshrl.u32 %v11691_v53, 16  ;;  %v11713_v7 = vcombine.low %v4590_v36, %v4591_v55  ;;  %v11748_v36 = vld [vmem:[%s11422_s20 + $0x11c] sm:$0xff]   ;;  %v1214_v38 = vor.u32 %v1212_v21, %v1210_v28  ;;  %v1211_v57 = vsel %vm1159_vm1, %v1206_v33, %v1210_v28 }
  0x5a   : > { %v1248_v21 = vshll.u32 %v11772_v56, 16  ;;  %v1236_v33 = vshrl.u32 %v11748_v36, 16 }
  0x5b   : > { %v4935_v24 = vshll.u32 %v11713_v7, 16 }
  0x5f   : > { %9686 = vmatmul.mubr.bf16.gmra.mrb[24].mxu1 %v8192_v4  ;;  %v10995_v4 = vld [vmem:[%s13901_s1 + $0xd0] sm:$0xff]  }
  0x60   : > { %9734 = vmatmul.mubr.bf16.gmra.mrb[24].mxu0 %v782_v6  ;;  %9689 = vmatprep.mubr.bf16.mxu1 %v8193_v5  ;;  %v11710_v5 = vld [vmem:[%s11422_s20 + $0x10c] sm:$0xff]   ;;  %v8565_v6 = vcombine.low %v4591_v55, %v4592_v62  ;;  %v11769_v55 = vld [vmem:[%s11422_s20 + $0x124] sm:$0xff]  }
  0x61   : > { %9737 = vmatprep.mubr.bf16.mxu0 %v791_v11  ;;  %v11720_v11 = vrot.slane %v4923_v49, 3  ;;  %v11765_v49 = vrot.slane %v4906_v20, 3  ;;  %v1232_v20 = vshll.u32 %v11748_v36, 16  ;;  %v11017_v62 = vld [vmem:[%s13901_s1 + $0x28] sm:$0xff]   ;;  %v1240_v17 = vshll.u32 %v11769_v55, 16 }
  0x62   : > { %v1250_v36 = vrot.slane %v1248_v21, 1  ;;  %v11893_v21 = vld [vmem:[%s11422_s20 + $0xf4] sm:$0xf] }
  0x67   : > { %9690 = vmatmul.mubr.bf16.gmra.mrb[28].mxu1 %v8194_v22  ;;  %v11730_v22 = vcombine.low %v4594_v61, %v4595_v16  ;;  %v1234_v16 = vrot.slane %v1232_v20, 1  ;;  %v11027_v20 = vld [vmem:[%s13901_s1 + $0x38] sm:$0xff]  }
  0x68   : > { %9738 = vmatmul.mubr.bf16.gmra.mrb[28].mxu0 %v800_v19  ;;  %10093 = vmatprep.mubr.bf16.mxu1 %v8562_v23  ;;  %v1216_v23 = vshll.u32 %v11710_v5, 16  ;;  %v4932_v19 = vshrl.u32 %v11713_v7, 16 }
  0x69   : > { %9757 = vmatprep.mubr.bf16.mxu0 %v1171_v27  ;;  %v11008_v27 = vld [vmem:[%s13901_s1 + $0x18] sm:$0xff]   ;;  %v4950_v35 = vshrl.u32 %v11730_v22, 16  ;;  %v4953_v37 = vshll.u32 %v11730_v22, 16 }
  0x6a   : > { %v1218_v41 = vrot.slane %v1216_v23, 1  ;;  %v1256_v23 = vshll.u32 %v11787_v63, 16 }
  0x6c   : > { %v1219_v47 = vsel %vm1159_vm1, %v1214_v38, %v1218_v41  ;;  %v11917_v38 = vld [vmem:[%s11422_s20 + $0x104] sm:$0xf] }
  0x6d   : > { %13934 = vst [vmem:[#allocation3_spill] sm:$0xff] %v11917_v38 }
  0x6f   : > { %10094 = vmatmul.mubr.bf16.vlgmr.msra.gmra.mrb[32].mxu1 %v8563_v45  ;;  %v4959_v45 = vshrl.u32 %v11739_v26, 16 }
  0x70   : > { %9758 = vmatmul.mubr.bf16.vlgmr.msra.gmra.mrb[0].mxu0 %v1179_v48  ;;  %10097 = vmatprep.mubr.bf16.mxu1 %v8564_v39  ;;  %v1220_v39 = vshrl.u32 %v11710_v5, 16  ;;  %v11016_v48 = vld [vmem:[%s13901_s1 + $0x20] sm:$0xff]  }
  0x71   : > { %9790 = vmatpush3.bf16.msra.mxu0 %v11630_v30  ;;  %9761 = vmatprep.mubr.bf16.mxu0 %v1187_v54  ;;  %v4917_v30 = vshll.u32 %v11691_v53, 16  ;;  %v1224_v54 = vshll.u32 %v11003_v31, 16  ;;  %v11032_v53 = vld [vmem:[%s11422_s20 + $0x154] ss:$0 sps:$4 sm:$0x11]  }
  0x72   : > { %9791 = vmatprep.subr.bf16.mxu0 %v10988_v51  ;;  %10118 = vmatpush3.bf16.msra.mxu1 %v11650_v52  ;;  %v8566_v52 = vcombine.low %v4593_v60, %v4594_v61  ;;  %v1228_v60 = vshrl.u32 %v11003_v31, 16  ;;  %v11022_v61 = vld [vmem:[%s13901_s1 + $0xe8] sm:$0xff]   ;;  %v11920_v31 = vld [vmem:[%s11422_s20 + $0x1b0] sm:$0xf] }
  0x73   : > { %10119 = vmatprep.subr.bf16.mxu1 %v10999_v58  ;;  %v1226_v5 = vrot.slane %v1224_v54, 1  ;;  %v11841_v54 = vld [vmem:[%s11422_s20 + $0xe8] sm:$0xf]  ;;  %v4919_v29 = vrot.slane %v4917_v30, 4  ;;  %v11888_v30 = vld [vmem:[%s13901_s1 + $0x80] sm:$0xff]  }
  0x74   : > { %v8286_v7 = vcombine.low %v11797_v3, %v11841_v54 }
  0x75   : > { %9792 = vmatpush3.bf16.msra.mxu0 %v10988_v51  ;;  %v4962_v51 = vshll.u32 %v11739_v26, 16  ;;  %v1230_v18 = vor.u32 %v1228_v60, %v1226_v5  ;;  %v11039_v26 = vld [vmem:[%s13901_s1 + $0x88] sm:$0xff]  }
  0x76   : > { %9793 = vmatprep.subr.bf16.mxu0 %v10995_v4  ;;  %10120 = vmatpush3.bf16.msra.mxu1 %v10999_v58  ;;  %v11777_v58 = vcombine.low %v4598_v34, %v11758_v40  ;;  %v11825_v34 = vld [vmem:[%s11422_s20 + $0x13c] sm:$0xff]  }
  0x77   : > { %10098 = vmatmul.mubr.bf16.gmra.mrb[36].mxu1 %v8565_v6  ;;  %10121 = vmatprep.subr.bf16.mxu1 %v11007_v10  ;;  %v11800_v6 = vcombine.low %v4600_v43, %v11781_v59  ;;  %v1264_v60 = vshll.u32 %v11825_v34, 16  ;;  %v12005_v22 = vrot.slane %v4962_v51, 4  ;;  %v12021_v51 = vld [vmem:[%s11422_s20 + $0x120] sm:$0xf] }
  0x78   : > { %9762 = vmatmul.mubr.bf16.gmra.mrb[4].mxu0 %v1195_v8  ;;  %10101 = vmatprep.mubr.bf16.mxu1 %v8566_v52  ;;  %v11807_v8 = vld [vmem:[%s11422_s20 + $0x198] sm:$0xf] }
  0x79   : > { %9765 = vmatprep.mubr.bf16.mxu0 %v1203_v14  ;;  %9794 = vmatpush3.bf16.msra.mxu0 %v10995_v4  ;;  %v1222_v4 = vor.u32 %v1220_v39, %v1218_v41  ;;  %v8569_v14 = vcombine.low %v11758_v40, %v4600_v43  ;;  %v8570_v28 = vcombine.low %v11781_v59, %v11807_v8  ;;  %v1242_v41 = vrot.slane %v1240_v17, 1  ;;  %v11832_v40 = vld [vmem:[%s11422_s20 + $0x19c] sm:$0xf]  ;;  %v11882_v17 = vld [vmem:[%s11422_s20 + $0x14c] sm:$0xff]  }
  0x7a   : > { %9795 = vmatprep.subr.bf16.mxu0 %v11004_v15  ;;  %10122 = vmatpush3.bf16.msra.mxu1 %v11007_v10  ;;  %v1235_v39 = vsel %vm1159_vm1, %v1230_v18, %v1234_v16  ;;  %v11852_v43 = vrot.slane %v1256_v23, 1  ;;  %v1260_v59 = vshrl.u32 %v11787_v63, 16 }
  0x7b   : > { %10123 = vmatprep.subr.bf16.mxu1 %v11008_v27 }
  0x7d   : > { %9796 = vmatpush3.bf16.msra.mxu0 %v11004_v15  ;;  %v11026_v15 = vld [vmem:[%s13901_s1 + $0x30] sm:$0xff]  }
  0x7e   : > { %10124 = vmatpush3.bf16.msra.mxu1 %v11008_v27  ;;  %9797 = vmatprep.subr.bf16.mxu0 %v11013_v42  ;;  %v1227_v27 = vsel %vm1159_vm1, %v1222_v4, %v1226_v5  ;;  %v1238_v4 = vor.u32 %v1236_v33, %v1234_v16  ;;  %v11873_v5 = vld [vmem:[%s11422_s20 + $0xf0] sm:$0xf]  ;;  %v1268_v16 = vshrl.u32 %v11825_v34, 16  ;;  %v1691_v33 = vshrl.u32 %v8286_v7, 16 }
  0x7f   : > { %10102 = vmatmul.mubr.bf16.gmra.mrb[40].mxu1 %v8567_v44  ;;  %10125 = vmatprep.subr.bf16.mxu1 %v11016_v48  ;;  %v1252_v44 = vshrl.u32 %v11772_v56, 16  ;;  %v11850_v56 = vld [vmem:[%s11422_s20 + $0x1a8] sm:$0xf]  ;;  %v4955_v34 = vrot.slane %v4953_v37, 4 }
  0x80   : > { %9766 = vmatmul.mubr.bf16.gmra.mrb[8].mxu0 %v1211_v57  ;;  %10105 = vmatprep.mubr.bf16.mxu1 %v8568_v50  ;;  %v11033_v50 = vld [vmem:[%s13901_s1 + $0xf8] sm:$0xff]   ;;  %v11844_v57 = vld [vmem:[%s11422_s20 + $0xec] sm:$0xf] }
  0x81   : > { %9769 = vmatprep.mubr.bf16.mxu0 %v1219_v47  ;;  %9798 = vmatpush3.bf16.msra.mxu0 %v11013_v42  ;;  %v1244_v42 = vshrl.u32 %v11769_v55, 16  ;;  %v11847_v55 = vld [vmem:[%s11422_s20 + $0x1a4] sm:$0xf]  ;;  %v1254_v10 = vor.u32 %v1252_v44, %v1250_v36  ;;  %v1266_v44 = vrot.slane %v1264_v60, 1 }
  0x82   : > { %10126 = vmatpush3.bf16.msra.mxu1 %v11016_v48  ;;  %9799 = vmatprep.subr.bf16.mxu0 %v11022_v61  ;;  %v11835_v48 = vld [vmem:[%s11422_s20 + $0x1a0] sm:$0xf]  ;;  %v8572_v23 = vcombine.low %v11847_v55, %v11850_v56 }
  0x83   : > { %10127 = vmatprep.subr.bf16.mxu1 %v11017_v62  ;;  %v1246_v63 = vor.u32 %v1244_v42, %v1242_v41  ;;  %v8571_v18 = vcombine.low %v11832_v40, %v11835_v48  ;;  %v4934_v42 = vrot.slane %v4932_v19, 3  ;;  %v1280_v19 = vshll.u32 %v11882_v17, 16 }
  0x84   : > { %v1270_v9 = vor.u32 %v1268_v16, %v1266_v44  ;;  %v1693_v16 = vrot.slane %v1691_v33, 3  ;;  %v13936_v33 = vshrl.u32 %v11777_v58, 16 }
  0x85   : > { %9800 = vmatpush3.bf16.msra.mxu0 %v11022_v61  ;;  %v4916_v61 = vrot.slane %v4914_v0, 3  ;;  %v11878_v0 = vld [vmem:[%s13901_s1 + $0x100] sm:$0xff]   ;;  %v1251_v47 = vsel %vm1159_vm1, %v1246_v63, %v1250_v36  ;;  %v1262_v63 = vor.u32 %v1260_v59, %v11852_v43  ;;  %v1282_v59 = vrot.slane %v1280_v19, 1  ;;  %v11981_v19 = vld [vmem:[%s11422_s20 + $0x11c] sm:$0xf] }
  0x86   : > { %10128 = vmatpush3.bf16.msra.mxu1 %v11017_v62  ;;  %9801 = vmatprep.subr.bf16.mxu0 %v11030_v2  ;;  %v11860_v62 = vrot.slane %v4909_v46, 4  ;;  %v11870_v46 = vld [vmem:[%s11422_s20 + $0x144] sm:$0xff]  }
  0x87   : > { %10106 = vmatmul.mubr.bf16.gmra.mrb[44].mxu1 %v8569_v14  ;;  %10129 = vmatprep.subr.bf16.mxu1 %v11026_v15  ;;  %v11899_v14 = vld [vmem:[%s11422_s20 + $0xfc] sm:$0xf]  ;;  %v11924_v52 = vor.u32 %v4919_v29, %v4916_v61  ;;  %v1272_v36 = vshll.u32 %v11870_v46, 16  ;;  %v11939_v61 = vld [vmem:[%s11422_s20 + $0x108] sm:$0xf] }
  0x88   : > { %9770 = vmatmul.mubr.bf16.gmra.mrb[12].mxu0 %v1227_v27  ;;  %10109 = vmatprep.mubr.bf16.mxu1 %v8570_v28  ;;  %v1549_v27 = vld [vmem:[%s11422_s20 + $0xdc] sm:$0x8]  ;;  %v11908_v28 = vld [vmem:[%s11422_s20 + $0x100] sm:$0xf]  ;;  %v4912_v13 = vor.u32 %v11860_v62, %v11765_v49  ;;  %v4937_v49 = vrot.slane %v4935_v24, 4  ;;  %13935 = vst [vmem:[#allocation4_spill] sm:$0xff] %v11939_v61 }
  0x89   : > { %9773 = vmatprep.mubr.bf16.mxu0 %v1235_v39  ;;  %9802 = vmatpush3.bf16.msra.mxu0 %v11030_v2  ;;  %v11896_v2 = vld [vmem:[%s11422_s20 + $0xf8] sm:$0xf]  ;;  %v1243_v39 = vsel %vm1159_vm1, %v1238_v4, %v1242_v41  ;;  %v8285_v62 = vcombine.low %v1549_v27, %v11794_v1  ;;  %v11946_v24 = vld [vmem:[%s11422_s20 + $0x10c] sm:$0xf]  ;;  %v1259_v4 = vsel %vm1159_vm1, %v1254_v10, %v11852_v43  ;;  %v4943_v10 = vrot.slane %v4941_v25, 3 }
  0x8a   : > { %10130 = vmatpush3.bf16.msra.mxu1 %v11026_v15  ;;  %9803 = vmatprep.subr.bf16.mxu0 %v11033_v50  ;;  %13933 = vst [vmem:[#allocation2_spill] sm:$0xff] %v11896_v2  ;;  %v11904_v15 = vld [vmem:[%s11422_s20 + $0x1ac] sm:$0xf]  ;;  %v4921_v29 = vsel %vm648_vm0, %v4912_v13, %v11924_v52  ;;  %v4946_v13 = vrot.slane %v4944_v32, 4  ;;  %v4929_v25 = vor.u32 %v11722_v12, %v11720_v11  ;;  %v11978_v43 = vld [vmem:[%s11422_s20 + $0x118] sm:$0xf] }
  0x8b   : > { %10131 = vmatprep.subr.bf16.mxu1 %v11027_v20  ;;  %v8573_v60 = vcombine.low %v11904_v15, %v11920_v31  ;;  %v1683_v27 = vshrl.u32 %v8285_v62, 16  ;;  %v4938_v32 = vor.u32 %v4937_v49, %v4934_v42  ;;  %v4952_v12 = vrot.slane %v4950_v35, 3 }
  0x8d   : > { %9804 = vmatpush3.bf16.msra.mxu0 %v11033_v50  ;;  %v1276_v50 = vshrl.u32 %v11870_v46, 16  ;;  %v11954_v46 = vld [vmem:[%s11422_s20 + $0x110] sm:$0xf] }
  0x8e   : > { %10132 = vmatpush3.bf16.msra.mxu1 %v11027_v20  ;;  %9837 = vmatprep.subr.bf16.mxu0 %v11878_v0  ;;  %v1288_v20 = vshll.u32 %v11032_v53, 16  ;;  %v11957_v53 = vld [vmem:[%s11422_s20 + $0x114] sm:$0xf] }
  0x8f   : > { %10110 = vmatmul.mubr.bf16.gmra.mrb[48].mxu1 %v8571_v18  ;;  %10157 = vmatprep.subr.bf16.mxu1 %v11888_v30  ;;  %v1274_v18 = vrot.slane %v1272_v36, 1  ;;  %v11972_v36 = vcombine.low %v11844_v57, %v11873_v5 }
  0x90   : > { %9774 = vmatmul.mubr.bf16.gmra.mrb[16].mxu0 %v1243_v39  ;;  %10113 = vmatprep.mubr.bf16.mxu1 %v8572_v23  ;;  %v1284_v23 = vshrl.u32 %v11882_v17, 16  ;;  %v1686_v39 = vshll.u32 %v8285_v62, 16  ;;  %v11968_v41 = vrot.slane %v1288_v20, 1  ;;  %v1267_v17 = vsel %vm1159_vm1, %v1262_v63, %v1266_v44 }
  0x91   : > { %9777 = vmatprep.mubr.bf16.mxu0 %v1251_v47  ;;  %v1694_v47 = vshll.u32 %v8286_v7, 16  ;;  %v8288_v20 = vcombine.low %v11893_v21, %v11896_v2  ;;  %v11989_v7 = vrot.slane %v1683_v27, 3  ;;  %v1700_v44 = vshrl.u32 %v11972_v36, 16  ;;  %v12057_v2 = vld [vmem:[%s11422_s20 + $0x144] sm:$0xf] }
  0x92   : > { %v11991_v11 = vrot.slane %v1686_v39, 4  ;;  %v1703_v49 = vshll.u32 %v11972_v36, 16  ;;  %v12009_v63 = vrot.slane %v13936_v33, 3  ;;  %v1275_v27 = vsel %vm1159_vm1, %v1270_v9, %v1274_v18  ;;  %v12030_v36 = vld [vmem:[%s11422_s20 + $0x128] sm:$0xf] }
  0x93   : > { %v1696_v42 = vrot.slane %v1694_v47, 4  ;;  %v1709_v35 = vshrl.u32 %v8288_v20, 16  ;;  %v1712_v37 = vshll.u32 %v8288_v20, 16  ;;  %v12024_v47 = vld [vmem:[%s11422_s20 + $0x124] sm:$0xf]  ;;  %v4939_v39 = vsel %vm648_vm0, %v4929_v25, %v4938_v32 }
  0x94   : > { %v12039_v20 = vld [vmem:[%s11422_s20 + $0x134] sm:$0xf]  ;;  %v12042_v33 = vld [vmem:[%s11422_s20 + $0x138] sm:$0xf]  ;;  %v4947_v9 = vor.u32 %v4946_v13, %v4943_v10  ;;  %v4956_v62 = vor.u32 %v4955_v34, %v4952_v12  ;;  %v1689_v13 = vor.u32 %v11991_v11, %v11989_v7  ;;  %v12071_v12 = vld [vmem:[%s11422_s20 + $0x14c] sm:$0xf] }
  0x95   : > { %v1711_v7 = vrot.slane %v1709_v35, 3  ;;  %v1714_v11 = vrot.slane %v1712_v37, 4  ;;  %v8290_v35 = vcombine.low %v11917_v38, %v11939_v61  ;;  %v12098_v37 = vld [vmem:[%s11422_s20 + $0x154] sm:$0xf]  ;;  %v12102_v34 = vld [vmem:[%s11422_s20 + $0x158] sm:$0xf] }
  0x96   : > { %v12105_v10 = vld [vmem:[%s11422_s20 + $0x15c] sm:$0xf] }
  0x97   : > { %10114 = vmatmul.mubr.bf16.gmra.mrb[52].mxu1 %v8573_v60  ;;  %v1278_v60 = vor.u32 %v1276_v50, %v1274_v18  ;;  %v12060_v18 = vld [vmem:[%s11422_s20 + $0x148] sm:$0xf]  ;;  %v1730_v38 = vshll.u32 %v8290_v35, 16 }
  0x98   : > { %9778 = vmatmul.mubr.bf16.gmra.mrb[20].mxu0 %v1259_v4  ;;  %10133 = vmatprep.mubr.bf16.mxu1 %v4921_v29  ;;  %v12001_v4 = vrot.slane %v4959_v45, 3  ;;  %v13937_v29 = vshll.u32 %v11777_v58, 16  ;;  %v4930_v45 = vsel %vm648_vm0, %v11924_v52, %v4929_v25  ;;  %v12036_v52 = vld [vmem:[%s11422_s20 + $0x130] sm:$0xf]  ;;  %v1286_v25 = vor.u32 %v1284_v23, %v1282_v59 }
  0x99   : > { %9781 = vmatprep.mubr.bf16.mxu0 %v1267_v17  ;;  %v1283_v58 = vsel %vm1159_vm1, %v1278_v60, %v1282_v59  ;;  %v12033_v17 = vld [vmem:[%s11422_s20 + $0x12c] sm:$0xf]  ;;  %v11043_v60 = vld [vmem:[%s13901_s1 + $0x90] sm:$0xff]   ;;  %v8591_v59 = vcombine.low %v11807_v8, %v11832_v40  ;;  %v4948_v40 = vsel %vm648_vm0, %v4938_v32, %v4947_v9  ;;  %v4957_v32 = vsel %vm648_vm0, %v4947_v9, %v4956_v62 }
  0x9a   : > { %v12013_v50 = vrot.slane %v13937_v29, 4  ;;  %v12050_v29 = vld [vmem:[%s11422_s20 + $0x13c] sm:$0xf]  ;;  %v1291_v8 = vsel %vm1159_vm1, %v1286_v25, %v11968_v41  ;;  %v4965_v25 = vor.u32 %v12005_v22, %v12001_v4  ;;  %v1715_v41 = vor.u32 %v1714_v11, %v1711_v7 }
  0x9b   : > { %v8593_v4 = vcombine.low %v11850_v56, %v11904_v15  ;;  %v13938_v22 = vshrl.u32 %v11800_v6, 16  ;;  %v8291_v7 = vcombine.low %v11946_v24, %v11954_v46 }
  0x9f   : > { %10134 = vmatmul.mubr.bf16.vlgmr.msra.gmra.mrb[32].mxu1 %v4930_v45  ;;  %v12054_v45 = vld [vmem:[%s11422_s20 + $0x140] sm:$0xf] }
  0xa0   : > { %9782 = vmatmul.mubr.bf16.gmra.mrb[24].mxu0 %v1275_v27  ;;  %10137 = vmatprep.mubr.bf16.mxu1 %v4939_v39  ;;  %v1702_v27 = vrot.slane %v1700_v44, 3  ;;  %v1705_v39 = vrot.slane %v1703_v49, 4  ;;  %v12086_v44 = vld [vmem:[%s11422_s20 + $0x150] sm:$0xf]  ;;  %v12090_v49 = vcombine.low %v11835_v48, %v11847_v55  ;;  %v4986_v48 = vshrl.u32 %v8591_v59, 16 }
  0xa1   : > { %9785 = vmatprep.mubr.bf16.mxu0 %v1283_v58  ;;  %10158 = vmatpush3.bf16.msra.mxu1 %v11888_v30  ;;  %v1697_v30 = vor.u32 %v1696_v42, %v1693_v16  ;;  %v8289_v16 = vcombine.low %v11899_v14, %v11908_v28  ;;  %v11044_v42 = vld [vmem:[%s13901_s1 + $0x98] sm:$0xff]   ;;  %v4989_v55 = vshll.u32 %v8591_v59, 16  ;;  %v4974_v59 = vor.u32 %v12013_v50, %v12009_v63 }
  0xa2   : > { %10159 = vmatprep.subr.bf16.mxu1 %v11039_v26  ;;  %v4995_v23 = vshrl.u32 %v12090_v49, 16  ;;  %v1706_v61 = vor.u32 %v1705_v39, %v1702_v27  ;;  %v13939_v27 = vshll.u32 %v11800_v6, 16  ;;  %v4966_v63 = vsel %vm648_vm0, %v4956_v62, %v4965_v25 }
  0xa3   : > { %v1698_v58 = vsel %vm648_vm0, %v1689_v13, %v1697_v30  ;;  %v1718_v9 = vshrl.u32 %v8289_v16, 16  ;;  %v1721_v13 = vshll.u32 %v8289_v16, 16  ;;  %v4979_v16 = vrot.slane %v13938_v22, 3 }
  0xa4   : > { %v4982_v39 = vrot.slane %v13939_v27, 4  ;;  %v1707_v11 = vsel %vm648_vm0, %v1697_v30, %v1706_v61  ;;  %v4975_v56 = vsel %vm648_vm0, %v4965_v25, %v4974_v59  ;;  %v4988_v15 = vrot.slane %v4986_v48, 3  ;;  %v11049_v30 = vld [vmem:[%s13901_s1 + $0xa8] sm:$0xff]  }
  0xa5   : > { %10160 = vmatpush3.bf16.msra.mxu1 %v11039_v26  ;;  %v1720_v50 = vrot.slane %v1718_v9, 3  ;;  %v1716_v6 = vsel %vm648_vm0, %v1706_v61, %v1715_v41  ;;  %v1732_v62 = vrot.slane %v1730_v38, 4  ;;  %v8292_v9 = vcombine.low %v11957_v53, %v11978_v43 }
  0xa6   : > { %10161 = vmatprep.subr.bf16.mxu1 %v11043_v60  ;;  %v12139_v22 = vcombine.low %v11920_v31, %v11920_v31  ;;  %v4983_v61 = vor.u32 %v4982_v39, %v4979_v16  ;;  %v1736_v38 = vshrl.u32 %v8291_v7, 16  ;;  %v1739_v48 = vshll.u32 %v8291_v7, 16  ;;  %v11047_v31 = vld [vmem:[%s13901_s1 + $0x110] sm:$0xff]  }
  0xa7   : > { %10138 = vmatmul.mubr.bf16.gmra.mrb[36].mxu1 %v4948_v40  ;;  %v1727_v40 = vshrl.u32 %v8290_v35, 16  ;;  %v1745_v27 = vshrl.u32 %v8292_v9, 16 }
  0xa8   : > { %9786 = vmatmul.mubr.bf16.gmra.mrb[28].mxu0 %v1291_v8  ;;  %10141 = vmatprep.mubr.bf16.mxu1 %v4957_v32  ;;  %v11048_v8 = vld [vmem:[%s13901_s1 + $0xa0] sm:$0xff]   ;;  %v4991_v32 = vrot.slane %v4989_v55, 4  ;;  %v5007_v55 = vshll.u32 %v8593_v4, 16  ;;  %v5013_v39 = vshrl.u32 %v12139_v22, 16  ;;  %v1741_v7 = vrot.slane %v1739_v48, 4 }
  0xa9   : > { %9805 = vmatprep.mubr.bf16.mxu0 %v1698_v58  ;;  %10162 = vmatpush3.bf16.msra.mxu1 %v11043_v60  ;;  %v1723_v60 = vrot.slane %v1721_v13, 4  ;;  %v11042_v58 = vld [vmem:[%s13901_s1 + $0x108] sm:$0xff]   ;;  %v1729_v35 = vrot.slane %v1727_v40, 3  ;;  %v4998_v13 = vshll.u32 %v12090_v49, 16 }
  0xaa   : > { %10163 = vmatprep.subr.bf16.mxu1 %v11044_v42  ;;  %v4992_v25 = vor.u32 %v4991_v32, %v4988_v15  ;;  %v5009_v32 = vrot.slane %v5007_v55, 4 }
  0xab   : > { %v1724_v49 = vor.u32 %v1723_v60, %v1720_v50  ;;  %v1733_v40 = vor.u32 %v1732_v62, %v1729_v35  ;;  %v5000_v16 = vrot.slane %v4998_v13, 4  ;;  %v4984_v50 = vsel %vm648_vm0, %v4974_v59, %v4983_v61  ;;  %v11052_v59 = vld [vmem:[%s13901_s1 + $0x118] sm:$0xff]  }
  0xac   : > { %v1738_v60 = vrot.slane %v1736_v38, 3  ;;  %v1747_v35 = vrot.slane %v1745_v27, 3 }
  0xad   : > { %10164 = vmatpush3.bf16.msra.mxu1 %v11044_v42  ;;  %v5004_v42 = vshrl.u32 %v8593_v4, 16  ;;  %v8293_v4 = vcombine.low %v11981_v19, %v12021_v51 }
  0xae   : > { %10165 = vmatprep.subr.bf16.mxu1 %v11048_v8  ;;  %v1742_v48 = vor.u32 %v1741_v7, %v1738_v60  ;;  %v8295_v7 = vcombine.low %v12033_v17, %v12036_v52 }
  0xaf   : > { %10142 = vmatmul.mubr.bf16.gmra.mrb[40].mxu1 %v4966_v63  ;;  %v1748_v63 = vshll.u32 %v8292_v9, 16  ;;  %v5006_v15 = vrot.slane %v5004_v42, 3  ;;  %v8294_v9 = vcombine.low %v12024_v47, %v12030_v36  ;;  %v1754_v13 = vshrl.u32 %v8293_v4, 16 }
  0xb0   : > { %9806 = vmatmul.mubr.bf16.vlgmr.msra.gmra.mrb[0].mxu0 %v1707_v11  ;;  %10145 = vmatprep.mubr.bf16.mxu1 %v4975_v56  ;;  %v4997_v11 = vrot.slane %v4995_v23, 3  ;;  %v12156_v56 = vld [vmem:[%s11422_s20 + $0x154] sm:$0xff]   ;;  %v4993_v23 = vsel %vm648_vm0, %v4983_v61, %v4992_v25  ;;  %v1757_v42 = vshll.u32 %v8293_v4, 16  ;;  %v11057_v61 = vld [vmem:[%s11422_s20 + $0x15c] sm:$0xff]  }
  0xb1   : > { %9838 = vmatpush3.bf16.msra.mxu0 %v11878_v0  ;;  %9809 = vmatprep.mubr.bf16.mxu0 %v1716_v6  ;;  %v11053_v0 = vld [vmem:[%s13901_s1 + $0xb0] sm:$0xff]   ;;  %v1734_v6 = vsel %vm648_vm0, %v1724_v49, %v1733_v40  ;;  %v1750_v62 = vrot.slane %v1748_v63, 4  ;;  %v5317_v38 = vshll.u32 %v12156_v56, 16  ;;  %v5010_v55 = vor.u32 %v5009_v32, %v5006_v15 }
  0xb2   : > { %9839 = vmatprep.subr.bf16.mxu0 %v11042_v58  ;;  %10166 = vmatpush3.bf16.msra.mxu1 %v11048_v8  ;;  %v1725_v8 = vsel %vm648_vm0, %v1715_v41, %v1724_v49  ;;  %v5016_v41 = vshll.u32 %v12139_v22, 16  ;;  %v5015_v22 = vrot.slane %v5013_v39, 3  ;;  %v1763_v27 = vshrl.u32 %v8294_v9, 16 }
  0xb3   : > { %10167 = vmatprep.subr.bf16.mxu1 %v11049_v30  ;;  %v1751_v49 = vor.u32 %v1750_v62, %v1747_v35  ;;  %v1766_v63 = vshll.u32 %v8294_v9, 16  ;;  %v1756_v4 = vrot.slane %v1754_v13, 3  ;;  %v5319_v39 = vrot.slane %v5317_v38, 1  ;;  %v11060_v35 = vld [vmem:[%s11422_s20 + $0x164] sm:$0xff]  }
  0xb4   : > { %v5322_v60 = vshll.u32 %v11057_v61, 16  ;;  %v1765_v32 = vrot.slane %v1763_v27, 3  ;;  %v11064_v62 = vld [vmem:[%s13901_s1 + $0x128] sm:$0xff]   ;;  %v1772_v13 = vshrl.u32 %v8295_v7, 16 }
  0xb5   : > { %9840 = vmatpush3.bf16.msra.mxu0 %v11042_v58  ;;  %v5001_v58 = vor.u32 %v5000_v16, %v4997_v11  ;;  %v11059_v11 = vld [vmem:[%s13901_s1 + $0x120] sm:$0xff]   ;;  %v1752_v15 = vsel %vm648_vm0, %v1742_v48, %v1751_v49 }
  0xb6   : > { %9841 = vmatprep.subr.bf16.mxu0 %v11047_v31  ;;  %10168 = vmatpush3.bf16.msra.mxu1 %v11049_v30  ;;  %v11054_v30 = vld [vmem:[%s13901_s1 + $0xb8] sm:$0xff]  }
  0xb7   : > { %10146 = vmatmul.mubr.bf16.gmra.mrb[44].mxu1 %v4984_v50  ;;  %10169 = vmatprep.subr.bf16.mxu1 %v11053_v0  ;;  %v5002_v16 = vsel %vm648_vm0, %v4992_v25, %v5001_v58  ;;  %v1759_v50 = vrot.slane %v1757_v42, 4  ;;  %v5011_v25 = vsel %vm648_vm0, %v5001_v58, %v5010_v55  ;;  %v5326_v58 = vshrl.u32 %v11057_v61, 16 }
  0xb8   : > { %9810 = vmatmul.mubr.bf16.gmra.mrb[4].mxu0 %v1725_v8  ;;  %10149 = vmatprep.mubr.bf16.mxu1 %v4993_v23  ;;  %v5018_v8 = vrot.slane %v5016_v41, 4  ;;  %v1743_v23 = vsel %vm648_vm0, %v1733_v40, %v1742_v48  ;;  %v5324_v41 = vrot.slane %v5322_v60, 1  ;;  %v1775_v42 = vshll.u32 %v8295_v7, 16 }
  0xb9   : > { %9813 = vmatprep.mubr.bf16.mxu0 %v1734_v6  ;;  %9842 = vmatpush3.bf16.msra.mxu0 %v11047_v31  ;;  %v12179_v31 = vld [vmem:[%s13901_s1 + $0xc0] sm:$0xff]   ;;  %v1768_v6 = vrot.slane %v1766_v63, 4  ;;  %v1760_v40 = vor.u32 %v1759_v50, %v1756_v4  ;;  %v5330_v48 = vshll.u32 %v11060_v35, 16  ;;  %v8297_v61 = vcombine.low %v12050_v29, %v12054_v45 }
  0xba   : > { %9843 = vmatprep.subr.bf16.mxu0 %v11052_v59  ;;  %10170 = vmatpush3.bf16.msra.mxu1 %v11053_v0  ;;  %v5315_v0 = vshrl.u32 %v12156_v56, 16  ;;  %v8296_v56 = vcombine.low %v12039_v20, %v12042_v33  ;;  %v5019_v9 = vor.u32 %v5018_v8, %v5015_v22  ;;  %v11069_v22 = vld [vmem:[%s13901_s1 + $0x130] sm:$0xff]   ;;  %v5328_v50 = vor.u32 %v5326_v58, %v5324_v41 }
  0xbb   : > { %10171 = vmatprep.subr.bf16.mxu1 %v11054_v30  ;;  %v1769_v38 = vor.u32 %v1768_v6, %v1765_v32  ;;  %v1761_v4 = vsel %vm648_vm0, %v1751_v49, %v1760_v40  ;;  %v1774_v8 = vrot.slane %v1772_v13, 3  ;;  %v5334_v60 = vshrl.u32 %v11060_v35, 16  ;;  %v11076_v49 = vld [vmem:[%s13901_s1 + $0x138] sm:$0xff]  }
  0xbc   : > { %v1781_v27 = vshrl.u32 %v8296_v56, 16  ;;  %v1784_v63 = vshll.u32 %v8296_v56, 16  ;;  %v1790_v6 = vshrl.u32 %v8297_v61, 16  ;;  %v1793_v35 = vshll.u32 %v8297_v61, 16 }
  0xbd   : > { %9844 = vmatpush3.bf16.msra.mxu0 %v11052_v59  ;;  %v5320_v59 = vor.u32 %v5319_v39, %v5315_v0  ;;  %v11065_v0 = vld [vmem:[%s11422_s20 + $0x174] sm:$0xff]   ;;  %v1777_v39 = vrot.slane %v1775_v42, 4  ;;  %v8299_v61 = vcombine.low %v12071_v12, %v12086_v44 }
  0xbe   : > { %10172 = vmatpush3.bf16.msra.mxu1 %v11054_v30  ;;  %9845 = vmatprep.subr.bf16.mxu0 %v11059_v11  ;;  %v12195_v30 = vld [vmem:[%s11422_s20 + $0x16c] sm:$0xff]   ;;  %v1786_v32 = vrot.slane %v1784_v63, 4  ;;  %v5346_v56 = vshll.u32 %v11065_v0, 16  ;;  %v1795_v63 = vrot.slane %v1793_v35, 4 }
  0xbf   : > { %10150 = vmatmul.mubr.bf16.gmra.mrb[48].mxu1 %v5002_v16  ;;  %10197 = vmatprep.subr.bf16.mxu1 %v12179_v31  ;;  %v5020_v16 = vsel %vm648_vm0, %v5010_v55, %v5019_v9  ;;  %v5338_v7 = vshll.u32 %v12195_v30, 16  ;;  %v1770_v55 = vsel %vm648_vm0, %v1760_v40, %v1769_v38  ;;  %v1778_v9 = vor.u32 %v1777_v39, %v1774_v8 }
  0xc0   : > { %9814 = vmatmul.mubr.bf16.gmra.mrb[8].mxu0 %v1743_v23  ;;  %10153 = vmatprep.mubr.bf16.mxu1 %v5011_v25  ;;  %v8298_v23 = vcombine.low %v12057_v2, %v12060_v18  ;;  %v5332_v25 = vrot.slane %v5330_v48, 1  ;;  %v12220_v48 = vld [vmem:[%s13901_s1 + $0x140] sm:$0xff]  }
  0xc1   : > { %9817 = vmatprep.mubr.bf16.mxu0 %v1752_v15  ;;  %9846 = vmatpush3.bf16.msra.mxu0 %v11059_v11  ;;  %v5325_v11 = vsel %vm1159_vm1, %v5320_v59, %v5324_v41  ;;  %v1783_v15 = vrot.slane %v1781_v27, 3  ;;  %v5340_v40 = vrot.slane %v5338_v7, 1  ;;  %v1792_v27 = vrot.slane %v1790_v6, 3  ;;  %v11070_v7 = vld [vmem:[%s11422_s20 + $0x184] sm:$0xff]  }
  0xc2   : > { %9847 = vmatprep.subr.bf16.mxu0 %v11064_v62  ;;  %v5336_v59 = vor.u32 %v5334_v60, %v5332_v25  ;;  %v1799_v41 = vshrl.u32 %v8298_v23, 16  ;;  %v5333_v58 = vsel %vm1159_vm1, %v5328_v50, %v5332_v25  ;;  %v1802_v42 = vshll.u32 %v8298_v23, 16 }
  0xc3   : > { %v1787_v13 = vor.u32 %v1786_v32, %v1783_v15  ;;  %v8300_v50 = vcombine.low %v12098_v37, %v12102_v34  ;;  %v1779_v8 = vsel %vm648_vm0, %v1769_v38, %v1778_v9  ;;  %v1811_v25 = vshll.u32 %v8299_v61, 16 }
  0xc4   : > { %v5341_v39 = vsel %vm1159_vm1, %v5336_v59, %v5340_v40  ;;  %v1801_v60 = vrot.slane %v1799_v41, 3  ;;  %v1804_v23 = vrot.slane %v1802_v42, 4  ;;  %v1796_v38 = vor.u32 %v1795_v63, %v1792_v27  ;;  %v12243_v59 = vld [vmem:[%s11422_s20 + $0x194] sm:$0xff]  }
  0xc5   : > { %9848 = vmatpush3.bf16.msra.mxu0 %v11064_v62  ;;  %v12214_v62 = vld [vmem:[%s11422_s20 + $0x17c] sm:$0xff]   ;;  %v1817_v6 = vshrl.u32 %v8300_v50, 16  ;;  %v1813_v27 = vrot.slane %v1811_v25, 4  ;;  %v5362_v63 = vshll.u32 %v11070_v7, 16 }
  0xc6   : > { %9849 = vmatprep.subr.bf16.mxu0 %v11069_v22  ;;  %v1805_v41 = vor.u32 %v1804_v23, %v1801_v60  ;;  %v11079_v60 = vld [vmem:[%s13901_s1 + $0xd8] sm:$0xff]   ;;  %v12262_v23 = vld [vmem:[%s11422_s20 + $0x1a4] sm:$0xff]  }
  0xc7   : > { %10154 = vmatmul.mubr.bf16.gmra.mrb[52].mxu1 %v5020_v16  ;;  %v5342_v16 = vshrl.u32 %v12195_v30, 16  ;;  %v1788_v30 = vsel %vm648_vm0, %v1778_v9, %v1787_v13  ;;  %v8301_v9 = vcombine.low %v12105_v10, %v12105_v10 }
  0xc8   : > { %9818 = vmatmul.mubr.bf16.gmra.mrb[12].mxu0 %v1761_v4  ;;  %10173 = vmatprep.mubr.bf16.mxu1 %v5325_v11  ;;  %v5348_v4 = vrot.slane %v5346_v56, 1  ;;  %v5354_v11 = vshll.u32 %v12214_v62, 16  ;;  %v1820_v56 = vshll.u32 %v8300_v50, 16 }
  0xc9   : > { %9821 = vmatprep.mubr.bf16.mxu0 %v1770_v55  ;;  %9850 = vmatpush3.bf16.msra.mxu0 %v11069_v22  ;;  %v5350_v22 = vshrl.u32 %v11065_v0, 16  ;;  %v11072_v0 = vld [vmem:[%s13901_s1 + $0xc8] sm:$0xff]   ;;  %v1808_v55 = vshrl.u32 %v8299_v61, 16  ;;  %v5344_v15 = vor.u32 %v5342_v16, %v5340_v40  ;;  %v11078_v40 = vld [vmem:[%s13901_s1 + $0xd0] sm:$0xff]   ;;  %v5366_v16 = vshrl.u32 %v11070_v7, 16 }
  0xca   : > { %9851 = vmatprep.subr.bf16.mxu0 %v11076_v49  ;;  %v5356_v32 = vrot.slane %v5354_v11, 1  ;;  %v1822_v50 = vrot.slane %v1820_v56, 4  ;;  %v1806_v7 = vsel %vm648_vm0, %v1796_v38, %v1805_v41 }
  0xcb   : > { %v5352_v35 = vor.u32 %v5350_v22, %v5348_v4  ;;  %v1810_v42 = vrot.slane %v1808_v55, 3  ;;  %v5349_v61 = vsel %vm1159_vm1, %v5344_v15, %v5348_v4  ;;  %v1819_v22 = vrot.slane %v1817_v6, 3 }
  0xcc   : > { %v5364_v4 = vrot.slane %v5362_v63, 1  ;;  %v5382_v63 = vshrl.u32 %v12243_v59, 16 }
  0xcd   : > { %9852 = vmatpush3.bf16.msra.mxu0 %v11076_v49  ;;  %v12237_v49 = vld [vmem:[%s11422_s20 + $0x18c] sm:$0xff]   ;;  %v1814_v15 = vor.u32 %v1813_v27, %v1810_v42  ;;  %v1823_v56 = vor.u32 %v1822_v50, %v1819_v22  ;;  %v5394_v42 = vshll.u32 %v12262_v23, 16 }
  0xce   : > { %9885 = vmatprep.subr.bf16.mxu0 %v12220_v48  ;;  %v5370_v11 = vshll.u32 %v12237_v49, 16  ;;  %v5374_v25 = vshrl.u32 %v12237_v49, 16  ;;  %v5368_v6 = vor.u32 %v5366_v16, %v5364_v4  ;;  %v11085_v49 = vld [vmem:[%s13901_s1 + $0xe0] sm:$0xff]   ;;  %v11086_v27 = vld [vmem:[%s13901_s1 + $0xe8] sm:$0xff]   ;;  %v5627_v16 = vld [vmem:[%s11422_s20 + $0x15c] sm:$0x8] }
  0xcf   : > { %10174 = vmatmul.mubr.bf16.vlgmr.msra.gmra.mrb[32].mxu1 %v5333_v58  ;;  %v5358_v58 = vshrl.u32 %v12214_v62, 16  ;;  %v5357_v62 = vsel %vm1159_vm1, %v5352_v35, %v5356_v32  ;;  %v1824_v22 = vsel %vm648_vm0, %v1814_v15, %v1823_v56 }
  0xd0   : > { %9822 = vmatmul.mubr.bf16.gmra.mrb[16].mxu0 %v1779_v8  ;;  %10177 = vmatprep.mubr.bf16.mxu1 %v5341_v39  ;;  %v1826_v8 = vshrl.u32 %v8301_v9, 16  ;;  %v5378_v39 = vshll.u32 %v12243_v59, 16  ;;  %v5372_v55 = vrot.slane %v5370_v11, 1  ;;  %v12278_v59 = vld [vmem:[%s11422_s20 + $0x160] sm:$0xf]  ;;  %v12284_v11 = vld [vmem:[%s11422_s20 + $0x1ac] sm:$0xff]  }
  0xd1   : > { %9825 = vmatprep.mubr.bf16.mxu0 %v1788_v30  ;;  %10198 = vmatpush3.bf16.msra.mxu1 %v12179_v31  ;;  %v1797_v31 = vsel %vm648_vm0, %v1787_v13, %v1796_v38  ;;  %v1829_v13 = vshll.u32 %v8301_v9, 16  ;;  %v12259_v30 = vld [vmem:[%s11422_s20 + $0x19c] sm:$0xff]  }
  0xd2   : > { %10199 = vmatprep.subr.bf16.mxu1 %v11072_v0  ;;  %v1828_v38 = vrot.slane %v1826_v8, 3  ;;  %v5380_v35 = vrot.slane %v5378_v39, 1  ;;  %v5376_v50 = vor.u32 %v5374_v25, %v5372_v55  ;;  %v12288_v8 = vld [vmem:[%s11422_s20 + $0x164] sm:$0xf]  ;;  %v12291_v39 = vld [vmem:[%s11422_s20 + $0x168] sm:$0xf] }
  0xd3   : > { %v1831_v9 = vrot.slane %v1829_v13, 4 }
  0xd5   : > { %10200 = vmatpush3.bf16.msra.mxu1 %v11072_v0  ;;  %v5360_v0 = vor.u32 %v5358_v58, %v5356_v32  ;;  %v5386_v32 = vshll.u32 %v12259_v30, 16  ;;  %v5390_v58 = vshrl.u32 %v12259_v30, 16  ;;  %v5398_v30 = vshrl.u32 %v12262_v23, 16 }
  0xd6   : > { %10201 = vmatprep.subr.bf16.mxu1 %v11078_v40 }
  0xd7   : > { %10178 = vmatmul.mubr.bf16.gmra.mrb[36].mxu1 %v5349_v61  ;;  %v5373_v61 = vsel %vm1159_vm1, %v5368_v6, %v5372_v55  ;;  %v5388_v13 = vrot.slane %v5386_v32, 1  ;;  %v5402_v55 = vshll.u32 %v12284_v11, 16  ;;  %v5381_v6 = vsel %vm1159_vm1, %v5376_v50, %v5380_v35 }
  0xd8   : > { %9826 = vmatmul.mubr.bf16.gmra.mrb[20].mxu0 %v1797_v31  ;;  %10181 = vmatprep.mubr.bf16.mxu1 %v5357_v62  ;;  %v1815_v31 = vsel %vm648_vm0, %v1805_v41, %v1814_v15  ;;  %v11091_v62 = vld [vmem:[%s11422_s20 + $0x1b4] ss:$0 sps:$4 sm:$0x11]   ;;  %v1832_v41 = vor.u32 %v1831_v9, %v1828_v38  ;;  %v8657_v15 = vcombine.low %v12288_v8, %v12291_v39  ;;  %v11093_v38 = vld [vmem:[%s13901_s1 + $0xf8] sm:$0xff]   ;;  %v5406_v50 = vshrl.u32 %v12284_v11, 16 }
  0xd9   : > { %9829 = vmatprep.mubr.bf16.mxu0 %v1806_v7  ;;  %10202 = vmatpush3.bf16.msra.mxu1 %v11078_v40  ;;  %v5365_v40 = vsel %vm1159_vm1, %v5360_v0, %v5364_v4  ;;  %v8656_v7 = vcombine.low %v5627_v16, %v12278_v59  ;;  %v5396_v4 = vrot.slane %v5394_v42, 1  ;;  %v11092_v0 = vld [vmem:[%s13901_s1 + $0xf0] sm:$0xff]   ;;  %v5410_v25 = vshll.u32 %v11091_v62, 16 }
  0xda   : > { %10203 = vmatprep.subr.bf16.mxu1 %v11079_v60  ;;  %v1833_v32 = vsel %vm648_vm0, %v1823_v56, %v1832_v41  ;;  %v12311_v42 = vld [vmem:[%s11422_s20 + $0x170] sm:$0xf]  ;;  %v5743_v16 = vshll.u32 %v8657_v15, 16  ;;  %v5404_v62 = vrot.slane %v5402_v55, 1 }
  0xdb   : > { %v5732_v23 = vshrl.u32 %v8656_v7, 16  ;;  %v5735_v9 = vshll.u32 %v8656_v7, 16  ;;  %v5400_v56 = vor.u32 %v5398_v30, %v5396_v4  ;;  %v5412_v7 = vrot.slane %v5410_v25, 1 }
  0xdc   : > { %v5745_v30 = vrot.slane %v5743_v16, 4  ;;  %v12352_v16 = vld [vmem:[%s11422_s20 + $0x184] sm:$0xf] }
  0xdd   : > { %10204 = vmatpush3.bf16.msra.mxu1 %v11079_v60  ;;  %v5384_v60 = vor.u32 %v5382_v63, %v5380_v35  ;;  %v12306_v63 = vld [vmem:[%s11422_s20 + $0x16c] sm:$0xf]  ;;  %v5740_v35 = vshrl.u32 %v8657_v15, 16  ;;  %v5734_v41 = vrot.slane %v5732_v23, 3  ;;  %v12338_v15 = vld [vmem:[%s11422_s20 + $0x17c] sm:$0xf]  ;;  %v13941_v23 = vcombine.low %v11841_v54, %v11844_v57 }
  0xde   : > { %10205 = vmatprep.subr.bf16.mxu1 %v11085_v49  ;;  %v11098_v54 = vld [vmem:[%s13901_s1 + $0x150] sm:$0xff]  }
  0xdf   : > { %10182 = vmatmul.mubr.bf16.gmra.mrb[40].mxu1 %v5365_v40  ;;  %v12314_v40 = vld [vmem:[%s11422_s20 + $0x174] sm:$0xf]  ;;  %v5742_v11 = vrot.slane %v5740_v35, 3 }
  0xe0   : > { %9830 = vmatmul.mubr.bf16.gmra.mrb[24].mxu0 %v1815_v31  ;;  %10185 = vmatprep.mubr.bf16.mxu1 %v5373_v61  ;;  %v5392_v31 = vor.u32 %v5390_v58, %v5388_v13  ;;  %v12317_v61 = vld [vmem:[%s11422_s20 + $0x178] sm:$0xf]  ;;  %v12328_v58 = vld [vmem:[%s13901_s1 + $0x100] sm:$0xff]  }
  0xe1   : > { %9833 = vmatprep.mubr.bf16.mxu0 %v1824_v22  ;;  %10206 = vmatpush3.bf16.msra.mxu1 %v11085_v49  ;;  %v5389_v49 = vsel %vm1159_vm1, %v5384_v60, %v5388_v13  ;;  %v13940_v22 = vcombine.low %v11794_v1, %v11797_v3  ;;  %v5737_v60 = vrot.slane %v5735_v9, 4  ;;  %v8659_v1 = vcombine.low %v12314_v40, %v12317_v61  ;;  %v11090_v13 = vld [vmem:[%s13901_s1 + $0x148] sm:$0xff]  }
  0xe2   : > { %10207 = vmatprep.subr.bf16.mxu1 %v11086_v27  ;;  %v5397_v3 = vsel %vm1159_vm1, %v5392_v31, %v5396_v4  ;;  %v5408_v9 = vor.u32 %v5406_v50, %v5404_v62  ;;  %v5746_v35 = vor.u32 %v5745_v30, %v5742_v11  ;;  %v12355_v31 = vld [vmem:[%s11422_s20 + $0x188] sm:$0xf]  ;;  %v11103_v50 = vld [vmem:[%s13901_s1 + $0x158] sm:$0xff]  }
  0xe3   : > { %v5758_v4 = vshrl.u32 %v8659_v1, 16 }
  0xe5   : > { %10208 = vmatpush3.bf16.msra.mxu1 %v11086_v27  ;;  %v8658_v27 = vcombine.low %v12306_v63, %v12311_v42 }
  0xe6   : > { %10209 = vmatprep.subr.bf16.mxu1 %v11092_v0 }
  0xe7   : > { %10186 = vmatmul.mubr.bf16.gmra.mrb[44].mxu1 %v5381_v6  ;;  %v5749_v55 = vshrl.u32 %v8658_v27, 16  ;;  %v5752_v25 = vshll.u32 %v8658_v27, 16  ;;  %v5761_v6 = vshll.u32 %v8659_v1, 16  ;;  %v12373_v1 = vld [vmem:[%s11422_s20 + $0x190] sm:$0xf] }
  0xe8   : > { %9834 = vmatmul.mubr.bf16.gmra.mrb[28].mxu0 %v1833_v32  ;;  %10189 = vmatprep.mubr.bf16.mxu1 %v5389_v49  ;;  %v12345_v32 = vld [vmem:[%s11422_s20 + $0x180] sm:$0xf]  ;;  %v5738_v49 = vor.u32 %v5737_v60, %v5734_v41  ;;  %v12370_v41 = vld [vmem:[%s11422_s20 + $0x18c] sm:$0xf] }
  0xe9   : > { %9853 = vmatprep.mubr.bf16.mxu0 %v13940_v22  ;;  %10210 = vmatpush3.bf16.msra.mxu1 %v11092_v0  ;;  %v5405_v0 = vsel %vm1159_vm1, %v5400_v56, %v5404_v62  ;;  %v8660_v57 = vcombine.low %v12338_v15, %v12345_v32  ;;  %v8661_v22 = vcombine.low %v12352_v16, %v12355_v31  ;;  %v5760_v62 = vrot.slane %v5758_v4, 3 }
  0xea   : > { %10211 = vmatprep.subr.bf16.mxu1 %v11093_v38  ;;  %v5747_v56 = vsel %vm648_vm0, %v5738_v49, %v5746_v35  ;;  %v5763_v27 = vrot.slane %v5761_v6, 4 }
  0xeb   : > { %v5770_v60 = vshll.u32 %v8660_v57, 16  ;;  %v5776_v30 = vshrl.u32 %v8661_v22, 16 }
  0xec   : > { %v5764_v6 = vor.u32 %v5763_v27, %v5760_v62  ;;  %v11111_v62 = vld [vmem:[%s13901_s1 + $0x108] sm:$0xff]   ;;  %v13947_v27 = vld [vmem:[#allocation4_spill] sm:$0xff] }
  0xed   : > { %10212 = vmatpush3.bf16.msra.mxu1 %v11093_v38  ;;  %v13942_v38 = vcombine.low %v11873_v5, %v11893_v21  ;;  %v5751_v5 = vrot.slane %v5749_v55, 3  ;;  %v5754_v21 = vrot.slane %v5752_v25, 4  ;;  %v12379_v55 = vld [vmem:[%s11422_s20 + $0x194] sm:$0xf]  ;;  %v13945_v25 = vld [vmem:[#allocation3_spill] sm:$0xff] }
  0xee   : > { %10237 = vmatprep.subr.bf16.mxu1 %v12328_v58  ;;  %v13946_v4 = vcombine.low %v11908_v28, %v13945_v25  ;;  %v12417_v25 = vld [vmem:[%s11422_s20 + $0x1a4] sm:$0xf] }
  0xef   : > { %10190 = vmatmul.mubr.bf16.gmra.mrb[48].mxu1 %v5397_v3  ;;  %v13943_v3 = vld [vmem:[#allocation2_spill] sm:$0xff]  ;;  %v5755_v11 = vor.u32 %v5754_v21, %v5751_v5  ;;  %v11115_v21 = vld [vmem:[%s13901_s1 + $0x168] sm:$0xff]  }
  0xf0   : > { %9854 = vmatmul.mubr.bf16.vlgmr.msra.gmra.mrb[0].mxu0 %v13941_v23  ;;  %10193 = vmatprep.mubr.bf16.mxu1 %v5405_v0  ;;  %v5779_v0 = vshll.u32 %v8661_v22, 16  ;;  %v12385_v23 = vld [vmem:[%s11422_s20 + $0x198] sm:$0xf]  ;;  %v12400_v22 = vld [vmem:[%s11422_s20 + $0x19c] sm:$0xf] }
  0xf1   : > { %9886 = vmatpush3.bf16.msra.mxu0 %v12220_v48  ;;  %9857 = vmatprep.mubr.bf16.mxu0 %v13942_v38  ;;  %v5413_v48 = vsel %vm1159_vm1, %v5408_v9, %v5412_v7  ;;  %v5767_v7 = vshrl.u32 %v8660_v57, 16  ;;  %v8662_v9 = vcombine.low %v12370_v41, %v12373_v1  ;;  %v5756_v38 = vsel %vm648_vm0, %v5746_v35, %v5755_v11  ;;  %v12403_v35 = vld [vmem:[%s11422_s20 + $0x1a0] sm:$0xf] }
  0xf2   : > { %9887 = vmatprep.subr.bf16.mxu0 %v11090_v13  ;;  %v5772_v57 = vrot.slane %v5770_v60, 4  ;;  %v8663_v28 = vcombine.low %v12379_v55, %v12385_v23  ;;  %v5781_v5 = vrot.slane %v5779_v0, 4  ;;  %v8664_v0 = vcombine.low %v12400_v22, %v12403_v35 }
  0xf3   : > { %v5769_v49 = vrot.slane %v5767_v7, 3  ;;  %v5788_v60 = vshll.u32 %v8662_v9, 16 }
  0xf5   : > { %9888 = vmatpush3.bf16.msra.mxu0 %v11090_v13  ;;  %v13944_v13 = vcombine.low %v13943_v3, %v11899_v14  ;;  %v11108_v14 = vld [vmem:[%s13901_s1 + $0x160] sm:$0xff]   ;;  %v5773_v7 = vor.u32 %v5772_v57, %v5769_v49  ;;  %v5794_v3 = vshrl.u32 %v8663_v28, 16  ;;  %v5790_v49 = vrot.slane %v5788_v60, 4  ;;  %v12451_v60 = vld [vmem:[%s11422_s20 + $0x1b0] sm:$0xf] }
  0xf6   : > { %9889 = vmatprep.subr.bf16.mxu0 %v11098_v54 }
  0xf7   : > { %10194 = vmatmul.mubr.bf16.gmra.mrb[52].mxu1 %v5413_v48  ;;  %v5778_v48 = vrot.slane %v5776_v30, 3 }
  0xf8   : > { %9858 = vmatmul.mubr.bf16.gmra.mrb[4].mxu0 %v13944_v13  ;;  %10213 = vmatprep.mubr.bf16.mxu1 %v5747_v56  ;;  %v5785_v56 = vshrl.u32 %v8662_v9, 16  ;;  %v5797_v13 = vshll.u32 %v8663_v28, 16  ;;  %v11122_v9 = vld [vmem:[%s13901_s1 + $0x170] sm:$0xff]  }
  0xf9   : > { %9861 = vmatprep.mubr.bf16.mxu0 %v13946_v4  ;;  %9890 = vmatpush3.bf16.msra.mxu0 %v11098_v54  ;;  %v5765_v54 = vsel %vm648_vm0, %v5755_v11, %v5764_v6  ;;  %v13949_v11 = vcombine.low %v11954_v46, %v11957_v53  ;;  %v5782_v30 = vor.u32 %v5781_v5, %v5778_v48  ;;  %v12420_v4 = vld [vmem:[%s11422_s20 + $0x1a8] sm:$0xf]  ;;  %v11117_v53 = vld [vmem:[%s13901_s1 + $0x110] sm:$0xff]   ;;  %v5796_v48 = vrot.slane %v5794_v3, 3 }
  0xfa   : > { %9891 = vmatprep.subr.bf16.mxu0 %v11103_v50  ;;  %v8665_v57 = vcombine.low %v12417_v25, %v12420_v4  ;;  %v5799_v5 = vrot.slane %v5797_v13, 4 }
  0xfb   : > { %v5783_v28 = vsel %vm648_vm0, %v5773_v7, %v5782_v30 }
  0xfc   : > { %v5815_v13 = vshll.u32 %v8665_v57, 16  ;;  %v5800_v26 = vor.u32 %v5799_v5, %v5796_v48 }
  0xfd   : > { %9892 = vmatpush3.bf16.msra.mxu0 %v11103_v50  ;;  %v13948_v50 = vcombine.low %v13947_v27, %v11946_v24  ;;  %v5803_v27 = vshrl.u32 %v8664_v0, 16 }
  0xfe   : > { %9893 = vmatprep.subr.bf16.mxu0 %v11108_v14 }
  0xff   : > { %10214 = vmatmul.mubr.bf16.vlgmr.msra.gmra.mrb[32].mxu1 %v5756_v38  ;;  %v5787_v38 = vrot.slane %v5785_v56, 3  ;;  %v5806_v56 = vshll.u32 %v8664_v0, 16  ;;  %v13955_v0 = vcombine.low %v12021_v51, %v12024_v47  ;;  %v11124_v47 = vld [vmem:[%s13901_s1 + $0x120] sm:$0xff]  }
 0x100   : > { %9862 = vmatmul.mubr.bf16.gmra.mrb[8].mxu0 %v13948_v50  ;;  %10217 = vmatprep.mubr.bf16.mxu1 %v5765_v54  ;;  %v12445_v50 = vld [vmem:[%s11422_s20 + $0x1ac] sm:$0xf] }
 0x101   : > { %9865 = vmatprep.mubr.bf16.mxu0 %v13949_v11  ;;  %9894 = vmatpush3.bf16.msra.mxu0 %v11108_v14  ;;  %v5774_v14 = vsel %vm648_vm0, %v5764_v6, %v5773_v7  ;;  %v11118_v6 = vld [vmem:[%s13901_s1 + $0x118] sm:$0xff]   ;;  %v5791_v3 = vor.u32 %v5790_v49, %v5787_v38  ;;  %v12457_v11 = vld [vmem:[%s11422_s20 + $0x1b4] sm:$0xf]  ;;  %v5808_v38 = vrot.slane %v5806_v56, 4  ;;  %v8666_v51 = vcombine.low %v12445_v50, %v12451_v60 }
 0x102   : > { %10238 = vmatpush3.bf16.msra.mxu1 %v12328_v58  ;;  %v12423_v24 = vpop.f32.mrb[0].mxu1  ;;  %9895 = vmatprep.subr.bf16.mxu0 %v11115_v21  ;;  %v11129_v7 = vld [vmem:[%s13901_s1 + $0x178] sm:$0xff]  }
 0x103   : > { %13950 = vst [vmem:[#allocation2_spill] sm:$0xff] %v12423_v24  ;;  %v12428_v46 = vpop.f32.mrb[1].mxu1  ;;  %10239 = vmatprep.subr.bf16.mxu1 %v11111_v62 }
 0x104   : > { %13951 = vst [vmem:[#allocation3_spill] sm:$0xff] %v12428_v46  ;;  %v12434_v58 = vpop.f32.mrb[2].mxu1 }
 0x105   : > { %13952 = vst [vmem:[#allocation4_spill] sm:$0xff] %v12434_v58  ;;  %v12439_v54 = vpop.f32.mrb[3].mxu1  ;;  %9896 = vmatpush3.bf16.msra.mxu0 %v11115_v21  ;;  %v13954_v21 = vcombine.low %v11978_v43, %v11981_v19  ;;  %v12470_v43 = vld [vmem:[%s13901_s1 + $0x180] sm:$0xff]   ;;  %v5805_v19 = vrot.slane %v5803_v27, 3  ;;  %v5817_v27 = vrot.slane %v5815_v13, 4 }
 0x106   : > { %13953 = vst [vmem:[#allocation5_spill] sm:$0xff] %v12439_v54  ;;  %10240 = vmatpush3.bf16.msra.mxu1 %v11111_v62  ;;  %9897 = vmatprep.subr.bf16.mxu0 %v11122_v9  ;;  %v5812_v62 = vshrl.u32 %v8665_v57, 16  ;;  %v12674_v58 = vld [vmem:[%s11422_s20 + $0xf0] sm:$0xf] }
 0x107   : > { %10218 = vmatmul.mubr.bf16.gmra.mrb[36].mxu1 %v5774_v14  ;;  %10241 = vmatprep.subr.bf16.mxu1 %v11117_v53  ;;  %v12463_v14 = vld [vmem:[%s11422_s20 + $0x1b8] sm:$0xf]  ;;  %v5809_v56 = vor.u32 %v5808_v38, %v5805_v19  ;;  %13988 = vst [vmem:[#allocation31_spill] sm:$0xff] %v12674_v58 }
 0x108   : > { %9866 = vmatmul.mubr.bf16.gmra.mrb[12].mxu0 %v13954_v21  ;;  %10221 = vmatprep.mubr.bf16.mxu1 %v5783_v28  ;;  %13956 = vst [vmem:[#allocation6_spill] sm:$0xff] %v12463_v14  ;;  %v8667_v57 = vcombine.low %v12457_v11, %v12463_v14  ;;  %v5801_v28 = vsel %vm648_vm0, %v5791_v3, %v5800_v26  ;;  %v5814_v5 = vrot.slane %v5812_v62, 3  ;;  %v5821_v21 = vshrl.u32 %v8666_v51, 16 }
 0x109   : > { %9869 = vmatprep.mubr.bf16.mxu0 %v13955_v0  ;;  %9898 = vmatpush3.bf16.msra.mxu0 %v11122_v9  ;;  %v5792_v9 = vsel %vm648_vm0, %v5782_v30, %v5791_v3  ;;  %v11125_v30 = vld [vmem:[%s13901_s1 + $0x128] sm:$0xff]   ;;  %v12492_v0 = vld [vmem:[%s11422_s20 + $0x1bc] sm:$0xf]  ;;  %v13962_v3 = vcombine.low %v12030_v36, %v12033_v17  ;;  %v5824_v62 = vshll.u32 %v8666_v51, 16  ;;  %v11131_v36 = vld [vmem:[%s13901_s1 + $0x130] sm:$0xff]  }
 0x10a   : > { %10242 = vmatpush3.bf16.msra.mxu1 %v11117_v53  ;;  %v12465_v54 = vpop.f32.mrb[4].mxu1  ;;  %9899 = vmatprep.subr.bf16.mxu0 %v11129_v7  ;;  %13961 = vst [vmem:[#allocation11_spill] sm:$0xff] %v12492_v0  ;;  %v5818_v13 = vor.u32 %v5817_v27, %v5814_v5  ;;  %v5833_v19 = vshll.u32 %v8667_v57, 16  ;;  %v5823_v17 = vrot.slane %v5821_v21, 3  ;;  %v11133_v5 = vld [vmem:[%s11422_s20 + $0xe0] sm:$0xff]   ;;  %v11132_v27 = vld [vmem:[%s13901_s1 + $0x138] sm:$0xff]   ;;  %v13968_v21 = vcombine.low %v12042_v33, %v12050_v29 }
 0x10b   : > { %13957 = vst [vmem:[#allocation7_spill] sm:$0xff] %v12465_v54  ;;  %v12472_v49 = vpop.f32.mrb[5].mxu1  ;;  %10243 = vmatprep.subr.bf16.mxu1 %v11118_v6  ;;  %v5826_v51 = vrot.slane %v5824_v62, 4  ;;  %v12535_v33 = vld [vmem:[%s13901_s1 + $0x140] sm:$0xff]  }
 0x10c   : > { %13958 = vst [vmem:[#allocation8_spill] sm:$0xff] %v12472_v49  ;;  %v12480_v53 = vpop.f32.mrb[6].mxu1  ;;  %v12662_v49 = vld [vmem:[%s11422_s20 + $0x158] sm:$0xff]  }
 0x10d   : > { %13959 = vst [vmem:[#allocation9_spill] sm:$0xff] %v12480_v53  ;;  %v12485_v48 = vpop.f32.mrb[7].mxu1  ;;  %9900 = vmatpush3.bf16.msra.mxu0 %v11129_v7  ;;  %v5830_v7 = vshrl.u32 %v8667_v57, 16  ;;  %13985 = vst [vmem:[#allocation28_spill] sm:$0xff] %v12662_v49 }
 0x10e   : > { %13960 = vst [vmem:[#allocation10_spill] sm:$0xff] %v12485_v48  ;;  %10244 = vmatpush3.bf16.msra.mxu1 %v11118_v6  ;;  %9933 = vmatprep.subr.bf16.mxu0 %v12470_v43  ;;  %v13963_v6 = vcombine.low %v12036_v52, %v12039_v20  ;;  %v8668_v20 = vcombine.low %v12492_v0, %v12492_v0  ;;  %v12698_v0 = vld [vmem:[%s11422_s20 + $0x178] sm:$0xff]  }
 0x10f   : > { %10222 = vmatmul.mubr.bf16.gmra.mrb[40].mxu1 %v5792_v9  ;;  %10245 = vmatprep.subr.bf16.mxu1 %v11124_v47  ;;  %v5810_v9 = vsel %vm648_vm0, %v5800_v26, %v5809_v56  ;;  %v5832_v52 = vrot.slane %v5830_v7, 3  ;;  %v5835_v26 = vrot.slane %v5833_v19, 4  ;;  %v13969_v7 = vcombine.low %v12054_v45, %v12057_v2  ;;  %v12528_v19 = vld [vmem:[%s11422_s20 + $0xe8] sm:$0xff]  }
 0x110   : > { %9870 = vmatmul.mubr.bf16.gmra.mrb[16].mxu0 %v13962_v3  ;;  %10225 = vmatprep.mubr.bf16.mxu1 %v5801_v28  ;;  %v5827_v3 = vor.u32 %v5826_v51, %v5823_v17  ;;  %v5839_v62 = vshrl.u32 %v8668_v20, 16 }
 0x111   : > { %9873 = vmatprep.mubr.bf16.mxu0 %v13963_v6 }
 0x112   : > { %10246 = vmatpush3.bf16.msra.mxu1 %v11124_v47  ;;  %v12500_v38 = vpop.f32.mrb[8].mxu1  ;;  %v5819_v47 = vsel %vm648_vm0, %v5809_v56, %v5818_v13  ;;  %v5842_v56 = vshll.u32 %v8668_v20, 16  ;;  %v5828_v2 = vsel %vm648_vm0, %v5818_v13, %v5827_v3  ;;  %v5841_v29 = vrot.slane %v5839_v62, 3  ;;  %v12549_v13 = vld [vmem:[%s11422_s20 + $0x100] sm:$0xff]   ;;  %v12552_v62 = vld [vmem:[%s11422_s20 + $0x108] sm:$0xff]  }
 0x113   : > { %13964 = vst [vmem:[#allocation12_spill] sm:$0xff] %v12500_v38  ;;  %v12503_v48 = vpop.f32.mrb[9].mxu1  ;;  %10247 = vmatprep.subr.bf16.mxu1 %v11125_v30  ;;  %v2515_v20 = vshrl.u32 %v11133_v5, 16 }
 0x114   : > { %13965 = vst [vmem:[#allocation13_spill] sm:$0xff] %v12503_v48  ;;  %v12508_v28 = vpop.f32.mrb[10].mxu1  ;;  %v5844_v45 = vrot.slane %v5842_v56, 4  ;;  %v13975_v56 = vcombine.low %v12086_v44, %v12098_v37  ;;  %v2546_v44 = vshll.u32 %v12549_v13, 16  ;;  %v2554_v37 = vshll.u32 %v12552_v62, 16  ;;  %v12625_v48 = vld [vmem:[%s11422_s20 + $0x160] sm:$0xff]  }
 0x115   : > { %13966 = vst [vmem:[#allocation14_spill] sm:$0xff] %v12508_v28  ;;  %v12513_v57 = vpop.f32.mrb[11].mxu1 }
 0x116   : > { %13967 = vst [vmem:[#allocation15_spill] sm:$0xff] %v12513_v57  ;;  %10248 = vmatpush3.bf16.msra.mxu1 %v11125_v30  ;;  %v5836_v30 = vor.u32 %v5835_v26, %v5832_v52  ;;  %v11136_v52 = vld [vmem:[%s11422_s20 + $0xf0] sm:$0xff]   ;;  %v2522_v26 = vshll.u32 %v12528_v19, 16 }
 0x117   : > { %10226 = vmatmul.mubr.bf16.gmra.mrb[44].mxu1 %v5810_v9  ;;  %10249 = vmatprep.subr.bf16.mxu1 %v11131_v36  ;;  %v2517_v9 = vshll.u32 %v11133_v5, 16  ;;  %v5845_v5 = vor.u32 %v5844_v45, %v5841_v29  ;;  %v8693_v29 = vcombine.low %v12278_v59, %v12288_v8  ;;  %v12590_v8 = vld [vmem:[%s11422_s20 + $0x130] sm:$0xff]  }
 0x118   : > { %9874 = vmatmul.mubr.bf16.gmra.mrb[20].mxu0 %v13968_v21  ;;  %10229 = vmatprep.mubr.bf16.mxu1 %v5819_v47  ;;  %v5837_v17 = vsel %vm648_vm0, %v5827_v3, %v5836_v30  ;;  %v12546_v21 = vld [vmem:[%s11422_s20 + $0xf8] sm:$0xff]   ;;  %v13974_v3 = vcombine.low %v12060_v18, %v12071_v12  ;;  %v12571_v12 = vld [vmem:[%s11422_s20 + $0x120] sm:$0xff]  }
 0x119   : > { %9877 = vmatprep.mubr.bf16.mxu0 %v13969_v7  ;;  %v2519_v47 = vrot.slane %v2517_v9, 1  ;;  %v2530_v7 = vshll.u32 %v11136_v52, 16  ;;  %v12565_v9 = vld [vmem:[%s11422_s20 + $0x118] sm:$0xff]   ;;  %v2538_v18 = vshll.u32 %v12546_v21, 16 }
 0x11a   : > { %10250 = vmatpush3.bf16.msra.mxu1 %v11131_v36  ;;  %v12525_v6 = vpop.f32.mrb[12].mxu1 }
 0x11b   : > { %13970 = vst [vmem:[#allocation16_spill] sm:$0xff] %v12525_v6  ;;  %v12530_v57 = vpop.f32.mrb[13].mxu1  ;;  %10251 = vmatprep.subr.bf16.mxu1 %v11132_v27  ;;  %v12602_v6 = vld [vmem:[%s11422_s20 + $0x138] sm:$0xff]  }
 0x11c   : > { %13971 = vst [vmem:[#allocation17_spill] sm:$0xff] %v12530_v57  ;;  %v12538_v36 = vpop.f32.mrb[14].mxu1  ;;  %v12609_v57 = vrot.slane %v2554_v37, 1  ;;  %v2594_v37 = vshll.u32 %v12590_v8, 16 }
 0x11d   : > { %13972 = vst [vmem:[#allocation18_spill] sm:$0xff] %v12538_v36  ;;  %v12541_v51 = vpop.f32.mrb[15].mxu1 }
 0x11e   : > { %13973 = vst [vmem:[#allocation19_spill] sm:$0xff] %v12541_v51  ;;  %10252 = vmatpush3.bf16.msra.mxu1 %v11132_v27  ;;  %v12559_v27 = vld [vmem:[%s11422_s20 + $0x110] sm:$0xff]   ;;  %v2524_v51 = vrot.slane %v2522_v26, 1  ;;  %v13980_v26 = vcombine.low %v12102_v34, %v12105_v10 }
 0x11f   : > { %10230 = vmatmul.mubr.bf16.gmra.mrb[48].mxu1 %v5828_v2  ;;  %10277 = vmatprep.subr.bf16.mxu1 %v12535_v33  ;;  %v2520_v2 = vor.u32 %v2519_v47, %v2515_v20  ;;  %v5846_v20 = vsel %vm648_vm0, %v5836_v30, %v5845_v5  ;;  %v2526_v47 = vshrl.u32 %v12528_v19, 16  ;;  %v2562_v59 = vshll.u32 %v12559_v27, 16 }
 0x120   : > { %9878 = vmatmul.mubr.bf16.gmra.mrb[24].mxu0 %v13974_v3  ;;  %10233 = vmatprep.mubr.bf16.mxu1 %v5837_v17  ;;  %v12580_v17 = vld [vmem:[%s11422_s20 + $0x128] sm:$0xff]   ;;  %v2570_v30 = vshll.u32 %v12565_v9, 16  ;;  %v12597_v5 = vrot.slane %v2538_v18, 1 }
 0x121   : > { %9881 = vmatprep.mubr.bf16.mxu0 %v13975_v56  ;;  %v2532_v56 = vrot.slane %v2530_v7, 1  ;;  %v2525_v19 = vsel %vm1159_vm1, %v2520_v2, %v2524_v51  ;;  %v12605_v7 = vld [vmem:[%s11422_s20 + $0x140] sm:$0xff]   ;;  %v2586_v2 = vshll.u32 %v12580_v17, 16  ;;  %v12614_v18 = vld [vmem:[%s11422_s20 + $0x148] sm:$0xff]   ;;  %v2528_v28 = vor.u32 %v2526_v47, %v2524_v51  ;;  %v12635_v51 = vld [vmem:[%s11422_s20 + $0x150] sm:$0xff]  }
 0x122   : > { %v12567_v36 = vpop.f32.mrb[16].mxu1  ;;  %v12631_v10 = vrot.slane %v2570_v30, 1  ;;  %13981 = vst [vmem:[#allocation24_spill] sm:$0xff] %v12635_v51  ;;  %v2602_v47 = vshll.u32 %v12602_v6, 16  ;;  %v2618_v34 = vshll.u32 %v12614_v18, 16 }
 0x123   : > { %13976 = vst [vmem:[#allocation20_spill] sm:$0xff] %v12567_v36  ;;  %v12575_v45 = vpop.f32.mrb[17].mxu1  ;;  %v2534_v36 = vshrl.u32 %v11136_v52, 16  ;;  %v12607_v52 = vrot.slane %v2546_v44, 1  ;;  %v12621_v44 = vrot.slane %v2562_v59, 1  ;;  %v12646_v59 = vrot.slane %v2586_v2, 1 }
 0x124   : > { %13977 = vst [vmem:[#allocation21_spill] sm:$0xff] %v12575_v45  ;;  %v12586_v3 = vpop.f32.mrb[18].mxu1  ;;  %v2533_v30 = vsel %vm1159_vm1, %v2528_v28, %v2532_v56  ;;  %v12679_v46 = vrot.slane %v2602_v47, 1  ;;  %v12692_v14 = vrot.slane %v2618_v34, 1  ;;  %v2634_v34 = vshll.u32 %v12662_v49, 16 }
 0x125   : > { %13978 = vst [vmem:[#allocation22_spill] sm:$0xff] %v12586_v3  ;;  %v12592_v45 = vpop.f32.mrb[19].mxu1  ;;  %v2578_v3 = vshll.u32 %v12571_v12, 16  ;;  %v2536_v38 = vor.u32 %v2534_v36, %v2532_v56  ;;  %v13989_v56 = vcombine.low %v12291_v39, %v12306_v63  ;;  %v11147_v39 = vld [vmem:[%s13901_s1 + $0x190] sm:$0xff]   ;;  %v12765_v49 = vld [vmem:[%s11422_s20 + $0x100] sm:$0xf] }
 0x126   : > { %13979 = vst [vmem:[#allocation23_spill] sm:$0xff] %v12592_v45  ;;  %v12628_v45 = vld [vmem:[%s11422_s20 + $0x168] sm:$0xff]   ;;  %v11180_v63 = vld [vmem:[%s11422_s20 + $0x160] ss:$0 sps:$4 sm:$0x11]  }
 0x127   : > { %10234 = vmatmul.mubr.bf16.gmra.mrb[52].mxu1 %v5846_v20  ;;  %v8695_v20 = vcombine.low %v12311_v42, %v12314_v40  ;;  %v12639_v40 = vrot.slane %v2578_v3, 1  ;;  %v12652_v3 = vld [vmem:[%s11422_s20 + $0x170] sm:$0xff]   ;;  %v6413_v2 = vshll.u32 %v12628_v45, 16 }
 0x128   : > { %9882 = vmatmul.mubr.bf16.gmra.mrb[28].mxu0 %v13980_v26  ;;  %10253 = vmatprep.mubr.bf16.mxu1 %v8693_v29  ;;  %v2610_v26 = vshll.u32 %v12605_v7, 16  ;;  %v12656_v29 = vrot.slane %v2594_v37, 1  ;;  %v12671_v37 = vld [vmem:[%s11422_s20 + $0xec] sm:$0xf]  ;;  %v6421_v28 = vshll.u32 %v12652_v3, 16 }
 0x129   : > { %9901 = vmatprep.mubr.bf16.mxu0 %v2525_v19  ;;  %v2541_v19 = vsel %vm1159_vm1, %v2536_v38, %v12597_v5  ;;  %13987 = vst [vmem:[#allocation30_spill] sm:$0xff] %v12671_v37 }
 0x12a   : > { %v12637_v42 = vpop.f32.mrb[20].mxu1  ;;  %v12681_v24 = vrot.slane %v2610_v26, 1  ;;  %v12714_v26 = vrot.slane %v6413_v2, 1  ;;  %v8696_v2 = vcombine.low %v12317_v61, %v12338_v15  ;;  %v11154_v61 = vld [vmem:[%s13901_s1 + $0x198] sm:$0xff]   ;;  %v12742_v15 = vrot.slane %v2634_v34, 1 }
 0x12b   : > { %13982 = vst [vmem:[#allocation25_spill] sm:$0xff] %v12637_v42  ;;  %v12644_v36 = vpop.f32.mrb[21].mxu1  ;;  %v11142_v42 = vld [vmem:[%s13901_s1 + $0x188] sm:$0xff]  }
 0x12c   : > { %13983 = vst [vmem:[#allocation26_spill] sm:$0xff] %v12644_v36  ;;  %v12654_v53 = vpop.f32.mrb[22].mxu1  ;;  %v6408_v36 = vshll.u32 %v12625_v48, 16  ;;  %13995 = vst [vmem:[#allocation35_spill] sm:$0xff] %v12742_v15 }
 0x12d   : > { %13984 = vst [vmem:[#allocation27_spill] sm:$0xff] %v12654_v53  ;;  %v12667_v54 = vpop.f32.mrb[23].mxu1  ;;  %v2626_v53 = vshll.u32 %v12635_v51, 16  ;;  %v12757_v51 = vld [vmem:[%s11422_s20 + $0xf8] sm:$0xf] }
 0x12e   : > { %13986 = vst [vmem:[#allocation29_spill] sm:$0xff] %v12667_v54  ;;  %v11150_v54 = vld [vmem:[%s13901_s1 + $0x148] sm:$0xff]  }
 0x12f   : > { %10254 = vmatmul.mubr.bf16.vlgmr.msra.gmra.mrb[32].mxu1 %v13989_v56  ;;  %v13990_v56 = vshrl.u32 %v12546_v21, 16  ;;  %v12716_v47 = vrot.slane %v2626_v53, 1 }
 0x130   : > { %9902 = vmatmul.mubr.bf16.vlgmr.msra.gmra.mrb[0].mxu0 %v2533_v30  ;;  %10257 = vmatprep.mubr.bf16.mxu1 %v8695_v20  ;;  %v11156_v20 = vld [vmem:[%s13901_s1 + $0x150] sm:$0xff]   ;;  %v12712_v30 = vrot.slane %v6408_v36, 1  ;;  %v2903_v36 = vld [vmem:[%s11422_s20 + $0xe8] sm:$0x8] }
 0x131   : > { %9934 = vmatpush3.bf16.msra.mxu0 %v12470_v43  ;;  %9905 = vmatprep.mubr.bf16.mxu0 %v2541_v19  ;;  %v2544_v38 = vor.u32 %v13990_v56, %v12597_v5  ;;  %v13991_v43 = vshrl.u32 %v12549_v13, 16  ;;  %v12731_v56 = vrot.slane %v6421_v28, 1  ;;  %v12746_v5 = vld [vmem:[%s11422_s20 + $0x180] sm:$0xff]   ;;  %v12749_v13 = vld [vmem:[%s11422_s20 + $0xf4] sm:$0xf] }
 0x132   : > { %9935 = vmatprep.subr.bf16.mxu0 %v11142_v42  ;;  %10278 = vmatpush3.bf16.msra.mxu1 %v12535_v33  ;;  %v12723_v21 = vpop.f32.mrb[24].mxu1  ;;  %v8697_v33 = vcombine.low %v12345_v32, %v12352_v16  ;;  %13996 = vst [vmem:[#allocation36_spill] sm:$0xff] %v12749_v13  ;;  %v2642_v16 = vshll.u32 %v11180_v63, 16  ;;  %v12762_v28 = vld [vmem:[%s11422_s20 + $0xfc] sm:$0xf] }
 0x133   : > { %v2552_v19 = vor.u32 %v13991_v43, %v12607_v52  ;;  %13992 = vst [vmem:[#allocation32_spill] sm:$0xff] %v12723_v21  ;;  %v12729_v53 = vpop.f32.mrb[25].mxu1  ;;  %10279 = vmatprep.subr.bf16.mxu1 %v11150_v54  ;;  %v6429_v43 = vshll.u32 %v12698_v0, 16  ;;  %13998 = vst [vmem:[#allocation38_spill] sm:$0xff] %v12762_v28 }
 0x134   : > { %13993 = vst [vmem:[#allocation33_spill] sm:$0xff] %v12729_v53  ;;  %v12737_v21 = vpop.f32.mrb[26].mxu1  ;;  %v2549_v53 = vsel %vm1159_vm1, %v2544_v38, %v12607_v52  ;;  %v11157_v52 = vld [vmem:[%s13901_s1 + $0x158] sm:$0xff]   ;;  %v8408_v38 = vcombine.low %v12674_v58, %v12749_v13  ;;  %v8698_v58 = vcombine.low %v12355_v31, %v12370_v41  ;;  %v11163_v31 = vld [vmem:[%s13901_s1 + $0x160] sm:$0xff]   ;;  %v12815_v41 = vrot.slane %v2642_v16, 1 }
 0x135   : > { %13994 = vst [vmem:[#allocation34_spill] sm:$0xff] %v12737_v21  ;;  %9936 = vmatpush3.bf16.msra.mxu0 %v11142_v42  ;;  %v12753_v32 = vpop.f32.mrb[27].mxu1  ;;  %v8407_v21 = vcombine.low %v2903_v36, %v12671_v37  ;;  %v2557_v34 = vsel %vm1159_vm1, %v2552_v19, %v12609_v57  ;;  %v12770_v42 = vrot.slane %v6429_v43, 1  ;;  %v11161_v19 = vld [vmem:[%s13901_s1 + $0x1a0] sm:$0xff]   ;;  %v6437_v36 = vshll.u32 %v12746_v5, 16 }
 0x136   : > { %13997 = vst [vmem:[#allocation37_spill] sm:$0xff] %v12753_v32  ;;  %9937 = vmatprep.subr.bf16.mxu0 %v11147_v39  ;;  %10280 = vmatpush3.bf16.msra.mxu1 %v11150_v54  ;;  %v12786_v43 = vld [vmem:[%s11422_s20 + $0x104] sm:$0xf]  ;;  %v12789_v32 = vld [vmem:[%s11422_s20 + $0x108] sm:$0xf]  ;;  %v14000_v54 = vshrl.u32 %v12552_v62, 16 }
 0x137   : > { %10258 = vmatmul.mubr.bf16.gmra.mrb[36].mxu1 %v8696_v2  ;;  %10281 = vmatprep.subr.bf16.mxu1 %v11156_v20  ;;  %v12783_v2 = vld [vmem:[%s11422_s20 + $0x188] sm:$0xff]   ;;  %13999 = vst [vmem:[#allocation39_spill] sm:$0xff] %v12786_v43  ;;  %v3040_v63 = vshll.u32 %v8407_v21, 16  ;;  %v14001_v37 = vshrl.u32 %v12559_v27, 16  ;;  %14005 = vst [vmem:[#allocation43_spill] sm:$0xff] %v12815_v41  ;;  %v3045_v27 = vshrl.u32 %v8408_v38, 16 }
 0x138   : > { %9906 = vmatmul.mubr.bf16.gmra.mrb[4].mxu0 %v2549_v53  ;;  %10261 = vmatprep.mubr.bf16.mxu1 %v8697_v33  ;;  %v2560_v53 = vor.u32 %v14000_v54, %v12609_v57  ;;  %v3037_v33 = vshrl.u32 %v8407_v21, 16  ;;  %v12805_v57 = vld [vmem:[%s11422_s20 + $0x10c] sm:$0xf]  ;;  %v8699_v54 = vcombine.low %v12373_v1, %v12379_v55  ;;  %v6445_v16 = vshll.u32 %v12783_v2, 16 }
 0x139   : > { %9909 = vmatprep.mubr.bf16.mxu0 %v2557_v34  ;;  %9938 = vmatpush3.bf16.msra.mxu0 %v11147_v39  ;;  %v2568_v15 = vor.u32 %v14001_v37, %v12621_v44  ;;  %v12808_v39 = vld [vmem:[%s11422_s20 + $0x110] sm:$0xf]  ;;  %v3048_v37 = vshll.u32 %v8408_v38, 16  ;;  %v11168_v62 = vld [vmem:[%s13901_s1 + $0x1a8] sm:$0xff]   ;;  %v8409_v38 = vcombine.low %v12757_v51, %v12762_v28  ;;  %v12849_v28 = vld [vmem:[%s11422_s20 + $0x118] sm:$0xf] }
 0x13a   : > { %9939 = vmatprep.subr.bf16.mxu0 %v11154_v61  ;;  %10282 = vmatpush3.bf16.msra.mxu1 %v11156_v20  ;;  %v12801_v34 = vpop.f32.mrb[28].mxu1  ;;  %14003 = vst [vmem:[#allocation41_spill] sm:$0xff] %v12808_v39  ;;  %v2565_v20 = vsel %vm1159_vm1, %v2560_v53, %v12621_v44  ;;  %v12838_v55 = vrot.slane %v3037_v33, 3  ;;  %v12844_v39 = vld [vmem:[%s11422_s20 + $0x114] sm:$0xf]  ;;  %v11164_v44 = vld [vmem:[%s13901_s1 + $0x168] sm:$0xff]  }
 0x13b   : > { %14002 = vst [vmem:[#allocation40_spill] sm:$0xff] %v12801_v34  ;;  %v12810_v21 = vpop.f32.mrb[29].mxu1  ;;  %10283 = vmatprep.subr.bf16.mxu1 %v11157_v52  ;;  %v12832_v34 = vld [vmem:[%s11422_s20 + $0x190] sm:$0xff]   ;;  %v2573_v41 = vsel %vm1159_vm1, %v2568_v15, %v12631_v10  ;;  %v3054_v33 = vshrl.u32 %v8409_v38, 16  ;;  %v14008_v53 = vshrl.u32 %v12565_v9, 16 }
 0x13c   : > { %14004 = vst [vmem:[#allocation42_spill] sm:$0xff] %v12810_v21  ;;  %v12821_v13 = vpop.f32.mrb[30].mxu1  ;;  %v12826_v21 = vrot.slane %v6437_v36, 1  ;;  %v12950_v9 = vld [vmem:[%s11422_s20 + $0x138] sm:$0xf] }
 0x13d   : > { %14006 = vst [vmem:[#allocation44_spill] sm:$0xff] %v12821_v13  ;;  %9940 = vmatpush3.bf16.msra.mxu0 %v11154_v61  ;;  %v12836_v1 = vpop.f32.mrb[31].mxu1  ;;  %v12840_v13 = vrot.slane %v3040_v63, 4  ;;  %v12854_v61 = vrot.slane %v3045_v27, 3  ;;  %v12856_v63 = vrot.slane %v3048_v37, 4  ;;  %v3057_v27 = vshll.u32 %v8409_v38, 16 }
 0x13e   : > { %14007 = vst [vmem:[#allocation45_spill] sm:$0xff] %v12836_v1  ;;  %10284 = vmatpush3.bf16.msra.mxu1 %v11157_v52  ;;  %9941 = vmatprep.subr.bf16.mxu0 %v11161_v19  ;;  %v12864_v52 = vrot.slane %v6445_v16, 1  ;;  %v6453_v37 = vshll.u32 %v12832_v34, 16  ;;  %v2576_v36 = vor.u32 %v14008_v53, %v12631_v10  ;;  %v12877_v16 = vld [vmem:[%s11422_s20 + $0x120] sm:$0xf]  ;;  %v14009_v38 = vshrl.u32 %v12571_v12, 16 }
 0x13f   : > { %10262 = vmatmul.mubr.bf16.gmra.mrb[40].mxu1 %v8698_v58  ;;  %10285 = vmatprep.subr.bf16.mxu1 %v11163_v31  ;;  %v11176_v58 = vld [vmem:[%s13901_s1 + $0x1b0] sm:$0xff]   ;;  %v8700_v10 = vcombine.low %v12385_v23, %v12400_v22  ;;  %v12892_v53 = vld [vmem:[%s11422_s20 + $0x128] sm:$0xf]  ;;  %v11181_v12 = vld [vmem:[%s13901_s1 + $0x1b8] sm:$0xff]   ;;  %v12903_v23 = vcombine.low %v12765_v49, %v12786_v43  ;;  %14011 = vst [vmem:[#allocation46_spill] sm:$0xff] %v12950_v9 }
 0x140   : > { %9910 = vmatmul.mubr.bf16.gmra.mrb[8].mxu0 %v2565_v20  ;;  %10265 = vmatprep.mubr.bf16.mxu1 %v8699_v54  ;;  %v11170_v20 = vld [vmem:[%s13901_s1 + $0x170] sm:$0xff]   ;;  %v12874_v54 = vld [vmem:[%s11422_s20 + $0x11c] sm:$0xf]  ;;  %v2584_v15 = vor.u32 %v14009_v38, %v12639_v40  ;;  %v12899_v38 = vrot.slane %v3057_v27, 4  ;;  %v12919_v1 = vld [vmem:[%s11422_s20 + $0x1a0] sm:$0xff]  }
 0x141   : > { %9913 = vmatprep.mubr.bf16.mxu0 %v2573_v41  ;;  %9942 = vmatpush3.bf16.msra.mxu0 %v11161_v19  ;;  %v8701_v19 = vcombine.low %v12403_v35, %v12417_v25  ;;  %v12889_v41 = vld [vmem:[%s11422_s20 + $0x124] sm:$0xf]  ;;  %v2581_v35 = vsel %vm1159_vm1, %v2576_v36, %v12639_v40  ;;  %v11171_v25 = vld [vmem:[%s13901_s1 + $0x178] sm:$0xff]   ;;  %v12924_v40 = vld [vmem:[%s11422_s20 + $0x12c] sm:$0xf] }
 0x142   : > { %10286 = vmatpush3.bf16.msra.mxu1 %v11163_v31  ;;  %9943 = vmatprep.subr.bf16.mxu0 %v11168_v62  ;;  %v12897_v31 = vrot.slane %v3054_v33, 3  ;;  %v12912_v33 = vrot.slane %v6453_v37, 1  ;;  %v12915_v27 = vld [vmem:[%s11422_s20 + $0x198] sm:$0xff]   ;;  %v2589_v43 = vsel %vm1159_vm1, %v2584_v15, %v12646_v59  ;;  %v12932_v36 = vld [vmem:[%s13901_s1 + $0x1c0] sm:$0xff]   ;;  %v3063_v37 = vshrl.u32 %v12903_v23, 16 }
 0x143   : > { %10287 = vmatprep.subr.bf16.mxu1 %v11164_v44 }
 0x145   : > { %9944 = vmatpush3.bf16.msra.mxu0 %v11168_v62  ;;  %v12927_v62 = vld [vmem:[%s11422_s20 + $0x130] sm:$0xf] }
 0x146   : > { %10288 = vmatpush3.bf16.msra.mxu1 %v11164_v44  ;;  %9945 = vmatprep.subr.bf16.mxu0 %v11176_v58  ;;  %v14012_v44 = vshrl.u32 %v12590_v8, 16  ;;  %v8703_v8 = vcombine.low %v12451_v60, %v12457_v11  ;;  %v14016_v11 = vshrl.u32 %v12602_v6, 16  ;;  %v13001_v6 = vld [vmem:[%s11422_s20 + $0x14c] sm:$0xf] }
 0x147   : > { %10266 = vmatmul.mubr.bf16.gmra.mrb[44].mxu1 %v8700_v10  ;;  %10289 = vmatprep.subr.bf16.mxu1 %v11170_v20  ;;  %v14010_v10 = vshrl.u32 %v12580_v17, 16  ;;  %v6461_v17 = vshll.u32 %v12915_v27, 16 }
 0x148   : > { %9914 = vmatmul.mubr.bf16.gmra.mrb[12].mxu0 %v2581_v35  ;;  %10269 = vmatprep.mubr.bf16.mxu1 %v8701_v19  ;;  %v12944_v19 = vld [vmem:[%s13901_s1 + $0x180] sm:$0xff]   ;;  %v12947_v35 = vld [vmem:[%s11422_s20 + $0x134] sm:$0xf] }
 0x149   : > { %9917 = vmatprep.mubr.bf16.mxu0 %v2589_v43  ;;  %v2592_v22 = vor.u32 %v14010_v10, %v12646_v59  ;;  %9946 = vmatpush3.bf16.msra.mxu0 %v11176_v58  ;;  %v2600_v43 = vor.u32 %v14012_v44, %v12656_v29  ;;  %v6469_v59 = vshll.u32 %v12919_v1, 16  ;;  %v8702_v10 = vcombine.low %v12420_v4, %v12445_v50  ;;  %v12966_v44 = vld [vmem:[%s11422_s20 + $0x13c] sm:$0xf]  ;;  %v12972_v58 = vld [vmem:[%s11422_s20 + $0x140] sm:$0xf] }
 0x14a   : > { %10290 = vmatpush3.bf16.msra.mxu1 %v11170_v20  ;;  %9947 = vmatprep.subr.bf16.mxu0 %v11181_v12  ;;  %14013 = vst [vmem:[#allocation47_spill] sm:$0xff] %v12966_v44  ;;  %v12976_v4 = vld [vmem:[%s11422_s20 + $0x144] sm:$0xf]  ;;  %v12979_v50 = vld [vmem:[%s11422_s20 + $0x148] sm:$0xf] }
 0x14b   : > { %10291 = vmatprep.subr.bf16.mxu1 %v11171_v25  ;;  %v2597_v20 = vsel %vm1159_vm1, %v2592_v22, %v12656_v29  ;;  %v2605_v15 = vsel %vm1159_vm1, %v2600_v43, %v12679_v46  ;;  %14014 = vst [vmem:[#allocation48_spill] sm:$0xff] %v12976_v4  ;;  %14015 = vst [vmem:[#allocation49_spill] sm:$0xff] %v12979_v50  ;;  %v2608_v29 = vor.u32 %v14016_v11, %v12679_v46 }
 0x14c   : > { %v14018_v43 = vshrl.u32 %v12605_v7, 16  ;;  %v14023_v7 = vshrl.u32 %v12628_v45, 16  ;;  %v8416_v45 = vcombine.low %v12927_v62, %v12947_v35 }
 0x14d   : > { %9948 = vmatpush3.bf16.msra.mxu0 %v11181_v12  ;;  %v14017_v12 = vshrl.u32 %v12625_v48, 16 }
 0x14e   : > { %10292 = vmatpush3.bf16.msra.mxu1 %v11171_v25  ;;  %9981 = vmatprep.subr.bf16.mxu0 %v12932_v36  ;;  %v6419_v11 = vor.u32 %v14023_v7, %v12714_v26 }
 0x14f   : > { %10270 = vmatmul.mubr.bf16.gmra.mrb[48].mxu1 %v8702_v10  ;;  %10317 = vmatprep.subr.bf16.mxu1 %v12944_v19  ;;  %v6411_v22 = vor.u32 %v12712_v30, %v14017_v12  ;;  %v2616_v10 = vor.u32 %v14018_v43, %v12681_v24  ;;  %v13006_v30 = vld [vmem:[%s11422_s20 + $0x150] sm:$0xf]  ;;  %v14027_v43 = vshrl.u32 %v12652_v3, 16 }
 0x150   : > { %9918 = vmatmul.mubr.bf16.gmra.mrb[16].mxu0 %v2597_v20  ;;  %10273 = vmatprep.mubr.bf16.mxu1 %v8703_v8  ;;  %v14019_v8 = vld [vmem:[#allocation11_spill] sm:$0xff]  ;;  %v14020_v20 = vld [vmem:[#allocation6_spill] sm:$0xff] }
 0x151   : > { %9921 = vmatprep.mubr.bf16.mxu0 %v2605_v15  ;;  %v8704_v60 = vcombine.low %v14020_v20, %v14019_v8  ;;  %v2613_v15 = vsel %vm1159_vm1, %v2608_v29, %v12681_v24  ;;  %v6416_v46 = vsel %vm1159_vm1, %v6411_v22, %v12714_v26  ;;  %14021 = vst [vmem:[#allocation11_spill] sm:$0xff] %v13001_v6  ;;  %14022 = vst [vmem:[#allocation6_spill] sm:$0xff] %v13006_v30  ;;  %v13012_v24 = vld [vmem:[%s11422_s20 + $0x154] sm:$0xf]  ;;  %v13015_v29 = vld [vmem:[%s11422_s20 + $0x158] sm:$0xf] }
 0x152   : > { %v2621_v48 = vsel %vm1159_vm1, %v2616_v10, %v12692_v14  ;;  %14024 = vst [vmem:[#allocation50_spill] sm:$0xff] %v13012_v24  ;;  %14025 = vst [vmem:[#allocation51_spill] sm:$0xff] %v13015_v29  ;;  %v14026_v22 = vshrl.u32 %v12614_v18, 16  ;;  %v6427_v10 = vor.u32 %v14027_v43, %v12731_v56  ;;  %v14028_v26 = vld [vmem:[#allocation24_spill] sm:$0xff] }
 0x153   : > { %v14029_v8 = vshrl.u32 %v14028_v26, 16 }
 0x154   : > { %v6432_v3 = vsel %vm1159_vm1, %v6427_v10, %v12770_v42  ;;  %v14036_v10 = vshrl.u32 %v12746_v5, 16  ;;  %v11209_v5 = vld [vmem:[%s11422_s20 + $0x1c0] ss:$0 sps:$4 sm:$0x11]  }
 0x155   : > { %v2632_v20 = vor.u32 %v14029_v8, %v12716_v47  ;;  %v11196_v8 = vld [vmem:[%s13901_s1 + $0x190] sm:$0xff]  }
 0x156   : > { %v6443_v26 = vor.u32 %v14036_v10, %v12826_v21  ;;  %v13093_v10 = vld [vmem:[%s11422_s20 + $0x1a8] sm:$0xff]  }
 0x157   : > { %10274 = vmatmul.mubr.bf16.gmra.mrb[52].mxu1 %v8704_v60  ;;  %v2624_v60 = vor.u32 %v14026_v22, %v12692_v14  ;;  %v11190_v14 = vld [vmem:[%s13901_s1 + $0x188] sm:$0xff]   ;;  %v13045_v22 = vld [vmem:[%s11422_s20 + $0x160] sm:$0xf] }
 0x158   : > { %9922 = vmatmul.mubr.bf16.gmra.mrb[20].mxu0 %v2613_v15  ;;  %10293 = vmatprep.mubr.bf16.mxu1 %v6416_v46  ;;  %v6424_v15 = vsel %vm1159_vm1, %v6419_v11, %v12731_v56  ;;  %v13040_v46 = vld [vmem:[%s11422_s20 + $0x15c] sm:$0xf]  ;;  %v14033_v56 = vld [vmem:[#allocation28_spill] sm:$0xff] }
 0x159   : > { %9925 = vmatprep.mubr.bf16.mxu0 %v2621_v48  ;;  %v2629_v18 = vsel %vm1159_vm1, %v2624_v60, %v12716_v47  ;;  %14030 = vst [vmem:[#allocation24_spill] sm:$0xff] %v13040_v46  ;;  %v14031_v48 = vld [vmem:[#allocation35_spill] sm:$0xff]  ;;  %v14034_v11 = vshrl.u32 %v14033_v56, 16  ;;  %v14035_v47 = vshrl.u32 %v12698_v0, 16  ;;  %v3043_v0 = vor.u32 %v12840_v13, %v12838_v55 }
 0x15a   : > { %v2637_v7 = vsel %vm1159_vm1, %v2632_v20, %v14031_v48  ;;  %14032 = vst [vmem:[#allocation35_spill] sm:$0xff] %v13045_v22  ;;  %v13060_v20 = vld [vmem:[%s11422_s20 + $0x164] sm:$0xf]  ;;  %v6448_v55 = vsel %vm1159_vm1, %v6443_v26, %v12864_v52  ;;  %v14043_v26 = vshrl.u32 %v12832_v34, 16 }
 0x15b   : > { %v2640_v43 = vor.u32 %v14034_v11, %v14031_v48  ;;  %v6435_v60 = vor.u32 %v14035_v47, %v12770_v42  ;;  %14037 = vst [vmem:[#allocation28_spill] sm:$0xff] %v13060_v20  ;;  %v3051_v42 = vor.u32 %v12856_v63, %v12854_v61  ;;  %v3065_v61 = vrot.slane %v3063_v37, 3 }
 0x15c   : > { %v14040_v63 = vshll.u32 %v12903_v23, 16  ;;  %v3060_v37 = vor.u32 %v12899_v38, %v12897_v31  ;;  %v14042_v23 = vshrl.u32 %v12783_v2, 16  ;;  %v8413_v31 = vcombine.low %v12849_v28, %v12874_v54 }
 0x15d   : > { %v6440_v48 = vsel %vm1159_vm1, %v6435_v60, %v12826_v21  ;;  %v3052_v13 = vsel %vm648_vm0, %v3043_v0, %v3051_v42  ;;  %v11197_v21 = vld [vmem:[%s13901_s1 + $0x198] sm:$0xff]   ;;  %v6459_v0 = vor.u32 %v14043_v26, %v12912_v33 }
 0x15f   : > { %10294 = vmatmul.mubr.bf16.vlgmr.msra.gmra.mrb[32].mxu1 %v6424_v15  ;;  %v13063_v15 = vld [vmem:[%s11422_s20 + $0x168] sm:$0xf] }
 0x160   : > { %9926 = vmatmul.mubr.bf16.gmra.mrb[24].mxu0 %v2629_v18  ;;  %10297 = vmatprep.mubr.bf16.mxu1 %v6432_v3  ;;  %14038 = vst [vmem:[#allocation52_spill] sm:$0xff] %v13063_v15  ;;  %v8411_v3 = vcombine.low %v12789_v32, %v12805_v57 }
 0x161   : > { %9929 = vmatprep.mubr.bf16.mxu0 %v2637_v7  ;;  %10318 = vmatpush3.bf16.msra.mxu1 %v12944_v19  ;;  %v14039_v7 = vld [vmem:[#allocation43_spill] sm:$0xff]  ;;  %v3068_v19 = vrot.slane %v14040_v63, 4  ;;  %v3090_v63 = vshrl.u32 %v8413_v31, 16 }
 0x162   : > { %10319 = vmatprep.subr.bf16.mxu1 %v11190_v14  ;;  %v2645_v56 = vsel %vm1159_vm1, %v2640_v43, %v14039_v7  ;;  %v3072_v11 = vshrl.u32 %v8411_v3, 16  ;;  %v14041_v43 = vld [vmem:[#allocation41_spill] sm:$0xff]  ;;  %v3075_v60 = vshll.u32 %v8411_v3, 16  ;;  %v6463_v3 = vrot.slane %v6461_v17, 1 }
 0x163   : > { %v8412_v47 = vcombine.low %v14041_v43, %v12844_v39  ;;  %v6471_v7 = vrot.slane %v6469_v59, 1  ;;  %v3069_v2 = vor.u32 %v3068_v19, %v3065_v61  ;;  %v6473_v17 = vshrl.u32 %v12919_v1, 16  ;;  %v11194_v1 = vld [vmem:[%s13901_s1 + $0x1c8] sm:$0xff]  }
 0x164   : > { %v6464_v61 = vsel %vm1159_vm1, %v6459_v0, %v6463_v3  ;;  %v3093_v19 = vshll.u32 %v8413_v31, 16  ;;  %v13134_v31 = vld [vmem:[%s11422_s20 + $0x1b8] sm:$0xff]  }
 0x165   : > { %10320 = vmatpush3.bf16.msra.mxu1 %v11190_v14  ;;  %v6451_v14 = vor.u32 %v14042_v23, %v12864_v52  ;;  %v3074_v52 = vrot.slane %v3072_v11, 3  ;;  %v3081_v38 = vshrl.u32 %v8412_v47, 16  ;;  %v3084_v34 = vshll.u32 %v8412_v47, 16  ;;  %v11204_v23 = vld [vmem:[%s13901_s1 + $0x1a8] sm:$0xff]  }
 0x166   : > { %10321 = vmatprep.subr.bf16.mxu1 %v11196_v8  ;;  %v3070_v11 = vsel %vm648_vm0, %v3060_v37, %v3069_v2  ;;  %v6475_v26 = vor.u32 %v6473_v17, %v6471_v7 }
 0x167   : > { %10298 = vmatmul.mubr.bf16.gmra.mrb[36].mxu1 %v6440_v48  ;;  %v6465_v48 = vshrl.u32 %v12915_v27, 16  ;;  %v6477_v27 = vshll.u32 %v13093_v10, 16  ;;  %v6456_v59 = vsel %vm1159_vm1, %v6451_v14, %v12912_v33  ;;  %v3083_v47 = vrot.slane %v3081_v38, 3  ;;  %v6718_v38 = vld [vmem:[%s11422_s20 + $0x168] sm:$0x8] }
 0x168   : > { %9930 = vmatmul.mubr.bf16.gmra.mrb[28].mxu0 %v2645_v56  ;;  %10301 = vmatprep.mubr.bf16.mxu1 %v6448_v55  ;;  %v11203_v56 = vld [vmem:[%s13901_s1 + $0x1a0] sm:$0xff]   ;;  %v13116_v55 = vld [vmem:[%s11422_s20 + $0x1b0] sm:$0xff]   ;;  %v8414_v33 = vcombine.low %v12877_v16, %v12889_v41 }
 0x169   : > { %9949 = vmatprep.mubr.bf16.mxu0 %v3052_v13  ;;  %10322 = vmatpush3.bf16.msra.mxu1 %v11196_v8  ;;  %v3077_v13 = vrot.slane %v3075_v60, 4  ;;  %v3061_v8 = vsel %vm648_vm0, %v3051_v42, %v3060_v37  ;;  %v3086_v60 = vrot.slane %v3084_v34, 4  ;;  %v6467_v42 = vor.u32 %v6465_v48, %v6463_v3  ;;  %v13138_v34 = vld [vmem:[%s11422_s20 + $0x16c] sm:$0xf]  ;;  %v13142_v48 = vld [vmem:[%s11422_s20 + $0x170] sm:$0xf] }
 0x16a   : > { %10323 = vmatprep.subr.bf16.mxu1 %v11197_v21  ;;  %v6481_v37 = vshrl.u32 %v13093_v10, 16  ;;  %v6485_v0 = vshll.u32 %v13116_v55, 16  ;;  %v3092_v3 = vrot.slane %v3090_v63, 3  ;;  %v3095_v10 = vrot.slane %v3093_v19, 4 }
 0x16b   : > { %v3078_v14 = vor.u32 %v3077_v13, %v3074_v52  ;;  %v11201_v52 = vld [vmem:[%s13901_s1 + $0x1d0] sm:$0xff]   ;;  %v3099_v13 = vshrl.u32 %v8414_v33, 16  ;;  %v3102_v17 = vshll.u32 %v8414_v33, 16  ;;  %v8766_v63 = vcombine.low %v6718_v38, %v13138_v34 }
 0x16c   : > { %v6487_v33 = vrot.slane %v6485_v0, 1 }
 0x16d   : > { %10324 = vmatpush3.bf16.msra.mxu1 %v11197_v21  ;;  %v6479_v21 = vrot.slane %v6477_v27, 1  ;;  %v13145_v27 = vld [vmem:[%s11422_s20 + $0x174] sm:$0xf]  ;;  %v3079_v19 = vsel %vm648_vm0, %v3069_v2, %v3078_v14  ;;  %v3101_v38 = vrot.slane %v3099_v13, 3  ;;  %v3104_v2 = vrot.slane %v3102_v17, 4 }
 0x16e   : > { %10325 = vmatprep.subr.bf16.mxu1 %v11203_v56  ;;  %v6826_v0 = vshll.u32 %v8766_v63, 16  ;;  %v6501_v17 = vshll.u32 %v11209_v5, 16 }
 0x16f   : > { %10302 = vmatmul.mubr.bf16.gmra.mrb[40].mxu1 %v6456_v59  ;;  %v3087_v59 = vor.u32 %v3086_v60, %v3083_v47  ;;  %v8767_v47 = vcombine.low %v13142_v48, %v13145_v27  ;;  %v6483_v60 = vor.u32 %v6481_v37, %v6479_v21  ;;  %v6497_v37 = vshrl.u32 %v13134_v31, 16 }
 0x170   : > { %9950 = vmatmul.mubr.bf16.vlgmr.msra.gmra.mrb[0].mxu0 %v3061_v8  ;;  %10305 = vmatprep.mubr.bf16.mxu1 %v6464_v61  ;;  %v6472_v8 = vsel %vm1159_vm1, %v6467_v42, %v6471_v7  ;;  %v11210_v61 = vld [vmem:[%s13901_s1 + $0x1b0] sm:$0xff]   ;;  %v3096_v7 = vor.u32 %v3095_v10, %v3092_v3  ;;  %v6489_v42 = vshrl.u32 %v13116_v55, 16  ;;  %v11211_v55 = vld [vmem:[%s13901_s1 + $0x1b8] sm:$0xff]  }
 0x171   : > { %9982 = vmatpush3.bf16.msra.mxu0 %v12932_v36  ;;  %9953 = vmatprep.mubr.bf16.mxu0 %v3070_v11  ;;  %v8415_v36 = vcombine.low %v12892_v53, %v12924_v40  ;;  %v6480_v11 = vsel %vm1159_vm1, %v6475_v26, %v6479_v21  ;;  %v3088_v18 = vsel %vm648_vm0, %v3078_v14, %v3087_v59  ;;  %v11208_v26 = vld [vmem:[%s13901_s1 + $0x1d8] sm:$0xff]   ;;  %v6831_v3 = vshrl.u32 %v8767_v47, 16 }
 0x172   : > { %9983 = vmatprep.subr.bf16.mxu0 %v11194_v1  ;;  %10326 = vmatpush3.bf16.msra.mxu1 %v11203_v56  ;;  %v6493_v56 = vshll.u32 %v13134_v31, 16  ;;  %v6834_v10 = vshll.u32 %v8767_v47, 16  ;;  %v6488_v13 = vsel %vm1159_vm1, %v6483_v60, %v6487_v33  ;;  %v6491_v31 = vor.u32 %v6489_v42, %v6487_v33  ;;  %v13186_v47 = vld [vmem:[%s11422_s20 + $0x180] sm:$0xf] }
 0x173   : > { %10327 = vmatprep.subr.bf16.mxu1 %v11204_v23  ;;  %v3111_v21 = vshll.u32 %v8415_v36, 16  ;;  %v8417_v42 = vcombine.low %v12950_v9, %v12966_v44 }
 0x174   : > { %v6495_v14 = vrot.slane %v6493_v56, 1  ;;  %v3117_v56 = vshrl.u32 %v8416_v45, 16 }
 0x175   : > { %9984 = vmatpush3.bf16.msra.mxu0 %v11194_v1  ;;  %v3108_v1 = vshrl.u32 %v8415_v36, 16  ;;  %v13179_v36 = vld [vmem:[%s11422_s20 + $0x178] sm:$0xf]  ;;  %v3113_v60 = vrot.slane %v3111_v21, 4  ;;  %v6503_v21 = vrot.slane %v6501_v17, 1 }
 0x176   : > { %9985 = vmatprep.subr.bf16.mxu0 %v11201_v52  ;;  %10328 = vmatpush3.bf16.msra.mxu1 %v11204_v23  ;;  %v6823_v23 = vshrl.u32 %v8766_v63, 16  ;;  %v3097_v63 = vsel %vm648_vm0, %v3087_v59, %v3096_v7  ;;  %v13196_v59 = vld [vmem:[%s13901_s1 + $0x1c0] sm:$0xff]   ;;  %v6496_v12 = vsel %vm1159_vm1, %v6491_v31, %v6495_v14  ;;  %v3119_v44 = vrot.slane %v3117_v56, 3 }
 0x177   : > { %10306 = vmatmul.mubr.bf16.gmra.mrb[44].mxu1 %v6472_v8  ;;  %10329 = vmatprep.subr.bf16.mxu1 %v11210_v61  ;;  %v11216_v8 = vld [vmem:[%s13901_s1 + $0x1e0] sm:$0xff]   ;;  %v3110_v5 = vrot.slane %v3108_v1, 3  ;;  %v6499_v1 = vor.u32 %v6497_v37, %v6495_v14  ;;  %v3129_v14 = vshll.u32 %v8417_v42, 16 }
 0x178   : > { %9954 = vmatmul.mubr.bf16.gmra.mrb[4].mxu0 %v3079_v19  ;;  %10309 = vmatprep.mubr.bf16.mxu1 %v6480_v11  ;;  %v13182_v19 = vld [vmem:[%s11422_s20 + $0x17c] sm:$0xf]  ;;  %v3105_v11 = vor.u32 %v3104_v2, %v3101_v38  ;;  %v6825_v33 = vrot.slane %v6823_v23, 3  ;;  %v6828_v38 = vrot.slane %v6826_v0, 4  ;;  %v6836_v2 = vrot.slane %v6834_v10, 4 }
 0x179   : > { %9957 = vmatprep.mubr.bf16.mxu0 %v3088_v18  ;;  %9986 = vmatpush3.bf16.msra.mxu0 %v11201_v52  ;;  %v3120_v18 = vshll.u32 %v8416_v45, 16  ;;  %v13189_v52 = vld [vmem:[%s11422_s20 + $0x184] sm:$0xf]  ;;  %v8768_v45 = vcombine.low %v13179_v36, %v13182_v19  ;;  %v8418_v0 = vcombine.low %v12972_v58, %v12976_v4  ;;  %v3114_v37 = vor.u32 %v3113_v60, %v3110_v5  ;;  %v13219_v5 = vld [vmem:[%s11422_s20 + $0x18c] sm:$0xf] }
 0x17a   : > { %9987 = vmatprep.subr.bf16.mxu0 %v11208_v26  ;;  %10330 = vmatpush3.bf16.msra.mxu1 %v11210_v61  ;;  %v6833_v61 = vrot.slane %v6831_v3, 3  ;;  %v8769_v23 = vcombine.low %v13186_v47, %v13189_v52  ;;  %v3106_v25 = vsel %vm648_vm0, %v3096_v7, %v3105_v11  ;;  %v11221_v3 = vld [vmem:[%s13901_s1 + $0x1e8] sm:$0xff]   ;;  %v6829_v7 = vor.u32 %v6828_v38, %v6825_v33  ;;  %v13226_v38 = vld [vmem:[%s11422_s20 + $0x194] sm:$0xf] }
 0x17b   : > { %10331 = vmatprep.subr.bf16.mxu1 %v11211_v55  ;;  %v3122_v9 = vrot.slane %v3120_v18, 4  ;;  %v6840_v10 = vshrl.u32 %v8768_v45, 16  ;;  %v6843_v31 = vshll.u32 %v8768_v45, 16  ;;  %v13216_v18 = vld [vmem:[%s11422_s20 + $0x188] sm:$0xf]  ;;  %v3135_v60 = vshrl.u32 %v8418_v0, 16 }
 0x17c   : > { %v6849_v17 = vshrl.u32 %v8769_v23, 16  ;;  %v6852_v56 = vshll.u32 %v8769_v23, 16  ;;  %v3138_v33 = vshll.u32 %v8418_v0, 16  ;;  %v8420_v0 = vcombine.low %v13006_v30, %v13012_v24  ;;  %v11229_v4 = vld [vmem:[%s13901_s1 + $0x1c8] sm:$0xff]  }
 0x17d   : > { %9988 = vmatpush3.bf16.msra.mxu0 %v11208_v26  ;;  %v3126_v26 = vshrl.u32 %v8417_v42, 16  ;;  %v13223_v42 = vld [vmem:[%s11422_s20 + $0x190] sm:$0xf]  ;;  %v6842_v23 = vrot.slane %v6840_v10, 3  ;;  %v11233_v10 = vld [vmem:[%s13901_s1 + $0x1f8] sm:$0xff]  }
 0x17e   : > { %10332 = vmatpush3.bf16.msra.mxu1 %v11211_v55  ;;  %9989 = vmatprep.subr.bf16.mxu0 %v11216_v8  ;;  %v13210_v55 = vor.u32 %v6836_v2, %v6833_v61  ;;  %v3115_v61 = vsel %vm648_vm0, %v3105_v11, %v3114_v37  ;;  %v8419_v2 = vcombine.low %v12979_v50, %v13001_v6 }
 0x17f   : > { %10310 = vmatmul.mubr.bf16.gmra.mrb[48].mxu1 %v6488_v13  ;;  %10357 = vmatprep.subr.bf16.mxu1 %v13196_v59  ;;  %v11226_v13 = vld [vmem:[%s13901_s1 + $0x1f0] sm:$0xff]   ;;  %v8771_v11 = vcombine.low %v13223_v42, %v13226_v38 }
 0x180   : > { %9958 = vmatmul.mubr.bf16.gmra.mrb[8].mxu0 %v3097_v63  ;;  %10313 = vmatprep.mubr.bf16.mxu1 %v6496_v12  ;;  %v6504_v12 = vsel %vm1159_vm1, %v6499_v1, %v6503_v21  ;;  %v3123_v63 = vor.u32 %v3122_v9, %v3119_v44  ;;  %v6838_v45 = vsel %vm648_vm0, %v6829_v7, %v13210_v55  ;;  %v6845_v1 = vrot.slane %v6843_v31, 4 }
 0x181   : > { %9961 = vmatprep.mubr.bf16.mxu0 %v3106_v25  ;;  %9990 = vmatpush3.bf16.msra.mxu0 %v11216_v8  ;;  %v3128_v25 = vrot.slane %v3126_v26, 3  ;;  %v3131_v8 = vrot.slane %v3129_v14, 4  ;;  %v8770_v9 = vcombine.low %v13216_v18, %v13219_v5  ;;  %v6851_v44 = vrot.slane %v6849_v17, 3 }
 0x182   : > { %9991 = vmatprep.subr.bf16.mxu0 %v11221_v3  ;;  %v6854_v21 = vrot.slane %v6852_v56, 4  ;;  %v3124_v26 = vsel %vm648_vm0, %v3114_v37, %v3123_v63  ;;  %v3137_v14 = vrot.slane %v3135_v60, 3  ;;  %v3140_v7 = vrot.slane %v3138_v33, 4  ;;  %v13246_v60 = vld [vmem:[%s11422_s20 + $0x198] sm:$0xf] }
 0x183   : > { %v3132_v31 = vor.u32 %v3131_v8, %v3128_v25  ;;  %v3147_v17 = vshll.u32 %v8419_v2, 16  ;;  %v6846_v56 = vor.u32 %v6845_v1, %v6842_v23  ;;  %v6858_v24 = vshrl.u32 %v8770_v9, 16  ;;  %v13249_v33 = vld [vmem:[%s11422_s20 + $0x19c] sm:$0xf]  ;;  %v13255_v23 = vld [vmem:[%s11422_s20 + $0x1a4] sm:$0xf] }
 0x184   : > { %v6861_v30 = vshll.u32 %v8770_v9, 16  ;;  %v8421_v37 = vcombine.low %v13015_v29, %v13040_v46  ;;  %v6855_v6 = vor.u32 %v6854_v21, %v6851_v44  ;;  %v6867_v25 = vshrl.u32 %v8771_v11, 16  ;;  %v13260_v1 = vld [vmem:[%s13901_s1 + $0x200] sm:$0xff]  }
 0x185   : > { %9992 = vmatpush3.bf16.msra.mxu0 %v11221_v3  ;;  %v3144_v3 = vshrl.u32 %v8419_v2, 16  ;;  %v6870_v8 = vshll.u32 %v8771_v11, 16  ;;  %v3156_v2 = vshll.u32 %v8420_v0, 16  ;;  %v3133_v9 = vsel %vm648_vm0, %v3123_v63, %v3132_v31 }
 0x186   : > { %9993 = vmatprep.subr.bf16.mxu0 %v11226_v13  ;;  %v3149_v44 = vrot.slane %v3147_v17, 4  ;;  %v8772_v21 = vcombine.low %v13246_v60, %v13249_v33  ;;  %v6863_v11 = vrot.slane %v6861_v30, 4  ;;  %v6869_v46 = vrot.slane %v6867_v25, 3  ;;  %v11235_v25 = vld [vmem:[%s13901_s1 + $0x1d0] sm:$0xff]  }
 0x187   : > { %10314 = vmatmul.mubr.bf16.gmra.mrb[52].mxu1 %v6504_v12  ;;  %v3153_v12 = vshrl.u32 %v8420_v0, 16  ;;  %v6860_v0 = vrot.slane %v6858_v24, 3  ;;  %v6872_v29 = vrot.slane %v6870_v8, 4  ;;  %v3158_v17 = vrot.slane %v3156_v2, 4 }
 0x188   : > { %9962 = vmatmul.mubr.bf16.gmra.mrb[12].mxu0 %v3115_v61  ;;  %10333 = vmatprep.mubr.bf16.mxu1 %v6838_v45  ;;  %v3141_v61 = vor.u32 %v3140_v7, %v3137_v14  ;;  %v13252_v45 = vld [vmem:[%s11422_s20 + $0x1a0] sm:$0xf]  ;;  %v3162_v14 = vshrl.u32 %v8421_v37, 16  ;;  %v6856_v7 = vsel %vm648_vm0, %v6846_v56, %v6855_v6  ;;  %v8422_v30 = vcombine.low %v13045_v22, %v13060_v20  ;;  %v13307_v22 = vld [vmem:[%s11422_s20 + $0x1b8] sm:$0xf] }
 0x189   : > { %9965 = vmatprep.mubr.bf16.mxu0 %v3124_v26  ;;  %9994 = vmatpush3.bf16.msra.mxu0 %v11226_v13  ;;  %v3146_v26 = vrot.slane %v3144_v3, 3  ;;  %v6847_v13 = vsel %vm648_vm0, %v13210_v55, %v6846_v56  ;;  %v8773_v50 = vcombine.low %v13252_v45, %v13255_v23  ;;  %v3155_v3 = vrot.slane %v3153_v12, 3 }
 0x18a   : > { %9995 = vmatprep.subr.bf16.mxu0 %v11233_v10  ;;  %v3142_v63 = vsel %vm648_vm0, %v3132_v31, %v3141_v61  ;;  %v3165_v24 = vshll.u32 %v8421_v37, 16  ;;  %v6876_v55 = vshrl.u32 %v8772_v21, 16  ;;  %v6879_v56 = vshll.u32 %v8772_v21, 16  ;;  %v13282_v37 = vld [vmem:[%s11422_s20 + $0x1a8] sm:$0xf] }
 0x18b   : > { %v6864_v31 = vor.u32 %v6863_v11, %v6860_v0  ;;  %v3164_v12 = vrot.slane %v3162_v14, 3  ;;  %v6873_v8 = vor.u32 %v6872_v29, %v6869_v46  ;;  %v6885_v2 = vshrl.u32 %v8773_v50, 16  ;;  %v13285_v21 = vld [vmem:[%s11422_s20 + $0x1ac] sm:$0xf]  ;;  %v13288_v0 = vld [vmem:[%s11422_s20 + $0x1b0] sm:$0xf] }
 0x18c   : > { %v13291_v11 = vld [vmem:[%s11422_s20 + $0x1b4] sm:$0xf]  ;;  %v3167_v14 = vrot.slane %v3165_v24, 4  ;;  %v8423_v29 = vcombine.low %v13063_v15, %v13063_v15 }
 0x18d   : > { %9996 = vmatpush3.bf16.msra.mxu0 %v11233_v10  ;;  %v3150_v10 = vor.u32 %v3149_v44, %v3146_v26  ;;  %v3171_v26 = vshrl.u32 %v8422_v30, 16  ;;  %v3174_v44 = vshll.u32 %v8422_v30, 16  ;;  %14044 = vst [vmem:[#allocation43_spill] sm:$0xff] %v13291_v11  ;;  %v6865_v46 = vsel %vm648_vm0, %v6855_v6, %v6864_v31  ;;  %v11236_v6 = vld [vmem:[%s13901_s1 + $0x1d8] sm:$0xff]  }
 0x18e   : > { %10029 = vmatprep.subr.bf16.mxu0 %v13260_v1  ;;  %v8775_v24 = vcombine.low %v13288_v0, %v13291_v11  ;;  %v13310_v11 = vld [vmem:[%s11422_s20 + $0x1bc] sm:$0xf] }
 0x18f   : > { %10334 = vmatmul.mubr.bf16.vlgmr.msra.gmra.mrb[32].mxu1 %v6847_v13  ;;  %v6888_v13 = vshll.u32 %v8773_v50, 16  ;;  %v3151_v50 = vsel %vm648_vm0, %v3141_v61, %v3150_v10  ;;  %v3176_v20 = vrot.slane %v3174_v44, 4  ;;  %v3168_v61 = vor.u32 %v3167_v14, %v3164_v12  ;;  %v11242_v12 = vld [vmem:[%s13901_s1 + $0x1e0] sm:$0xff]  }
 0x190   : > { %9966 = vmatmul.mubr.bf16.gmra.mrb[16].mxu0 %v3133_v9  ;;  %10337 = vmatprep.mubr.bf16.mxu1 %v6856_v7  ;;  %v3159_v9 = vor.u32 %v3158_v17, %v3155_v3  ;;  %v6878_v7 = vrot.slane %v6876_v55, 3  ;;  %v6874_v3 = vsel %vm648_vm0, %v6864_v31, %v6873_v8  ;;  %v6887_v17 = vrot.slane %v6885_v2, 3  ;;  %v13316_v14 = vld [vmem:[%s11422_s20 + $0x1c0] sm:$0xf] }
 0x191   : > { %9969 = vmatprep.mubr.bf16.mxu0 %v3142_v63  ;;  %10358 = vmatpush3.bf16.msra.mxu1 %v13196_v59  ;;  %v6881_v63 = vrot.slane %v6879_v56, 4  ;;  %v8774_v59 = vcombine.low %v13282_v37, %v13285_v21  ;;  %v6890_v30 = vrot.slane %v6888_v13, 4  ;;  %v3173_v56 = vrot.slane %v3171_v26, 3 }
 0x192   : > { %10359 = vmatprep.subr.bf16.mxu1 %v11229_v4  ;;  %v3160_v55 = vsel %vm648_vm0, %v3150_v10, %v3159_v9  ;;  %v3183_v2 = vshll.u32 %v8423_v29, 16  ;;  %v6903_v44 = vshrl.u32 %v8775_v24, 16  ;;  %v6906_v15 = vshll.u32 %v8775_v24, 16 }
 0x193   : > { %v6882_v31 = vor.u32 %v6881_v63, %v6878_v7  ;;  %v6894_v13 = vshrl.u32 %v8774_v59, 16  ;;  %v6897_v10 = vshll.u32 %v8774_v59, 16  ;;  %v6891_v26 = vor.u32 %v6890_v30, %v6887_v17  ;;  %v13319_v7 = vld [vmem:[%s11422_s20 + $0x1c4] sm:$0xf] }
 0x194   : > { %v3169_v63 = vsel %vm648_vm0, %v3159_v9, %v3168_v61  ;;  %v6905_v30 = vrot.slane %v6903_v44, 3  ;;  %v6908_v24 = vrot.slane %v6906_v15, 4 }
 0x195   : > { %10360 = vmatpush3.bf16.msra.mxu1 %v11229_v4  ;;  %v3180_v4 = vshrl.u32 %v8423_v29, 16  ;;  %v6896_v59 = vrot.slane %v6894_v13, 3  ;;  %v6892_v17 = vsel %vm648_vm0, %v6882_v31, %v6891_v26 }
 0x196   : > { %10361 = vmatprep.subr.bf16.mxu1 %v11235_v25  ;;  %v6909_v15 = vor.u32 %v6908_v24, %v6905_v30  ;;  %v14045_v24 = vld [vmem:[#allocation30_spill] sm:$0xff] }
 0x197   : > { %10338 = vmatmul.mubr.bf16.gmra.mrb[36].mxu1 %v6865_v46  ;;  %v3177_v46 = vor.u32 %v3176_v20, %v3173_v56  ;;  %v3182_v29 = vrot.slane %v3180_v4, 3  ;;  %v8776_v20 = vcombine.low %v13307_v22, %v13310_v11 }
 0x198   : > { %9970 = vmatmul.mubr.bf16.gmra.mrb[20].mxu0 %v3151_v50  ;;  %10341 = vmatprep.mubr.bf16.mxu1 %v6874_v3  ;;  %v3185_v50 = vrot.slane %v3183_v2, 4  ;;  %v6899_v3 = vrot.slane %v6897_v10, 4  ;;  %v13333_v10 = vld [vmem:[%s11422_s20 + $0x1c8] sm:$0xf] }
 0x199   : > { %9973 = vmatprep.mubr.bf16.mxu0 %v3160_v55  ;;  %10362 = vmatpush3.bf16.msra.mxu1 %v11235_v25  ;;  %v6883_v25 = vsel %vm648_vm0, %v6873_v8, %v6882_v31  ;;  %v8777_v55 = vcombine.low %v13316_v14, %v13319_v7  ;;  %v3178_v9 = vsel %vm648_vm0, %v3168_v61, %v3177_v46  ;;  %v11243_v8 = vld [vmem:[%s13901_s1 + $0x1e8] sm:$0xff]   ;;  %v6912_v4 = vshrl.u32 %v8776_v20, 16  ;;  %v11249_v61 = vld [vmem:[%s13901_s1 + $0x1f0] sm:$0xff]  }
 0x19a   : > { %10363 = vmatprep.subr.bf16.mxu1 %v11236_v6  ;;  %v6900_v56 = vor.u32 %v6899_v3, %v6896_v59  ;;  %v6915_v31 = vshll.u32 %v8776_v20, 16  ;;  %v8778_v59 = vcombine.low %v13333_v10, %v13333_v10  ;;  %v11250_v20 = vld [vmem:[%s13901_s1 + $0x1f8] sm:$0xff]  }
 0x19b   : > { %v6921_v2 = vshrl.u32 %v8777_v55, 16  ;;  %v6924_v13 = vshll.u32 %v8777_v55, 16  ;;  %v14046_v55 = vld [vmem:[#allocation31_spill] sm:$0xff] }
 0x19c   : > { %v6901_v44 = vsel %vm648_vm0, %v6891_v26, %v6900_v56  ;;  %v6933_v30 = vshll.u32 %v8778_v59, 16 }
 0x19d   : > { %10364 = vmatpush3.bf16.msra.mxu1 %v11236_v6  ;;  %v3186_v6 = vor.u32 %v3185_v50, %v3182_v29  ;;  %v6923_v50 = vrot.slane %v6921_v2, 3  ;;  %v6926_v3 = vrot.slane %v6924_v13, 4  ;;  %v11247_v2 = vld [vmem:[%s13901_s1 + $0x208] sm:$0xff]   ;;  %v14048_v13 = vld [vmem:[#allocation36_spill] sm:$0xff] }
 0x19e   : > { %10365 = vmatprep.subr.bf16.mxu1 %v11242_v12 }
 0x19f   : > { %10342 = vmatmul.mubr.bf16.gmra.mrb[40].mxu1 %v6883_v25  ;;  %v6917_v25 = vrot.slane %v6915_v31, 4  ;;  %v3187_v29 = vsel %vm648_vm0, %v3177_v46, %v3186_v6  ;;  %v6927_v46 = vor.u32 %v6926_v3, %v6923_v50  ;;  %v6935_v31 = vrot.slane %v6933_v30, 4  ;;  %v11289_v3 = vld [vmem:[%s11422_s20 + $0xec] sm:$0xff]  }
 0x1a0   : > { %9974 = vmatmul.mubr.bf16.gmra.mrb[24].mxu0 %v3169_v63  ;;  %10345 = vmatprep.mubr.bf16.mxu1 %v6892_v17  ;;  %v6914_v63 = vrot.slane %v6912_v4, 3  ;;  %v6930_v17 = vshrl.u32 %v8778_v59, 16  ;;  %v8805_v50 = vcombine.low %v13182_v19, %v13186_v47  ;;  %v8806_v19 = vcombine.low %v13189_v52, %v13216_v18 }
 0x1a1   : > { %9977 = vmatprep.mubr.bf16.mxu0 %v3178_v9  ;;  %10366 = vmatpush3.bf16.msra.mxu1 %v11242_v12  ;;  %v6910_v12 = vsel %vm648_vm0, %v6900_v56, %v6909_v15  ;;  %v14047_v9 = vcombine.low %v14045_v24, %v14046_v55  ;;  %v14057_v47 = vcombine.low %v12889_v41, %v12892_v53  ;;  %v11281_v53 = vld [vmem:[%s13901_s1 + $0x228] sm:$0xff]   ;;  %v11292_v24 = vld [vmem:[%s11422_s20 + $0x174] sm:$0xff]   ;;  %v3871_v55 = vshll.u32 %v11289_v3, 16 }
 0x1a2   : > { %10367 = vmatprep.subr.bf16.mxu1 %v11243_v8  ;;  %v6918_v26 = vor.u32 %v6917_v25, %v6914_v63  ;;  %v6932_v4 = vrot.slane %v6930_v17, 3  ;;  %v11254_v25 = vld [vmem:[%s13901_s1 + $0x210] sm:$0xff]   ;;  %v14058_v52 = vcombine.low %v12924_v40, %v12927_v62  ;;  %v8808_v18 = vcombine.low %v13226_v38, %v13246_v60  ;;  %v14059_v40 = vld [vmem:[#allocation46_spill] sm:$0xff] }
 0x1a3   : > { %v8809_v41 = vcombine.low %v13249_v33, %v13252_v45  ;;  %v14060_v62 = vcombine.low %v12947_v35, %v14059_v40  ;;  %v8810_v60 = vcombine.low %v13255_v23, %v13282_v37  ;;  %v11287_v33 = vld [vmem:[%s13901_s1 + $0x230] sm:$0xff]   ;;  %v8811_v35 = vcombine.low %v13285_v21, %v13288_v0  ;;  %v14064_v23 = vld [vmem:[#allocation49_spill] sm:$0xff]  ;;  %v14067_v17 = vld [vmem:[#allocation6_spill] sm:$0xff] }
 0x1a4   : > { %v6919_v56 = vsel %vm648_vm0, %v6909_v15, %v6918_v26  ;;  %v6928_v6 = vsel %vm648_vm0, %v6918_v26, %v6927_v46  ;;  %v14050_v15 = vld [vmem:[#allocation38_spill] sm:$0xff]  ;;  %v11291_v45 = vld [vmem:[%s11422_s20 + $0x16c] sm:$0xff]   ;;  %v11290_v0 = vld [vmem:[%s11422_s20 + $0xf4] sm:$0xff]  }
 0x1a5   : > { %10368 = vmatpush3.bf16.msra.mxu1 %v11243_v8  ;;  %v11266_v8 = vld [vmem:[%s13901_s1 + $0x200] sm:$0xff]   ;;  %v14051_v63 = vcombine.low %v14050_v15, %v12765_v49  ;;  %v14066_v26 = vld [vmem:[#allocation11_spill] sm:$0xff]  ;;  %v7499_v21 = vshll.u32 %v11291_v45, 16 }
 0x1a6   : > { %10369 = vmatprep.subr.bf16.mxu1 %v11249_v61  ;;  %v14068_v30 = vcombine.low %v14066_v26, %v14067_v17  ;;  %v14071_v15 = vld [vmem:[#allocation51_spill] sm:$0xff] }
 0x1a7   : > { %10346 = vmatmul.mubr.bf16.gmra.mrb[44].mxu1 %v6901_v44  ;;  %v6936_v44 = vor.u32 %v6935_v31, %v6932_v4  ;;  %v7501_v4 = vrot.slane %v7499_v21, 1  ;;  %v7504_v31 = vshll.u32 %v11292_v24, 16 }
 0x1a8   : > { %9978 = vmatmul.mubr.bf16.gmra.mrb[28].mxu0 %v3187_v29  ;;  %10349 = vmatprep.mubr.bf16.mxu1 %v6910_v12  ;;  %v8803_v29 = vcombine.low %v13138_v34, %v13142_v48  ;;  %v14054_v12 = vcombine.low %v12805_v57, %v14041_v43  ;;  %v11264_v34 = vld [vmem:[%s13901_s1 + $0x220] sm:$0xff]   ;;  %v8804_v48 = vcombine.low %v13145_v27, %v13179_v36  ;;  %v11267_v57 = vld [vmem:[%s13901_s1 + $0x208] sm:$0xff]   ;;  %v11278_v36 = vld [vmem:[%s13901_s1 + $0x230] sm:$0xff]  }
 0x1a9   : > { %9997 = vmatprep.mubr.bf16.mxu0 %v14047_v9  ;;  %10370 = vmatpush3.bf16.msra.mxu1 %v11249_v61  ;;  %v14049_v61 = vcombine.low %v14048_v13, %v12757_v51  ;;  %v6937_v59 = vsel %vm648_vm0, %v6927_v46, %v6936_v44  ;;  %v11259_v51 = vld [vmem:[%s13901_s1 + $0x218] sm:$0xff]   ;;  %v14055_v43 = vcombine.low %v12844_v39, %v12849_v28  ;;  %v11273_v28 = vld [vmem:[%s13901_s1 + $0x210] sm:$0xff]   ;;  %v14069_v9 = vld [vmem:[#allocation43_spill] sm:$0xff]  ;;  %v3876_v13 = vshll.u32 %v11290_v0, 16 }
 0x1aa   : > { %10371 = vmatprep.subr.bf16.mxu1 %v11250_v20  ;;  %v14056_v27 = vcombine.low %v12874_v54, %v12877_v16  ;;  %v8807_v39 = vcombine.low %v13219_v5, %v13223_v42  ;;  %v11285_v54 = vld [vmem:[%s13901_s1 + $0x238] sm:$0xff]   ;;  %v11280_v5 = vld [vmem:[%s13901_s1 + $0x220] sm:$0xff]   ;;  %v14061_v42 = vld [vmem:[#allocation47_spill] sm:$0xff]  ;;  %v8812_v46 = vcombine.low %v14069_v9, %v13307_v22 }
 0x1ab   : > { %v11274_v16 = vld [vmem:[%s13901_s1 + $0x218] sm:$0xff]   ;;  %v14062_v38 = vcombine.low %v14061_v42, %v12972_v58  ;;  %v14070_v44 = vld [vmem:[#allocation50_spill] sm:$0xff] }
 0x1ac   : > { %v11288_v58 = vld [vmem:[%s13901_s1 + $0x238] sm:$0xff]  }
 0x1ad   : > { %10372 = vmatpush3.bf16.msra.mxu1 %v11250_v20  ;;  %v14063_v20 = vld [vmem:[#allocation48_spill] sm:$0xff]  ;;  %v11293_v22 = vld [vmem:[%s11422_s20 + $0xfc] sm:$0xff]  }
 0x1ae   : > { %10397 = vmatprep.subr.bf16.mxu1 %v11266_v8  ;;  %v14065_v37 = vcombine.low %v14063_v20, %v14064_v23 }
 0x1af   : > { %10350 = vmatmul.mubr.bf16.gmra.mrb[48].mxu1 %v6919_v56  ;;  %v7497_v56 = vshrl.u32 %v11291_v45, 16 }
 0x1b0   : > { %9998 = vmatmul.mubr.bf16.vlgmr.msra.gmra.mrb[0].mxu0 %v14049_v61  ;;  %10353 = vmatprep.mubr.bf16.mxu1 %v6928_v6  ;;  %v3869_v6 = vshrl.u32 %v11289_v3, 16  ;;  %v11294_v61 = vld [vmem:[%s11422_s20 + $0x17c] sm:$0xff]  }
 0x1b1   : > { %10030 = vmatpush3.bf16.msra.mxu0 %v13260_v1  ;;  %10001 = vmatprep.mubr.bf16.mxu0 %v14051_v63  ;;  %v14052_v1 = vld [vmem:[#allocation39_spill] sm:$0xff]  ;;  %v14072_v63 = vcombine.low %v14070_v44, %v14071_v15 }
 0x1b2   : > { %10031 = vmatprep.subr.bf16.mxu0 %v11247_v2  ;;  %v14053_v49 = vcombine.low %v14052_v1, %v12789_v32  ;;  %v11271_v32 = vld [vmem:[%s13901_s1 + $0x228] sm:$0xff]  }
 0x1b5   : > { %10032 = vmatpush3.bf16.msra.mxu0 %v11247_v2  ;;  %v3873_v2 = vrot.slane %v3871_v55, 1 }
 0x1b6   : > { %10033 = vmatprep.subr.bf16.mxu0 %v11254_v25 }
 0x1b7   : > { %10354 = vmatmul.mubr.bf16.gmra.mrb[52].mxu1 %v6937_v59  ;;  %v14074_v59 = vld [vmem:[#allocation35_spill] sm:$0xff]  ;;  %v3874_v1 = vor.u32 %v3873_v2, %v3869_v6 }
 0x1b8   : > { %10002 = vmatmul.mubr.bf16.gmra.mrb[4].mxu0 %v14053_v49  ;;  %10373 = vmatprep.mubr.bf16.mxu1 %v8803_v29  ;;  %v7506_v29 = vrot.slane %v7504_v31, 1  ;;  %v3878_v49 = vrot.slane %v3876_v13, 1  ;;  %v11304_v31 = vld [vmem:[%s11422_s20 + $0x1a4] sm:$0xff]  }
 0x1b9   : > { %10005 = vmatprep.mubr.bf16.mxu0 %v14054_v12  ;;  %10034 = vmatpush3.bf16.msra.mxu0 %v11254_v25  ;;  %v14073_v25 = vld [vmem:[#allocation24_spill] sm:$0xff]  ;;  %v11295_v12 = vld [vmem:[%s11422_s20 + $0x104] sm:$0xff]  }
 0x1ba   : > { %10035 = vmatprep.subr.bf16.mxu0 %v11259_v51  ;;  %v3896_v45 = vshrl.u32 %v11295_v12, 16  ;;  %v11303_v13 = vld [vmem:[%s11422_s20 + $0x124] sm:$0xff]  }
 0x1bd   : > { %10036 = vmatpush3.bf16.msra.mxu0 %v11259_v51  ;;  %v11296_v51 = vld [vmem:[%s11422_s20 + $0x184] sm:$0xff]  }
 0x1be   : > { %10037 = vmatprep.subr.bf16.mxu0 %v11264_v34 }
 0x1bf   : > { %10374 = vmatmul.mubr.bf16.vlgmr.msra.gmra.mrb[32].mxu1 %v8804_v48  ;;  %v7512_v48 = vshll.u32 %v11294_v61, 16 }
 0x1c0   : > { %10006 = vmatmul.mubr.bf16.gmra.mrb[8].mxu0 %v14055_v43  ;;  %10377 = vmatprep.mubr.bf16.mxu1 %v8805_v50  ;;  %v7508_v50 = vshrl.u32 %v11292_v24, 16 }
 0x1c1   : > { %10009 = vmatprep.mubr.bf16.mxu0 %v14056_v27  ;;  %10038 = vmatpush3.bf16.msra.mxu0 %v11264_v34  ;;  %v8814_v34 = vcombine.low %v13319_v7, %v13333_v10  ;;  %v7516_v27 = vshrl.u32 %v11294_v61, 16  ;;  %v14077_v7 = vld [vmem:[#allocation52_spill] sm:$0xff] }
 0x1c2   : > { %10398 = vmatpush3.bf16.msra.mxu1 %v11266_v8  ;;  %10039 = vmatprep.subr.bf16.mxu0 %v11271_v32  ;;  %v8813_v8 = vcombine.low %v13310_v11, %v13316_v14  ;;  %v14075_v11 = vcombine.low %v14073_v25, %v14074_v59  ;;  %v7502_v14 = vor.u32 %v7501_v4, %v7497_v56 }
 0x1c3   : > { %10399 = vmatprep.subr.bf16.mxu1 %v11267_v57 }
 0x1c4   : > { %v7507_v43 = vsel %vm1159_vm1, %v7502_v14, %v7506_v29  ;;  %v7552_v14 = vshll.u32 %v11304_v31, 16 }
 0x1c5   : > { %10040 = vmatpush3.bf16.msra.mxu0 %v11271_v32  ;;  %v3884_v32 = vshll.u32 %v11293_v22, 16 }
 0x1c6   : > { %10400 = vmatpush3.bf16.msra.mxu1 %v11267_v57  ;;  %10041 = vmatprep.subr.bf16.mxu0 %v11278_v36  ;;  %v3880_v57 = vshrl.u32 %v11290_v0, 16  ;;  %v11302_v0 = vld [vmem:[%s11422_s20 + $0x19c] sm:$0xff]  }
 0x1c7   : > { %10378 = vmatmul.mubr.bf16.gmra.mrb[36].mxu1 %v8806_v19  ;;  %10401 = vmatprep.subr.bf16.mxu1 %v11273_v28  ;;  %v3879_v19 = vsel %vm1159_vm1, %v3874_v1, %v3878_v49  ;;  %v7544_v61 = vshll.u32 %v11302_v0, 16  ;;  %v3924_v1 = vshll.u32 %v11303_v13, 16 }
 0x1c8   : > { %10010 = vmatmul.mubr.bf16.gmra.mrb[12].mxu0 %v14057_v47  ;;  %10381 = vmatprep.mubr.bf16.mxu1 %v8807_v39  ;;  %v3892_v39 = vshll.u32 %v11295_v12, 16  ;;  %v14076_v47 = vld [vmem:[#allocation28_spill] sm:$0xff] }
 0x1c9   : > { %10013 = vmatprep.mubr.bf16.mxu0 %v14058_v52  ;;  %10042 = vmatpush3.bf16.msra.mxu0 %v11278_v36  ;;  %v7520_v36 = vshll.u32 %v11296_v51, 16  ;;  %v14078_v10 = vcombine.low %v14076_v47, %v14077_v7  ;;  %v7510_v52 = vor.u32 %v7508_v50, %v7506_v29  ;;  %v11306_v12 = vld [vmem:[%s11422_s20 + $0x1ac] sm:$0xff]   ;;  %v7556_v7 = vshrl.u32 %v11304_v31, 16 }
 0x1ca   : > { %10402 = vmatpush3.bf16.msra.mxu1 %v11273_v28  ;;  %10043 = vmatprep.subr.bf16.mxu0 %v11285_v54  ;;  %v3888_v28 = vshrl.u32 %v11293_v22, 16  ;;  %v11305_v50 = vld [vmem:[%s11422_s20 + $0x12c] sm:$0xff]  }
 0x1cb   : > { %10403 = vmatprep.subr.bf16.mxu1 %v11274_v16  ;;  %v7522_v40 = vrot.slane %v7520_v36, 1  ;;  %v3932_v47 = vshll.u32 %v11305_v50, 16 }
 0x1cd   : > { %10044 = vmatpush3.bf16.msra.mxu0 %v11285_v54  ;;  %v7514_v54 = vrot.slane %v7512_v48, 1 }
 0x1ce   : > { %10404 = vmatpush3.bf16.msra.mxu1 %v11274_v16  ;;  %v11298_v16 = vld [vmem:[%s11422_s20 + $0x18c] sm:$0xff]  }
 0x1cf   : > { %10382 = vmatmul.mubr.bf16.gmra.mrb[40].mxu1 %v8808_v18  ;;  %10405 = vmatprep.subr.bf16.mxu1 %v11280_v5  ;;  %v3886_v18 = vrot.slane %v3884_v32, 1 }
 0x1d0   : > { %10014 = vmatmul.mubr.bf16.gmra.mrb[16].mxu0 %v14060_v62  ;;  %10385 = vmatprep.mubr.bf16.mxu1 %v8809_v41  ;;  %v3882_v41 = vor.u32 %v3880_v57, %v3878_v49  ;;  %v11300_v62 = vld [vmem:[%s11422_s20 + $0x194] sm:$0xff]   ;;  %v7546_v49 = vrot.slane %v7544_v61, 1  ;;  %v11314_v61 = vld [vmem:[%s11422_s20 + $0x1cc] ss:$0 sps:$4 sm:$0x11]  }
 0x1d1   : > { %10017 = vmatprep.mubr.bf16.mxu0 %v14062_v38  ;;  %v3890_v42 = vor.u32 %v3888_v28, %v3886_v18  ;;  %v3894_v38 = vrot.slane %v3892_v39, 1  ;;  %v7536_v26 = vshll.u32 %v11300_v62, 16  ;;  %v7540_v22 = vshrl.u32 %v11300_v62, 16  ;;  %v11307_v28 = vld [vmem:[%s11422_s20 + $0x134] sm:$0xff]  }
 0x1d2   : > { %10406 = vmatpush3.bf16.msra.mxu1 %v11280_v5  ;;  %v11297_v5 = vld [vmem:[%s11422_s20 + $0x10c] sm:$0xff]   ;;  %v3887_v20 = vsel %vm1159_vm1, %v3882_v41, %v3886_v18  ;;  %v7560_v39 = vshll.u32 %v11306_v12, 16  ;;  %v7564_v18 = vshrl.u32 %v11306_v12, 16 }
 0x1d3   : > { %10407 = vmatprep.subr.bf16.mxu1 %v11281_v53  ;;  %v3900_v3 = vshll.u32 %v11297_v5, 16  ;;  %v3895_v17 = vsel %vm1159_vm1, %v3890_v42, %v3894_v38  ;;  %v3898_v55 = vor.u32 %v3896_v45, %v3894_v38  ;;  %v7538_v4 = vrot.slane %v7536_v26, 1  ;;  %v11310_v42 = vld [vmem:[%s11422_s20 + $0x1bc] sm:$0xff]  }
 0x1d4   : > { %v7562_v62 = vrot.slane %v7560_v39, 1  ;;  %v7576_v26 = vshll.u32 %v11310_v42, 16  ;;  %v11317_v39 = vld [vmem:[%s11422_s20 + $0x164] sm:$0xff]  }
 0x1d5   : > { %v3902_v9 = vrot.slane %v3900_v3, 1  ;;  %v7542_v48 = vor.u32 %v7540_v22, %v7538_v4 }
 0x1d6   : > { %10408 = vmatpush3.bf16.msra.mxu1 %v11281_v53  ;;  %v7518_v53 = vor.u32 %v7516_v27, %v7514_v54  ;;  %v11308_v27 = vld [vmem:[%s11422_s20 + $0x1b4] sm:$0xff]   ;;  %v7566_v45 = vor.u32 %v7564_v18, %v7562_v62  ;;  %v7578_v31 = vrot.slane %v7576_v26, 1  ;;  %v3988_v18 = vshll.u32 %v11317_v39, 16 }
 0x1d7   : > { %10386 = vmatmul.mubr.bf16.gmra.mrb[44].mxu1 %v8810_v60  ;;  %10409 = vmatprep.subr.bf16.mxu1 %v11287_v33  ;;  %v11299_v60 = vld [vmem:[%s11422_s20 + $0x114] sm:$0xff]   ;;  %v3903_v44 = vsel %vm1159_vm1, %v3898_v55, %v3902_v9  ;;  %v3944_v55 = vshrl.u32 %v11307_v28, 16 }
 0x1d8   : > { %10018 = vmatmul.mubr.bf16.gmra.mrb[20].mxu0 %v14065_v37  ;;  %10389 = vmatprep.mubr.bf16.mxu1 %v8811_v35  ;;  %v7515_v35 = vsel %vm1159_vm1, %v7510_v52, %v7514_v54  ;;  %v7523_v23 = vsel %vm1159_vm1, %v7518_v53, %v7522_v40  ;;  %v7532_v37 = vshrl.u32 %v11298_v16, 16  ;;  %v3908_v24 = vshll.u32 %v11299_v60, 16 }
 0x1d9   : > { %10021 = vmatprep.mubr.bf16.mxu0 %v14068_v30  ;;  %v3904_v30 = vshrl.u32 %v11297_v5, 16  ;;  %v3912_v59 = vshrl.u32 %v11299_v60, 16  ;;  %v7547_v54 = vsel %vm1159_vm1, %v7542_v48, %v7546_v49  ;;  %v7568_v5 = vshll.u32 %v11308_v27, 16 }
 0x1da   : > { %10410 = vmatpush3.bf16.msra.mxu1 %v11287_v33  ;;  %v7528_v33 = vshll.u32 %v11298_v16, 16  ;;  %v3910_v2 = vrot.slane %v3908_v24, 1  ;;  %v3928_v16 = vshrl.u32 %v11303_v13, 16  ;;  %v3936_v53 = vshrl.u32 %v11305_v50, 16  ;;  %v11313_v13 = vld [vmem:[%s11422_s20 + $0x14c] sm:$0xff]  }
 0x1db   : > { %10411 = vmatprep.subr.bf16.mxu1 %v11288_v58  ;;  %v3906_v6 = vor.u32 %v3904_v30, %v3902_v9  ;;  %v3934_v60 = vrot.slane %v3932_v47, 1  ;;  %v7570_v3 = vrot.slane %v7568_v5, 1  ;;  %v7580_v9 = vshrl.u32 %v11310_v42, 16 }
 0x1dc   : > { %v7530_v21 = vrot.slane %v7528_v33, 1  ;;  %v3914_v32 = vor.u32 %v3912_v59, %v3910_v2  ;;  %v11315_v59 = vld [vmem:[%s11422_s20 + $0x154] sm:$0xff]   ;;  %v3968_v48 = vshrl.u32 %v11313_v13, 16 }
 0x1dd   : > { %v3911_v29 = vsel %vm1159_vm1, %v3906_v6, %v3910_v2  ;;  %v3972_v50 = vshll.u32 %v11315_v59, 16 }
 0x1de   : > { %10412 = vmatpush3.bf16.msra.mxu1 %v11288_v58  ;;  %v7524_v58 = vshrl.u32 %v11296_v51, 16  ;;  %v7534_v56 = vor.u32 %v7532_v37, %v7530_v21  ;;  %v11311_v37 = vld [vmem:[%s11422_s20 + $0x144] sm:$0xff]  }
 0x1df   : > { %10390 = vmatmul.mubr.bf16.gmra.mrb[48].mxu1 %v8812_v46  ;;  %v3960_v12 = vshrl.u32 %v11311_v37, 16 }
 0x1e0   : > { %10022 = vmatmul.mubr.bf16.gmra.mrb[24].mxu0 %v14072_v63  ;;  %10393 = vmatprep.mubr.bf16.mxu1 %v8813_v8  ;;  %v7526_v46 = vor.u32 %v7524_v58, %v7522_v40  ;;  %v11301_v8 = vld [vmem:[%s11422_s20 + $0x11c] sm:$0xff]   ;;  %v7539_v25 = vsel %vm1159_vm1, %v7534_v56, %v7538_v4  ;;  %v3940_v40 = vshll.u32 %v11307_v28, 16  ;;  %v11312_v58 = vld [vmem:[%s11422_s20 + $0x1c4] sm:$0xff]   ;;  %v3956_v4 = vshll.u32 %v11311_v37, 16 }
 0x1e1   : > { %10025 = vmatprep.mubr.bf16.mxu0 %v14075_v11  ;;  %v3916_v63 = vshll.u32 %v11301_v8, 16  ;;  %v7548_v11 = vshrl.u32 %v11302_v0, 16  ;;  %v3920_v51 = vshrl.u32 %v11301_v8, 16  ;;  %v7571_v0 = vsel %vm1159_vm1, %v7566_v45, %v7570_v3 }
 0x1e2   : > { %v7531_v15 = vsel %vm1159_vm1, %v7526_v46, %v7530_v21  ;;  %v7572_v21 = vshrl.u32 %v11308_v27, 16  ;;  %v7584_v46 = vshll.u32 %v11312_v58, 16  ;;  %v11316_v27 = vld [vmem:[%s11422_s20 + $0x15c] sm:$0xff]   ;;  %v3974_v28 = vrot.slane %v3972_v50, 1 }
 0x1e3   : > { %v7550_v57 = vor.u32 %v7548_v11, %v7546_v49 }
 0x1e4   : > { %v7574_v2 = vor.u32 %v7572_v21, %v7570_v3 }
 0x1e6   : > { %v7579_v11 = vsel %vm1159_vm1, %v7574_v2, %v7578_v31 }
 0x1e7   : > { %10394 = vmatmul.mubr.bf16.gmra.mrb[52].mxu1 %v8814_v34  ;;  %v3918_v34 = vrot.slane %v3916_v63, 1  ;;  %v7586_v63 = vrot.slane %v7584_v46, 1 }
 0x1e8   : > { %10026 = vmatmul.mubr.bf16.gmra.mrb[28].mxu0 %v14078_v10  ;;  %10413 = vmatprep.mubr.bf16.mxu1 %v7507_v43  ;;  %v7554_v43 = vrot.slane %v7552_v14, 1  ;;  %v3964_v14 = vshll.u32 %v11313_v13, 16 }
 0x1e9   : > { %10045 = vmatprep.mubr.bf16.mxu0 %v3879_v19  ;;  %v3922_v36 = vor.u32 %v3920_v51, %v3918_v34  ;;  %v3926_v19 = vrot.slane %v3924_v1, 1  ;;  %v3919_v10 = vsel %vm1159_vm1, %v3914_v32, %v3918_v34  ;;  %v7592_v51 = vshll.u32 %v11314_v61, 16 }
 0x1ea   : > { %v7555_v52 = vsel %vm1159_vm1, %v7550_v57, %v7554_v43  ;;  %v7558_v33 = vor.u32 %v7556_v7, %v7554_v43  ;;  %v3966_v32 = vrot.slane %v3964_v14, 1  ;;  %v3976_v7 = vshrl.u32 %v11315_v59, 16 }
 0x1eb   : > { %v3927_v41 = vsel %vm1159_vm1, %v3922_v36, %v3926_v19  ;;  %v3930_v38 = vor.u32 %v3928_v16, %v3926_v19  ;;  %v7594_v43 = vrot.slane %v7592_v51, 1  ;;  %v3980_v16 = vshll.u32 %v11316_v27, 16 }
 0x1ec   : > { %v7563_v30 = vsel %vm1159_vm1, %v7558_v33, %v7562_v62  ;;  %v3970_v19 = vor.u32 %v3968_v48, %v3966_v32  ;;  %v3990_v62 = vrot.slane %v3988_v18, 1 }
 0x1ed   : > { %v3982_v5 = vrot.slane %v3980_v16, 1 }
 0x1ef   : > { %10414 = vmatmul.mubr.bf16.vlgmr.msra.gmra.mrb[32].mxu1 %v7515_v35  ;;  %v11309_v35 = vld [vmem:[%s11422_s20 + $0x13c] sm:$0xff]  }
 0x1f0   : > { %10046 = vmatmul.mubr.bf16.vlgmr.msra.gmra.mrb[0].mxu0 %v3887_v20  ;;  %10417 = vmatprep.mubr.bf16.mxu1 %v7523_v23  ;;  %v3938_v20 = vor.u32 %v3936_v53, %v3934_v60  ;;  %v3942_v23 = vrot.slane %v3940_v40, 1  ;;  %v3948_v24 = vshll.u32 %v11309_v35, 16  ;;  %v3952_v56 = vshrl.u32 %v11309_v35, 16  ;;  %v11318_v53 = vld [vmem:[%s11422_s20 + $0x16c] ss:$0 sps:$4 sm:$0x11]   ;;  %s13531_s20 = scalar_lea.vmem %s13903_s3, %s10886_s11 }
 0x1f1   : > { %10049 = vmatprep.mubr.bf16.mxu0 %v3895_v17  ;;  %v3935_v17 = vsel %vm1159_vm1, %v3930_v38, %v3934_v60  ;;  %v3992_v38 = vshrl.u32 %v11317_v39, 16  ;;  %v3996_v60 = vshll.u32 %v11318_v53, 16  ;;  %v13543_v37 = vld [vmem:[%s13531_s20] sm:$0xff]   ;;  %v13546_v26 = vld [vmem:[%s13531_s20 + $0x98] sm:$0xff]   ;;  %v13574_v61 = vld [vmem:[%s13531_s20 + $0x28] sm:$0xff]  }
 0x1f2   : > { %v3943_v8 = vsel %vm1159_vm1, %v3938_v20, %v3942_v23  ;;  %v3950_v6 = vrot.slane %v3948_v24, 1  ;;  %v13537_v20 = vld [vmem:[%s13531_s20 + $0x80] sm:$0xff]   ;;  %v13554_v21 = vld [vmem:[%s13531_s20 + $0x18] sm:$0xff]   ;;  %v9101_v2 = vunpack.c.l.bf16 %v13546_v26  ;;  %v14081_v53 = vld [vmem:[#allocation4_spill] sm:$0xff] }
 0x1f3   : > { %v3994_v35 = vor.u32 %v3992_v38, %v3990_v62  ;;  %v3998_v45 = vrot.slane %v3996_v60, 1  ;;  %v9089_v24 = vunpack.c.l.bf16 %v13537_v20  ;;  %v13584_v59 = vld [vmem:[%s13531_s20 + $0xb8] sm:$0xff]   ;;  %v13622_v16 = vld [vmem:[%s13531_s20 + $0x40] sm:$0xff]   ;;  %v14080_v60 = vld [vmem:[#allocation3_spill] sm:$0xff] }
 0x1f4   : > { %v3954_v22 = vor.u32 %v3952_v56, %v3950_v6  ;;  %v13564_v56 = vld [vmem:[%s13531_s20 + $0xa8] sm:$0xff]  }
 0x1f5   : > { %v3999_v3 = vsel %vm1159_vm1, %v3994_v35, %v3998_v45  ;;  %v9109_v51 = vunpack.c.l.bf16 %v13564_v56  ;;  %v9110_v50 = vunpack.c.h.bf16 %v13564_v56  ;;  %v14079_v45 = vld [vmem:[#allocation2_spill] sm:$0xff] }
 0x1f7   : > { %10418 = vmatmul.mubr.bf16.gmra.mrb[36].mxu1 %v7531_v15  ;;  %v7582_v15 = vor.u32 %v7580_v9, %v7578_v31  ;;  %v8945_v9 = vunpack.c.l.bf16 %v13543_v37 }
 0x1f8   : > { %10050 = vmatmul.mubr.bf16.gmra.mrb[4].mxu0 %v3903_v44  ;;  %10421 = vmatprep.mubr.bf16.mxu1 %v7539_v25  ;;  %v3946_v44 = vor.u32 %v3944_v55, %v3942_v23  ;;  %v3958_v25 = vrot.slane %v3956_v4, 1  ;;  %v13540_v23 = vld [vmem:[%s13531_s20 + $0x8] sm:$0xff]   ;;  %v13567_v4 = vld [vmem:[%s13531_s20 + $0xa0] sm:$0xff]  }
 0x1f9   : > { %10053 = vmatprep.mubr.bf16.mxu0 %v3911_v29  ;;  %v7588_v29 = vshrl.u32 %v11312_v58, 16  ;;  %v7587_v49 = vsel %vm1159_vm1, %v7582_v15, %v7586_v63  ;;  %v13534_v58 = vld [vmem:[%s13531_s20 + $0x88] sm:$0xff]   ;;  %v8949_v55 = vunpack.c.l.bf16 %v13540_v23  ;;  %v8950_v31 = vunpack.c.h.bf16 %v13540_v23 }
 0x1fa   : > { %v3951_v1 = vsel %vm1159_vm1, %v3946_v44, %v3950_v6  ;;  %v3959_v34 = vsel %vm1159_vm1, %v3954_v22, %v3958_v25  ;;  %v3962_v36 = vor.u32 %v3960_v12, %v3958_v25  ;;  %v9094_v46 = vunpack.c.h.bf16 %v13534_v58  ;;  %v13577_v44 = vld [vmem:[%s13531_s20 + $0x20] sm:$0xff]   ;;  %v13597_v12 = vld [vmem:[%s13531_s20 + $0x30] sm:$0xff]  }
 0x1fb   : > { %v7590_v57 = vor.u32 %v7588_v29, %v7586_v63  ;;  %v8946_v6 = vunpack.c.h.bf16 %v13543_v37  ;;  %v8957_v15 = vunpack.c.l.bf16 %v13554_v21  ;;  %v8958_v22 = vunpack.c.h.bf16 %v13554_v21  ;;  %v14087_v21 = vld [vmem:[#allocation12_spill] sm:$0xff] }
 0x1fc   : > { %v3967_v47 = vsel %vm1159_vm1, %v3962_v36, %v3966_v32  ;;  %v9102_v25 = vunpack.c.h.bf16 %v13546_v26  ;;  %v8961_v48 = vunpack.c.l.bf16 %v13577_v44  ;;  %v9106_v32 = vunpack.c.h.bf16 %v13567_v4 }
 0x1fd   : > { %v8966_v36 = vunpack.c.h.bf16 %v13574_v61 }
 0x1ff   : > { %10422 = vmatmul.mubr.bf16.gmra.mrb[40].mxu1 %v7547_v54  ;;  %v7595_v54 = vsel %vm1159_vm1, %v7590_v57, %v7594_v43  ;;  %v13604_v57 = vld [vmem:[%s13531_s20 + $0xc8] sm:$0xff]   ;;  %v13607_v43 = vld [vmem:[%s13531_s20 + $0xc0] sm:$0xff]  }
 0x200   : > { %10054 = vmatmul.mubr.bf16.gmra.mrb[8].mxu0 %v3919_v10  ;;  %10425 = vmatprep.mubr.bf16.mxu1 %v7555_v52  ;;  %v3975_v10 = vsel %vm1159_vm1, %v3970_v19, %v3974_v28  ;;  %v3984_v52 = vshrl.u32 %v11316_v27, 16  ;;  %v13612_v27 = vld [vmem:[%s13902_s2] ss:$0 sm:$0xff]  ;;  %v8962_v19 = vunpack.c.h.bf16 %v13577_v44 }
 0x201   : > { %10057 = vmatprep.mubr.bf16.mxu0 %v3927_v41  ;;  %v3978_v41 = vor.u32 %v3976_v7, %v3974_v28 }
 0x202   : > { %v3986_v40 = vor.u32 %v3984_v52, %v3982_v5 }
 0x203   : > { %v3983_v42 = vsel %vm1159_vm1, %v3978_v41, %v3982_v5 }
 0x204   : > { %v3991_v33 = vsel %vm1159_vm1, %v3986_v40, %v3990_v62 }
 0x207   : > { %10426 = vmatmul.mubr.bf16.gmra.mrb[44].mxu1 %v7563_v30  ;;  %v9093_v30 = vunpack.c.l.bf16 %v13534_v58 }
 0x208   : > { %10058 = vmatmul.mubr.bf16.gmra.mrb[12].mxu0 %v3935_v17  ;;  %10429 = vmatprep.mubr.bf16.mxu1 %v7571_v0  ;;  %v13549_v17 = vld [vmem:[%s13531_s20 + $0x90] sm:$0xff]  }
 0x209   : > { %10061 = vmatprep.mubr.bf16.mxu0 %v3943_v8  ;;  %v13557_v0 = vld [vmem:[%s13531_s20 + $0x10] sm:$0xff]   ;;  %v9090_v8 = vunpack.c.h.bf16 %v13537_v20  ;;  %v9097_v13 = vunpack.c.l.bf16 %v13549_v17  ;;  %v9098_v29 = vunpack.c.h.bf16 %v13549_v17 }
 0x20a   : > { %v8953_v63 = vunpack.c.l.bf16 %v13557_v0  ;;  %v8954_v14 = vunpack.c.h.bf16 %v13557_v0 }
 0x20f   : > { %10430 = vmatmul.mubr.bf16.gmra.mrb[48].mxu1 %v7579_v11  ;;  %v13587_v11 = vld [vmem:[%s13531_s20 + $0xb0] sm:$0xff]  }
 0x210   : > { %10062 = vmatmul.mubr.bf16.gmra.mrb[16].mxu0 %v3951_v1  ;;  %10433 = vmatprep.mubr.bf16.mxu1 %v7587_v49  ;;  %v9105_v1 = vunpack.c.l.bf16 %v13567_v4  ;;  %v13594_v49 = vld [vmem:[%s13531_s20 + $0x38] sm:$0xff]  }
 0x211   : > { %10065 = vmatprep.mubr.bf16.mxu0 %v3959_v34  ;;  %v8965_v34 = vunpack.c.l.bf16 %v13574_v61 }
 0x217   : > { %10434 = vmatmul.mubr.bf16.gmra.mrb[52].mxu1 %v7595_v54  ;;  %v13619_v54 = vld [vmem:[%s13531_s20 + $0x48] sm:$0xff]  }
 0x218   : > { %10066 = vmatmul.mubr.bf16.gmra.mrb[20].mxu0 %v3967_v47 }
 0x219   : > { %10069 = vmatprep.mubr.bf16.mxu0 %v3975_v10  ;;  %v13641_v10 = vld [vmem:[%s13531_s20 + $0xd8] sm:$0xff]  }
 0x220   : > { %10070 = vmatmul.mubr.bf16.gmra.mrb[24].mxu0 %v3983_v42 }
 0x221   : > { %10073 = vmatprep.mubr.bf16.mxu0 %v3991_v33 }
 0x228   : > { %10074 = vmatmul.mubr.bf16.gmra.mrb[28].mxu0 %v3999_v3 }
 0x2c2   : > { %v10415_v18 = vpop.f32.mrb[32].mxu1 }
 0x2c3   : > { %v10047_v62 = vpop.f32.mrb[0].mxu0  ;;  %v7818_v42 = vadd.f32 %v10415_v18, %v13612_v27  ;;  %v7690_v38 = vpop.f32.mrb[33].mxu1 }
 0x2c4   : > { %v10437_v3 = vadd.f32 %v10047_v62, %v14079_v45  ;;  %v4098_v5 = vpop.f32.mrb[1].mxu0  ;;  %v7816_v41 = vadd.f32 %v13612_v27, %v7690_v38  ;;  %v10416_v52 = vpop.f32.mrb[34].mxu1  ;;  %v13649_v45 = vld [vmem:[%s13531_s20 + $0xd0] sm:$0xff]   ;;  %v9133_v62 = vunpack.c.l.bf16 %v13641_v10 }
 0x2c5   : > { %v7890_v18 = vadd.f32 %v9093_v30, %v7818_v42  ;;  %v10438_v7 = vadd.f32 %v4098_v5, %v14080_v60  ;;  %v10048_v33 = vpop.f32.mrb[2].mxu0  ;;  %v7819_v35 = vadd.f32 %v10416_v52, %v13612_v27  ;;  %v7693_v47 = vpop.f32.mrb[35].mxu1  ;;  %v14082_v42 = vld [vmem:[#allocation5_spill] sm:$0xff] }
 0x2c6   : > { %v4266_v38 = vadd.f32 %v10437_v3, %v13612_v27  ;;  %v7888_v40 = vadd.f32 %v9089_v24, %v7816_v41  ;;  %v10439_v39 = vadd.f32 %v10048_v33, %v14081_v53  ;;  %v4101_v28 = vpop.f32.mrb[3].mxu0  ;;  %v7817_v30 = vadd.f32 %v13612_v27, %v7693_v47 }
 0x2c7   : > { %v4264_v5 = vadd.f32 %v10438_v7, %v13612_v27  ;;  %v7891_v52 = vadd.f32 %v9094_v46, %v7819_v35  ;;  %v10440_v60 = vadd.f32 %v4101_v28, %v14082_v42  ;;  %v9129_v53 = vunpack.c.l.bf16 %v13649_v45 }
 0x2c8   : > { %v4362_v3 = vadd.f32 %v8949_v55, %v4266_v38  ;;  %v4267_v24 = vadd.f32 %v10439_v39, %v13612_v27  ;;  %v7889_v41 = vadd.f32 %v9090_v8, %v7817_v30  ;;  %v7914_v47 = vmax.f32 %v7890_v18, 0.0 }
 0x2c9   : > { %v4360_v7 = vadd.f32 %v8945_v9, %v4264_v5  ;;  %v7915_v58 = vmax.f32 %v7891_v52, 0.0  ;;  %v4265_v46 = vadd.f32 %v10440_v60, %v13612_v27  ;;  %v7912_v33 = vmax.f32 %v7888_v40, 0.0  ;;  %v14083_v52 = vld [vmem:[#allocation7_spill] sm:$0xff] }
 0x2ca   : > { %v4394_v28 = vmax.f32 %v4362_v3, 0.0  ;;  %v4363_v20 = vadd.f32 %v8950_v31, %v4267_v24  ;;  %v7913_v55 = vmax.f32 %v7889_v41, 0.0  ;;  %v10419_v8 = vpop.f32.mrb[36].mxu1  ;;  %v13685_v3 = vld [vmem:[%s13531_s20 + $0x58] sm:$0xff]  }
 0x2cb   : > { %v4392_v39 = vmax.f32 %v4360_v7, 0.0  ;;  %v9143_v9 = vpack.c.bf16 %v7915_v58, %v7914_v47  ;;  %v4361_v35 = vadd.f32 %v8946_v6, %v4265_v46  ;;  %v10051_v18 = vpop.f32.mrb[4].mxu0  ;;  %v7822_v40 = vadd.f32 %v10419_v8, %v13612_v27  ;;  %v7706_v38 = vpop.f32.mrb[37].mxu1  ;;  %v14084_v6 = vld [vmem:[#allocation8_spill] sm:$0xff] }
 0x2cc   : > { %v4395_v30 = vmax.f32 %v4363_v20, 0.0  ;;  %v9138_v5 = vpack.c.bf16 %v7913_v55, %v7912_v33  ;;  %v10441_v42 = vadd.f32 %v10051_v18, %v14083_v52  ;;  %v4114_v23 = vpop.f32.mrb[5].mxu0  ;;  %v7820_v31 = vadd.f32 %v13612_v27, %v7706_v38  ;;  %v10420_v60 = vpop.f32.mrb[38].mxu1  ;;  %v14085_v55 = vld [vmem:[#allocation9_spill] sm:$0xff] }
 0x2cd   : > { %9238 = vst [vmem:[%s13675_s23 + $0x88] sm:$0xff] %v9143_v9   ;;  %v4393_v24 = vmax.f32 %v4361_v35, 0.0  ;;  %v7894_v37 = vadd.f32 %v9101_v2, %v7822_v40  ;;  %v10442_v41 = vadd.f32 %v4114_v23, %v14084_v6  ;;  %v10052_v47 = vpop.f32.mrb[6].mxu0  ;;  %v7823_v7 = vadd.f32 %v10420_v60, %v13612_v27  ;;  %v7709_v58 = vpop.f32.mrb[39].mxu1 }
 0x2ce   : > { %v9015_v46 = vpack.c.bf16 %v4395_v30, %v4394_v28  ;;  %9237 = vst [vmem:[%s13675_s23 + $0x80] sm:$0xff] %v9138_v5   ;;  %v4270_v33 = vadd.f32 %v10441_v42, %v13612_v27  ;;  %v7892_v20 = vadd.f32 %v9097_v13, %v7820_v31  ;;  %v10443_v8 = vadd.f32 %v10052_v47, %v14085_v55  ;;  %v4117_v9 = vpop.f32.mrb[7].mxu0  ;;  %v14086_v30 = vld [vmem:[#allocation10_spill] sm:$0xff]  ;;  %v13722_v55 = vld [vmem:[%s13531_s20 + $0x50] sm:$0xff]  }
 0x2cf   : > { %v9010_v35 = vpack.c.bf16 %v4393_v24, %v4392_v39  ;;  %v4268_v2 = vadd.f32 %v10442_v41, %v13612_v27  ;;  %v7895_v18 = vadd.f32 %v9102_v25, %v7823_v7  ;;  %v8989_v40 = vunpack.c.l.bf16 %v13685_v3 }
 0x2d0   : > { %9210 = vst [vmem:[%s13675_s23 + $0x8] sm:$0xff] %v9015_v46   ;;  %v4366_v28 = vadd.f32 %v8957_v15, %v4270_v33  ;;  %v4271_v38 = vadd.f32 %v10443_v8, %v13612_v27  ;;  %v10444_v5 = vadd.f32 %v4117_v9, %v14086_v30  ;;  %v9134_v13 = vunpack.c.h.bf16 %v13641_v10  ;;  %v14088_v8 = vld [vmem:[#allocation13_spill] sm:$0xff] }
 0x2d1   : > { %9011 = vst [vmem:[%s13675_s23] sm:$0xff] %v9010_v35   ;;  %v7918_v52 = vmax.f32 %v7894_v37, 0.0  ;;  %v4364_v39 = vadd.f32 %v8953_v63, %v4268_v2  ;;  %v7919_v42 = vmax.f32 %v7895_v18, 0.0  ;;  %v7821_v26 = vadd.f32 %v13612_v27, %v7709_v58 }
 0x2d2   : > { %v4398_v25 = vmax.f32 %v4366_v28, 0.0  ;;  %v7916_v23 = vmax.f32 %v7892_v20, 0.0  ;;  %v4367_v15 = vadd.f32 %v8958_v22, %v4271_v38  ;;  %v4269_v31 = vadd.f32 %v10444_v5, %v13612_v27  ;;  %v10423_v60 = vpop.f32.mrb[40].mxu1 }
 0x2d3   : > { %v4396_v24 = vmax.f32 %v4364_v39, 0.0  ;;  %v9153_v6 = vpack.c.bf16 %v7919_v42, %v7918_v52  ;;  %v7893_v37 = vadd.f32 %v9098_v29, %v7821_v26  ;;  %v10055_v41 = vpop.f32.mrb[8].mxu0  ;;  %v7826_v63 = vadd.f32 %v10423_v60, %v13612_v27  ;;  %v7722_v47 = vpop.f32.mrb[41].mxu1  ;;  %v14090_v60 = vld [vmem:[#allocation15_spill] sm:$0xff] }
 0x2d4   : > { %v4399_v7 = vmax.f32 %v4367_v15, 0.0  ;;  %v4365_v58 = vadd.f32 %v8954_v14, %v4269_v31  ;;  %v10445_v46 = vadd.f32 %v10055_v41, %v14087_v21  ;;  %v4130_v22 = vpop.f32.mrb[9].mxu0  ;;  %v7824_v33 = vadd.f32 %v13612_v27, %v7722_v47  ;;  %v10424_v20 = vpop.f32.mrb[42].mxu1 }
 0x2d5   : > { %9240 = vst [vmem:[%s13675_s23 + $0x98] sm:$0xff] %v9153_v6   ;;  %v7917_v17 = vmax.f32 %v7893_v37, 0.0  ;;  %v7898_v29 = vadd.f32 %v9109_v51, %v7826_v63  ;;  %v10446_v9 = vadd.f32 %v4130_v22, %v14088_v8  ;;  %v10056_v35 = vpop.f32.mrb[10].mxu0  ;;  %v7827_v0 = vadd.f32 %v10424_v20, %v13612_v27  ;;  %v7725_v14 = vpop.f32.mrb[43].mxu1  ;;  %v14089_v51 = vld [vmem:[#allocation14_spill] sm:$0xff]  ;;  %v14091_v22 = vld [vmem:[#allocation16_spill] sm:$0xff] }
 0x2d6   : > { %v9025_v2 = vpack.c.bf16 %v4399_v7, %v4398_v25  ;;  %v4397_v18 = vmax.f32 %v4365_v58, 0.0  ;;  %v4274_v28 = vadd.f32 %v10445_v46, %v13612_v27  ;;  %v7896_v38 = vadd.f32 %v9105_v1, %v7824_v33  ;;  %v4133_v30 = vpop.f32.mrb[11].mxu0 }
 0x2d7   : > { %v9148_v5 = vpack.c.bf16 %v7917_v17, %v7916_v23  ;;  %v4272_v52 = vadd.f32 %v10446_v9, %v13612_v27  ;;  %v10447_v39 = vadd.f32 %v10056_v35, %v14089_v51  ;;  %v8985_v42 = vunpack.c.l.bf16 %v13722_v55  ;;  %v14092_v35 = vld [vmem:[#allocation17_spill] sm:$0xff] }
 0x2d8   : > { %9212 = vst [vmem:[%s13675_s23 + $0x18] sm:$0xff] %v9025_v2   ;;  %v9020_v26 = vpack.c.bf16 %v4397_v18, %v4396_v24  ;;  %v4370_v25 = vadd.f32 %v8965_v34, %v4274_v28  ;;  %v7899_v15 = vadd.f32 %v9110_v50, %v7827_v0  ;;  %v9130_v31 = vunpack.c.h.bf16 %v13649_v45 }
 0x2d9   : > { %9239 = vst [vmem:[%s13675_s23 + $0x90] sm:$0xff] %v9148_v5   ;;  %v4368_v1 = vadd.f32 %v8961_v48, %v4272_v52  ;;  %v4275_v23 = vadd.f32 %v10447_v39, %v13612_v27  ;;  %v10448_v6 = vadd.f32 %v4133_v30, %v14090_v60  ;;  %v7825_v37 = vadd.f32 %v13612_v27, %v7725_v14  ;;  %v14095_v30 = vld [vmem:[#allocation18_spill] sm:$0xff] }
 0x2da   : > { %9211 = vst [vmem:[%s13675_s23 + $0x10] sm:$0xff] %v9020_v26   ;;  %v4402_v24 = vmax.f32 %v4370_v25, 0.0  ;;  %v7922_v41 = vmax.f32 %v7898_v29, 0.0  ;;  %v7920_v63 = vmax.f32 %v7896_v38, 0.0  ;;  %v7923_v34 = vmax.f32 %v7899_v15, 0.0  ;;  %v10427_v47 = vpop.f32.mrb[44].mxu1 }
 0x2db   : > { %v4400_v56 = vmax.f32 %v4368_v1, 0.0  ;;  %v4371_v50 = vadd.f32 %v8966_v36, %v4275_v23  ;;  %v4273_v7 = vadd.f32 %v10448_v6, %v13612_v27  ;;  %v7897_v48 = vadd.f32 %v9106_v32, %v7825_v37  ;;  %v10059_v58 = vpop.f32.mrb[12].mxu0  ;;  %v7738_v21 = vpop.f32.mrb[45].mxu1 }
 0x2dc   : > { %v9163_v46 = vpack.c.bf16 %v7923_v34, %v7922_v41  ;;  %v10449_v33 = vadd.f32 %v10059_v58, %v14091_v22  ;;  %v7830_v20 = vadd.f32 %v10427_v47, %v13612_v27  ;;  %v4146_v17 = vpop.f32.mrb[13].mxu0  ;;  %v7828_v29 = vadd.f32 %v13612_v27, %v7738_v21  ;;  %v10428_v8 = vpop.f32.mrb[46].mxu1 }
 0x2dd   : > { %v4403_v9 = vmax.f32 %v4371_v50, 0.0  ;;  %v4369_v61 = vadd.f32 %v8962_v19, %v4273_v7  ;;  %v7921_v36 = vmax.f32 %v7897_v48, 0.0  ;;  %v10450_v4 = vadd.f32 %v4146_v17, %v14092_v35  ;;  %v10060_v0 = vpop.f32.mrb[14].mxu0  ;;  %v7741_v32 = vpop.f32.mrb[47].mxu1 }
 0x2de   : > { %9242 = vst [vmem:[%s13675_s23 + $0xa8] sm:$0xff] %v9163_v46   ;;  %v4278_v14 = vadd.f32 %v10449_v33, %v13612_v27  ;;  %v14093_v2 = vunpack.c.l.bf16 %v13584_v59  ;;  %v14094_v28 = vunpack.c.l.bf16 %v13587_v11  ;;  %v10451_v5 = vadd.f32 %v10060_v0, %v14095_v30  ;;  %v4149_v44 = vpop.f32.mrb[15].mxu0 }
 0x2df   : > { %v9035_v19 = vpack.c.bf16 %v4403_v9, %v4402_v24  ;;  %v4401_v52 = vmax.f32 %v4369_v61, 0.0  ;;  %v9158_v51 = vpack.c.bf16 %v7921_v36, %v7920_v63  ;;  %v4276_v39 = vadd.f32 %v10450_v4, %v13612_v27  ;;  %v14097_v24 = vld [vmem:[#allocation19_spill] sm:$0xff]  ;;  %v14102_v9 = vld [vmem:[#allocation20_spill] sm:$0xff] }
 0x2e0   : > { %v7902_v18 = vadd.f32 %v14093_v2, %v7830_v20  ;;  %v7900_v38 = vadd.f32 %v14094_v28, %v7828_v29  ;;  %v14096_v26 = vunpack.c.l.bf16 %v13594_v49  ;;  %v4279_v15 = vadd.f32 %v10451_v5, %v13612_v27 }
 0x2e1   : > { %v8990_v1 = vunpack.c.h.bf16 %v13685_v3  ;;  %v8986_v23 = vunpack.c.h.bf16 %v13722_v55  ;;  %9214 = vst [vmem:[%s13675_s23 + $0x28] sm:$0xff] %v9035_v19   ;;  %v9030_v60 = vpack.c.bf16 %v4401_v52, %v4400_v56  ;;  %9241 = vst [vmem:[%s13675_s23 + $0xa0] sm:$0xff] %v9158_v51   ;;  %v7831_v37 = vadd.f32 %v10428_v8, %v13612_v27 }
 0x2e2   : > { %v4374_v25 = vadd.f32 %v14096_v26, %v4278_v14  ;;  %v7926_v6 = vmax.f32 %v7902_v18, 0.0  ;;  %v10452_v41 = vadd.f32 %v4149_v44, %v14097_v24  ;;  %v14098_v63 = vunpack.c.l.bf16 %v13597_v12  ;;  %v10431_v58 = vpop.f32.mrb[48].mxu1  ;;  %v14105_v18 = vld [vmem:[#allocation21_spill] sm:$0xff] }
 0x2e3   : > { %v7924_v47 = vmax.f32 %v7900_v38, 0.0  ;;  %v14099_v50 = vunpack.c.h.bf16 %v13594_v49  ;;  %v7829_v48 = vadd.f32 %v13612_v27, %v7741_v32  ;;  %9213 = vst [vmem:[%s13675_s23 + $0x20] sm:$0xff] %v9030_v60   ;;  %v14100_v56 = vunpack.c.h.bf16 %v13584_v59  ;;  %v10063_v33 = vpop.f32.mrb[16].mxu0  ;;  %v7754_v17 = vpop.f32.mrb[49].mxu1 }
 0x2e4   : > { %v4372_v34 = vadd.f32 %v14098_v63, %v4276_v39  ;;  %v4406_v21 = vmax.f32 %v4374_v25, 0.0  ;;  %v4277_v22 = vadd.f32 %v10452_v41, %v13612_v27  ;;  %v7834_v20 = vadd.f32 %v10431_v58, %v13612_v27  ;;  %v4162_v36 = vpop.f32.mrb[17].mxu0  ;;  %v10432_v4 = vpop.f32.mrb[50].mxu1  ;;  %v14108_v41 = vld [vmem:[#allocation22_spill] sm:$0xff] }
 0x2e5   : > { %v4375_v7 = vadd.f32 %v14099_v50, %v4279_v15  ;;  %v7903_v46 = vadd.f32 %v14100_v56, %v7831_v37  ;;  %v14101_v8 = vunpack.c.h.bf16 %v13587_v11  ;;  %v10453_v61 = vadd.f32 %v10063_v33, %v14102_v9  ;;  %v10064_v38 = vpop.f32.mrb[18].mxu0  ;;  %v7757_v30 = vpop.f32.mrb[51].mxu1  ;;  %v13796_v11 = vld [vmem:[%s13531_s20 + $0x68] sm:$0xff]  }
 0x2e6   : > { %v7832_v35 = vadd.f32 %v13612_v27, %v7754_v17  ;;  %v14103_v59 = vunpack.c.h.bf16 %v13597_v12  ;;  %v14104_v14 = vunpack.c.l.bf16 %v13604_v57  ;;  %v10454_v28 = vadd.f32 %v4162_v36, %v14105_v18  ;;  %v4165_v12 = vpop.f32.mrb[19].mxu0 }
 0x2e7   : > { %v4407_v29 = vmax.f32 %v4375_v7, 0.0  ;;  %v7901_v49 = vadd.f32 %v14101_v8, %v7829_v48  ;;  %v7927_v0 = vmax.f32 %v7903_v46, 0.0  ;;  %v4282_v19 = vadd.f32 %v10453_v61, %v13612_v27 }
 0x2e8   : > { %v4373_v32 = vadd.f32 %v14103_v59, %v4277_v22  ;;  %v7906_v2 = vadd.f32 %v14104_v14, %v7834_v20  ;;  %v14106_v52 = vunpack.c.l.bf16 %v13607_v43  ;;  %v4404_v39 = vmax.f32 %v4372_v34, 0.0  ;;  %v14110_v34 = vld [vmem:[#allocation23_spill] sm:$0xff]  ;;  %v14114_v59 = vld [vmem:[#allocation25_spill] sm:$0xff] }
 0x2e9   : > { %v9045_v5 = vpack.c.bf16 %v4407_v29, %v4406_v21  ;;  %v7925_v44 = vmax.f32 %v7901_v49, 0.0  ;;  %v9173_v26 = vpack.c.bf16 %v7927_v0, %v7926_v6  ;;  %v4280_v15 = vadd.f32 %v10454_v28, %v13612_v27 }
 0x2ea   : > { %v7904_v51 = vadd.f32 %v14106_v52, %v7832_v35  ;;  %v4405_v25 = vmax.f32 %v4373_v32, 0.0  ;;  %v14107_v37 = vunpack.c.l.bf16 %v13619_v54  ;;  %v10455_v63 = vadd.f32 %v10064_v38, %v14108_v41  ;;  %v10435_v33 = vpop.f32.mrb[52].mxu1  ;;  %v13830_v52 = vld [vmem:[%s13531_s20 + $0x60] sm:$0xff]  }
 0x2eb   : > { %9216 = vst [vmem:[%s13675_s23 + $0x38] sm:$0xff] %v9045_v5   ;;  %v9168_v60 = vpack.c.bf16 %v7925_v44, %v7924_v47  ;;  %v8997_v50 = vunpack.c.l.bf16 %v13796_v11  ;;  %9244 = vst [vmem:[%s13675_s23 + $0xb8] sm:$0xff] %v9173_v26   ;;  %v14109_v48 = vunpack.c.l.bf16 %v13622_v16  ;;  %v7835_v6 = vadd.f32 %v10432_v4, %v13612_v27  ;;  %v10067_v49 = vpop.f32.mrb[20].mxu0  ;;  %v7770_v61 = vpop.f32.mrb[53].mxu1  ;;  %v14116_v5 = vld [vmem:[#allocation26_spill] sm:$0xff] }
 0x2ec   : > { %v4378_v24 = vadd.f32 %v14107_v37, %v4282_v19  ;;  %v9040_v7 = vpack.c.bf16 %v4405_v25, %v4404_v39  ;;  %v10456_v21 = vadd.f32 %v4165_v12, %v14110_v34  ;;  %v7930_v56 = vmax.f32 %v7906_v2, 0.0  ;;  %v4178_v14 = vpop.f32.mrb[21].mxu0 }
 0x2ed   : > { %v4376_v58 = vadd.f32 %v14109_v48, %v4280_v15  ;;  %9243 = vst [vmem:[%s13675_s23 + $0xb0] sm:$0xff] %v9168_v60   ;;  %v7928_v46 = vmax.f32 %v7904_v51, 0.0  ;;  %v4283_v47 = vadd.f32 %v10455_v63, %v13612_v27  ;;  %v7833_v22 = vadd.f32 %v13612_v27, %v7757_v30  ;;  %v10068_v19 = vpop.f32.mrb[22].mxu0  ;;  %v14117_v48 = vld [vmem:[#allocation27_spill] sm:$0xff] }
 0x2ee   : > { %9215 = vst [vmem:[%s13675_s23 + $0x30] sm:$0xff] %v9040_v7   ;;  %v4410_v20 = vmax.f32 %v4378_v24, 0.0  ;;  %v14111_v17 = vunpack.c.h.bf16 %v13604_v57  ;;  %v4281_v8 = vadd.f32 %v10456_v21, %v13612_v27  ;;  %v7838_v9 = vadd.f32 %v10435_v33, %v13612_v27  ;;  %v10436_v57 = vpop.f32.mrb[54].mxu1  ;;  %v4181_v26 = vpop.f32.mrb[23].mxu0 }
 0x2ef   : > { %v14112_v36 = vunpack.c.h.bf16 %v13619_v54  ;;  %v14113_v4 = vunpack.c.h.bf16 %v13607_v43  ;;  %v10457_v32 = vadd.f32 %v10067_v49, %v14114_v59  ;;  %v7836_v2 = vadd.f32 %v13612_v27, %v7770_v61  ;;  %v7773_v54 = vpop.f32.mrb[55].mxu1 }
 0x2f0   : > { %v7907_v29 = vadd.f32 %v14111_v17, %v7835_v6  ;;  %v4408_v18 = vmax.f32 %v4376_v58, 0.0  ;;  %v14115_v38 = vunpack.c.h.bf16 %v13622_v16  ;;  %v10458_v44 = vadd.f32 %v4178_v14, %v14116_v5 }
 0x2f1   : > { %v4379_v35 = vadd.f32 %v14112_v36, %v4283_v47  ;;  %v7905_v0 = vadd.f32 %v14113_v4, %v7833_v22  ;;  %v4286_v12 = vadd.f32 %v10457_v32, %v13612_v27  ;;  %v7910_v39 = vadd.f32 %v9133_v62, %v7838_v9  ;;  %v14120_v4 = vld [vmem:[#allocation33_spill] sm:$0xff] }
 0x2f2   : > { %v7931_v28 = vmax.f32 %v7907_v29, 0.0  ;;  %v4377_v30 = vadd.f32 %v14115_v38, %v4281_v8  ;;  %v4284_v15 = vadd.f32 %v10458_v44, %v13612_v27  ;;  %v7908_v60 = vadd.f32 %v9129_v53, %v7836_v2  ;;  %v14118_v53 = vld [vmem:[#allocation29_spill] sm:$0xff]  ;;  %v14119_v8 = vld [vmem:[#allocation32_spill] sm:$0xff] }
 0x2f3   : > { %v4411_v43 = vmax.f32 %v4379_v35, 0.0  ;;  %v7929_v51 = vmax.f32 %v7905_v0, 0.0  ;;  %v4382_v41 = vadd.f32 %v8989_v40, %v4286_v12  ;;  %v8993_v63 = vunpack.c.l.bf16 %v13830_v52  ;;  %v10071_v33 = vpop.f32.mrb[24].mxu0 }
 0x2f4   : > { %v9183_v25 = vpack.c.bf16 %v7931_v28, %v7930_v56  ;;  %v4409_v16 = vmax.f32 %v4377_v30, 0.0  ;;  %v4380_v62 = vadd.f32 %v8985_v42, %v4284_v15  ;;  %v10459_v58 = vadd.f32 %v10068_v19, %v14117_v48  ;;  %v4194_v9 = vpop.f32.mrb[25].mxu0  ;;  %v9209_v19 = vld [vmem:[%s13531_s20 + $0x78] sm:$0xff]   ;;  %v14125_v48 = vld [vmem:[#allocation44_spill] sm:$0xff] }
 0x2f5   : > { %v9055_v37 = vpack.c.bf16 %v4411_v43, %v4410_v20  ;;  %v9178_v24 = vpack.c.bf16 %v7929_v51, %v7928_v46  ;;  %v7839_v6 = vadd.f32 %v10436_v57, %v13612_v27  ;;  %v10460_v34 = vadd.f32 %v4181_v26, %v14118_v53  ;;  %v10072_v10 = vpop.f32.mrb[26].mxu0  ;;  %v14122_v57 = vld [vmem:[#allocation37_spill] sm:$0xff]  ;;  %v9208_v43 = vld [vmem:[%s13531_s20 + $0x70] sm:$0xff]  }
 0x2f6   : > { %9246 = vst [vmem:[%s13675_s23 + $0xc8] sm:$0xff] %v9183_v25   ;;  %v9050_v7 = vpack.c.bf16 %v4409_v16, %v4408_v18  ;;  %v7837_v21 = vadd.f32 %v13612_v27, %v7773_v54  ;;  %v8998_v56 = vunpack.c.h.bf16 %v13796_v11  ;;  %v8994_v40 = vunpack.c.h.bf16 %v13830_v52  ;;  %v4197_v14 = vpop.f32.mrb[27].mxu0  ;;  %v14123_v11 = vld [vmem:[#allocation40_spill] sm:$0xff] }
 0x2f7   : > { %9218 = vst [vmem:[%s13675_s23 + $0x48] sm:$0xff] %v9055_v37   ;;  %9245 = vst [vmem:[%s13675_s23 + $0xc0] sm:$0xff] %v9178_v24   ;;  %v7934_v46 = vmax.f32 %v7910_v39, 0.0  ;;  %v7932_v47 = vmax.f32 %v7908_v60, 0.0  ;;  %v4287_v22 = vadd.f32 %v10459_v58, %v13612_v27  ;;  %v7911_v42 = vadd.f32 %v9134_v13, %v7839_v6  ;;  %v14124_v37 = vld [vmem:[#allocation42_spill] sm:$0xff] }
 0x2f8   : > { %9217 = vst [vmem:[%s13675_s23 + $0x40] sm:$0xff] %v9050_v7   ;;  %v4414_v20 = vmax.f32 %v4382_v41, 0.0  ;;  %v4285_v17 = vadd.f32 %v10460_v34, %v13612_v27  ;;  %v7909_v29 = vadd.f32 %v9130_v31, %v7837_v21  ;;  %v10461_v49 = vadd.f32 %v10071_v33, %v14119_v8  ;;  %v14121_v31 = vld [vmem:[#allocation34_spill] sm:$0xff] }
 0x2f9   : > { %v4412_v61 = vmax.f32 %v4380_v62, 0.0  ;;  %v4383_v36 = vadd.f32 %v8990_v1, %v4287_v22  ;;  %v7935_v35 = vmax.f32 %v7911_v42, 0.0  ;;  %v10462_v0 = vadd.f32 %v4194_v9, %v14120_v4 }
 0x2fa   : > { %v4381_v13 = vadd.f32 %v8986_v23, %v4285_v17  ;;  %v7933_v59 = vmax.f32 %v7909_v29, 0.0  ;;  %v4290_v45 = vadd.f32 %v10461_v49, %v13612_v27  ;;  %v10463_v32 = vadd.f32 %v10072_v10, %v14121_v31 }
 0x2fb   : > { %v4415_v2 = vmax.f32 %v4383_v36, 0.0  ;;  %v9193_v3 = vpack.c.bf16 %v7935_v35, %v7934_v46  ;;  %v4288_v1 = vadd.f32 %v10462_v0, %v13612_v27  ;;  %v10464_v18 = vadd.f32 %v4197_v14, %v14122_v57  ;;  %v10075_v12 = vpop.f32.mrb[28].mxu0 }
 0x2fc   : > { %v4413_v28 = vmax.f32 %v4381_v13, 0.0  ;;  %v9188_v55 = vpack.c.bf16 %v7933_v59, %v7932_v47  ;;  %v4386_v23 = vadd.f32 %v8997_v50, %v4290_v45  ;;  %v4291_v38 = vadd.f32 %v10463_v32, %v13612_v27  ;;  %v4210_v16 = vpop.f32.mrb[29].mxu0 }
 0x2fd   : > { %v9065_v30 = vpack.c.bf16 %v4415_v2, %v4414_v20  ;;  %9248 = vst [vmem:[%s13675_s23 + $0xd8] sm:$0xff] %v9193_v3   ;;  %v4384_v5 = vadd.f32 %v8993_v63, %v4288_v1  ;;  %v4289_v44 = vadd.f32 %v10464_v18, %v13612_v27  ;;  %v10465_v50 = vadd.f32 %v10075_v12, %v14123_v11  ;;  %v10076_v63 = vpop.f32.mrb[30].mxu0 }
 0x2fe   : > { %v9060_v54 = vpack.c.bf16 %v4413_v28, %v4412_v61  ;;  %9247 = vst [vmem:[%s13675_s23 + $0xd0] sm:$0xff] %v9188_v55   ;;  %v4387_v52 = vadd.f32 %v8998_v56, %v4291_v38  ;;  %v4418_v39 = vmax.f32 %v4386_v23, 0.0  ;;  %v9005_v25 = vunpack.c.l.bf16 %v9209_v19  ;;  %v4213_v53 = vpop.f32.mrb[31].mxu0  ;;  %v14126_v56 = vld [vmem:[#allocation45_spill] sm:$0xff] }
 0x2ff   : > { %9220 = vst [vmem:[%s13675_s23 + $0x58] sm:$0xff] %v9065_v30   ;;  %v4385_v51 = vadd.f32 %v8994_v40, %v4289_v44  ;;  %v4416_v15 = vmax.f32 %v4384_v5, 0.0  ;;  %v10466_v24 = vadd.f32 %v4210_v16, %v14124_v37  ;;  %v9001_v41 = vunpack.c.l.bf16 %v9208_v43 }
 0x300   : > { %9219 = vst [vmem:[%s13675_s23 + $0x50] sm:$0xff] %v9060_v54   ;;  %v4419_v26 = vmax.f32 %v4387_v52, 0.0  ;;  %v4294_v62 = vadd.f32 %v10465_v50, %v13612_v27  ;;  %v10467_v58 = vadd.f32 %v10076_v63, %v14125_v48  ;;  %v9006_v6 = vunpack.c.h.bf16 %v9209_v19 }
 0x301   : > { %v4417_v60 = vmax.f32 %v4385_v51, 0.0  ;;  %v4292_v21 = vadd.f32 %v10466_v24, %v13612_v27  ;;  %v10468_v40 = vadd.f32 %v4213_v53, %v14126_v56  ;;  %v9002_v46 = vunpack.c.h.bf16 %v9208_v43 }
 0x302   : > { %v9075_v7 = vpack.c.bf16 %v4419_v26, %v4418_v39  ;;  %v4390_v47 = vadd.f32 %v9005_v25, %v4294_v62  ;;  %v4295_v22 = vadd.f32 %v10467_v58, %v13612_v27 }
 0x303   : > { %v9070_v34 = vpack.c.bf16 %v4417_v60, %v4416_v15  ;;  %v4388_v42 = vadd.f32 %v9001_v41, %v4292_v21  ;;  %v4293_v33 = vadd.f32 %v10468_v40, %v13612_v27 }
 0x304   : > { %9222 = vst [vmem:[%s13675_s23 + $0x68] sm:$0xff] %v9075_v7   ;;  %v4391_v20 = vadd.f32 %v9006_v6, %v4295_v22  ;;  %v4422_v29 = vmax.f32 %v4390_v47, 0.0 }
 0x305   : > { %9221 = vst [vmem:[%s13675_s23 + $0x60] sm:$0xff] %v9070_v34   ;;  %v4389_v17 = vadd.f32 %v9002_v46, %v4293_v33  ;;  %v4420_v49 = vmax.f32 %v4388_v42, 0.0 }
 0x306   : > { %v4423_v8 = vmax.f32 %v4391_v20, 0.0 }
 0x307   : > { %v4421_v9 = vmax.f32 %v4389_v17, 0.0 }
 0x308   : > { %v9085_v61 = vpack.c.bf16 %v4423_v8, %v4422_v29 }
 0x309   : > { %v9080_v36 = vpack.c.bf16 %v4421_v9, %v4420_v49 }
 0x30a   : > { %9224 = vst [vmem:[%s13675_s23 + $0x78] sm:$0xff] %v9085_v61  }
 0x30b   : > { %9223 = vst [vmem:[%s13675_s23 + $0x70] sm:$0xff] %v9080_v36  }
 0x30c PF: > { %s14_s17 = sadd.s32 1, %s11341_s17   ;;  %s14127_s15 = smov %s11337_s16 }
 0x30d   : > { %p11_p5 = scmp.ge.s32.totalorder %s14_s17, 4   ;;  %s14128_s16 = smov %s14130_s18 }
 0x30f   :  { %13 = sbr.rel (!%p11_p5) target bundleno = 2 (0x2), region = 77 }

</bundles_post_ra>
